<compile_context>
chip_gen: v5e
topology: v5e:2x2
jax: 0.10.0
libtpu: 0.0.40
codegen_flags: <defaults>
</compile_context>

<pallas_src>
import numpy as np
import jax
import jax.numpy as jnp
from jax.experimental import pallas as pl
from jax.experimental.pallas import tpu as pltpu


_BB = 8  # images per grid step (multiple of 8 so every reshape is tile-aligned)


# ----------------------------- fused kernel ------------------------------

def _make_kernel(BB):
    f32 = jnp.float32

    def kernel(x_ref,      # (28, BB, 28)  rows = image row, lanes = image col
               w1b_ref,    # (140, 480)    conv1 width-band matrix
               b1t_ref,    # (1, 240)      conv1 bias tiled over pooled width
               w2b_ref,    # (1200, 400)   conv2 width-band matrix
               b2t_ref,    # (1, 200)      conv2 bias tiled over pooled width
               wfc1_ref,   # (800, 500)
               bfc1_ref,   # (1, 500)
               wfc2_ref,   # (500, 10)
               bfc2_ref,   # (1, 10)
               o_ref):     # (BB, 10)      per-image log-probs
        # ---- conv1 (5x5, 1->20) as ONE band matmul, fused with 2x2 max-pool ----
        # lhs rows = (oh, b); K = (ki, input column j) = 5*28 = 140.
        lhs1 = jnp.concatenate([x_ref[ki:ki + 24, :, :] for ki in range(5)],
                               axis=2).reshape(24 * BB, 140)
        a1 = jnp.dot(lhs1, w1b_ref[...], preferred_element_type=f32)  # (24*BB, 480)
        # W-pool: output columns are ordered (ow%2, ow//2, c) -> max of lane halves.
        a1 = jnp.maximum(a1[:, :240], a1[:, 240:])                    # (24*BB, 240)
        # H-pool: rows are (oh, b); split oh -> (oh//2, oh%2) as leading dims.
        a1 = a1.reshape(12, 2, BB, 240)
        p1 = jnp.maximum(a1[:, 0], a1[:, 1])                          # (12, BB, 240)
        p1 = jnp.maximum(p1 + b1t_ref[...], 0.0)                      # bias + ReLU
        # p1[h, b, w*20 + c] == maxpool1(relu(conv1))[b, h, w, c]

        # ---- conv2 (5x5, 20->50) as ONE band matmul, fused with 2x2 max-pool ----
        lhs2 = jnp.concatenate([p1[ki:ki + 8, :, :] for ki in range(5)],
                               axis=2).reshape(8 * BB, 1200)
        a2 = jnp.dot(lhs2, w2b_ref[...], preferred_element_type=f32)  # (8*BB, 400)
        a2 = jnp.maximum(a2[:, :200], a2[:, 200:])                    # (8*BB, 200)
        a2 = a2.reshape(4, 2, BB, 200)
        p2 = jnp.maximum(a2[:, 0], a2[:, 1])                          # (4, BB, 200)
        p2 = jnp.maximum(p2 + b2t_ref[...], 0.0)                      # bias + ReLU
        # p2[h, b, w*50 + c] == maxpool2(relu(conv2))[b, h, w, c]

        # ---- fc1 (800 -> 500) as ONE K=800 matmul + ReLU ----
        p2f = jnp.concatenate([p2[0], p2[1], p2[2], p2[3]], axis=1)   # (BB, 800)
        h1 = jnp.dot(p2f, wfc1_ref[...], preferred_element_type=f32) + bfc1_ref[...]
        h1 = jnp.maximum(h1, 0.0)

        # ---- fc2 (500 -> 10) + log_softmax ----
        logits = jnp.dot(h1, wfc2_ref[...], preferred_element_type=f32) + bfc2_ref[...]
        m = jnp.max(logits, axis=-1, keepdims=True)
        sh = logits - m
        lse = jnp.log(jnp.sum(jnp.exp(sh), axis=-1, keepdims=True))
        o_ref[...] = (sh - lse).astype(o_ref.dtype)

    return kernel


# ------------------------------ wrapper ----------------------------------

def net_forward(x_nchw, prepared):
    """x_nchw: (B, 1, 28, 28) float32 -> (B, 10) log-probs."""
    B = x_nchw.shape[0]
    BB = _BB
    Bp = ((B + BB - 1) // BB) * BB
    x = x_nchw.reshape(B, 28, 28).astype(jnp.float32)
    if Bp != B:
        x = jnp.pad(x, ((0, Bp - B), (0, 0), (0, 0)))
    x_t = jnp.transpose(x, (1, 0, 2))          # (28, Bp, 28): row-major, batch minor

    out = pl.pallas_call(
        _make_kernel(BB),
        out_shape=jax.ShapeDtypeStruct((Bp, 10), jnp.float32),
        grid_spec=pltpu.PrefetchScalarGridSpec(
            num_scalar_prefetch=0,
            grid=(Bp // BB,),
            in_specs=[
                pl.BlockSpec((28, BB, 28), lambda b: (0, b, 0)),
                pl.BlockSpec((140, 480), lambda b: (0, 0)),
                pl.BlockSpec((1, 240), lambda b: (0, 0)),
                pl.BlockSpec((1200, 400), lambda b: (0, 0)),
                pl.BlockSpec((1, 200), lambda b: (0, 0)),
                pl.BlockSpec((800, 500), lambda b: (0, 0)),
                pl.BlockSpec((1, 500), lambda b: (0, 0)),
                pl.BlockSpec((500, 10), lambda b: (0, 0)),
                pl.BlockSpec((1, 10), lambda b: (0, 0)),
            ],
            out_specs=pl.BlockSpec((BB, 10), lambda b: (b, 0)),
        ),
        compiler_params=pltpu.CompilerParams(
            dimension_semantics=("parallel",),
            vmem_limit_bytes=32 * 1024 * 1024),
    )(x_t, prepared["w1b"], prepared["b1t"], prepared["w2b"], prepared["b2t"],
      prepared["wfc1p"], prepared["bfc1"], prepared["wfc2p"], prepared["bfc2"])
    return out[:B]


# ------------------- one-time weight layout preparation -------------------

def prepare_params(p):
    """Fold all band / permutation layout transforms into the parameters."""
    w1 = np.asarray(p["w1"], np.float32)      # (20, 1, 5, 5)
    w2 = np.asarray(p["w2"], np.float32)      # (50, 20, 5, 5)
    wfc1 = np.asarray(p["wfc1"], np.float32)  # (500, 800)
    wfc2 = np.asarray(p["wfc2"], np.float32)  # (10, 500)
    b1 = np.asarray(p["b1"], np.float32)
    b2 = np.asarray(p["b2"], np.float32)
    bfc1 = np.asarray(p["bfc1"], np.float32)
    bfc2 = np.asarray(p["bfc2"], np.float32)

    # conv1 band matrix: rows = ki*28 + j, cols = (ow%2)*240 + (ow//2)*20 + c
    w1b = np.zeros((5, 28, 2, 12, 20), np.float32)
    for ki in range(5):
        for ow in range(24):
            for kj in range(5):
                w1b[ki, ow + kj, ow % 2, ow // 2, :] = w1[:, 0, ki, kj]
    w1b = w1b.reshape(140, 480)
    b1t = np.tile(b1, 12).reshape(1, 240)     # cols = w*20 + c after pooling

    # conv2 band matrix: rows = ki*240 + w*20 + cin,
    #                    cols = (ow%2)*200 + (ow//2)*50 + cout
    w2b = np.zeros((5, 12, 20, 2, 4, 50), np.float32)
    for ki in range(5):
        for ow in range(8):
            for kj in range(5):
                w2b[ki, ow + kj, :, ow % 2, ow // 2, :] = w2[:, :, ki, kj].T
    w2b = w2b.reshape(1200, 400)
    b2t = np.tile(b2, 4).reshape(1, 200)      # cols = w*50 + c after pooling

    # fc1: rows ordered (h, w, c) to match the in-kernel flatten; torch index
    # is c*16 + h*4 + w.
    wfc1p = wfc1.reshape(500, 50, 4, 4).transpose(2, 3, 1, 0).reshape(800, 500)
    wfc2p = wfc2.T                            # (500, 10)

    out = {
        "w1b": w1b, "b1t": b1t, "w2b": w2b, "b2t": b2t,
        "wfc1p": wfc1p, "bfc1": bfc1.reshape(1, 500),
        "wfc2p": wfc2p, "bfc2": bfc2.reshape(1, 10),
    }
    return {k: jnp.asarray(v) for k, v in out.items()}


# ---------------------- deterministic parameters --------------------------

def init_params(key):
    ks = jax.random.split(key, 8)
    s = 0.05
    return {
        "w1":   jax.random.normal(ks[0], (20, 1, 5, 5), jnp.float32) * s,
        "b1":   jax.random.normal(ks[1], (20,), jnp.float32) * s,
        "w2":   jax.random.normal(ks[2], (50, 20, 5, 5), jnp.float32) * s,
        "b2":   jax.random.normal(ks[3], (50,), jnp.float32) * s,
        "wfc1": jax.random.normal(ks[4], (500, 4 * 4 * 50), jnp.float32) * s,
        "bfc1": jax.random.normal(ks[5], (500,), jnp.float32) * s,
        "wfc2": jax.random.normal(ks[6], (10, 500), jnp.float32) * s,
        "bfc2": jax.random.normal(ks[7], (10,), jnp.float32) * s,
    }


# -------------------------- pure-JAX reference ----------------------------

def reference_forward(x_nchw, p):
    y = jax.lax.conv_general_dilated(
        x_nchw, p["w1"], (1, 1), "VALID",
        dimension_numbers=("NCHW", "OIHW", "NCHW"))
    y = jnp.maximum(y + p["b1"][None, :, None, None], 0.0)
    y = jax.lax.reduce_window(y, -jnp.inf, jax.lax.max,
                              (1, 1, 2, 2), (1, 1, 2, 2), "VALID")
    y = jax.lax.conv_general_dilated(
        y, p["w2"], (1, 1), "VALID",
        dimension_numbers=("NCHW", "OIHW", "NCHW"))
    y = jnp.maximum(y + p["b2"][None, :, None, None], 0.0)
    y = jax.lax.reduce_window(y, -jnp.inf, jax.lax.max,
                              (1, 1, 2, 2), (1, 1, 2, 2), "VALID")
    y = y.reshape(y.shape[0], -1)
    y = jnp.maximum(y @ p["wfc1"].T + p["bfc1"], 0.0)
    y = y @ p["wfc2"].T + p["bfc2"]
    return jax.nn.log_softmax(y, axis=1)


if __name__ == "__main__":
    key = jax.random.PRNGKey(0)
    pkey, xkey = jax.random.split(key)
    params = init_params(pkey)
    prepared = prepare_params(params)        # one-time weight repack (host side)

    # fc1 expects 4*4*50 features => 1x28x28 input; B=16 => grid of 2 blocks of 8.
    x = jax.random.normal(xkey, (16, 1, 28, 28), jnp.float32)

    fwd = jax.jit(net_forward)
    out = jax.block_until_ready(fwd(x, prepared))
    ref = reference_forward(x, params)

    assert out.shape == (16, 10) and out.dtype == jnp.float32
    max_err = float(jnp.max(jnp.abs(out - ref)))
    assert jnp.allclose(out, ref, atol=2e-4, rtol=2e-4), max_err
    print("KERNEL_OK")
</pallas_src>

<mosaic_0001>
module attributes {stable_mosaic.version = 11 : i64} {
  func.func @kernel(%arg0: i32, %arg1: memref<28x8x28xf32, #tpu.memory_space<vmem>>, %arg2: memref<140x480xf32, #tpu.memory_space<vmem>>, %arg3: memref<1x240xf32, #tpu.memory_space<vmem>>, %arg4: memref<1200x400xf32, #tpu.memory_space<vmem>>, %arg5: memref<1x200xf32, #tpu.memory_space<vmem>>, %arg6: memref<800x500xf32, #tpu.memory_space<vmem>>, %arg7: memref<1x500xf32, #tpu.memory_space<vmem>>, %arg8: memref<500x10xf32, #tpu.memory_space<vmem>>, %arg9: memref<1x10xf32, #tpu.memory_space<vmem>>, %arg10: memref<8x10xf32, #tpu.memory_space<vmem>>) attributes {dimension_semantics = [#tpu.dimension_semantics<parallel>], iteration_bounds = array<i64: 2>, scalar_prefetch = 0 : i64, scratch_operands = 0 : i64, tpu.core_type = #tpu.core_type<tc>, window_params = [{transform_indices = @transform_0, window_bounds = array<i64: 28, 8, 28>}, {pipeline_mode = #tpu.pipeline_mode<synchronous>, transform_indices = @transform_1, window_bounds = array<i64: 140, 480>}, {pipeline_mode = #tpu.pipeline_mode<synchronous>, transform_indices = @transform_2, window_bounds = array<i64: 1, 240>}, {pipeline_mode = #tpu.pipeline_mode<synchronous>, transform_indices = @transform_3, window_bounds = array<i64: 1200, 400>}, {pipeline_mode = #tpu.pipeline_mode<synchronous>, transform_indices = @transform_4, window_bounds = array<i64: 1, 200>}, {pipeline_mode = #tpu.pipeline_mode<synchronous>, transform_indices = @transform_5, window_bounds = array<i64: 800, 500>}, {pipeline_mode = #tpu.pipeline_mode<synchronous>, transform_indices = @transform_6, window_bounds = array<i64: 1, 500>}, {pipeline_mode = #tpu.pipeline_mode<synchronous>, transform_indices = @transform_7, window_bounds = array<i64: 500, 10>}, {pipeline_mode = #tpu.pipeline_mode<synchronous>, transform_indices = @transform_8, window_bounds = array<i64: 1, 10>}, {transform_indices = @transform_9, window_bounds = array<i64: 8, 10>}]} {
    %c0 = arith.constant 0 : index
    %c0_0 = arith.constant 0 : index
    %c0_1 = arith.constant 0 : index
    %0 = vector.load %arg1[%c0, %c0_0, %c0_1] : memref<28x8x28xf32, #tpu.memory_space<vmem>>, vector<24x8x28xf32>
    %c1 = arith.constant 1 : index
    %c0_2 = arith.constant 0 : index
    %c0_3 = arith.constant 0 : index
    %1 = vector.load %arg1[%c1, %c0_2, %c0_3] : memref<28x8x28xf32, #tpu.memory_space<vmem>>, vector<24x8x28xf32>
    %c2 = arith.constant 2 : index
    %c0_4 = arith.constant 0 : index
    %c0_5 = arith.constant 0 : index
    %2 = vector.load %arg1[%c2, %c0_4, %c0_5] : memref<28x8x28xf32, #tpu.memory_space<vmem>>, vector<24x8x28xf32>
    %c3 = arith.constant 3 : index
    %c0_6 = arith.constant 0 : index
    %c0_7 = arith.constant 0 : index
    %3 = vector.load %arg1[%c3, %c0_6, %c0_7] : memref<28x8x28xf32, #tpu.memory_space<vmem>>, vector<24x8x28xf32>
    %c4 = arith.constant 4 : index
    %c0_8 = arith.constant 0 : index
    %c0_9 = arith.constant 0 : index
    %4 = vector.load %arg1[%c4, %c0_8, %c0_9] : memref<28x8x28xf32, #tpu.memory_space<vmem>>, vector<24x8x28xf32>
    %5 = tpu.concatenate %0, %1, %2, %3, %4 in 2 : vector<24x8x28xf32>, vector<24x8x28xf32>, vector<24x8x28xf32>, vector<24x8x28xf32>, vector<24x8x28xf32> -> vector<24x8x140xf32>
    %6 = vector.shape_cast %5 : vector<24x8x140xf32> to vector<192x140xf32>
    %c0_10 = arith.constant 0 : index
    %c0_11 = arith.constant 0 : index
    %7 = vector.load %arg2[%c0_10, %c0_11] : memref<140x480xf32, #tpu.memory_space<vmem>>, vector<140x480xf32>
    %cst = arith.constant dense<0.000000e+00> : vector<192x480xf32>
    %8 = tpu.matmul %6, %7, %cst {dimension_numbers = #tpu.dot_dimension_numbers<[1], [0], [0], [1], [0, 0, 1, 1], [], []>} : vector<192x140xf32>, vector<140x480xf32>, vector<192x480xf32> -> vector<192x480xf32>
    %9 = vector.extract_strided_slice %8 {offsets = [0, 0], sizes = [192, 240], strides = [1, 1]} : vector<192x480xf32> to vector<192x240xf32>
    %10 = vector.extract_strided_slice %8 {offsets = [0, 240], sizes = [192, 240], strides = [1, 1]} : vector<192x480xf32> to vector<192x240xf32>
    %11 = arith.maximumf %9, %10 : vector<192x240xf32>
    %12 = vector.shape_cast %11 : vector<192x240xf32> to vector<12x2x8x240xf32>
    %13 = vector.extract_strided_slice %12 {offsets = [0, 0, 0, 0], sizes = [12, 1, 8, 240], strides = [1, 1, 1, 1]} : vector<12x2x8x240xf32> to vector<12x1x8x240xf32>
    %14 = vector.shape_cast %13 : vector<12x1x8x240xf32> to vector<12x8x240xf32>
    %15 = vector.extract_strided_slice %12 {offsets = [0, 1, 0, 0], sizes = [12, 1, 8, 240], strides = [1, 1, 1, 1]} : vector<12x2x8x240xf32> to vector<12x1x8x240xf32>
    %16 = vector.shape_cast %15 : vector<12x1x8x240xf32> to vector<12x8x240xf32>
    %17 = arith.maximumf %14, %16 : vector<12x8x240xf32>
    %c0_12 = arith.constant 0 : index
    %c0_13 = arith.constant 0 : index
    %18 = vector.load %arg3[%c0_12, %c0_13] : memref<1x240xf32, #tpu.memory_space<vmem>>, vector<1x240xf32>
    %19 = vector.shape_cast %18 : vector<1x240xf32> to vector<1x1x240xf32>
    %20 = vector.broadcast %19 : vector<1x1x240xf32> to vector<12x8x240xf32>
    %21 = arith.addf %17, %20 : vector<12x8x240xf32>
    %cst_14 = arith.constant 0.000000e+00 : f32
    %22 = vector.broadcast %cst_14 : f32 to vector<12x8x240xf32>
    %23 = arith.maximumf %21, %22 : vector<12x8x240xf32>
    %24 = vector.extract_strided_slice %23 {offsets = [0, 0, 0], sizes = [8, 8, 240], strides = [1, 1, 1]} : vector<12x8x240xf32> to vector<8x8x240xf32>
    %25 = vector.extract_strided_slice %23 {offsets = [1, 0, 0], sizes = [8, 8, 240], strides = [1, 1, 1]} : vector<12x8x240xf32> to vector<8x8x240xf32>
    %26 = vector.extract_strided_slice %23 {offsets = [2, 0, 0], sizes = [8, 8, 240], strides = [1, 1, 1]} : vector<12x8x240xf32> to vector<8x8x240xf32>
    %27 = vector.extract_strided_slice %23 {offsets = [3, 0, 0], sizes = [8, 8, 240], strides = [1, 1, 1]} : vector<12x8x240xf32> to vector<8x8x240xf32>
    %28 = vector.extract_strided_slice %23 {offsets = [4, 0, 0], sizes = [8, 8, 240], strides = [1, 1, 1]} : vector<12x8x240xf32> to vector<8x8x240xf32>
    %29 = tpu.concatenate %24, %25, %26, %27, %28 in 2 : vector<8x8x240xf32>, vector<8x8x240xf32>, vector<8x8x240xf32>, vector<8x8x240xf32>, vector<8x8x240xf32> -> vector<8x8x1200xf32>
    %30 = vector.shape_cast %29 : vector<8x8x1200xf32> to vector<64x1200xf32>
    %c0_15 = arith.constant 0 : index
    %c0_16 = arith.constant 0 : index
    %31 = vector.load %arg4[%c0_15, %c0_16] : memref<1200x400xf32, #tpu.memory_space<vmem>>, vector<1200x400xf32>
    %cst_17 = arith.constant dense<0.000000e+00> : vector<64x400xf32>
    %32 = tpu.matmul %30, %31, %cst_17 {dimension_numbers = #tpu.dot_dimension_numbers<[1], [0], [0], [1], [0, 0, 1, 1], [], []>} : vector<64x1200xf32>, vector<1200x400xf32>, vector<64x400xf32> -> vector<64x400xf32>
    %33 = vector.extract_strided_slice %32 {offsets = [0, 0], sizes = [64, 200], strides = [1, 1]} : vector<64x400xf32> to vector<64x200xf32>
    %34 = vector.extract_strided_slice %32 {offsets = [0, 200], sizes = [64, 200], strides = [1, 1]} : vector<64x400xf32> to vector<64x200xf32>
    %35 = arith.maximumf %33, %34 : vector<64x200xf32>
    %36 = vector.shape_cast %35 : vector<64x200xf32> to vector<4x2x8x200xf32>
    %37 = vector.extract_strided_slice %36 {offsets = [0, 0, 0, 0], sizes = [4, 1, 8, 200], strides = [1, 1, 1, 1]} : vector<4x2x8x200xf32> to vector<4x1x8x200xf32>
    %38 = vector.shape_cast %37 : vector<4x1x8x200xf32> to vector<4x8x200xf32>
    %39 = vector.extract_strided_slice %36 {offsets = [0, 1, 0, 0], sizes = [4, 1, 8, 200], strides = [1, 1, 1, 1]} : vector<4x2x8x200xf32> to vector<4x1x8x200xf32>
    %40 = vector.shape_cast %39 : vector<4x1x8x200xf32> to vector<4x8x200xf32>
    %41 = arith.maximumf %38, %40 : vector<4x8x200xf32>
    %c0_18 = arith.constant 0 : index
    %c0_19 = arith.constant 0 : index
    %42 = vector.load %arg5[%c0_18, %c0_19] : memref<1x200xf32, #tpu.memory_space<vmem>>, vector<1x200xf32>
    %43 = vector.shape_cast %42 : vector<1x200xf32> to vector<1x1x200xf32>
    %44 = vector.broadcast %43 : vector<1x1x200xf32> to vector<4x8x200xf32>
    %45 = arith.addf %41, %44 : vector<4x8x200xf32>
    %cst_20 = arith.constant 0.000000e+00 : f32
    %46 = vector.broadcast %cst_20 : f32 to vector<4x8x200xf32>
    %47 = arith.maximumf %45, %46 : vector<4x8x200xf32>
    %48 = vector.extract_strided_slice %47 {offsets = [0, 0, 0], sizes = [1, 8, 200], strides = [1, 1, 1]} : vector<4x8x200xf32> to vector<1x8x200xf32>
    %49 = vector.shape_cast %48 : vector<1x8x200xf32> to vector<8x200xf32>
    %50 = vector.extract_strided_slice %47 {offsets = [1, 0, 0], sizes = [1, 8, 200], strides = [1, 1, 1]} : vector<4x8x200xf32> to vector<1x8x200xf32>
    %51 = vector.shape_cast %50 : vector<1x8x200xf32> to vector<8x200xf32>
    %52 = vector.extract_strided_slice %47 {offsets = [2, 0, 0], sizes = [1, 8, 200], strides = [1, 1, 1]} : vector<4x8x200xf32> to vector<1x8x200xf32>
    %53 = vector.shape_cast %52 : vector<1x8x200xf32> to vector<8x200xf32>
    %54 = vector.extract_strided_slice %47 {offsets = [3, 0, 0], sizes = [1, 8, 200], strides = [1, 1, 1]} : vector<4x8x200xf32> to vector<1x8x200xf32>
    %55 = vector.shape_cast %54 : vector<1x8x200xf32> to vector<8x200xf32>
    %56 = tpu.concatenate %49, %51, %53, %55 in 1 : vector<8x200xf32>, vector<8x200xf32>, vector<8x200xf32>, vector<8x200xf32> -> vector<8x800xf32>
    %c0_21 = arith.constant 0 : index
    %c0_22 = arith.constant 0 : index
    %57 = vector.load %arg6[%c0_21, %c0_22] : memref<800x500xf32, #tpu.memory_space<vmem>>, vector<800x500xf32>
    %cst_23 = arith.constant dense<0.000000e+00> : vector<8x500xf32>
    %58 = tpu.matmul %56, %57, %cst_23 {dimension_numbers = #tpu.dot_dimension_numbers<[1], [0], [0], [1], [0, 0, 1, 1], [], []>} : vector<8x800xf32>, vector<800x500xf32>, vector<8x500xf32> -> vector<8x500xf32>
    %c0_24 = arith.constant 0 : index
    %c0_25 = arith.constant 0 : index
    %59 = vector.load %arg7[%c0_24, %c0_25] : memref<1x500xf32, #tpu.memory_space<vmem>>, vector<1x500xf32>
    %60 = vector.broadcast %59 : vector<1x500xf32> to vector<8x500xf32>
    %61 = arith.addf %58, %60 : vector<8x500xf32>
    %cst_26 = arith.constant 0.000000e+00 : f32
    %62 = vector.broadcast %cst_26 : f32 to vector<8x500xf32>
    %63 = arith.maximumf %61, %62 : vector<8x500xf32>
    %c0_27 = arith.constant 0 : index
    %c0_28 = arith.constant 0 : index
    %64 = vector.load %arg8[%c0_27, %c0_28] : memref<500x10xf32, #tpu.memory_space<vmem>>, vector<500x10xf32>
    %cst_29 = arith.constant dense<0.000000e+00> : vector<8x10xf32>
    %65 = tpu.matmul %63, %64, %cst_29 {dimension_numbers = #tpu.dot_dimension_numbers<[1], [0], [0], [1], [0, 0, 1, 1], [], []>} : vector<8x500xf32>, vector<500x10xf32>, vector<8x10xf32> -> vector<8x10xf32>
    %c0_30 = arith.constant 0 : index
    %c0_31 = arith.constant 0 : index
    %66 = vector.load %arg9[%c0_30, %c0_31] : memref<1x10xf32, #tpu.memory_space<vmem>>, vector<1x10xf32>
    %67 = vector.broadcast %66 : vector<1x10xf32> to vector<8x10xf32>
    %68 = arith.addf %65, %67 : vector<8x10xf32>
    %cst_32 = arith.constant dense<0xFF800000> : vector<8xf32>
    %69 = vector.multi_reduction <maximumf>, %68, %cst_32 [1] : vector<8x10xf32> to vector<8xf32>
    %70 = vector.shape_cast %69 : vector<8xf32> to vector<8x1xf32>
    %71 = vector.broadcast %70 : vector<8x1xf32> to vector<8x10xf32>
    %72 = arith.subf %68, %71 : vector<8x10xf32>
    %73 = math.exp %72 : vector<8x10xf32>
    %cst_33 = arith.constant dense<0.000000e+00> : vector<8xf32>
    %74 = vector.multi_reduction <add>, %73, %cst_33 [1] : vector<8x10xf32> to vector<8xf32>
    %75 = vector.shape_cast %74 : vector<8xf32> to vector<8x1xf32>
    %76 = math.log %75 : vector<8x1xf32>
    %77 = vector.broadcast %76 : vector<8x1xf32> to vector<8x10xf32>
    %78 = arith.subf %72, %77 : vector<8x10xf32>
    %c0_34 = arith.constant 0 : index
    %c0_35 = arith.constant 0 : index
    %79 = vector.load %arg10[%c0_34, %c0_35] : memref<8x10xf32, #tpu.memory_space<vmem>>, vector<8x10xf32>
    tpu.vector_store %arg10[%c0_34, %c0_35], %78 {strides = array<i32>} : memref<8x10xf32, #tpu.memory_space<vmem>>, vector<8x10xf32>,
    return
  }
  func.func @transform_0(%arg0: i32) -> (i32, i32, i32) {
    %c0_i32 = arith.constant 0 : i32
    %c0_i32_0 = arith.constant 0 : i32
    %c0_i32_1 = arith.constant 0 : i32
    return %c0_i32, %arg0, %c0_i32_0 : i32, i32, i32
  }
  func.func @transform_1(%arg0: i32) -> (i32, i32) {
    %c0_i32 = arith.constant 0 : i32
    %c0_i32_0 = arith.constant 0 : i32
    %c0_i32_1 = arith.constant 0 : i32
    return %c0_i32, %c0_i32_0 : i32, i32
  }
  func.func @transform_2(%arg0: i32) -> (i32, i32) {
    %c0_i32 = arith.constant 0 : i32
    %c0_i32_0 = arith.constant 0 : i32
    %c0_i32_1 = arith.constant 0 : i32
    return %c0_i32, %c0_i32_0 : i32, i32
  }
  func.func @transform_3(%arg0: i32) -> (i32, i32) {
    %c0_i32 = arith.constant 0 : i32
    %c0_i32_0 = arith.constant 0 : i32
    %c0_i32_1 = arith.constant 0 : i32
    return %c0_i32, %c0_i32_0 : i32, i32
  }
  func.func @transform_4(%arg0: i32) -> (i32, i32) {
    %c0_i32 = arith.constant 0 : i32
    %c0_i32_0 = arith.constant 0 : i32
    %c0_i32_1 = arith.constant 0 : i32
    return %c0_i32, %c0_i32_0 : i32, i32
  }
  func.func @transform_5(%arg0: i32) -> (i32, i32) {
    %c0_i32 = arith.constant 0 : i32
    %c0_i32_0 = arith.constant 0 : i32
    %c0_i32_1 = arith.constant 0 : i32
    return %c0_i32, %c0_i32_0 : i32, i32
  }
  func.func @transform_6(%arg0: i32) -> (i32, i32) {
    %c0_i32 = arith.constant 0 : i32
    %c0_i32_0 = arith.constant 0 : i32
    %c0_i32_1 = arith.constant 0 : i32
    return %c0_i32, %c0_i32_0 : i32, i32
  }
  func.func @transform_7(%arg0: i32) -> (i32, i32) {
    %c0_i32 = arith.constant 0 : i32
    %c0_i32_0 = arith.constant 0 : i32
    %c0_i32_1 = arith.constant 0 : i32
    return %c0_i32, %c0_i32_0 : i32, i32
  }
  func.func @transform_8(%arg0: i32) -> (i32, i32) {
    %c0_i32 = arith.constant 0 : i32
    %c0_i32_0 = arith.constant 0 : i32
    %c0_i32_1 = arith.constant 0 : i32
    return %c0_i32, %c0_i32_0 : i32, i32
  }
  func.func @transform_9(%arg0: i32) -> (i32, i32) {
    %c0_i32 = arith.constant 0 : i32
    %c0_i32_0 = arith.constant 0 : i32
    return %arg0, %c0_i32 : i32, i32
  }
}

</mosaic_0001>

<bundles_post_ra>
// kernel: net_forward.1
= control target key start
LH: loop header
LB: loop body
LE: loop exit
PB: predicated region body
PF: predicated region fallthrough
CT: control target
= control target key end

     0   :  { %s13748_s0 = inlined_call_operand.vmem [shape: f32[28,16,28], index: 0, kind: input, shape index: {}]   ;;  %s13749_s1 = inlined_call_operand.vmem [shape: f32[140,480], index: 1, kind: input, shape index: {}]   ;;  %s13750_s2 = inlined_call_operand.vmem [shape: f32[1,240], index: 2, kind: input, shape index: {}]   ;;  %s13751_s3 = inlined_call_operand.vmem [shape: f32[1200,400], index: 3, kind: input, shape index: {}]   ;;  %s13752_s4 = inlined_call_operand.vmem [shape: f32[1,200], index: 4, kind: input, shape index: {}]   ;;  %s13753_s5 = inlined_call_operand.vmem [shape: f32[800,500], index: 5, kind: input, shape index: {}]   ;;  %s13754_s6 = inlined_call_operand.vmem [shape: f32[1,500], index: 6, kind: input, shape index: {}]   ;;  %s13755_s7 = inlined_call_operand.vmem [shape: f32[500,10], index: 7, kind: input, shape index: {}]   ;;  %s13756_s8 = inlined_call_operand.vmem [shape: f32[1,10], index: 8, kind: input, shape index: {}]   ;;  %s13757_s9 = inlined_call_operand.hbm [shape: f32[16,10], index: 9, kind: output, shape index: {}]  }
   0x1   :  { %13943 = sst [smem:[#allocation148_spill]] %s13748_s0 }
   0x2   :  { %14 = vsyncpa [#allocation4], 0 }
   0x3   :  { %16 = vsyncpa [#allocation4 + $0x1], 0  ;;  %s7079_s30 = smov 0   ;;  %s7081_s10 = smov 0  }
   0x4   :  { %s7083_s11 = smov 0   ;;  %s7085_s12 = smov 0  }
   0x5 LB: > { %13944 = sst [smem:[#allocation6_spill]] %s7013_s11  ;;  %s13758_s13 = sadd.s32 4294967295, %s7017_s12   ;;  %s7017_s12 = sphi %s7085_s12, %s14394_s12   ;;  %s7013_s11 = sphi %s7083_s11, %s14393_s11   ;;  %s7009_s10 = sphi %s7081_s10, %s14392_s10   ;;  %s7005_s30 = sphi %s7079_s30, %s14391_s30  }
   0x6   : > { %s6338_s14 = sadd.s32 4294967294, %s7017_s12   ;;  %s7102_s15 = sadd.s32 1, %s7017_s12  }
   0x7   : > { %s29_s16 = sadd.s32 1, %s7013_s11  ;;  %s26_s17 = ssub.s32 %s7017_s12, %s7102_s15 }
   0x8   : > { %p36_p0 = scmp.ne.s32.totalorder %s7013_s11, %s7009_s10  ;;  %p27_p1 = scmp.eq.s32.totalorder %s26_s17, 0 }
   0x9   : > { %p37_p2 = scmp.eq.s32.totalorder %s7017_s12, 0  ;;  %p234_p3 = scmp.eq.s32.totalorder %s13758_s13, 1 }
   0xa   : > { %p239_p4 = scmp.ne.s32.totalorder %s7009_s10, %s7005_s30  ;;  %p240_p7 = scmp.eq.s32.totalorder %s6338_s14, 1 }
   0xb   : > { %s7115_s18 = scalar_select %p27_p1, %s7013_s11, %s29_s16  }
   0xc   : > { %p38_p5 = por %p37_p2, %p36_p0  ;;  %p7117_p6 = por %p234_p3, %p36_p0 }
   0xd   : > { %13945 = sst [smem:[#allocation7_spill]] %s7115_s18  ;;  %p7121_p8 = por %p240_p7, %p239_p4 }
   0xe   : > { %p6340_p9 = scmp.ge.s32.totalorder %s7017_s12, 2 }
  0x10   : > { %280 = sbr.rel (%p6340_p9) target bundleno = 59 (0x3b), region = 48 }
  0x15   : > { %283 = sbr.rel (!%p38_p5) target bundleno = 59 (0x3b), region = 52  ;;  %s285_s21 = sand.u32 (%p38_p5), 1, %s7013_s11  }
  0x16   : > { %s6341_s22 = sshll.u32 (%p38_p5), %s7017_s12, 3  ;;  %s6614_s23 = smul.u32 (%p38_p5), 224, %s285_s21 }
  0x17   : > { %s13948_s0 = sld [smem:[#allocation148_spill]] (%p38_p5) }
  0x18   : > { %s7138_s27 = scalar_lea.vmem (%p38_p5), [#allocation2], %s6614_s23 }
  0x1d   : > { %s7133_s26 = scalar_lea.vmem %s13948_s0, %s6341_s22 }
  0x1e   : > { %v372_v0 = vld [vmem:[%s7133_s26] sm:$0xff]  ;;  %v374_v1 = vld [vmem:[%s7133_s26 + $0x10] sm:$0xff] }
  0x1f   : > { %v376_v2 = vld [vmem:[%s7133_s26 + $0x20] sm:$0xff]  ;;  %373 = vst [vmem:[%s7138_s27] sm:$0xff] %v372_v0  ;;  %v378_v3 = vld [vmem:[%s7133_s26 + $0x30] sm:$0xff] }
  0x20   : > { %375 = vst [vmem:[%s7138_s27 + $0x8] sm:$0xff] %v374_v1  ;;  %v380_v4 = vld [vmem:[%s7133_s26 + $0x40] sm:$0xff]  ;;  %v382_v5 = vld [vmem:[%s7133_s26 + $0x50] sm:$0xff] }
  0x21   : > { %377 = vst [vmem:[%s7138_s27 + $0x10] sm:$0xff] %v376_v2  ;;  %v384_v6 = vld [vmem:[%s7133_s26 + $0x60] sm:$0xff]  ;;  %v386_v7 = vld [vmem:[%s7133_s26 + $0x70] sm:$0xff] }
  0x22   : > { %379 = vst [vmem:[%s7138_s27 + $0x18] sm:$0xff] %v378_v3  ;;  %v388_v8 = vld [vmem:[%s7133_s26 + $0x80] sm:$0xff]  ;;  %v390_v9 = vld [vmem:[%s7133_s26 + $0x90] sm:$0xff] }
  0x23   : > { %381 = vst [vmem:[%s7138_s27 + $0x20] sm:$0xff] %v380_v4  ;;  %v392_v10 = vld [vmem:[%s7133_s26 + $0xa0] sm:$0xff]  ;;  %v394_v11 = vld [vmem:[%s7133_s26 + $0xb0] sm:$0xff] }
  0x24   : > { %383 = vst [vmem:[%s7138_s27 + $0x28] sm:$0xff] %v382_v5  ;;  %v396_v12 = vld [vmem:[%s7133_s26 + $0xc0] sm:$0xff]  ;;  %v398_v13 = vld [vmem:[%s7133_s26 + $0xd0] sm:$0xff] }
  0x25   : > { %385 = vst [vmem:[%s7138_s27 + $0x30] sm:$0xff] %v384_v6  ;;  %v400_v14 = vld [vmem:[%s7133_s26 + $0xe0] sm:$0xff]  ;;  %v402_v15 = vld [vmem:[%s7133_s26 + $0xf0] sm:$0xff] }
  0x26   : > { %387 = vst [vmem:[%s7138_s27 + $0x38] sm:$0xff] %v386_v7  ;;  %v404_v16 = vld [vmem:[%s7133_s26 + $0x100] sm:$0xff]  ;;  %v406_v17 = vld [vmem:[%s7133_s26 + $0x110] sm:$0xff] }
  0x27   : > { %389 = vst [vmem:[%s7138_s27 + $0x40] sm:$0xff] %v388_v8  ;;  %v408_v18 = vld [vmem:[%s7133_s26 + $0x120] sm:$0xff]  ;;  %v410_v19 = vld [vmem:[%s7133_s26 + $0x130] sm:$0xff] }
  0x28   : > { %391 = vst [vmem:[%s7138_s27 + $0x48] sm:$0xff] %v390_v9  ;;  %v412_v20 = vld [vmem:[%s7133_s26 + $0x140] sm:$0xff]  ;;  %v414_v21 = vld [vmem:[%s7133_s26 + $0x150] sm:$0xff] }
  0x29   : > { %393 = vst [vmem:[%s7138_s27 + $0x50] sm:$0xff] %v392_v10  ;;  %v416_v22 = vld [vmem:[%s7133_s26 + $0x160] sm:$0xff]  ;;  %v418_v23 = vld [vmem:[%s7133_s26 + $0x170] sm:$0xff] }
  0x2a   : > { %395 = vst [vmem:[%s7138_s27 + $0x58] sm:$0xff] %v394_v11  ;;  %v420_v24 = vld [vmem:[%s7133_s26 + $0x180] sm:$0xff]  ;;  %v422_v25 = vld [vmem:[%s7133_s26 + $0x190] sm:$0xff] }
  0x2b   : > { %397 = vst [vmem:[%s7138_s27 + $0x60] sm:$0xff] %v396_v12  ;;  %v424_v26 = vld [vmem:[%s7133_s26 + $0x1a0] sm:$0xff]  ;;  %v426_v27 = vld [vmem:[%s7133_s26 + $0x1b0] sm:$0xff] }
  0x2c   : > { %399 = vst [vmem:[%s7138_s27 + $0x68] sm:$0xff] %v398_v13 }
  0x2d   : > { %401 = vst [vmem:[%s7138_s27 + $0x70] sm:$0xff] %v400_v14 }
  0x2e   : > { %403 = vst [vmem:[%s7138_s27 + $0x78] sm:$0xff] %v402_v15 }
  0x2f   : > { %405 = vst [vmem:[%s7138_s27 + $0x80] sm:$0xff] %v404_v16 }
  0x30   : > { %407 = vst [vmem:[%s7138_s27 + $0x88] sm:$0xff] %v406_v17 }
  0x31   : > { %409 = vst [vmem:[%s7138_s27 + $0x90] sm:$0xff] %v408_v18 }
  0x32   : > { %411 = vst [vmem:[%s7138_s27 + $0x98] sm:$0xff] %v410_v19 }
  0x33   : > { %413 = vst [vmem:[%s7138_s27 + $0xa0] sm:$0xff] %v412_v20 }
  0x34   : > { %415 = vst [vmem:[%s7138_s27 + $0xa8] sm:$0xff] %v414_v21 }
  0x35   : > { %417 = vst [vmem:[%s7138_s27 + $0xb0] sm:$0xff] %v416_v22 }
  0x36   : > { %419 = vst [vmem:[%s7138_s27 + $0xb8] sm:$0xff] %v418_v23 }
  0x37   : > { %421 = vst [vmem:[%s7138_s27 + $0xc0] sm:$0xff] %v420_v24 }
  0x38   : > { %423 = vst [vmem:[%s7138_s27 + $0xc8] sm:$0xff] %v422_v25 }
  0x39   : > { %425 = vst [vmem:[%s7138_s27 + $0xd0] sm:$0xff] %v424_v26 }
  0x3a   : > { %427 = vst [vmem:[%s7138_s27 + $0xd8] sm:$0xff] %v426_v27 }
  0x3b PF: > { %p6342_p10 = scmp.ge.s32.totalorder %s7017_s12, 1  ;;  %p432_p11 = scmp.lt.s32.totalorder %s7017_s12, 3 }
  0x3d   : > { %p433_p12 = pnand %p6342_p10, %p432_p11 }
  0x3f   : > { %436 = sbr.rel (%p433_p12) target bundleno = 2642 (0xa52), region = 90 }
  0x44   : > { %s7196_s28 = sand.u32 1, %s7009_s10   ;;  %s13759_s16 = smov 112   ;;  %v1142_v51 = vld [vmem:[%s13749_s1 + $0x1e0] sm:$0xff]  ;;  %v1143_v52 = vld [vmem:[%s13749_s1 + $0x1e8] sm:$0xff]  ;;  %vm1203_vm0 = vcmask 1043456   ;;  %vm1154_vm1 = vcmask 97280  }
  0x45   : > { %s6615_s29 = smul.u32 224, %s7196_s28  ;;  %s13765_s17 = smov 56   ;;  %v1138_v53 = vld [vmem:[%s13749_s1 + $0x1c0] sm:$0xff]  ;;  %1216 = vmatpush.msra.mxu0 %v1142_v51  ;;  %v1139_v54 = vld [vmem:[%s13749_s1 + $0x1c8] sm:$0xff]  ;;  %1394 = vmatpush.msra.mxu2 %v1143_v52  ;;  %vm982_vm2 = vcmask 228352   ;;  %vm1007_vm3 = vcmask 457728  }
  0x46   : > { %s13763_s21 = smov 28   ;;  %s13761_s22 = smov 84   ;;  %v1134_v55 = vld [vmem:[%s13749_s1 + $0x1a0] sm:$0xff]  ;;  %v1135_v56 = vld [vmem:[%s13749_s1 + $0x1a8] sm:$0xff]  ;;  %vm1032_vm4 = vcmask 687104   ;;  %vm1057_vm5 = vcmask 916480  }
  0x47   : > { %s7199_s14 = scalar_lea.vmem [#allocation2], %s6615_s29  ;;  %1217 = vmatpush.msra.mxu0 %v1138_v53  ;;  %1395 = vmatpush.msra.mxu2 %v1139_v54  ;;  %v1130_v57 = vld [vmem:[%s13749_s1 + $0x180] sm:$0xff]  ;;  %v1131_v59 = vld [vmem:[%s13749_s1 + $0x188] sm:$0xff]  ;;  %s13949_s27 = smov 112   ;;  %vm2144_vm6 = vcmask 130048   ;;  %vm2481_vm7 = vcmask 785408  }
  0x48   : > { %v7202_v28 = vld [vmem:[%s7199_s14 + $0x20] sm:$0xff]  ;;  %v7205_v29 = vld [vmem:[%s7199_s14 + $0x10] sm:$0xff]  ;;  %v7208_v30 = vld [vmem:[%s7199_s14 + $0x18] sm:$0xff]  ;;  %s13950_s23 = smov 56   ;;  %s13951_s24 = smov 84   ;;  %vm2548_vm8 = vcmask 654336  }
  0x49   : > { %910 = vrot.lane.b32.xlu0 %v7202_v28, %s13759_s16  ;;  %v6670_v31 = vpack.i.bf16 %v7208_v30, %v7205_v29  ;;  %v7215_v32 = vld [vmem:[%s7199_s14 + $0x28] sm:$0xff]  ;;  %v6675_v35 = vpack.i.bf16 %v7202_v28, %v7208_v30  ;;  %v7229_v36 = vld [vmem:[%s7199_s14 + $0x30] sm:$0xff]  ;;  %v7242_v39 = vld [vmem:[%s7199_s14 + $0x38] sm:$0xff]  ;;  %1218 = vmatpush.msra.mxu0 %v1134_v55  ;;  %s13952_s25 = smov 28   ;;  %s7025_s26 = smov 80   ;;  %vm2615_vm9 = vcmask 523264  }
  0x4a   : > { %v7218_v33 = vld [vmem:[%s7199_s14 + $0x8] sm:$0xff]  ;;  %912 = vrot.lane.b32.xlu2 %v7215_v32, %s13759_s16  ;;  %v6690_v37 = vpack.i.bf16 %v7229_v36, %v7215_v32  ;;  %v6685_v38 = vpack.i.bf16 %v7215_v32, %v7202_v28  ;;  %v7245_v40 = vld [vmem:[%s7199_s14 + $0x40] sm:$0xff]  ;;  %v6700_v41 = vpack.i.bf16 %v7242_v39, %v7229_v36  ;;  %v7264_v44 = vld [vmem:[%s7199_s14 + $0x50] sm:$0xff]  ;;  %1396 = vmatpush.msra.mxu2 %v1135_v56  ;;  %vm3272_vm10 = vcmask 392192   ;;  %s7027_s13 = smov 72   ;;  %s14388_s0 = sadd.s32 4294967295, %s7017_s12  }
  0x4b   : > { %6671 = vrot.lane.b32.xlu1 %v6670_v31, %s13765_s17  ;;  %v6665_v34 = vpack.i.bf16 %v7205_v29, %v7218_v33  ;;  %v6705_v42 = vpack.i.bf16 %v7245_v40, %v7242_v39  ;;  %v7258_v43 = vld [vmem:[%s7199_s14 + $0x48] sm:$0xff]  ;;  %v7275_v47 = vld [vmem:[%s7199_s14 + $0x58] sm:$0xff]  ;;  %v7279_v48 = vld [vmem:[%s7199_s14 + $0x60] sm:$0xff]  ;;  %1219 = vmatpush.msra.mxu0 %v1130_v57  ;;  %vm5085_vm11 = vcmask 588800   ;;  %vm5522_vm12 = vcmask 261120   ;;  %s6975_s29 = scalar_lea.hbm %s13757_s9, 16 }
  0x4c   : > { %v6715_v45 = vpack.i.bf16 %v7258_v43, %v7245_v40  ;;  %v6720_v46 = vpack.i.bf16 %v7264_v44, %v7258_v43  ;;  %v6735_v49 = vpack.i.bf16 %v7279_v48, %v7275_v47  ;;  %v6730_v50 = vpack.i.bf16 %v7275_v47, %v7264_v44  ;;  %v7314_v58 = vld [vmem:[%s7199_s14 + $0x68] sm:$0xff]  ;;  %v1126_v60 = vld [vmem:[%s13749_s1 + $0x160] sm:$0xff]  ;;  %v7323_v61 = vld [vmem:[%s7199_s14 + $0x70] sm:$0xff]  ;;  %1397 = vmatpush.msra.mxu2 %v1131_v59 }
  0x4d   : > { %v1127_v62 = vld [vmem:[%s13749_s1 + $0x168] sm:$0xff]  ;;  %v1122_v63 = vld [vmem:[%s13749_s1 + $0x140] sm:$0xff]  ;;  %1220 = vmatpush.msra.mxu0 %v1126_v60  ;;  %v6745_v6 = vpack.i.bf16 %v7314_v58, %v7279_v48  ;;  %v6750_v10 = vpack.i.bf16 %v7323_v61, %v7314_v58  ;;  %v7377_v13 = vld [vmem:[%s7199_s14 + $0x78] sm:$0xff]  ;;  %vm5105_vm13 = vcmask 719872   ;;  %vm6156_vm14 = vcmask 949248  }
  0x4e   : > { %v1123_v0 = vld [vmem:[%s13749_s1 + $0x148] sm:$0xff]  ;;  %1398 = vmatpush.msra.mxu2 %v1127_v62  ;;  %v1118_v1 = vld [vmem:[%s13749_s1 + $0x120] sm:$0xff]  ;;  %v6760_v18 = vpack.i.bf16 %v7377_v13, %v7323_v61  ;;  %v7479_v54 = vld [vmem:[%s7199_s14 + $0xb0] sm:$0xff]  ;;  %vm6243_vm15 = vcmask 80896  }
  0x4f   : > { %v1150_v2 = vld [vmem:[%s13749_s1 + $0x220] sm:$0xf]  ;;  %1221 = vmatpush.msra.mxu0 %v1122_v63  ;;  %v1119_v3 = vld [vmem:[%s13749_s1 + $0x128] sm:$0xff] }
  0x50   : > { %6440 = vmatpush.msk.msra.mxu1 %vm1203_vm0, %v1150_v2  ;;  %v1151_v4 = vld [vmem:[%s13749_s1 + $0x228] sm:$0xf]  ;;  %v1146_v5 = vld [vmem:[%s13749_s1 + $0x200] sm:$0xff]  ;;  %1399 = vmatpush.msra.mxu2 %v1123_v0 }
  0x51   : > { %6666 = vrot.lane.b32.xlu0 %v6665_v34, %s13763_s21  ;;  %v1114_v7 = vld [vmem:[%s13749_s1 + $0x100] sm:$0xff]  ;;  %6465 = vmatpush.msk.msra.mxu3 %vm1203_vm0, %v1151_v4  ;;  %v1147_v8 = vld [vmem:[%s13749_s1 + $0x208] sm:$0xff] }
  0x52   : > { %914 = vrot.lane.b32.xlu2 %v7229_v36, %s13759_s16  ;;  %1222 = vmatpush.msra.mxu0 %v1118_v1  ;;  %v1115_v9 = vld [vmem:[%s13749_s1 + $0x108] sm:$0xff]  ;;  %v1110_v11 = vld [vmem:[%s13749_s1 + $0xe0] sm:$0xff] }
  0x53   : > { %6676 = vrot.lane.b32.xlu1 %v6675_v35, %s13761_s22  ;;  %1320 = vmatpush.msra.mxu1 %v1146_v5  ;;  %v1111_v12 = vld [vmem:[%s13749_s1 + $0xe8] sm:$0xff]  ;;  %v7383_v14 = vld [vmem:[%s7199_s14 + $0x80] sm:$0xff] }
  0x54   : > { %1400 = vmatpush.msra.mxu2 %v1119_v3  ;;  %1498 = vmatpush.msra.mxu3 %v1147_v8  ;;  %v1106_v15 = vld [vmem:[%s13749_s1 + $0xc0] sm:$0xff]  ;;  %v1107_v16 = vld [vmem:[%s13749_s1 + $0xc8] sm:$0xff]  ;;  %v6765_v17 = vpack.i.bf16 %v7383_v14, %v7377_v13 }
  0x55   : > { %1223 = vmatpush.msra.mxu0 %v1114_v7  ;;  %v1102_v19 = vld [vmem:[%s13749_s1 + $0xa0] sm:$0xff]  ;;  %v1103_v20 = vld [vmem:[%s13749_s1 + $0xa8] sm:$0xff]  ;;  %v7504_v7 = vld [vmem:[%s7199_s14 + $0xb8] sm:$0xff] }
  0x56   : > { %1401 = vmatpush.msra.mxu2 %v1115_v9  ;;  %v1098_v21 = vld [vmem:[%s13749_s1 + $0x80] sm:$0xff]  ;;  %v1099_v22 = vld [vmem:[%s13749_s1 + $0x88] sm:$0xff] }
  0x57   : > { %1224 = vmatpush.msra.mxu0 %v1110_v11  ;;  %v7411_v23 = vld [vmem:[%s7199_s14 + $0x88] sm:$0xff]  ;;  %v1094_v24 = vld [vmem:[%s13749_s1 + $0x60] sm:$0xff] }
  0x58   : > { %1402 = vmatpush.msra.mxu2 %v1111_v12  ;;  %v1095_v25 = vld [vmem:[%s13749_s1 + $0x68] sm:$0xff]  ;;  %v1090_v26 = vld [vmem:[%s13749_s1 + $0x40] sm:$0xff] }
  0x59   : > { %6681 = vrot.lane.b32.xlu0 %v6675_v35, %s13763_s21  ;;  %1225 = vmatpush.msra.mxu0 %v1106_v15  ;;  %v1091_v27 = vld [vmem:[%s13749_s1 + $0x48] sm:$0xff]  ;;  %v1086_v31 = vld [vmem:[%s13749_s1 + $0x20] sm:$0xff] }
  0x5a   : > { %6691 = vrot.lane.b32.xlu2 %v6690_v37, %s13761_s22  ;;  %1403 = vmatpush.msra.mxu2 %v1107_v16  ;;  %v1087_v34 = vld [vmem:[%s13749_s1 + $0x28] sm:$0xff]  ;;  %v1082_v35 = vld [vmem:[%s13749_s1] sm:$0xff] }
  0x5b   : > { %6686 = vrot.lane.b32.xlu1 %v6685_v38, %s13765_s17  ;;  %1226 = vmatpush.msra.mxu0 %v1102_v19  ;;  %v7441_v38 = vld [vmem:[%s7199_s14 + $0x90] sm:$0xff]  ;;  %v7482_v55 = vld [vmem:[%s7199_s14 + $0xa8] sm:$0xff]  ;;  %v474_v57 = vld [vmem:[%s7199_s14] sm:$0xff] }
  0x5c   : > { %1404 = vmatpush.msra.mxu2 %v1103_v20  ;;  %v6810_v1 = vpack.i.bf16 %v7479_v54, %v7482_v55  ;;  %v6820_v20 = vpack.i.bf16 %v7504_v7, %v7479_v54 }
  0x5d   : > { %1227 = vmatpush.msra.mxu0 %v1098_v21 }
  0x5e   : > { %1405 = vmatpush.msra.mxu2 %v1099_v22 }
  0x5f   : > { %1228 = vmatpush.msra.mxu0 %v1094_v24 }
  0x60   : > { %1406 = vmatpush.msra.mxu2 %v1095_v25 }
  0x61   : > { %916 = vrot.lane.b32.xlu0 %v7242_v39, %s13759_s16  ;;  %1229 = vmatpush.msra.mxu0 %v1090_v26 }
  0x62   : > { %6696 = vrot.lane.b32.xlu2 %v6690_v37, %s13763_s21  ;;  %1407 = vmatpush.msra.mxu2 %v1091_v27  ;;  %v6775_v37 = vpack.i.bf16 %v7411_v23, %v7383_v14  ;;  %v6436_v27 = vld [vmem:[%s7199_s14 + $0xc0] sm:$0xff] }
  0x63   : > { %918 = vrot.lane.b32.xlu1 %v7245_v40, %s13759_s16  ;;  %1230 = vmatpush.msra.mxu0 %v1086_v31 }
  0x64   : > { %1408 = vmatpush.msra.mxu2 %v1087_v34 }
  0x65   : > { %1231 = vmatpush.msra.mxu0 %v1082_v35 }
  0x69   : > { %6701 = vrot.lane.b32.xlu0 %v6700_v41, %s13765_s17  ;;  %v1083_v41 = vld [vmem:[%s13749_s1 + $0x8] sm:$0xff] }
  0x6a   : > { %920 = vrot.lane.b32.xlu2 %v7258_v43, %s13759_s16  ;;  %1409 = vmatpush.msra.mxu2 %v1083_v41  ;;  %v1152_v41 = vld [vmem:[%s13749_s1 + $0x230] sm:$0xf] }
  0x6b   : > { %6706 = vrot.lane.b32.xlu1 %v6705_v42, %s13761_s22  ;;  %6490 = vmatpush.msk.msrb.mxu3 %vm1203_vm0, %v1152_v41  ;;  %v6439_v41 = vld [vmem:[%s7199_s14 + $0xd8] sm:$0xff] }
  0x71   : > { %922 = vrot.lane.b32.xlu0 %v7264_v44, %s13759_s16 }
  0x72   : > { %6716 = vrot.lane.b32.xlu2 %v6715_v45, %s13765_s17  ;;  %v6780_v45 = vpack.i.bf16 %v7441_v38, %v7411_v23 }
  0x73   : > { %6711 = vrot.lane.b32.xlu1 %v6705_v42, %s13763_s21  ;;  %v7451_v42 = vld [vmem:[%s7199_s14 + $0x98] sm:$0xff] }
  0x79   : > { %6721 = vrot.lane.b32.xlu0 %v6720_v46, %s13761_s22 }
  0x7a   : > { %926 = vrot.lane.b32.xlu2 %v7279_v48, %s13759_s16 }
  0x7b   : > { %924 = vrot.lane.b32.xlu1 %v7275_v47, %s13759_s16  ;;  %s7024_s16 = smov 96  }
  0x81   : > { %6726 = vrot.lane.b32.xlu0 %v6720_v46, %s13763_s21  ;;  %v7456_v46 = vld [vmem:[%s7199_s14 + $0xa0] sm:$0xff] }
  0x82   : > { %6736 = vrot.lane.b32.xlu2 %v6735_v49, %s13761_s22  ;;  %v6805_v15 = vpack.i.bf16 %v7482_v55, %v7456_v46  ;;  %s6579_s22 = sshll.u32 %s14388_s0, 3 }
  0x83   : > { %6731 = vrot.lane.b32.xlu1 %v6730_v50, %s13765_s17  ;;  %v6795_v50 = vpack.i.bf16 %v7456_v46, %v7451_v42  ;;  %s7023_s17 = smov 16  }
  0x89   : > { %928 = vrot.lane.b32.xlu0 %v7314_v58, %s13949_s27 }
  0x8a   : > { %6741 = vrot.lane.b32.xlu2 %v6735_v49, %s13763_s21  ;;  %v6790_v49 = vpack.i.bf16 %v7451_v42, %v7441_v38  ;;  %s7028_s21 = smov 88  }
  0x8b   : > { %930 = vrot.lane.b32.xlu1 %v7323_v61, %s13949_s27 }
  0x91   : > { %6746 = vrot.lane.b32.xlu0 %v6745_v6, %s13950_s23 }
  0x92   : > { %932 = vrot.lane.b32.xlu2 %v7377_v13, %s13949_s27 }
  0x93   : > { %6751 = vrot.lane.b32.xlu1 %v6750_v10, %s13951_s24 }
  0x99   : > { %934 = vrot.lane.b32.xlu0 %v7383_v14, %s13949_s27 }
  0x9a   : > { %6761 = vrot.lane.b32.xlu2 %v6760_v18, %s13950_s23 }
  0x9b   : > { %6756 = vrot.lane.b32.xlu1 %v6750_v10, %s13952_s25 }
  0xa1   : > { %6766 = vrot.lane.b32.xlu0 %v6765_v17, %s13951_s24 }
  0xa2   : > { %938 = vrot.lane.b32.xlu2 %v7441_v38, %s13949_s27 }
  0xa3   : > { %936 = vrot.lane.b32.xlu1 %v7411_v23, %s13949_s27 }
  0xa4   : > { %v7469_v51 = vpop.permute.xlu2 %912 }
  0xa9   : > { %6771 = vrot.lane.b32.xlu0 %v6765_v17, %s13952_s25 }
  0xaa   : > { %6781 = vrot.lane.b32.xlu2 %v6780_v45, %s13951_s24 }
  0xab   : > { %6776 = vrot.lane.b32.xlu1 %v6775_v37, %s13950_s23  ;;  %v6437_v37 = vld [vmem:[%s7199_s14 + $0xc8] sm:$0xff] }
  0xac   : > { %v7494_v62 = vpop.permute.xlu2 %914 }
  0xb1   : > { %940 = vrot.lane.b32.xlu0 %v7451_v42, %s13949_s27 }
  0xb2   : > { %6786 = vrot.lane.b32.xlu2 %v6780_v45, %s13952_s25 }
  0xb3   : > { %942 = vrot.lane.b32.xlu1 %v7456_v46, %s13949_s27 }
  0xb4   : > { %v6692_v17 = vpop.permute.xlu2 %6691 }
  0xb5   : > { %v6693_v24 = vunpack.i.l.bf16 %v6692_v17 }
  0xb9   : > { %6791 = vrot.lane.b32.xlu0 %v6790_v49, %s13950_s23 }
  0xba   : > { %944 = vrot.lane.b32.xlu2 %v7482_v55, %s13949_s27 }
  0xbb   : > { %v7471_v52 = vpop.permute.xlu0 %910  ;;  %6796 = vrot.lane.b32.xlu1 %v6795_v50, %s13951_s24 }
  0xbc   : > { %6441 = vmatmul.msk.f32.vlgmr.msra.gmra.mxu1 %vm1154_vm1, %v7471_v52  ;;  %6466 = vmatmul.msk.f32.vlgmr.msra.gmra.mxu3 %vm1154_vm1, %v7471_v52  ;;  %v6697_v34 = vpop.permute.xlu2 %6696 }
  0xbd   : > { %v6672_v53 = vpop.permute.xlu1 %6671 }
  0xbe   : > { %v6673_v63 = vunpack.i.l.bf16 %v6672_v53  ;;  %v6674_v8 = vunpack.i.h.bf16 %v6672_v53 }
  0xc1   : > { %946 = vrot.lane.b32.xlu0 %v7479_v54, %s13949_s27 }
  0xc2   : > { %6806 = vrot.lane.b32.xlu2 %v6805_v15, %s13950_s23 }
  0xc3   : > { %v6667_v56 = vpop.permute.xlu0 %6666  ;;  %6801 = vrot.lane.b32.xlu1 %v6795_v50, %s13952_s25  ;;  %v7556_v50 = vld [vmem:[%s7199_s14 + $0xd0] sm:$0xff] }
  0xc4   : > { %v6669_v59 = vunpack.i.h.bf16 %v6667_v56  ;;  %v6668_v60 = vunpack.i.l.bf16 %v6667_v56  ;;  %6442 = vmatmul.msk.f32.gmra.mxu1 %vm1154_vm1, %v7469_v51  ;;  %6467 = vmatmul.msk.f32.gmra.mxu3 %vm1154_vm1, %v7469_v51  ;;  %v6694_v56 = vunpack.i.h.bf16 %v6692_v17 }
  0xc5   : > { %v6677_v0 = vpop.permute.xlu1 %6676 }
  0xc6   : > { %v983_v2 = vsel %vm982_vm2, %v474_v57, %v6668_v60  ;;  %v6678_v3 = vunpack.i.l.bf16 %v6677_v0  ;;  %v984_v5 = vsel %vm982_vm2, %v7218_v33, %v6669_v59  ;;  %v6679_v10 = vunpack.i.h.bf16 %v6677_v0  ;;  %v1144_v60 = vld [vmem:[%s13749_s1 + $0x1f0] sm:$0xff] }
  0xc7   : > { %v1008_v4 = vsel %vm1007_vm3, %v983_v2, %v6673_v63  ;;  %v1009_v12 = vsel %vm1007_vm3, %v984_v5, %v6674_v8  ;;  %v6825_v63 = vpack.i.bf16 %v6436_v27, %v7504_v7  ;;  %1572 = vmatpush.msrb.mxu1 %v1144_v60  ;;  %6582 = vmatpush.msrb.mxu2 %v1144_v60 }
  0xc8   : > { %v1033_v6 = vsel %vm1032_vm4, %v1008_v4, %v6678_v3  ;;  %v1034_v18 = vsel %vm1032_vm4, %v1009_v12, %v6679_v10  ;;  %v7580_v4 = vpop.permute.xlu2 %920  ;;  %v6699_v10 = vunpack.i.h.bf16 %v6697_v34 }
  0xc9   : > { %v7508_v9 = vsel %vm1057_vm5, %v1033_v6, %v7471_v52  ;;  %6811 = vrot.lane.b32.xlu0 %v6810_v1, %s13951_s24  ;;  %v7530_v22 = vsel %vm1057_vm5, %v1034_v18, %v7469_v51 }
  0xca   : > { %1232 = vmatmul.f32.vlgmr.msra.gmra.mxu0 %v7508_v9  ;;  %1410 = vmatmul.f32.vlgmr.msra.gmra.mxu2 %v7508_v9  ;;  %v988_v15 = vsel %vm982_vm2, %v7215_v32, %v6699_v10 }
  0xcb   : > { %v6682_v11 = vpop.permute.xlu0 %6681  ;;  %948 = vrot.lane.b32.xlu1 %v7504_v7, %s13949_s27  ;;  %950 = vrot.lane.b32.xlu2 %v6436_v27, %s13949_s27 }
  0xcc   : > { %v6683_v33 = vunpack.i.l.bf16 %v6682_v11  ;;  %6443 = vmatmul.msk.f32.gmra.mxu1 %vm1154_vm1, %v7494_v62  ;;  %6468 = vmatmul.msk.f32.gmra.mxu3 %vm1154_vm1, %v7494_v62 }
  0xcd   : > { %v6687_v16 = vpop.permute.xlu1 %6686 }
  0xce   : > { %v6688_v19 = vunpack.i.l.bf16 %v6687_v16  ;;  %v985_v21 = vsel %vm982_vm2, %v7205_v29, %v6683_v33  ;;  %v6684_v29 = vunpack.i.h.bf16 %v6682_v11  ;;  %v6689_v45 = vunpack.i.h.bf16 %v6687_v16 }
  0xd0   : > { %v1010_v26 = vsel %vm1007_vm3, %v985_v21, %v6688_v19  ;;  %v986_v49 = vsel %vm982_vm2, %v7208_v30, %v6684_v29  ;;  %v6698_v30 = vunpack.i.l.bf16 %v6697_v34  ;;  %v6717_v18 = vpop.permute.xlu2 %6716  ;;  %v1140_v19 = vld [vmem:[%s13749_s1 + $0x1d0] sm:$0xff]  ;;  %v1145_v21 = vld [vmem:[%s13749_s1 + $0x1f8] sm:$0xff] }
  0xd1   : > { %6816 = vrot.lane.b32.xlu0 %v6810_v1, %s13952_s25  ;;  %v1035_v35 = vsel %vm1032_vm4, %v1010_v26, %v6693_v24  ;;  %v1011_v59 = vsel %vm1007_vm3, %v986_v49, %v6689_v45  ;;  %1573 = vmatpush.msrb.mxu1 %v1140_v19  ;;  %v6718_v29 = vunpack.i.l.bf16 %v6717_v18  ;;  %v6719_v60 = vunpack.i.h.bf16 %v6717_v18  ;;  %v1137_v18 = vld [vmem:[%s13749_s1 + $0x1b8] sm:$0xff] }
  0xd2   : > { %1235 = vmatmul.f32.gmra.mxu0 %v7530_v22  ;;  %1413 = vmatmul.f32.gmra.mxu2 %v7530_v22  ;;  %v7560_v53 = vsel %vm1057_vm5, %v1035_v35, %v7494_v62  ;;  %v1036_v0 = vsel %vm1032_vm4, %v1011_v59, %v6694_v56  ;;  %v987_v3 = vsel %vm982_vm2, %v7202_v28, %v6698_v30 }
  0xd3   : > { %v7535_v25 = vpop.permute.xlu0 %916  ;;  %6821 = vrot.lane.b32.xlu1 %v6820_v20, %s13950_s23  ;;  %6826 = vrot.lane.b32.xlu2 %v6825_v63, %s13951_s24 }
  0xd4   : > { %6444 = vmatmul.msk.f32.gmra.mxu1 %vm1154_vm1, %v7535_v25  ;;  %6469 = vmatmul.msk.f32.gmra.mxu3 %vm1154_vm1, %v7535_v25  ;;  %v7584_v5 = vsel %vm1057_vm5, %v1036_v0, %v7535_v25 }
  0xd5   : > { %v7544_v31 = vpop.permute.xlu1 %918  ;;  %6583 = vmatpush.msrb.mxu2 %v1140_v19  ;;  %1750 = vmatpush.msrb.mxu0 %v1145_v21 }
  0xd8   : > { %v7635_v56 = vpop.permute.xlu2 %926 }
  0xd9   : > { %952 = vrot.lane.b32.xlu0 %v6437_v37, %s13949_s27 }
  0xda   : > { %1238 = vmatmul.f32.gmra.mxu0 %v7560_v53  ;;  %1416 = vmatmul.f32.gmra.mxu2 %v7560_v53 }
  0xdb   : > { %v6702_v57 = vpop.permute.xlu0 %6701  ;;  %954 = vrot.lane.b32.xlu1 %v7556_v50, %s13949_s27  ;;  %666 = vrot.lane.b32.xlu2 %v7504_v7, %s13952_s25 }
  0xdc   : > { %6445 = vmatmul.msk.f32.gmra.mxu1 %vm1154_vm1, %v7544_v31  ;;  %6470 = vmatmul.msk.f32.gmra.mxu3 %vm1154_vm1, %v7544_v31  ;;  %v6703_v1 = vunpack.i.l.bf16 %v6702_v57  ;;  %v6704_v12 = vunpack.i.h.bf16 %v6702_v57  ;;  %v1141_v57 = vld [vmem:[%s13749_s1 + $0x1d8] sm:$0xff] }
  0xdd   : > { %v6707_v2 = vpop.permute.xlu1 %6706  ;;  %1751 = vmatpush.msrb.mxu0 %v1141_v57 }
  0xde   : > { %v6708_v6 = vunpack.i.l.bf16 %v6707_v2  ;;  %v1012_v8 = vsel %vm1007_vm3, %v987_v3, %v6703_v1  ;;  %v6709_v17 = vunpack.i.h.bf16 %v6707_v2  ;;  %v1013_v20 = vsel %vm1007_vm3, %v988_v15, %v6704_v12  ;;  %v1132_v15 = vld [vmem:[%s13749_s1 + $0x190] sm:$0xff] }
  0xdf   : > { %1752 = vmatpush.msrb.mxu0 %v1137_v18 }
  0xe0   : > { %v1037_v28 = vsel %vm1032_vm4, %v1012_v8, %v6708_v6  ;;  %v1038_v26 = vsel %vm1032_vm4, %v1013_v20, %v6709_v17 }
  0xe1   : > { %762 = vrot.lane.b32.xlu0 %v6436_v27, %s13950_s23  ;;  %v7604_v16 = vsel %vm1057_vm5, %v1037_v28, %v7544_v31  ;;  %v7628_v35 = vsel %vm1057_vm5, %v1038_v26, %v7580_v4 }
  0xe2   : > { %1241 = vmatmul.f32.gmra.mxu0 %v7584_v5  ;;  %1419 = vmatmul.f32.gmra.mxu2 %v7584_v5 }
  0xe3   : > { %858 = vrot.lane.b32.xlu1 %v6437_v37, %s13951_s24  ;;  %v7591_v11 = vpop.permute.xlu0 %922  ;;  %956 = vrot.lane.b32.xlu2 %v6439_v41, %s13949_s27 }
  0xe4   : > { %6446 = vmatmul.msk.f32.gmra.mxu1 %vm1154_vm1, %v7580_v4  ;;  %6471 = vmatmul.msk.f32.gmra.mxu3 %vm1154_vm1, %v7580_v4 }
  0xe5   : > { %v6712_v33 = vpop.permute.xlu1 %6711 }
  0xe6   : > { %v6713_v32 = vunpack.i.l.bf16 %v6712_v33  ;;  %v6714_v49 = vunpack.i.h.bf16 %v6712_v33 }
  0xe8   : > { %v990_v63 = vsel %vm982_vm2, %v7242_v39, %v6714_v49  ;;  %v6737_v39 = vpop.permute.xlu2 %6736 }
  0xe9   : > { %668 = vrot.lane.b32.xlu0 %v6436_v27, %s13952_s25  ;;  %v989_v27 = vsel %vm982_vm2, %v7229_v36, %v6713_v32  ;;  %v1136_v36 = vld [vmem:[%s13749_s1 + $0x1b0] sm:$0xff]  ;;  %v1015_v3 = vsel %vm1007_vm3, %v990_v63, %v6719_v60  ;;  %s6343_s25 = sshll.u32 %s7196_s28, 3 }
  0xea   : > { %1244 = vmatmul.f32.gmra.mxu0 %v7604_v16  ;;  %1422 = vmatmul.f32.gmra.mxu2 %v7604_v16  ;;  %v1014_v45 = vsel %vm1007_vm3, %v989_v27, %v6718_v29  ;;  %v6739_v29 = vunpack.i.h.bf16 %v6737_v39 }
  0xeb   : > { %764 = vrot.lane.b32.xlu1 %v6437_v37, %s13950_s23  ;;  %v6722_v24 = vpop.permute.xlu0 %6721  ;;  %1574 = vmatpush.msrb.mxu1 %v1136_v36 }
  0xec   : > { %6447 = vmatmul.msk.f32.gmra.mxu1 %vm1154_vm1, %v7591_v11  ;;  %6472 = vmatmul.msk.f32.gmra.mxu3 %vm1154_vm1, %v7591_v11  ;;  %v6723_v37 = vunpack.i.l.bf16 %v6722_v24  ;;  %v6724_v1 = vunpack.i.h.bf16 %v6722_v24 }
  0xed   : > { %v7624_v34 = vpop.permute.xlu1 %924  ;;  %6584 = vmatpush.msrb.mxu2 %v1136_v36  ;;  %860 = vrot.lane.b32.xlu2 %v7556_v50, %s13951_s24  ;;  %v6738_v50 = vunpack.i.l.bf16 %v6737_v39 }
  0xee   : > { %v1039_v30 = vsel %vm1032_vm4, %v1014_v45, %v6723_v37  ;;  %v1040_v8 = vsel %vm1032_vm4, %v1015_v3, %v6724_v1  ;;  %1575 = vmatpush.msrb.mxu1 %v1132_v15  ;;  %v1133_v45 = vld [vmem:[%s13749_s1 + $0x198] sm:$0xff] }
  0xef   : > { %v7652_v0 = vsel %vm1057_vm5, %v1039_v30, %v7591_v11  ;;  %v7670_v33 = vsel %vm1057_vm5, %v1040_v8, %v7624_v34  ;;  %6585 = vmatpush.msrb.mxu2 %v1132_v15  ;;  %1753 = vmatpush.msrb.mxu0 %v1133_v45  ;;  %v1124_v15 = vld [vmem:[%s13749_s1 + $0x150] sm:$0xff] }
  0xf0   : > { %v6742_v20 = vpop.permute.xlu2 %6741 }
  0xf1   : > { %v6743_v41 = vunpack.i.l.bf16 %v6742_v20 }
  0xf2   : > { %1247 = vmatmul.f32.gmra.mxu0 %v7628_v35  ;;  %1425 = vmatmul.f32.gmra.mxu2 %v7628_v35 }
  0xf3   : > { %v6727_v59 = vpop.permute.xlu0 %6726 }
  0xf4   : > { %6448 = vmatmul.msk.f32.gmra.mxu1 %vm1154_vm1, %v7624_v34  ;;  %6473 = vmatmul.msk.f32.gmra.mxu3 %vm1154_vm1, %v7624_v34  ;;  %v6728_v6 = vunpack.i.l.bf16 %v6727_v59 }
  0xf5   : > { %v6732_v2 = vpop.permute.xlu1 %6731 }
  0xf6   : > { %v6733_v10 = vunpack.i.l.bf16 %v6732_v2  ;;  %v991_v28 = vsel %vm982_vm2, %v7245_v40, %v6728_v6  ;;  %v6729_v40 = vunpack.i.h.bf16 %v6727_v59  ;;  %v6734_v21 = vunpack.i.h.bf16 %v6732_v2 }
  0xf7   : > { %v993_v59 = vsel %vm982_vm2, %v7264_v44, %v6743_v41  ;;  %v6744_v2 = vunpack.i.h.bf16 %v6742_v20 }
  0xf8   : > { %v1016_v17 = vsel %vm1007_vm3, %v991_v28, %v6733_v10  ;;  %v992_v24 = vsel %vm982_vm2, %v7258_v43, %v6729_v40  ;;  %v1128_v43 = vld [vmem:[%s13749_s1 + $0x170] sm:$0xff]  ;;  %v7710_v30 = vpop.permute.xlu2 %932 }
  0xf9   : > { %v1041_v32 = vsel %vm1032_vm4, %v1016_v17, %v6738_v50  ;;  %v1017_v37 = vsel %vm1007_vm3, %v992_v24, %v6734_v21  ;;  %1576 = vmatpush.msrb.mxu1 %v1128_v43  ;;  %6586 = vmatpush.msrb.mxu2 %v1128_v43  ;;  %v994_v8 = vsel %vm982_vm2, %v7275_v47, %v6744_v2  ;;  %v1129_v47 = vld [vmem:[%s13749_s1 + $0x178] sm:$0xff] }
  0xfa   : > { %1250 = vmatmul.f32.gmra.mxu0 %v7652_v0  ;;  %1428 = vmatmul.f32.gmra.mxu2 %v7652_v0  ;;  %v7692_v26 = vsel %vm1057_vm5, %v1041_v32, %v7635_v56  ;;  %v1042_v49 = vsel %vm1032_vm4, %v1017_v37, %v6739_v29 }
  0xfb   : > { %v7666_v12 = vpop.permute.xlu0 %928  ;;  %1577 = vmatpush.msrb.mxu1 %v1124_v15  ;;  %6587 = vmatpush.msrb.mxu2 %v1124_v15 }
  0xfc   : > { %6449 = vmatmul.msk.f32.gmra.mxu1 %vm1154_vm1, %v7635_v56  ;;  %6474 = vmatmul.msk.f32.gmra.mxu3 %vm1154_vm1, %v7635_v56  ;;  %v7714_v60 = vsel %vm1057_vm5, %v1042_v49, %v7666_v12 }
  0xfd   : > { %v7685_v19 = vpop.permute.xlu1 %930  ;;  %1754 = vmatpush.msrb.mxu0 %v1129_v47 }
 0x100   : > { %v6762_v50 = vpop.permute.xlu2 %6761 }
 0x101   : > { %v6763_v32 = vunpack.i.l.bf16 %v6762_v50  ;;  %v6764_v49 = vunpack.i.h.bf16 %v6762_v50 }
 0x102   : > { %1253 = vmatmul.f32.gmra.mxu0 %v7670_v33  ;;  %1431 = vmatmul.f32.gmra.mxu2 %v7670_v33 }
 0x103   : > { %v6747_v27 = vpop.permute.xlu0 %6746 }
 0x104   : > { %6450 = vmatmul.msk.f32.gmra.mxu1 %vm1154_vm1, %v7666_v12  ;;  %6475 = vmatmul.msk.f32.gmra.mxu3 %vm1154_vm1, %v7666_v12  ;;  %v6748_v36 = vunpack.i.l.bf16 %v6747_v27  ;;  %v6749_v6 = vunpack.i.h.bf16 %v6747_v27 }
 0x105   : > { %v6752_v57 = vpop.permute.xlu1 %6751 }
 0x106   : > { %v6753_v63 = vunpack.i.l.bf16 %v6752_v57  ;;  %v1018_v1 = vsel %vm1007_vm3, %v993_v59, %v6748_v36  ;;  %v6754_v28 = vunpack.i.h.bf16 %v6752_v57  ;;  %v1019_v17 = vsel %vm1007_vm3, %v994_v8, %v6749_v6  ;;  %v1120_v57 = vld [vmem:[%s13749_s1 + $0x130] sm:$0xff] }
 0x107   : > { %1578 = vmatpush.msrb.mxu1 %v1120_v57  ;;  %6588 = vmatpush.msrb.mxu2 %v1120_v57 }
 0x108   : > { %v1043_v44 = vsel %vm1032_vm4, %v1018_v1, %v6753_v63  ;;  %v1044_v20 = vsel %vm1032_vm4, %v1019_v17, %v6754_v28  ;;  %v7757_v43 = vpop.permute.xlu2 %938  ;;  %v1125_v63 = vld [vmem:[%s13749_s1 + $0x158] sm:$0xff] }
 0x109   : > { %v7730_v10 = vsel %vm1057_vm5, %v1043_v44, %v7685_v19  ;;  %v7752_v29 = vsel %vm1057_vm5, %v1044_v20, %v7710_v30  ;;  %1755 = vmatpush.msrb.mxu0 %v1125_v63 }
 0x10a   : > { %1256 = vmatmul.f32.gmra.mxu0 %v7692_v26  ;;  %1434 = vmatmul.f32.gmra.mxu2 %v7692_v26 }
 0x10b   : > { %v7719_v3 = vpop.permute.xlu0 %934 }
 0x10c   : > { %6451 = vmatmul.msk.f32.gmra.mxu1 %vm1154_vm1, %v7685_v19  ;;  %6476 = vmatmul.msk.f32.gmra.mxu3 %vm1154_vm1, %v7685_v19 }
 0x10d   : > { %v6757_v39 = vpop.permute.xlu1 %6756 }
 0x10e   : > { %v6758_v40 = vunpack.i.l.bf16 %v6757_v39  ;;  %v6759_v41 = vunpack.i.h.bf16 %v6757_v39 }
 0x110   : > { %v995_v21 = vsel %vm982_vm2, %v7279_v48, %v6758_v40  ;;  %v996_v36 = vsel %vm982_vm2, %v7314_v58, %v6759_v41  ;;  %v6782_v6 = vpop.permute.xlu2 %6781  ;;  %v1116_v40 = vld [vmem:[%s13749_s1 + $0x110] sm:$0xff] }
 0x111   : > { %v1020_v37 = vsel %vm1007_vm3, %v995_v21, %v6763_v32  ;;  %v1021_v2 = vsel %vm1007_vm3, %v996_v36, %v6764_v49  ;;  %v6783_v17 = vunpack.i.l.bf16 %v6782_v6  ;;  %1579 = vmatpush.msrb.mxu1 %v1116_v40  ;;  %6589 = vmatpush.msrb.mxu2 %v1116_v40  ;;  %v1121_v21 = vld [vmem:[%s13749_s1 + $0x138] sm:$0xff]  ;;  %v1148_v41 = vld [vmem:[%s13749_s1 + $0x210] sm:$0xff]  ;;  %v6784_v49 = vunpack.i.h.bf16 %v6782_v6 }
 0x112   : > { %1259 = vmatmul.f32.gmra.mxu0 %v7714_v60  ;;  %1437 = vmatmul.f32.gmra.mxu2 %v7714_v60 }
 0x113   : > { %v6767_v18 = vpop.permute.xlu0 %6766  ;;  %1756 = vmatpush.msrb.mxu0 %v1121_v21  ;;  %1676 = vmatpush.msrb.mxu3 %v1148_v41 }
 0x114   : > { %6452 = vmatmul.msk.f32.gmra.mxu1 %vm1154_vm1, %v7710_v30  ;;  %6477 = vmatmul.msk.f32.gmra.mxu3 %vm1154_vm1, %v7710_v30  ;;  %v6768_v27 = vunpack.i.l.bf16 %v6767_v18  ;;  %v6769_v1 = vunpack.i.h.bf16 %v6767_v18 }
 0x115   : > { %v7748_v24 = vpop.permute.xlu1 %936 }
 0x116   : > { %v1045_v45 = vsel %vm1032_vm4, %v1020_v37, %v6768_v27  ;;  %v1046_v39 = vsel %vm1032_vm4, %v1021_v2, %v6769_v1 }
 0x117   : > { %v7771_v59 = vsel %vm1057_vm5, %v1045_v45, %v7719_v3  ;;  %v7790_v15 = vsel %vm1057_vm5, %v1046_v39, %v7748_v24  ;;  %v1112_v39 = vld [vmem:[%s13749_s1 + $0xf0] sm:$0xff] }
 0x118   : > { %v6787_v20 = vpop.permute.xlu2 %6786  ;;  %1580 = vmatpush.msrb.mxu1 %v1112_v39  ;;  %6590 = vmatpush.msrb.mxu2 %v1112_v39 }
 0x11a   : > { %1262 = vmatmul.f32.gmra.mxu0 %v7730_v10  ;;  %1440 = vmatmul.f32.gmra.mxu2 %v7730_v10 }
 0x11b   : > { %v6772_v48 = vpop.permute.xlu0 %6771 }
 0x11c   : > { %6453 = vmatmul.msk.f32.gmra.mxu1 %vm1154_vm1, %v7719_v3  ;;  %6478 = vmatmul.msk.f32.gmra.mxu3 %vm1154_vm1, %v7719_v3  ;;  %v6773_v44 = vunpack.i.l.bf16 %v6772_v48 }
 0x11d   : > { %v6777_v58 = vpop.permute.xlu1 %6776 }
 0x11e   : > { %v6778_v8 = vunpack.i.l.bf16 %v6777_v58  ;;  %v997_v28 = vsel %vm982_vm2, %v7323_v61, %v6773_v44  ;;  %v6774_v61 = vunpack.i.h.bf16 %v6772_v48  ;;  %v6779_v27 = vunpack.i.h.bf16 %v6777_v58 }
 0x120   : > { %v1022_v47 = vsel %vm1007_vm3, %v997_v28, %v6778_v8  ;;  %v998_v37 = vsel %vm982_vm2, %v7377_v13, %v6774_v61  ;;  %v6788_v13 = vunpack.i.l.bf16 %v6787_v20  ;;  %v7829_v6 = vpop.permute.xlu2 %944 }
 0x121   : > { %v1047_v32 = vsel %vm1032_vm4, %v1022_v47, %v6783_v17  ;;  %v1023_v57 = vsel %vm1007_vm3, %v998_v37, %v6779_v27  ;;  %v1117_v17 = vld [vmem:[%s13749_s1 + $0x118] sm:$0xff]  ;;  %v6789_v47 = vunpack.i.h.bf16 %v6787_v20 }
 0x122   : > { %1265 = vmatmul.f32.gmra.mxu0 %v7752_v29  ;;  %1443 = vmatmul.f32.gmra.mxu2 %v7752_v29  ;;  %v7817_v45 = vsel %vm1057_vm5, %v1047_v32, %v7757_v43  ;;  %v1048_v63 = vsel %vm1032_vm4, %v1023_v57, %v6784_v49  ;;  %v999_v44 = vsel %vm982_vm2, %v7383_v14, %v6788_v13 }
 0x123   : > { %v7786_v50 = vpop.permute.xlu0 %940  ;;  %1757 = vmatpush.msrb.mxu0 %v1117_v17  ;;  %v1000_v41 = vsel %vm982_vm2, %v7411_v23, %v6789_v47 }
 0x124   : > { %6454 = vmatmul.msk.f32.gmra.mxu1 %vm1154_vm1, %v7748_v24  ;;  %6479 = vmatmul.msk.f32.gmra.mxu3 %vm1154_vm1, %v7748_v24  ;;  %v7838_v28 = vsel %vm1057_vm5, %v1048_v63, %v7786_v50 }
 0x125   : > { %v7802_v18 = vpop.permute.xlu1 %942 }
 0x128   : > { %v7863_v63 = vpop.permute.xlu2 %6806 }
 0x12a   : > { %1268 = vmatmul.f32.gmra.mxu0 %v7771_v59  ;;  %1446 = vmatmul.f32.gmra.mxu2 %v7771_v59 }
 0x12b   : > { %v6792_v36 = vpop.permute.xlu0 %6791 }
 0x12c   : > { %6455 = vmatmul.msk.f32.gmra.mxu1 %vm1154_vm1, %v7757_v43  ;;  %6480 = vmatmul.msk.f32.gmra.mxu3 %vm1154_vm1, %v7757_v43  ;;  %v6793_v1 = vunpack.i.l.bf16 %v6792_v36  ;;  %v6794_v21 = vunpack.i.h.bf16 %v6792_v36  ;;  %v1108_v36 = vld [vmem:[%s13749_s1 + $0xd0] sm:$0xff] }
 0x12d   : > { %v6797_v58 = vpop.permute.xlu1 %6796  ;;  %1581 = vmatpush.msrb.mxu1 %v1108_v36  ;;  %6591 = vmatpush.msrb.mxu2 %v1108_v36 }
 0x12e   : > { %v6798_v40 = vunpack.i.l.bf16 %v6797_v58  ;;  %v1024_v14 = vsel %vm1007_vm3, %v999_v44, %v6793_v1  ;;  %v6799_v13 = vunpack.i.h.bf16 %v6797_v58  ;;  %v1025_v23 = vsel %vm1007_vm3, %v1000_v41, %v6794_v21  ;;  %v1113_v58 = vld [vmem:[%s13749_s1 + $0xf8] sm:$0xff]  ;;  %v1104_v41 = vld [vmem:[%s13749_s1 + $0xb0] sm:$0xff] }
 0x12f   : > { %1758 = vmatpush.msrb.mxu0 %v1113_v58  ;;  %1582 = vmatpush.msrb.mxu1 %v1104_v41 }
 0x130   : > { %v1049_v32 = vsel %vm1032_vm4, %v1024_v14, %v6798_v40  ;;  %v1050_v40 = vsel %vm1032_vm4, %v1025_v23, %v6799_v13  ;;  %v6808_v14 = vunpack.i.l.bf16 %v7863_v63  ;;  %6592 = vmatpush.msrb.mxu2 %v1104_v41 }
 0x131   : > { %v7861_v20 = vsel %vm1057_vm5, %v1049_v32, %v7802_v18  ;;  %v7897_v13 = vsel %vm1057_vm5, %v1050_v40, %v7829_v6  ;;  %v1096_v40 = vld [vmem:[%s13749_s1 + $0x70] sm:$0xff] }
 0x132   : > { %1271 = vmatmul.f32.gmra.mxu0 %v7790_v15  ;;  %1449 = vmatmul.f32.gmra.mxu2 %v7790_v15 }
 0x133   : > { %v7846_v61 = vpop.permute.xlu0 %946 }
 0x134   : > { %6456 = vmatmul.msk.f32.gmra.mxu1 %vm1154_vm1, %v7786_v50  ;;  %6481 = vmatmul.msk.f32.gmra.mxu3 %vm1154_vm1, %v7786_v50 }
 0x135   : > { %v6802_v49 = vpop.permute.xlu1 %6801 }
 0x136   : > { %v6803_v1 = vunpack.i.l.bf16 %v6802_v49  ;;  %v6804_v58 = vunpack.i.h.bf16 %v6802_v49  ;;  %v1092_v49 = vld [vmem:[%s13749_s1 + $0x50] sm:$0xff] }
 0x138   : > { %v1001_v21 = vsel %vm982_vm2, %v7441_v38, %v6803_v1  ;;  %v1100_v38 = vld [vmem:[%s13749_s1 + $0x90] sm:$0xff] }
 0x139   : > { %v7813_v48 = vpop.f32.mrf.mxu1  ;;  %v1026_v1 = vsel %vm1007_vm3, %v1001_v21, %v6808_v14  ;;  %1583 = vmatpush.msrb.mxu1 %v1100_v38  ;;  %6593 = vmatpush.msrb.mxu2 %v1100_v38  ;;  %v6809_v21 = vunpack.i.h.bf16 %v7863_v63 }
 0x13a   : > { %13953 = vst [vmem:[#allocation8_spill] sm:$0xff] %v7813_v48  ;;  %1274 = vmatmul.f32.gmra.mxu0 %v7817_v45  ;;  %1452 = vmatmul.f32.gmra.mxu2 %v7817_v45 }
 0x13b   : > { %v7878_v39 = vpop.permute.xlu0 %6811  ;;  %1584 = vmatpush.msrb.mxu1 %v1096_v40  ;;  %6594 = vmatpush.msrb.mxu2 %v1096_v40  ;;  %v1109_v40 = vld [vmem:[%s13749_s1 + $0xd8] sm:$0xff] }
 0x13c   : > { %6457 = vmatmul.msk.f32.gmra.mxu1 %vm1154_vm1, %v7802_v18  ;;  %6482 = vmatmul.msk.f32.gmra.mxu3 %vm1154_vm1, %v7802_v18  ;;  %v6813_v36 = vunpack.i.l.bf16 %v7878_v39 }
 0x13d   : > { %v7900_v23 = vpop.permute.xlu1 %948  ;;  %1585 = vmatpush.msrb.mxu1 %v1092_v49  ;;  %6595 = vmatpush.msrb.mxu2 %v1092_v49 }
 0x13e   : > { %v1051_v14 = vsel %vm1032_vm4, %v1026_v1, %v6813_v36  ;;  %1759 = vmatpush.msrb.mxu0 %v1109_v40 }
 0x13f   : > { %v1500_v2 = vpop.f32.mrf.mxu3  ;;  %v7937_v63 = vsel %vm1057_vm5, %v1051_v14, %v7846_v61 }
 0x141   : > { %v7834_v8 = vpop.f32.mrf.mxu1 }
 0x142   : > { %13954 = vst [vmem:[#allocation9_spill] sm:$0xff] %v7834_v8  ;;  %1277 = vmatmul.f32.gmra.mxu0 %v7838_v28  ;;  %1455 = vmatmul.f32.gmra.mxu2 %v7838_v28 }
 0x143   : > { %v6817_v36 = vpop.permute.xlu0 %6816 }
 0x144   : > { %6458 = vmatmul.msk.f32.gmra.mxu1 %vm1154_vm1, %v7829_v6  ;;  %6483 = vmatmul.msk.f32.gmra.mxu3 %vm1154_vm1, %v7829_v6  ;;  %v6818_v14 = vunpack.i.l.bf16 %v6817_v36 }
 0x145   : > { %v6822_v49 = vpop.permute.xlu1 %6821 }
 0x146   : > { %v1003_v8 = vsel %vm982_vm2, %v7456_v46, %v6818_v14  ;;  %v1097_v46 = vld [vmem:[%s13749_s1 + $0x78] sm:$0xff] }
 0x147   : > { %v7853_v27 = vpop.f32.mrf.mxu0  ;;  %v1503_v37 = vpop.f32.mrf.mxu3 }
 0x149   : > { %v7857_v57 = vpop.f32.mrf.mxu1 }
 0x14a   : > { %13955 = vst [vmem:[#allocation10_spill] sm:$0xff] %v7857_v57  ;;  %1280 = vmatmul.f32.gmra.mxu0 %v7861_v20  ;;  %1458 = vmatmul.f32.gmra.mxu2 %v7861_v20  ;;  %v1002_v57 = vsel %vm982_vm2, %v7451_v42, %v6804_v58  ;;  %v6814_v42 = vunpack.i.h.bf16 %v7878_v39  ;;  %v1084_v58 = vld [vmem:[%s13749_s1 + $0x10] sm:$0xff] }
 0x14c   : > { %6459 = vmatmul.msk.f32.gmra.mxu1 %vm1154_vm1, %v7846_v61  ;;  %6484 = vmatmul.msk.f32.gmra.mxu3 %vm1154_vm1, %v7846_v61 }
 0x14d   : > { %v1411_v44 = vpop.f32.mrf.mxu2 }
 0x14e   : > { %v7880_v17 = vadd.f32 %v1500_v2, %v1411_v44  ;;  %v7908_v44 = vpop.permute.xlu2 %950 }
 0x14f   : > { %v7884_v47 = vpop.f32.mrf.mxu0  ;;  %v1506_v32 = vpop.f32.mrf.mxu3 }
 0x150   : > { %13956 = vst [vmem:[#allocation11_spill] sm:$0xff] %v7880_v17  ;;  %2000 = vrot.lane.b32.xlu1 %v7880_v17, %s7023_s17 }
 0x151   : > { %13957 = vst [vmem:[#allocation12_spill] sm:$0xff] %v7884_v47  ;;  %v7893_v2 = vpop.f32.mrf.mxu1 }
 0x152   : > { %13958 = vst [vmem:[#allocation13_spill] sm:$0xff] %v7893_v2  ;;  %1283 = vmatmul.f32.gmra.mxu0 %v7897_v13  ;;  %1461 = vmatmul.f32.gmra.mxu2 %v7897_v13 }
 0x154   : > { %6460 = vmatmul.msk.f32.gmra.mxu1 %vm1154_vm1, %v7900_v23  ;;  %6485 = vmatmul.msk.f32.gmra.mxu3 %vm1154_vm1, %v7900_v23 }
 0x155   : > { %v1414_v41 = vpop.f32.mrf.mxu2 }
 0x156   : > { %v7917_v17 = vadd.f32 %v1503_v37, %v1414_v41  ;;  %v1088_v37 = vld [vmem:[%s13749_s1 + $0x30] sm:$0xff]  ;;  %v1027_v41 = vsel %vm1007_vm3, %v1002_v57, %v6809_v21  ;;  %v1105_v57 = vld [vmem:[%s13749_s1 + $0xb8] sm:$0xff]  ;;  %v6823_v21 = vunpack.i.l.bf16 %v6822_v49 }
 0x157   : > { %v7924_v38 = vpop.f32.mrf.mxu0  ;;  %v1509_v2 = vpop.f32.mrf.mxu3  ;;  %1586 = vmatpush.msrb.mxu1 %v1088_v37  ;;  %6596 = vmatpush.msrb.mxu2 %v1088_v37 }
 0x158   : > { %13959 = vst [vmem:[#allocation14_spill] sm:$0xff] %v7917_v17  ;;  %2006 = vrot.lane.b32.xlu2 %v7917_v17, %s7023_s17  ;;  %v6827_v37 = vpop.permute.xlu2 %6826  ;;  %v1052_v17 = vsel %vm1032_vm4, %v1027_v41, %v6814_v42  ;;  %1760 = vmatpush.msrb.mxu0 %v1105_v57  ;;  %v7974_v41 = vpop.permute.xlu0 %952  ;;  %v1028_v14 = vsel %vm1007_vm3, %v1003_v8, %v6823_v21  ;;  %v6819_v57 = vunpack.i.h.bf16 %v6817_v36  ;;  %v1089_v36 = vld [vmem:[%s13749_s1 + $0x38] sm:$0xff]  ;;  %v6824_v21 = vunpack.i.h.bf16 %v6822_v49 }
 0x159   : > { %13960 = vst [vmem:[#allocation15_spill] sm:$0xff] %v7924_v38  ;;  %v7933_v1 = vpop.f32.mrf.mxu1  ;;  %1587 = vmatpush.msrb.mxu1 %v1084_v58  ;;  %6597 = vmatpush.msrb.mxu2 %v1084_v58  ;;  %v7972_v58 = vsel %vm1057_vm5, %v1052_v17, %v7900_v23  ;;  %v7986_v17 = vpop.permute.xlu1 %954  ;;  %v6829_v49 = vunpack.i.h.bf16 %v6827_v37 }
 0x15a   : > { %13961 = vst [vmem:[#allocation16_spill] sm:$0xff] %v7933_v1  ;;  %1286 = vmatmul.f32.gmra.mxu0 %v7937_v63  ;;  %1464 = vmatmul.f32.gmra.mxu2 %v7937_v63  ;;  %v1004_v48 = vsel %vm982_vm2, %v7482_v55, %v6819_v57 }
 0x15c   : > { %6461 = vmatmul.msk.f32.gmra.mxu1 %vm1154_vm1, %v7908_v44  ;;  %6486 = vmatmul.msk.f32.gmra.mxu3 %vm1154_vm1, %v7908_v44 }
 0x15d   : > { %v1417_v39 = vpop.f32.mrf.mxu2 }
 0x15e   : > { %v7953_v1 = vadd.f32 %v1506_v32, %v1417_v39  ;;  %v1101_v32 = vld [vmem:[%s13749_s1 + $0x98] sm:$0xff]  ;;  %v6828_v39 = vunpack.i.l.bf16 %v6827_v37 }
 0x15f   : > { %v7959_v40 = vpop.f32.mrf.mxu0  ;;  %v1512_v38 = vpop.f32.mrf.mxu3  ;;  %1761 = vmatpush.msrb.mxu0 %v1101_v32  ;;  %v1093_v32 = vld [vmem:[%s13749_s1 + $0x58] sm:$0xff] }
 0x160   : > { %13962 = vst [vmem:[#allocation17_spill] sm:$0xff] %v7953_v1  ;;  %2012 = vrot.lane.b32.xlu0 %v7953_v1, %s7023_s17  ;;  %v1053_v8 = vsel %vm1032_vm4, %v1028_v14, %v6828_v39  ;;  %v763_v55 = vpop.permute.xlu0 %762  ;;  %v1029_v14 = vsel %vm1007_vm3, %v1004_v48, %v6824_v21  ;;  %v1153_v37 = vld [vmem:[%s13749_s1 + $0x238] sm:$0xf] }
 0x161   : > { %13963 = vst [vmem:[#allocation18_spill] sm:$0xff] %v7959_v40  ;;  %v7968_v42 = vpop.f32.mrf.mxu1  ;;  %1762 = vmatpush.msrb.mxu0 %v1097_v46  ;;  %v667_v40 = vpop.permute.xlu2 %666  ;;  %v8010_v39 = vsel %vm1057_vm5, %v1053_v8, %v7908_v44  ;;  %v1054_v8 = vsel %vm1032_vm4, %v1029_v14, %v6829_v49  ;;  %6515 = vmatpush.msk.msra.mxu2 %vm1203_vm0, %v1153_v37 }
 0x162   : > { %13964 = vst [vmem:[#allocation19_spill] sm:$0xff] %v7968_v42  ;;  %1289 = vmatmul.f32.gmra.mxu0 %v7972_v58  ;;  %1467 = vmatmul.f32.gmra.mxu2 %v7972_v58  ;;  %v1005_v48 = vsel %vm982_vm2, %v7479_v54, %v667_v40  ;;  %v8041_v14 = vsel %vm1057_vm5, %v1054_v8, %v7974_v41 }
 0x163   : > { %1763 = vmatpush.msrb.mxu0 %v1093_v32  ;;  %v859_v32 = vpop.permute.xlu1 %858  ;;  %v1030_v54 = vsel %vm1007_vm3, %v1005_v48, %v763_v55 }
 0x164   : > { %6462 = vmatmul.msk.f32.gmra.mxu1 %vm1154_vm1, %v7974_v41  ;;  %6487 = vmatmul.msk.f32.gmra.mxu3 %vm1154_vm1, %v7974_v41  ;;  %v1055_v37 = vsel %vm1032_vm4, %v1030_v54, %v859_v32 }
 0x165   : > { %v1420_v1 = vpop.f32.mrf.mxu2  ;;  %1764 = vmatpush.msrb.mxu0 %v1089_v36  ;;  %v8063_v48 = vsel %vm1057_vm5, %v1055_v37, %v7986_v17 }
 0x166   : > { %v7991_v42 = vadd.f32 %v1509_v2, %v1420_v1  ;;  %v1085_v2 = vld [vmem:[%s13749_s1 + $0x18] sm:$0xff] }
 0x167   : > { %v7997_v46 = vpop.f32.mrf.mxu0  ;;  %v1515_v47 = vpop.f32.mrf.mxu3  ;;  %1765 = vmatpush.msrb.mxu0 %v1085_v2 }
 0x168   : > { %13965 = vst [vmem:[#allocation20_spill] sm:$0xff] %v7991_v42  ;;  %2018 = vrot.lane.b32.xlu2 %v7991_v42, %s7023_s17  ;;  %v669_v40 = vpop.permute.xlu0 %668 }
 0x169   : > { %v8006_v1 = vpop.f32.mrf.mxu1  ;;  %v8035_v21 = vpop.permute.xlu2 %956 }
 0x16a   : > { %13966 = vst [vmem:[#allocation21_spill] sm:$0xff] %v8006_v1  ;;  %1292 = vmatmul.f32.gmra.mxu0 %v8010_v39  ;;  %1470 = vmatmul.f32.gmra.mxu2 %v8010_v39 }
 0x16b   : > { %v765_v42 = vpop.permute.xlu1 %764 }
 0x16c   : > { %6463 = vmatmul.msk.f32.gmra.mxu1 %vm1154_vm1, %v7986_v17  ;;  %6488 = vmatmul.msk.f32.gmra.mxu3 %vm1154_vm1, %v7986_v17 }
 0x16d   : > { %v1423_v57 = vpop.f32.mrf.mxu2 }
 0x16e   : > { %v8019_v36 = vadd.f32 %v1512_v38, %v1423_v57  ;;  %v1149_v38 = vld [vmem:[%s13749_s1 + $0x218] sm:$0xff] }
 0x16f   : > { %v8025_v2 = vpop.f32.mrf.mxu0  ;;  %v1518_v1 = vpop.f32.mrf.mxu3  ;;  %1854 = vmatpush.msra.mxu2 %v1149_v38 }
 0x170   : > { %13967 = vst [vmem:[#allocation22_spill] sm:$0xff] %v8019_v36  ;;  %2024 = vrot.lane.b32.xlu1 %v8019_v36, %s7023_s17 }
 0x171   : > { %v8037_v49 = vpop.f32.mrf.mxu1  ;;  %v861_v32 = vpop.permute.xlu2 %860 }
 0x172   : > { %13968 = vst [vmem:[#allocation23_spill] sm:$0xff] %v8037_v49  ;;  %1295 = vmatmul.f32.gmra.mxu0 %v8041_v14  ;;  %1473 = vmatmul.f32.gmra.mxu2 %v8041_v14  ;;  %v1006_v49 = vsel %vm982_vm2, %v7504_v7, %v669_v40 }
 0x174   : > { %6464 = vmatmul.msk.f32.gmra.mxu1 %vm1154_vm1, %v8035_v21  ;;  %6489 = vmatmul.msk.f32.gmra.mxu3 %vm1154_vm1, %v8035_v21 }
 0x175   : > { %v1426_v57 = vpop.f32.mrf.mxu2 }
 0x176   : > { %v8051_v36 = vadd.f32 %v1515_v47, %v1426_v57  ;;  %v1031_v47 = vsel %vm1007_vm3, %v1006_v49, %v765_v42 }
 0x177   : > { %v8053_v8 = vpop.f32.mrf.mxu0  ;;  %v1521_v38 = vpop.f32.mrf.mxu3  ;;  %v1056_v54 = vsel %vm1032_vm4, %v1031_v47, %v861_v32 }
 0x178   : > { %2030 = vrot.lane.b32.xlu0 %v8051_v36, %s7023_s17  ;;  %v8082_v42 = vsel %vm1057_vm5, %v1056_v54, %v8035_v21 }
 0x179   : > { %v8059_v55 = vpop.f32.mrf.mxu1 }
 0x17a   : > { %13969 = vst [vmem:[#allocation24_spill] sm:$0xff] %v8059_v55  ;;  %1298 = vmatmul.f32.gmra.mxu0 %v8063_v48  ;;  %1476 = vmatmul.f32.gmra.mxu2 %v8063_v48 }
 0x17c   : > { %1588 = vmatmul.f32.vlgmr.msrb.gmra.mxu1 %v7508_v9  ;;  %6491 = vmatmul.msk.f32.vlgmr.msrb.gmra.mxu3 %vm1154_vm1, %v7471_v52 }
 0x17d   : > { %v1429_v7 = vpop.f32.mrf.mxu2 }
 0x17e   : > { %v8072_v40 = vadd.f32 %v1518_v1, %v1429_v7 }
 0x17f   : > { %v8074_v57 = vpop.f32.mrf.mxu0  ;;  %v1524_v37 = vpop.f32.mrf.mxu3 }
 0x180   : > { %13970 = vst [vmem:[#allocation25_spill] sm:$0xff] %v8072_v40  ;;  %2036 = vrot.lane.b32.xlu1 %v8072_v40, %s7023_s17 }
 0x181   : > { %v8078_v55 = vpop.f32.mrf.mxu1 }
 0x182   : > { %1301 = vmatmul.f32.gmra.mxu0 %v8082_v42  ;;  %1479 = vmatmul.f32.gmra.mxu2 %v8082_v42 }
 0x184   : > { %1591 = vmatmul.f32.gmra.mxu1 %v7530_v22  ;;  %6492 = vmatmul.msk.f32.gmra.mxu3 %vm1154_vm1, %v7469_v51 }
 0x185   : > { %v1432_v1 = vpop.f32.mrf.mxu2 }
 0x186   : > { %v8089_v49 = vadd.f32 %v1521_v38, %v1432_v1 }
 0x187   : > { %v8091_v47 = vpop.f32.mrf.mxu0  ;;  %v1527_v32 = vpop.f32.mrf.mxu3 }
 0x188   : > { %13971 = vst [vmem:[#allocation26_spill] sm:$0xff] %v8089_v49  ;;  %2042 = vrot.lane.b32.xlu0 %v8089_v49, %s7023_s17 }
 0x189   : > { %v8095_v7 = vpop.f32.mrf.mxu1 }
 0x18a   : > { %13972 = vst [vmem:[#allocation27_spill] sm:$0xff] %v8095_v7  ;;  %1657 = vmatmul.f32.vlgmr.msrb.gmra.mxu2 %v8082_v42  ;;  %1766 = vmatmul.f32.vlgmr.msrb.gmra.mxu0 %v7508_v9 }
 0x18c   : > { %1594 = vmatmul.f32.gmra.mxu1 %v7560_v53  ;;  %6493 = vmatmul.msk.f32.gmra.mxu3 %vm1154_vm1, %v7494_v62 }
 0x18d   : > { %v1435_v54 = vpop.f32.mrf.mxu2 }
 0x18e   : > { %v8102_v38 = vadd.f32 %v1524_v37, %v1435_v54 }
 0x18f   : > { %v8104_v1 = vpop.f32.mrf.mxu0  ;;  %v1530_v40 = vpop.f32.mrf.mxu3 }
 0x190   : > { %13973 = vst [vmem:[#allocation28_spill] sm:$0xff] %v8102_v38  ;;  %2048 = vrot.lane.b32.xlu1 %v8102_v38, %s7023_s17 }
 0x191   : > { %v8108_v49 = vpop.f32.mrf.mxu1 }
 0x192   : > { %1769 = vmatmul.f32.gmra.mxu0 %v7530_v22  ;;  %6516 = vmatmul.msk.f32.vlgmr.msra.gmra.mxu2 %vm1154_vm1, %v7471_v52 }
 0x194   : > { %1597 = vmatmul.f32.gmra.mxu1 %v7584_v5  ;;  %6494 = vmatmul.msk.f32.gmra.mxu3 %vm1154_vm1, %v7535_v25 }
 0x195   : > { %v1438_v9 = vpop.f32.mrf.mxu2 }
 0x196   : > { %v8116_v37 = vadd.f32 %v1527_v32, %v1438_v9 }
 0x197   : > { %v8118_v54 = vpop.f32.mrf.mxu0  ;;  %v1533_v7 = vpop.f32.mrf.mxu3 }
 0x198   : > { %2054 = vrot.lane.b32.xlu0 %v8116_v37, %s7023_s17 }
 0x199   : > { %v8122_v38 = vpop.f32.mrf.mxu1 }
 0x19a   : > { %13974 = vst [vmem:[#allocation29_spill] sm:$0xff] %v8122_v38  ;;  %1772 = vmatmul.f32.gmra.mxu0 %v7560_v53  ;;  %6517 = vmatmul.msk.f32.gmra.mxu2 %vm1154_vm1, %v7469_v51 }
 0x19c   : > { %1600 = vmatmul.f32.gmra.mxu1 %v7604_v16  ;;  %6495 = vmatmul.msk.f32.gmra.mxu3 %vm1154_vm1, %v7544_v31 }
 0x19d   : > { %v1441_v52 = vpop.f32.mrf.mxu2 }
 0x19e   : > { %v8130_v22 = vadd.f32 %v1530_v40, %v1441_v52 }
 0x19f   : > { %v8132_v32 = vpop.f32.mrf.mxu0  ;;  %v1536_v9 = vpop.f32.mrf.mxu3 }
 0x1a0   : > { %13975 = vst [vmem:[#allocation30_spill] sm:$0xff] %v8130_v22  ;;  %2060 = vrot.lane.b32.xlu1 %v8130_v22, %s7023_s17 }
 0x1a1   : > { %v8136_v38 = vpop.f32.mrf.mxu1 }
 0x1a2   : > { %1775 = vmatmul.f32.gmra.mxu0 %v7584_v5  ;;  %6518 = vmatmul.msk.f32.gmra.mxu2 %vm1154_vm1, %v7494_v62 }
 0x1a4   : > { %1603 = vmatmul.f32.gmra.mxu1 %v7628_v35  ;;  %6496 = vmatmul.msk.f32.gmra.mxu3 %vm1154_vm1, %v7580_v4 }
 0x1a5   : > { %v1444_v51 = vpop.f32.mrf.mxu2 }
 0x1a6   : > { %v8144_v53 = vadd.f32 %v1533_v7, %v1444_v51 }
 0x1a7   : > { %v8146_v40 = vpop.f32.mrf.mxu0  ;;  %v1539_v52 = vpop.f32.mrf.mxu3 }
 0x1a8   : > { %2066 = vrot.lane.b32.xlu0 %v8144_v53, %s7023_s17 }
 0x1a9   : > { %v8150_v22 = vpop.f32.mrf.mxu1 }
 0x1aa   : > { %13976 = vst [vmem:[#allocation31_spill] sm:$0xff] %v8150_v22  ;;  %1778 = vmatmul.f32.gmra.mxu0 %v7604_v16  ;;  %6519 = vmatmul.msk.f32.gmra.mxu2 %vm1154_vm1, %v7535_v25 }
 0x1ac   : > { %1606 = vmatmul.f32.gmra.mxu1 %v7652_v0  ;;  %6497 = vmatmul.msk.f32.gmra.mxu3 %vm1154_vm1, %v7591_v11 }
 0x1ad   : > { %v1447_v62 = vpop.f32.mrf.mxu2 }
 0x1ae   : > { %v8158_v5 = vadd.f32 %v1536_v9, %v1447_v62 }
 0x1af   : > { %v8160_v7 = vpop.f32.mrf.mxu0  ;;  %v1542_v51 = vpop.f32.mrf.mxu3 }
 0x1b0   : > { %13977 = vst [vmem:[#allocation32_spill] sm:$0xff] %v8158_v5  ;;  %2072 = vrot.lane.b32.xlu2 %v8158_v5, %s7023_s17 }
 0x1b1   : > { %v8164_v22 = vpop.f32.mrf.mxu1 }
 0x1b2   : > { %1781 = vmatmul.f32.gmra.mxu0 %v7628_v35  ;;  %6520 = vmatmul.msk.f32.gmra.mxu2 %vm1154_vm1, %v7544_v31 }
 0x1b4   : > { %1609 = vmatmul.f32.gmra.mxu1 %v7670_v33  ;;  %6498 = vmatmul.msk.f32.gmra.mxu3 %vm1154_vm1, %v7624_v34 }
 0x1b5   : > { %v1450_v25 = vpop.f32.mrf.mxu2 }
 0x1b6   : > { %v8172_v16 = vadd.f32 %v1539_v52, %v1450_v25 }
 0x1b7   : > { %v8174_v9 = vpop.f32.mrf.mxu0  ;;  %v1545_v62 = vpop.f32.mrf.mxu3 }
 0x1b8   : > { %2078 = vrot.lane.b32.xlu1 %v8172_v16, %s7023_s17 }
 0x1b9   : > { %v8178_v5 = vpop.f32.mrf.mxu1 }
 0x1ba   : > { %13978 = vst [vmem:[#allocation33_spill] sm:$0xff] %v8178_v5  ;;  %1784 = vmatmul.f32.gmra.mxu0 %v7652_v0  ;;  %6521 = vmatmul.msk.f32.gmra.mxu2 %vm1154_vm1, %v7580_v4 }
 0x1bc   : > { %1612 = vmatmul.f32.gmra.mxu1 %v7692_v26  ;;  %6499 = vmatmul.msk.f32.gmra.mxu3 %vm1154_vm1, %v7635_v56 }
 0x1bd   : > { %v1453_v31 = vpop.f32.mrf.mxu2 }
 0x1be   : > { %v8186_v35 = vadd.f32 %v1542_v51, %v1453_v31 }
 0x1bf   : > { %v8188_v52 = vpop.f32.mrf.mxu0  ;;  %v1548_v25 = vpop.f32.mrf.mxu3 }
 0x1c0   : > { %13979 = vst [vmem:[#allocation34_spill] sm:$0xff] %v8186_v35  ;;  %2084 = vrot.lane.b32.xlu2 %v8186_v35, %s7023_s17 }
 0x1c1   : > { %v8192_v5 = vpop.f32.mrf.mxu1 }
 0x1c2   : > { %13980 = vst [vmem:[#allocation35_spill] sm:$0xff] %v8192_v5  ;;  %1787 = vmatmul.f32.gmra.mxu0 %v7670_v33  ;;  %6522 = vmatmul.msk.f32.gmra.mxu2 %vm1154_vm1, %v7591_v11 }
 0x1c4   : > { %1615 = vmatmul.f32.gmra.mxu1 %v7714_v60  ;;  %6500 = vmatmul.msk.f32.gmra.mxu3 %vm1154_vm1, %v7666_v12 }
 0x1c5   : > { %v1456_v4 = vpop.f32.mrf.mxu2 }
 0x1c6   : > { %v8200_v0 = vadd.f32 %v1545_v62, %v1456_v4 }
 0x1c7   : > { %v8202_v51 = vpop.f32.mrf.mxu0  ;;  %v1551_v31 = vpop.f32.mrf.mxu3 }
 0x1c8   : > { %13981 = vst [vmem:[#allocation36_spill] sm:$0xff] %v8200_v0  ;;  %2090 = vrot.lane.b32.xlu1 %v8200_v0, %s7023_s17 }
 0x1c9   : > { %v8206_v35 = vpop.f32.mrf.mxu1 }
 0x1ca   : > { %13982 = vst [vmem:[#allocation37_spill] sm:$0xff] %v8206_v35  ;;  %1790 = vmatmul.f32.gmra.mxu0 %v7692_v26  ;;  %6523 = vmatmul.msk.f32.gmra.mxu2 %vm1154_vm1, %v7624_v34 }
 0x1cc   : > { %1618 = vmatmul.f32.gmra.mxu1 %v7730_v10  ;;  %6501 = vmatmul.msk.f32.gmra.mxu3 %vm1154_vm1, %v7685_v19 }
 0x1cd   : > { %v1459_v11 = vpop.f32.mrf.mxu2 }
 0x1ce   : > { %v8214_v33 = vadd.f32 %v1548_v25, %v1459_v11 }
 0x1cf   : > { %v8216_v62 = vpop.f32.mrf.mxu0  ;;  %v1554_v4 = vpop.f32.mrf.mxu3 }
 0x1d0   : > { %13983 = vst [vmem:[#allocation38_spill] sm:$0xff] %v8214_v33  ;;  %2096 = vrot.lane.b32.xlu2 %v8214_v33, %s7023_s17 }
 0x1d1   : > { %v8220_v35 = vpop.f32.mrf.mxu1 }
 0x1d2   : > { %13984 = vst [vmem:[#allocation39_spill] sm:$0xff] %v8220_v35  ;;  %1793 = vmatmul.f32.gmra.mxu0 %v7714_v60  ;;  %6524 = vmatmul.msk.f32.gmra.mxu2 %vm1154_vm1, %v7635_v56 }
 0x1d4   : > { %1621 = vmatmul.f32.gmra.mxu1 %v7752_v29  ;;  %6502 = vmatmul.msk.f32.gmra.mxu3 %vm1154_vm1, %v7710_v30 }
 0x1d5   : > { %v1462_v34 = vpop.f32.mrf.mxu2 }
 0x1d6   : > { %v8228_v26 = vadd.f32 %v1551_v31, %v1462_v34 }
 0x1d7   : > { %v8230_v25 = vpop.f32.mrf.mxu0  ;;  %v1557_v11 = vpop.f32.mrf.mxu3 }
 0x1d8   : > { %13985 = vst [vmem:[#allocation40_spill] sm:$0xff] %v8228_v26  ;;  %2102 = vrot.lane.b32.xlu1 %v8228_v26, %s7023_s17 }
 0x1d9   : > { %13986 = vst [vmem:[#allocation41_spill] sm:$0xff] %v8230_v25  ;;  %v8234_v35 = vpop.f32.mrf.mxu1 }
 0x1da   : > { %13987 = vst [vmem:[#allocation42_spill] sm:$0xff] %v8234_v35  ;;  %1796 = vmatmul.f32.gmra.mxu0 %v7730_v10  ;;  %6525 = vmatmul.msk.f32.gmra.mxu2 %vm1154_vm1, %v7666_v12 }
 0x1dc   : > { %1624 = vmatmul.f32.gmra.mxu1 %v7771_v59  ;;  %6503 = vmatmul.msk.f32.gmra.mxu3 %vm1154_vm1, %v7719_v3 }
 0x1dd   : > { %v1465_v56 = vpop.f32.mrf.mxu2 }
 0x1de   : > { %v8242_v60 = vadd.f32 %v1554_v4, %v1465_v56 }
 0x1df   : > { %v8244_v31 = vpop.f32.mrf.mxu0  ;;  %v1560_v34 = vpop.f32.mrf.mxu3 }
 0x1e0   : > { %13988 = vst [vmem:[#allocation43_spill] sm:$0xff] %v8242_v60  ;;  %2108 = vrot.lane.b32.xlu0 %v8242_v60, %s7023_s17 }
 0x1e1   : > { %13989 = vst [vmem:[#allocation44_spill] sm:$0xff] %v8244_v31  ;;  %v8248_v35 = vpop.f32.mrf.mxu1 }
 0x1e2   : > { %13990 = vst [vmem:[#allocation45_spill] sm:$0xff] %v8248_v35  ;;  %1799 = vmatmul.f32.gmra.mxu0 %v7752_v29  ;;  %6526 = vmatmul.msk.f32.gmra.mxu2 %vm1154_vm1, %v7685_v19 }
 0x1e4   : > { %1627 = vmatmul.f32.gmra.mxu1 %v7790_v15  ;;  %6504 = vmatmul.msk.f32.gmra.mxu3 %vm1154_vm1, %v7748_v24 }
 0x1e5   : > { %v1468_v12 = vpop.f32.mrf.mxu2 }
 0x1e6   : > { %v8256_v10 = vadd.f32 %v1557_v11, %v1468_v12 }
 0x1e7   : > { %v8258_v4 = vpop.f32.mrf.mxu0  ;;  %v1563_v56 = vpop.f32.mrf.mxu3 }
 0x1e8   : > { %13991 = vst [vmem:[#allocation46_spill] sm:$0xff] %v8256_v10  ;;  %2114 = vrot.lane.b32.xlu2 %v8256_v10, %s7023_s17 }
 0x1e9   : > { %13992 = vst [vmem:[#allocation47_spill] sm:$0xff] %v8258_v4  ;;  %v8262_v35 = vpop.f32.mrf.mxu1 }
 0x1ea   : > { %13993 = vst [vmem:[#allocation48_spill] sm:$0xff] %v8262_v35  ;;  %1802 = vmatmul.f32.gmra.mxu0 %v7771_v59  ;;  %6527 = vmatmul.msk.f32.gmra.mxu2 %vm1154_vm1, %v7710_v30 }
 0x1ec   : > { %1630 = vmatmul.f32.gmra.mxu1 %v7817_v45  ;;  %6505 = vmatmul.msk.f32.gmra.mxu3 %vm1154_vm1, %v7757_v43 }
 0x1ed   : > { %v1471_v19 = vpop.f32.mrf.mxu2 }
 0x1ee   : > { %v8270_v29 = vadd.f32 %v1560_v34, %v1471_v19 }
 0x1ef   : > { %v8272_v11 = vpop.f32.mrf.mxu0  ;;  %v1566_v12 = vpop.f32.mrf.mxu3 }
 0x1f0   : > { %13994 = vst [vmem:[#allocation49_spill] sm:$0xff] %v8272_v11 }
 0x1f1   : > { %v8274_v4 = vpop.f32.mrf.mxu1 }
 0x1f2   : > { %13995 = vst [vmem:[#allocation50_spill] sm:$0xff] %v8274_v4  ;;  %1805 = vmatmul.f32.gmra.mxu0 %v7790_v15  ;;  %6528 = vmatmul.msk.f32.gmra.mxu2 %vm1154_vm1, %v7719_v3 }
 0x1f4   : > { %1633 = vmatmul.f32.gmra.mxu1 %v7838_v28  ;;  %6506 = vmatmul.msk.f32.gmra.mxu3 %vm1154_vm1, %v7786_v50 }
 0x1f5   : > { %v1474_v30 = vpop.f32.mrf.mxu2 }
 0x1f6   : > { %v8282_v59 = vadd.f32 %v1563_v56, %v1474_v30 }
 0x1f7   : > { %v8284_v34 = vpop.f32.mrf.mxu0  ;;  %v1569_v19 = vpop.f32.mrf.mxu3 }
 0x1f8   : > { %13996 = vst [vmem:[#allocation51_spill] sm:$0xff] %v8282_v59 }
 0x1f9   : > { %13997 = vst [vmem:[#allocation52_spill] sm:$0xff] %v8284_v34  ;;  %v1589_v35 = vpop.f32.mrf.mxu1 }
 0x1fa   : > { %1808 = vmatmul.f32.gmra.mxu0 %v7817_v45  ;;  %6529 = vmatmul.msk.f32.gmra.mxu2 %vm1154_vm1, %v7748_v24 }
 0x1fc   : > { %1636 = vmatmul.f32.gmra.mxu1 %v7861_v20  ;;  %6507 = vmatmul.msk.f32.gmra.mxu3 %vm1154_vm1, %v7802_v18 }
 0x1fd   : > { %v1477_v3 = vpop.f32.mrf.mxu2 }
 0x1fe   : > { %v8292_v15 = vadd.f32 %v1566_v12, %v1477_v3 }
 0x1ff   : > { %v8294_v4 = vpop.f32.mrf.mxu0  ;;  %v1678_v56 = vpop.f32.mrf.mxu3 }
 0x200   : > { %13998 = vst [vmem:[#allocation53_spill] sm:$0xff] %v8292_v15  ;;  %v1679_v30 = vadd.f32 %v1678_v56, %v1589_v35 }
 0x201   : > { %13999 = vst [vmem:[#allocation54_spill] sm:$0xff] %v8294_v4  ;;  %v1592_v34 = vpop.f32.mrf.mxu1 }
 0x202   : > { %6530 = vmatmul.msk.f32.gmra.mxu2 %vm1154_vm1, %v7757_v43  ;;  %2002 = vrot.lane.b32.xlu1 %v1679_v30, %s7023_s17 }
 0x203   : > { %1811 = vmatmul.f32.gmra.mxu0 %v7838_v28 }
 0x204   : > { %1639 = vmatmul.f32.gmra.mxu1 %v7897_v13  ;;  %6508 = vmatmul.msk.f32.gmra.mxu3 %vm1154_vm1, %v7829_v6 }
 0x205   : > { %v1480_v24 = vpop.f32.mrf.mxu2 }
 0x206   : > { %v8303_v45 = vadd.f32 %v1569_v19, %v1480_v24 }
 0x207   : > { %v1681_v12 = vpop.f32.mrf.mxu3  ;;  %v1767_v3 = vpop.f32.mrf.mxu0 }
 0x208   : > { %14000 = vst [vmem:[#allocation55_spill] sm:$0xff] %v8303_v45  ;;  %v1682_v4 = vadd.f32 %v1681_v12, %v1592_v34 }
 0x209   : > { %v1595_v35 = vpop.f32.mrf.mxu1 }
 0x20a   : > { %6531 = vmatmul.msk.f32.gmra.mxu2 %vm1154_vm1, %v7786_v50  ;;  %2008 = vrot.lane.b32.xlu0 %v1682_v4, %s7023_s17 }
 0x20b   : > { %1814 = vmatmul.f32.gmra.mxu0 %v7861_v20 }
 0x20c   : > { %1642 = vmatmul.f32.gmra.mxu1 %v7937_v63  ;;  %6509 = vmatmul.msk.f32.gmra.mxu3 %vm1154_vm1, %v7846_v61 }
 0x20d   : > { %v8312_v43 = vpop.f32.mrf.mxu2 }
 0x20e   : > { %14001 = vst [vmem:[#allocation56_spill] sm:$0xff] %v8312_v43 }
 0x20f   : > { %v1684_v28 = vpop.f32.mrf.mxu3  ;;  %v1770_v19 = vpop.f32.mrf.mxu0 }
 0x210   : > { %v1685_v56 = vadd.f32 %v1684_v28, %v1595_v35 }
 0x211   : > { %v1598_v30 = vpop.f32.mrf.mxu1 }
 0x212   : > { %6532 = vmatmul.msk.f32.gmra.mxu2 %vm1154_vm1, %v7802_v18  ;;  %2014 = vrot.lane.b32.xlu1 %v1685_v56, %s7023_s17 }
 0x213   : > { %1817 = vmatmul.f32.gmra.mxu0 %v7897_v13 }
 0x214   : > { %1645 = vmatmul.f32.gmra.mxu1 %v7972_v58  ;;  %6510 = vmatmul.msk.f32.gmra.mxu3 %vm1154_vm1, %v7900_v23 }
 0x215   : > { %v1856_v50 = vpop.f32.mrf.mxu2 }
 0x216   : > { %v1857_v20 = vadd.f32 %v1856_v50, %v1767_v3 }
 0x217   : > { %v1687_v4 = vpop.f32.mrf.mxu3  ;;  %v1773_v34 = vpop.f32.mrf.mxu0 }
 0x218   : > { %v1688_v24 = vadd.f32 %v1687_v4, %v1598_v30  ;;  %2004 = vrot.lane.b32.xlu2 %v1857_v20, %s7023_s17 }
 0x219   : > { %v1601_v12 = vpop.f32.mrf.mxu1 }
 0x21a   : > { %6533 = vmatmul.msk.f32.gmra.mxu2 %vm1154_vm1, %v7829_v6  ;;  %2020 = vrot.lane.b32.xlu0 %v1688_v24, %s7023_s17 }
 0x21b   : > { %1820 = vmatmul.f32.gmra.mxu0 %v7937_v63 }
 0x21c   : > { %1648 = vmatmul.f32.gmra.mxu1 %v8010_v39  ;;  %6511 = vmatmul.msk.f32.gmra.mxu3 %vm1154_vm1, %v7908_v44 }
 0x21d   : > { %v1859_v18 = vpop.f32.mrf.mxu2 }
 0x21e   : > { %v1860_v13 = vadd.f32 %v1859_v18, %v1770_v19 }
 0x21f   : > { %v1690_v3 = vpop.f32.mrf.mxu3  ;;  %v1776_v35 = vpop.f32.mrf.mxu0 }
 0x220   : > { %2010 = vrot.lane.b32.xlu1 %v1860_v13, %s7023_s17 }
 0x221   : > { %v1604_v28 = vpop.f32.mrf.mxu1 }
 0x222   : > { %6534 = vmatmul.msk.f32.gmra.mxu2 %vm1154_vm1, %v7846_v61 }
 0x223   : > { %1823 = vmatmul.f32.gmra.mxu0 %v7972_v58  ;;  %v1691_v58 = vadd.f32 %v1690_v3, %v1601_v12 }
 0x224   : > { %1651 = vmatmul.f32.gmra.mxu1 %v8041_v14  ;;  %6512 = vmatmul.msk.f32.gmra.mxu3 %vm1154_vm1, %v7974_v41 }
 0x225   : > { %v1862_v6 = vpop.f32.mrf.mxu2 }
 0x226   : > { %v1863_v63 = vadd.f32 %v1862_v6, %v1773_v34 }
 0x227   : > { %v1693_v56 = vpop.f32.mrf.mxu3  ;;  %v1779_v30 = vpop.f32.mrf.mxu0 }
 0x228   : > { %v1694_v19 = vadd.f32 %v1693_v56, %v1604_v28  ;;  %2016 = vrot.lane.b32.xlu2 %v1863_v63, %s7023_s17 }
 0x229   : > { %v1607_v50 = vpop.f32.mrf.mxu1 }
 0x22a   : > { %6535 = vmatmul.msk.f32.gmra.mxu2 %vm1154_vm1, %v7900_v23  ;;  %2032 = vrot.lane.b32.xlu1 %v1694_v19, %s7023_s17  ;;  %v8349_v23 = vpop.permute.xlu1 %2000 }
 0x22b   : > { %1826 = vmatmul.f32.gmra.mxu0 %v8010_v39 }
 0x22c   : > { %1654 = vmatmul.f32.gmra.mxu1 %v8063_v48  ;;  %6513 = vmatmul.msk.f32.gmra.mxu3 %vm1154_vm1, %v7986_v17 }
 0x22d   : > { %v1865_v61 = vpop.f32.mrf.mxu2 }
 0x22e   : > { %v1866_v20 = vadd.f32 %v1865_v61, %v1776_v35 }
 0x22f   : > { %v1696_v4 = vpop.f32.mrf.mxu3  ;;  %v1782_v34 = vpop.f32.mrf.mxu0 }
 0x230   : > { %2026 = vrot.lane.b32.xlu2 %v1691_v58, %s7023_s17  ;;  %2022 = vrot.lane.b32.xlu0 %v1866_v20, %s7023_s17  ;;  %v1697_v28 = vadd.f32 %v1696_v4, %v1607_v50  ;;  %v2732_v20 = vld [vmem:[%s13751_s3 + $0x1e0] sm:$0xff] }
 0x231   : > { %v1610_v24 = vpop.f32.mrf.mxu1  ;;  %3289 = vmatpush.msra.mxu1 %v2732_v20  ;;  %v2704_v20 = vld [vmem:[%s13751_s3 + $0x100] sm:$0xff] }
 0x232   : > { %6536 = vmatmul.msk.f32.gmra.mxu2 %vm1154_vm1, %v7908_v44  ;;  %v8358_v44 = vpop.permute.xlu1 %2024 }
 0x233   : > { %1829 = vmatmul.f32.gmra.mxu0 %v8041_v14 }
 0x234   : > { %6514 = vmatmul.msk.f32.gmra.mxu3 %vm1154_vm1, %v8035_v21 }
 0x235   : > { %v1868_v39 = vpop.f32.mrf.mxu2 }
 0x236   : > { %v1869_v12 = vadd.f32 %v1868_v39, %v1779_v30 }
 0x237   : > { %v1699_v18 = vpop.f32.mrf.mxu3  ;;  %v1785_v13 = vpop.f32.mrf.mxu0 }
 0x238   : > { %v1700_v3 = vadd.f32 %v1699_v18, %v1610_v24  ;;  %2028 = vrot.lane.b32.xlu2 %v1869_v12, %s7023_s17  ;;  %v8382_v24 = vpop.permute.xlu0 %2012 }
 0x239   : > { %v1613_v35 = vpop.f32.mrf.mxu1 }
 0x23a   : > { %6537 = vmatmul.msk.f32.gmra.mxu2 %vm1154_vm1, %v7974_v41  ;;  %2044 = vrot.lane.b32.xlu1 %v1700_v3, %s7023_s17  ;;  %v8365_v41 = vpop.permute.xlu2 %2006 }
 0x23b   : > { %1832 = vmatmul.f32.gmra.mxu0 %v8063_v48  ;;  %v8367_v48 = vpop.permute.xlu1 %2036 }
 0x23d   : > { %v1871_v14 = vpop.f32.mrf.mxu2 }
 0x23e   : > { %v1872_v6 = vadd.f32 %v1871_v14, %v1782_v34 }
 0x23f   : > { %v1702_v63 = vpop.f32.mrf.mxu3  ;;  %v1788_v56 = vpop.f32.mrf.mxu0 }
 0x240   : > { %2038 = vrot.lane.b32.xlu2 %v1697_v28, %s7023_s17  ;;  %2034 = vrot.lane.b32.xlu0 %v1872_v6, %s7023_s17  ;;  %v2716_v6 = vld [vmem:[%s13751_s3 + $0x160] sm:$0xff] }
 0x241   : > { %v1616_v30 = vpop.f32.mrf.mxu1 }
 0x242   : > { %6538 = vmatmul.msk.f32.gmra.mxu2 %vm1154_vm1, %v7986_v17  ;;  %v2728_v17 = vld [vmem:[%s13751_s3 + $0x1c0] sm:$0xff]  ;;  %v8384_v39 = vpop.permute.xlu2 %2018 }
 0x243   : > { %1835 = vmatmul.f32.gmra.mxu0 %v8082_v42  ;;  %v2724_v42 = vld [vmem:[%s13751_s3 + $0x1a0] sm:$0xff]  ;;  %3290 = vmatpush.msra.mxu1 %v2728_v17  ;;  %v8386_v12 = vpop.permute.xlu1 %2048 }
 0x245   : > { %v1874_v19 = vpop.f32.mrf.mxu2  ;;  %3291 = vmatpush.msra.mxu1 %v2724_v42 }
 0x246   : > { %v1875_v61 = vadd.f32 %v1874_v19, %v1785_v13  ;;  %v2720_v13 = vld [vmem:[%s13751_s3 + $0x180] sm:$0xff] }
 0x247   : > { %v1705_v50 = vpop.f32.mrf.mxu3  ;;  %v1791_v58 = vpop.f32.mrf.mxu0  ;;  %3292 = vmatpush.msra.mxu1 %v2720_v13  ;;  %v2712_v19 = vld [vmem:[%s13751_s3 + $0x140] sm:$0xff] }
 0x248   : > { %v1706_v4 = vadd.f32 %v1705_v50, %v1616_v30  ;;  %2040 = vrot.lane.b32.xlu2 %v1875_v61, %s7023_s17 }
 0x249   : > { %v1619_v34 = vpop.f32.mrf.mxu1  ;;  %3293 = vmatpush.msra.mxu1 %v2716_v6 }
 0x24a   : > { %6539 = vmatmul.msk.f32.gmra.mxu2 %vm1154_vm1, %v8035_v21  ;;  %2056 = vrot.lane.b32.xlu1 %v1706_v4, %s7023_s17  ;;  %v1703_v21 = vadd.f32 %v1702_v63, %v1613_v35  ;;  %v2708_v35 = vld [vmem:[%s13751_s3 + $0x120] sm:$0xff]  ;;  %v8402_v63 = vpop.permute.xlu0 %2030 }
 0x24b   : > { %3294 = vmatpush.msra.mxu1 %v2712_v19  ;;  %v8406_v61 = vpop.permute.xlu1 %2060 }
 0x24d   : > { %v1877_v18 = vpop.f32.mrf.mxu2  ;;  %3295 = vmatpush.msra.mxu1 %v2708_v35 }
 0x24e   : > { %v1878_v3 = vadd.f32 %v1877_v18, %v1788_v56  ;;  %v8404_v56 = vpop.permute.xlu2 %2072  ;;  %v2700_v18 = vld [vmem:[%s13751_s3 + $0xe0] sm:$0xff] }
 0x24f   : > { %v1708_v14 = vpop.f32.mrf.mxu3  ;;  %v1794_v28 = vpop.f32.mrf.mxu0  ;;  %3296 = vmatpush.msra.mxu1 %v2704_v20 }
 0x250   : > { %2050 = vrot.lane.b32.xlu2 %v1703_v21, %s7023_s17  ;;  %2046 = vrot.lane.b32.xlu0 %v1878_v3, %s7023_s17  ;;  %v2696_v3 = vld [vmem:[%s13751_s3 + $0xc0] sm:$0xff]  ;;  %v1709_v20 = vadd.f32 %v1708_v14, %v1619_v34 }
 0x251   : > { %v1622_v30 = vpop.f32.mrf.mxu1  ;;  %3297 = vmatpush.msra.mxu1 %v2700_v18  ;;  %v2684_v18 = vld [vmem:[%s13751_s3 + $0x60] sm:$0xff] }
 0x252   : > { %v8422_v6 = vpop.permute.xlu0 %2042  ;;  %v2676_v34 = vld [vmem:[%s13751_s3 + $0x20] sm:$0xff] }
 0x253   : > { %3298 = vmatpush.msra.mxu1 %v2696_v3 }
 0x255   : > { %v1880_v50 = vpop.f32.mrf.mxu2 }
 0x256   : > { %v1881_v4 = vadd.f32 %v1880_v50, %v1791_v58  ;;  %v2692_v58 = vld [vmem:[%s13751_s3 + $0xa0] sm:$0xff]  ;;  %v8424_v19 = vpop.permute.xlu2 %2084 }
 0x257   : > { %v1711_v17 = vpop.f32.mrf.mxu3  ;;  %v1797_v42 = vpop.f32.mrf.mxu0  ;;  %3299 = vmatpush.msra.mxu1 %v2692_v58  ;;  %v2688_v50 = vld [vmem:[%s13751_s3 + $0x80] sm:$0xff] }
 0x258   : > { %v1712_v13 = vadd.f32 %v1711_v17, %v1622_v30  ;;  %2052 = vrot.lane.b32.xlu2 %v1881_v4, %s7023_s17  ;;  %v8426_v30 = vpop.permute.xlu1 %2078  ;;  %v2680_v58 = vld [vmem:[%s13751_s3 + $0x40] sm:$0xff] }
 0x259   : > { %v1625_v21 = vpop.f32.mrf.mxu1  ;;  %3300 = vmatpush.msra.mxu1 %v2688_v50  ;;  %v2672_v50 = vld [vmem:[%s13751_s3] sm:$0xff] }
 0x25a   : > { %2068 = vrot.lane.b32.xlu1 %v1712_v13, %s7023_s17  ;;  %v8439_v11 = vpop.permute.xlu0 %2054 }
 0x25b   : > { %3301 = vmatpush.msra.mxu1 %v2684_v18 }
 0x25d   : > { %v1883_v35 = vpop.f32.mrf.mxu2  ;;  %3302 = vmatpush.msra.mxu1 %v2680_v58 }
 0x25e   : > { %v1884_v4 = vadd.f32 %v1883_v35, %v1794_v28  ;;  %v8444_v14 = vpop.permute.xlu2 %2096 }
 0x25f   : > { %v1714_v17 = vpop.f32.mrf.mxu3  ;;  %v1800_v13 = vpop.f32.mrf.mxu0  ;;  %14002 = vst [vmem:[#allocation57_spill] sm:$0xff] %v8444_v14  ;;  %3303 = vmatpush.msra.mxu1 %v2676_v34 }
 0x260   : > { %2062 = vrot.lane.b32.xlu2 %v1709_v20, %s7023_s17  ;;  %2058 = vrot.lane.b32.xlu0 %v1884_v4, %s7023_s17  ;;  %v8446_v28 = vpop.permute.xlu1 %2090  ;;  %v1715_v45 = vadd.f32 %v1714_v17, %v1625_v21 }
 0x261   : > { %v1628_v3 = vpop.f32.mrf.mxu1  ;;  %3304 = vmatpush.msra.mxu1 %v2672_v50 }
 0x262   : > { %v8453_v10 = vpop.permute.xlu0 %2066 }
 0x265   : > { %v1886_v35 = vpop.f32.mrf.mxu2 }
 0x266   : > { %v1887_v20 = vadd.f32 %v1886_v35, %v1797_v42  ;;  %v8455_v43 = vpop.permute.xlu2 %2114  ;;  %v14005_v35 = vld [vmem:[#allocation8_spill] sm:$0xff] }
 0x267   : > { %v1717_v4 = vpop.f32.mrf.mxu3  ;;  %v1803_v60 = vpop.f32.mrf.mxu0  ;;  %14003 = vst [vmem:[#allocation58_spill] sm:$0xff] %v8455_v43  ;;  %v1323_v50 = vadd.f32 %v14005_v35, %v7853_v27  ;;  %v8473_v27 = vld [vmem:[%s13750_s2] sm:$0x3]  ;;  %v14006_v35 = vld [vmem:[#allocation12_spill] sm:$0xff] }
 0x268   : > { %v1718_v18 = vadd.f32 %v1717_v4, %v1628_v3  ;;  %2064 = vrot.lane.b32.xlu0 %v1887_v20, %s7023_s17  ;;  %v8457_v15 = vpop.permute.xlu1 %2102 }
 0x269   : > { %v1631_v58 = vpop.f32.mrf.mxu1 }
 0x26a   : > { %2080 = vrot.lane.b32.xlu2 %v1718_v18, %s7023_s17  ;;  %v8461_v42 = vpop.permute.xlu0 %2108 }
 0x26b   : > { %14004 = vst [vmem:[#allocation59_spill] sm:$0xff] %v8461_v42  ;;  %v14007_v42 = vld [vmem:[#allocation9_spill] sm:$0xff] }
 0x26c   : > { %v1326_v59 = vadd.f32 %v14007_v42, %v14006_v35  ;;  %v14008_v35 = vld [vmem:[#allocation15_spill] sm:$0xff] }
 0x26d   : > { %v1889_v34 = vpop.f32.mrf.mxu2 }
 0x26e   : > { %v1890_v31 = vadd.f32 %v1889_v34, %v1800_v13 }
 0x26f   : > { %v1720_v25 = vpop.f32.mrf.mxu3  ;;  %v1806_v18 = vpop.f32.mrf.mxu0 }
 0x270   : > { %2074 = vrot.lane.b32.xlu0 %v1715_v45, %s7023_s17  ;;  %2070 = vrot.lane.b32.xlu1 %v1890_v31, %s7023_s17 }
 0x271   : > { %v1634_v3 = vpop.f32.mrf.mxu1 }
 0x272   : > { %v2005_v20 = vpop.permute.xlu2 %2004 }
 0x274   : > { %v2003_v4 = vpop.permute.xlu1 %2002 }
 0x275   : > { %v2145_v43 = vsel %vm2144_vm6, %v8349_v23, %v2003_v4  ;;  %v2146_v21 = vsel %vm2144_vm6, %v2003_v4, %v2005_v20  ;;  %v1892_v17 = vpop.f32.mrf.mxu2 }
 0x276   : > { %v2241_v13 = vmax.f32 %v1323_v50, %v2145_v43  ;;  %v1893_v45 = vadd.f32 %v1892_v17, %v1803_v60  ;;  %v1721_v50 = vadd.f32 %v1720_v25, %v1631_v58 }
 0x277   : > { %v1723_v34 = vpop.f32.mrf.mxu3  ;;  %v1809_v17 = vpop.f32.mrf.mxu0 }
 0x278   : > { %v1724_v31 = vadd.f32 %v1723_v34, %v1634_v3  ;;  %2076 = vrot.lane.b32.xlu0 %v1893_v45, %s7023_s17  ;;  %v8480_v3 = vperm.slane %v8473_v27, 0 }
 0x279   : > { %v1637_v33 = vpop.f32.mrf.mxu1 }
 0x27a   : > { %2092 = vrot.lane.b32.xlu2 %v1724_v31, %s7023_s17 }
 0x27c   : > { %v2009_v23 = vpop.permute.xlu0 %2008 }
 0x27d   : > { %v2147_v43 = vsel %vm2144_vm6, %v8365_v41, %v2009_v23  ;;  %v1895_v60 = vpop.f32.mrf.mxu2  ;;  %v14009_v41 = vld [vmem:[#allocation10_spill] sm:$0xff] }
 0x27e   : > { %v2243_v20 = vmax.f32 %v1326_v59, %v2147_v43  ;;  %v1896_v4 = vadd.f32 %v1895_v60, %v1806_v18  ;;  %v1329_v26 = vadd.f32 %v14009_v41, %v14008_v35 }
 0x27f   : > { %v1726_v45 = vpop.f32.mrf.mxu3 }
 0x280   : > { %v2289_v34 = vmax.f32 %v2241_v13, %v2243_v20  ;;  %2086 = vrot.lane.b32.xlu0 %v1721_v50, %s7023_s17  ;;  %2082 = vrot.lane.b32.xlu1 %v1896_v4, %s7023_s17  ;;  %v1812_v4 = vpop.f32.mrf.mxu0 }
 0x281   : > { %v1640_v60 = vpop.f32.mrf.mxu1 }
 0x282   : > { %v2319_v42 = vadd.f32 %v8480_v3, %v2289_v34  ;;  %v8485_v31 = vpop.permute.xlu2 %2016  ;;  %v14011_v34 = vld [vmem:[#allocation18_spill] sm:$0xff] }
 0x284   : > { %v8489_v25 = vmax.f32 %v2319_v42, 0.0  ;;  %v2015_v58 = vpop.permute.xlu1 %2014  ;;  %v14012_v42 = vld [vmem:[#allocation13_spill] sm:$0xff] }
 0x285   : > { %v2149_v59 = vsel %vm2144_vm6, %v8382_v24, %v2015_v58  ;;  %v1898_v18 = vpop.f32.mrf.mxu2  ;;  %v1332_v35 = vadd.f32 %v14012_v42, %v14011_v34  ;;  %v14013_v34 = vld [vmem:[#allocation11_spill] sm:$0xff] }
 0x286   : > { %14010 = vst [vmem:[#allocation8_spill] sm:$0xff] %v8489_v25  ;;  %v2245_v43 = vmax.f32 %v1329_v26, %v2149_v59  ;;  %v1899_v13 = vadd.f32 %v1898_v18, %v1809_v17  ;;  %3305 = vmatmul.f32.vlgmr.msra.gmra.mxu1 %v8489_v25  ;;  %v1727_v17 = vadd.f32 %v1726_v45, %v1637_v33 }
 0x287   : > { %v1729_v50 = vpop.f32.mrf.mxu3  ;;  %v2242_v42 = vmax.f32 %v14013_v34, %v2146_v21  ;;  %v14016_v21 = vld [vmem:[#allocation16_spill] sm:$0xff] }
 0x288   : > { %v1730_v20 = vadd.f32 %v1729_v50, %v1640_v60  ;;  %2088 = vrot.lane.b32.xlu0 %v1899_v13, %s7023_s17  ;;  %v1815_v50 = vpop.f32.mrf.mxu0 }
 0x28a   : > { %2104 = vrot.lane.b32.xlu2 %v1730_v20, %s7023_s17  ;;  %v8498_v41 = vpop.permute.xlu2 %2026 }
 0x28c   : > { %v2021_v0 = vpop.permute.xlu0 %2020 }
 0x28d   : > { %v2151_v26 = vsel %vm2144_vm6, %v8384_v39, %v2021_v0  ;;  %v1901_v24 = vpop.f32.mrf.mxu2  ;;  %v14015_v39 = vld [vmem:[#allocation14_spill] sm:$0xff] }
 0x28e   : > { %v2247_v59 = vmax.f32 %v1332_v35, %v2151_v26  ;;  %v1902_v18 = vadd.f32 %v1901_v24, %v1812_v4  ;;  %v1335_v35 = vadd.f32 %v14016_v21, %v7997_v46  ;;  %v14017_v26 = vld [vmem:[#allocation19_spill] sm:$0xff]  ;;  %v14019_v21 = vld [vmem:[#allocation17_spill] sm:$0xff] }
 0x28f   : > { %v1338_v24 = vadd.f32 %v14017_v26, %v8025_v2 }
 0x290   : > { %v2291_v25 = vmax.f32 %v2245_v43, %v2247_v59  ;;  %2098 = vrot.lane.b32.xlu0 %v1727_v17, %s7023_s17  ;;  %2094 = vrot.lane.b32.xlu1 %v1902_v18, %s7023_s17  ;;  %v1643_v17 = vpop.f32.mrf.mxu1  ;;  %v1818_v59 = vpop.f32.mrf.mxu0 }
 0x292   : > { %v2321_v13 = vadd.f32 %v8480_v3, %v2291_v25  ;;  %v2011_v60 = vpop.permute.xlu1 %2010  ;;  %v2029_v43 = vpop.permute.xlu2 %2028  ;;  %v2153_v25 = vsel %vm2144_vm6, %v8358_v44, %v8498_v41 }
 0x293   : > { %v2148_v20 = vsel %vm2144_vm6, %v2009_v23, %v2011_v60  ;;  %v1732_v23 = vpop.f32.mrf.mxu3  ;;  %v2249_v60 = vmax.f32 %v1335_v35, %v2153_v25  ;;  %v14018_v25 = vld [vmem:[#allocation20_spill] sm:$0xff] }
 0x294   : > { %v8507_v14 = vmax.f32 %v2321_v13, 0.0  ;;  %v2244_v5 = vmax.f32 %v14015_v39, %v2148_v20 }
 0x295   : > { %v1904_v33 = vpop.f32.mrf.mxu2 }
 0x296   : > { %14014 = vst [vmem:[#allocation12_spill] sm:$0xff] %v8507_v14  ;;  %v8510_v45 = vmax.f32 %v2242_v42, %v2244_v5  ;;  %v1905_v4 = vadd.f32 %v1904_v33, %v1815_v50  ;;  %3308 = vmatmul.f32.gmra.mxu1 %v8507_v14  ;;  %v1733_v50 = vadd.f32 %v1732_v23, %v1643_v17  ;;  %v14020_v17 = vld [vmem:[#allocation21_spill] sm:$0xff] }
 0x298   : > { %2100 = vrot.lane.b32.xlu1 %v1905_v4, %s7023_s17  ;;  %v2150_v4 = vsel %vm2144_vm6, %v2015_v58, %v8485_v31  ;;  %v1646_v58 = vpop.f32.mrf.mxu1 }
 0x299   : > { %v2246_v35 = vmax.f32 %v14019_v21, %v2150_v4 }
 0x29a   : > { %v8523_v42 = vpop.permute.xlu2 %2038 }
 0x29c   : > { %v2033_v5 = vpop.permute.xlu1 %2032 }
 0x29d   : > { %v2155_v18 = vsel %vm2144_vm6, %v8402_v63, %v2033_v5  ;;  %v1907_v13 = vpop.f32.mrf.mxu2 }
 0x29e   : > { %v2251_v20 = vmax.f32 %v1338_v24, %v2155_v18  ;;  %v1908_v34 = vadd.f32 %v1907_v13, %v1818_v59  ;;  %v1735_v24 = vpop.f32.mrf.mxu3  ;;  %v1341_v59 = vadd.f32 %v14020_v17, %v8053_v8  ;;  %v14021_v18 = vld [vmem:[#allocation23_spill] sm:$0xff]  ;;  %v14023_v17 = vld [vmem:[#allocation24_spill] sm:$0xff] }
 0x29f   : > { %v1344_v13 = vadd.f32 %v14021_v18, %v8074_v57  ;;  %v1821_v18 = vpop.f32.mrf.mxu0 }
 0x2a0   : > { %v2293_v44 = vmax.f32 %v2249_v60, %v2251_v20  ;;  %2110 = vrot.lane.b32.xlu1 %v1733_v50, %s7023_s17  ;;  %2106 = vrot.lane.b32.xlu2 %v1908_v34, %s7023_s17  ;;  %v8549_v20 = vperm.slane %v8473_v27, 1  ;;  %v1736_v34 = vadd.f32 %v1735_v24, %v1646_v58 }
 0x2a2   : > { %v2323_v46 = vadd.f32 %v8480_v3, %v2293_v44  ;;  %v2023_v2 = vpop.permute.xlu0 %2022  ;;  %v2041_v26 = vpop.permute.xlu2 %2040 }
 0x2a3   : > { %v2152_v33 = vsel %vm2144_vm6, %v2021_v0, %v2023_v2  ;;  %v2157_v0 = vsel %vm2144_vm6, %v8367_v48, %v8523_v42 }
 0x2a4   : > { %v8528_v39 = vmax.f32 %v2323_v46, 0.0  ;;  %v2248_v23 = vmax.f32 %v14018_v25, %v2152_v33  ;;  %v2253_v44 = vmax.f32 %v1341_v59, %v2157_v0  ;;  %v1347_v59 = vadd.f32 %v14023_v17, %v8091_v47 }
 0x2a5   : > { %v1910_v24 = vpop.f32.mrf.mxu2 }
 0x2a6   : > { %3311 = vmatmul.f32.gmra.mxu1 %v8528_v39  ;;  %v6830_v63 = vpack.i.bf16 %v8528_v39, %v8507_v14  ;;  %v2292_v60 = vmax.f32 %v2246_v35, %v2248_v23  ;;  %v2154_v23 = vsel %vm2144_vm6, %v8498_v41, %v2029_v43  ;;  %v1350_v41 = vadd.f32 %v8078_v55, %v8104_v1 }
 0x2a8   : > { %6831 = vrot.lane.b32.xlu0 %v6830_v63, %s13949_s27  ;;  %v8553_v8 = vadd.f32 %v8549_v20, %v2292_v60  ;;  %v1911_v60 = vadd.f32 %v1910_v24, %v1821_v18 }
 0x2aa   : > { %v8556_v33 = vpop.permute.xlu2 %2050 }
 0x2ab   : > { %v2161_v0 = vsel %vm2144_vm6, %v8386_v12, %v8556_v33 }
 0x2ac   : > { %v2045_v31 = vpop.permute.xlu1 %2044  ;;  %v2257_v58 = vmax.f32 %v1347_v59, %v2161_v0 }
 0x2ad   : > { %v2159_v50 = vsel %vm2144_vm6, %v8422_v6, %v2045_v31  ;;  %v2346_v6 = vmax.f32 %v8553_v8, 0.0 }
 0x2ae   : > { %v2255_v46 = vmax.f32 %v1344_v13, %v2159_v50 }
 0x2b0   : > { %v2295_v2 = vmax.f32 %v2253_v44, %v2255_v46  ;;  %2116 = vrot.lane.b32.xlu0 %v1736_v34, %s7023_s17 }
 0x2b2   : > { %v2325_v57 = vadd.f32 %v8480_v3, %v2295_v2  ;;  %v2035_v48 = vpop.permute.xlu0 %2034  ;;  %v2053_v50 = vpop.permute.xlu2 %2052 }
 0x2b3   : > { %v2156_v27 = vsel %vm2144_vm6, %v2033_v5, %v2035_v48  ;;  %v14022_v5 = vld [vmem:[#allocation22_spill] sm:$0xff] }
 0x2b4   : > { %v8558_v63 = vmax.f32 %v2325_v57, 0.0  ;;  %v2252_v21 = vmax.f32 %v8051_v36, %v2156_v27  ;;  %v2250_v35 = vmax.f32 %v14022_v5, %v2154_v23  ;;  %v2158_v57 = vsel %vm2144_vm6, %v8523_v42, %v2041_v26  ;;  %v14024_v27 = vld [vmem:[#allocation26_spill] sm:$0xff] }
 0x2b6   : > { %3314 = vmatmul.f32.gmra.mxu1 %v8558_v63  ;;  %v6840_v4 = vpack.i.bf16 %v8558_v63, %v8528_v39  ;;  %v6835_v25 = vpack.i.bf16 %v8558_v63, %v2346_v6  ;;  %v2294_v43 = vmax.f32 %v2250_v35, %v2252_v21  ;;  %v14026_v21 = vld [vmem:[#allocation27_spill] sm:$0xff]  ;;  %v1356_v35 = vadd.f32 %v8108_v49, %v8132_v32 }
 0x2b7   : > { %v1353_v5 = vadd.f32 %v14026_v21, %v8118_v54 }
 0x2b8   : > { %6841 = vrot.lane.b32.xlu0 %v6840_v4, %s7024_s16  ;;  %6836 = vrot.lane.b32.xlu2 %v6835_v25, %s13949_s27  ;;  %v2324_v44 = vadd.f32 %v8549_v20, %v2294_v43  ;;  %v14025_v25 = vld [vmem:[#allocation25_spill] sm:$0xff] }
 0x2b9   : > { %v2254_v23 = vmax.f32 %v14025_v25, %v2158_v57  ;;  %v1362_v25 = vadd.f32 %v8136_v38, %v8160_v7  ;;  %v2784_v38 = vld [vmem:[%s13751_s3 + $0x380] sm:$0xff] }
 0x2ba   : > { %v8586_v2 = vmax.f32 %v2324_v44, 0.0  ;;  %v8596_v48 = vpop.permute.xlu2 %2062  ;;  %v2162_v44 = vsel %vm2144_vm6, %v8556_v33, %v2053_v50  ;;  %v2856_v33 = vld [vmem:[%s13751_s3 + $0x5c0] sm:$0xff]  ;;  %v14027_v50 = vld [vmem:[#allocation28_spill] sm:$0xff] }
 0x2bb   : > { %v2848_v7 = vld [vmem:[%s13751_s3 + $0x580] sm:$0xff] }
 0x2bc   : > { %v2057_v36 = vpop.permute.xlu1 %2056 }
 0x2bd   : > { %v2163_v13 = vsel %vm2144_vm6, %v8439_v11, %v2057_v36 }
 0x2be   : > { %v2259_v34 = vmax.f32 %v1350_v41, %v2163_v13 }
 0x2c0   : > { %v2297_v46 = vmax.f32 %v2257_v58, %v2259_v34  ;;  %2112 = vrot.lane.b32.xlu0 %v1911_v60, %s7023_s17  ;;  %v1738_v60 = vpop.f32.mrf.mxu3  ;;  %v1649_v34 = vpop.f32.mrf.mxu1 }
 0x2c2   : > { %v2327_v47 = vadd.f32 %v8480_v3, %v2297_v46  ;;  %v2047_v12 = vpop.permute.xlu0 %2046  ;;  %v1739_v46 = vadd.f32 %v1738_v60, %v1649_v34  ;;  %v2772_v34 = vld [vmem:[%s13751_s3 + $0x320] sm:$0xff] }
 0x2c3   : > { %v2160_v1 = vsel %vm2144_vm6, %v2045_v31, %v2047_v12  ;;  %v2165_v31 = vsel %vm2144_vm6, %v8406_v61, %v8596_v48 }
 0x2c4   : > { %v8588_v55 = vmax.f32 %v2327_v47, 0.0  ;;  %v2256_v4 = vmax.f32 %v14024_v27, %v2160_v1  ;;  %v2261_v0 = vmax.f32 %v1353_v5, %v2165_v31  ;;  %v8638_v47 = vpop.permute.xlu2 %2080  ;;  %v2796_v1 = vld [vmem:[%s13751_s3 + $0x3e0] sm:$0xff]  ;;  %v14028_v27 = vld [vmem:[#allocation29_spill] sm:$0xff] }
 0x2c5   : > { %3330 = vmatpush.msra.mxu3 %v2796_v1  ;;  %v2171_v57 = vsel %vm2144_vm6, %v8426_v30, %v8638_v47  ;;  %v2788_v5 = vld [vmem:[%s13751_s3 + $0x3a0] sm:$0xff] }
 0x2c6   : > { %3317 = vmatmul.f32.gmra.mxu1 %v8588_v55  ;;  %v6845_v11 = vpack.i.bf16 %v8588_v55, %v8586_v2  ;;  %v2296_v24 = vmax.f32 %v2254_v23, %v2256_v4  ;;  %v6850_v59 = vpack.i.bf16 %v8588_v55, %v8558_v63  ;;  %v1359_v4 = vadd.f32 %v14028_v27, %v8146_v40  ;;  %v2852_v30 = vld [vmem:[%s13751_s3 + $0x5a0] sm:$0xff] }
 0x2c7   : > { %v2832_v1 = vld [vmem:[%s13751_s3 + $0x500] sm:$0xff] }
 0x2c8   : > { %6846 = vrot.lane.b32.xlu1 %v6845_v11, %s13949_s27  ;;  %v2326_v61 = vadd.f32 %v8549_v20, %v2296_v24  ;;  %v2860_v11 = vld [vmem:[%s13751_s3 + $0x5e0] sm:$0xff] }
 0x2c9   : > { %3371 = vmatpush.msra.mxu0 %v2860_v11  ;;  %v2760_v27 = vld [vmem:[%s13751_s3 + $0x2c0] sm:$0xff] }
 0x2ca   : > { %v8618_v32 = vmax.f32 %v2326_v61, 0.0  ;;  %v2776_v61 = vld [vmem:[%s13751_s3 + $0x340] sm:$0xff] }
 0x2cb   : > { %3372 = vmatpush.msra.mxu0 %v2856_v33  ;;  %v2924_v33 = vld [vmem:[%s13751_s3 + $0x7e0] sm:$0xff] }
 0x2cc   : > { %v8608_v42 = vpop.permute.xlu1 %2068  ;;  %3412 = vmatpush.msrb.mxu2 %v2924_v33  ;;  %v2740_v33 = vld [vmem:[%s13751_s3 + $0x220] sm:$0xff] }
 0x2cd   : > { %v2167_v26 = vsel %vm2144_vm6, %v8453_v10, %v8608_v42  ;;  %3373 = vmatpush.msra.mxu0 %v2852_v30 }
 0x2ce   : > { %v2263_v17 = vmax.f32 %v1356_v35, %v2167_v26  ;;  %v2267_v35 = vmax.f32 %v1362_v25, %v2171_v57  ;;  %v2780_v26 = vld [vmem:[%s13751_s3 + $0x360] sm:$0xff] }
 0x2cf   : > { %3374 = vmatpush.msra.mxu0 %v2848_v7  ;;  %v2920_v25 = vld [vmem:[%s13751_s3 + $0x7c0] sm:$0xff] }
 0x2d0   : > { %v2299_v41 = vmax.f32 %v2261_v0, %v2263_v17  ;;  %6851 = vrot.lane.b32.xlu1 %v6850_v59, %s7025_s26  ;;  %v2844_v0 = vld [vmem:[%s13751_s3 + $0x560] sm:$0xff]  ;;  %3413 = vmatpush.msrb.mxu2 %v2920_v25 }
 0x2d1   : > { %3375 = vmatpush.msra.mxu0 %v2844_v0 }
 0x2d2   : > { %v2329_v49 = vadd.f32 %v8480_v3, %v2299_v41  ;;  %v2059_v54 = vpop.permute.xlu0 %2058  ;;  %v2840_v41 = vld [vmem:[%s13751_s3 + $0x540] sm:$0xff] }
 0x2d3   : > { %v2164_v58 = vsel %vm2144_vm6, %v2057_v36, %v2059_v54  ;;  %v2792_v36 = vld [vmem:[%s13751_s3 + $0x3c0] sm:$0xff]  ;;  %3376 = vmatpush.msra.mxu0 %v2840_v41 }
 0x2d4   : > { %v8620_v43 = vmax.f32 %v2329_v49, 0.0  ;;  %v2260_v12 = vmax.f32 %v8116_v37, %v2164_v58  ;;  %v2258_v37 = vmax.f32 %v14027_v50, %v2162_v44  ;;  %3331 = vmatpush.msra.mxu3 %v2792_v36  ;;  %v2836_v44 = vld [vmem:[%s13751_s3 + $0x520] sm:$0xff]  ;;  %v8722_v11 = vpop.permute.xlu2 %2092 }
 0x2d5   : > { %3377 = vmatpush.msra.mxu0 %v2836_v44  ;;  %v14029_v50 = vld [vmem:[#allocation30_spill] sm:$0xff]  ;;  %v2175_v57 = vsel %vm2144_vm6, %v8446_v28, %v8722_v11 }
 0x2d6   : > { %3320 = vmatmul.f32.gmra.mxu1 %v8620_v43  ;;  %v8625_v10 = vpack.i.bf16 %v8620_v43, %v8618_v32  ;;  %v8629_v18 = vpack.i.bf16 %v8620_v43, %v8588_v55  ;;  %v2298_v23 = vmax.f32 %v2258_v37, %v2260_v12  ;;  %3332 = vmatpush.msra.mxu3 %v2788_v5  ;;  %v2908_v41 = vld [vmem:[%s13751_s3 + $0x760] sm:$0xff] }
 0x2d7   : > { %3378 = vmatpush.msra.mxu0 %v2832_v1  ;;  %v1368_v5 = vadd.f32 %v8164_v22, %v8188_v52  ;;  %v2916_v22 = vld [vmem:[%s13751_s3 + $0x7a0] sm:$0xff] }
 0x2d8   : > { %6856 = vrot.lane.b32.xlu2 %v8625_v10, %s13949_s27  ;;  %6861 = vrot.lane.b32.xlu0 %v8629_v18, %s7024_s16  ;;  %v2744_v44 = vld [vmem:[%s13751_s3 + $0x240] sm:$0xff] }
 0x2d9   : > { %3333 = vmatpush.msra.mxu3 %v2784_v38  ;;  %v2756_v38 = vld [vmem:[%s13751_s3 + $0x2a0] sm:$0xff]  ;;  %v2271_v7 = vmax.f32 %v1368_v5, %v2175_v57  ;;  %3414 = vmatpush.msrb.mxu2 %v2916_v22 }
 0x2da   : > { %v2065_v13 = vpop.permute.xlu0 %2064  ;;  %v2736_v57 = vld [vmem:[%s13751_s3 + $0x200] sm:$0xff] }
 0x2db   : > { %3334 = vmatpush.msra.mxu3 %v2780_v26  ;;  %v2166_v12 = vsel %vm2144_vm6, %v8596_v48, %v2065_v13  ;;  %v2764_v48 = vld [vmem:[%s13751_s3 + $0x2e0] sm:$0xff] }
 0x2dc   : > { %v2828_v13 = vld [vmem:[%s13751_s3 + $0x4e0] sm:$0xff]  ;;  %v2262_v37 = vmax.f32 %v14029_v50, %v2166_v12 }
 0x2dd   : > { %3335 = vmatpush.msra.mxu3 %v2776_v61  ;;  %3379 = vmatpush.msra.mxu0 %v2828_v13  ;;  %v2912_v26 = vld [vmem:[%s13751_s3 + $0x780] sm:$0xff] }
 0x2de   : > { %3415 = vmatpush.msrb.mxu2 %v2912_v26  ;;  %v2812_v61 = vld [vmem:[%s13751_s3 + $0x460] sm:$0xff] }
 0x2df   : > { %3336 = vmatpush.msra.mxu3 %v2772_v34  ;;  %v2808_v12 = vld [vmem:[%s13751_s3 + $0x440] sm:$0xff] }
 0x2e0   : > { %2120 = vrot.lane.b32.xlu2 %v8270_v29, %s7023_s17  ;;  %2122 = vrot.lane.b32.xlu0 %v1739_v46, %s7023_s17  ;;  %v2804_v50 = vld [vmem:[%s13751_s3 + $0x420] sm:$0xff] }
 0x2e1   : > { %3416 = vmatpush.msrb.mxu2 %v2908_v41  ;;  %v2892_v5 = vld [vmem:[%s13751_s3 + $0x6e0] sm:$0xff] }
 0x2e2   : > { %v8664_v31 = vpop.permute.xlu0 %2074  ;;  %v2071_v59 = vpop.permute.xlu1 %2070 }
 0x2e3   : > { %v2169_v21 = vsel %vm2144_vm6, %v8404_v56, %v8664_v31  ;;  %v2328_v56 = vadd.f32 %v8549_v20, %v2298_v23  ;;  %v2168_v58 = vsel %vm2144_vm6, %v8608_v42, %v2071_v59  ;;  %v2768_v42 = vld [vmem:[%s13751_s3 + $0x300] sm:$0xff]  ;;  %v14030_v23 = vld [vmem:[#allocation31_spill] sm:$0xff] }
 0x2e4   : > { %v2265_v40 = vmax.f32 %v1359_v4, %v2169_v21  ;;  %v2264_v36 = vmax.f32 %v8144_v53, %v2168_v58  ;;  %3337 = vmatpush.msra.mxu3 %v2768_v42  ;;  %v1913_v53 = vpop.f32.mrf.mxu2  ;;  %v2824_v4 = vld [vmem:[%s13751_s3 + $0x4c0] sm:$0xff]  ;;  %v1365_v21 = vadd.f32 %v14030_v23, %v8174_v9  ;;  %v2105_v25 = vpop.permute.xlu2 %2104 }
 0x2e5   : > { %v8695_v49 = vmax.f32 %v2328_v56, 0.0  ;;  %3380 = vmatpush.msra.mxu0 %v2824_v4  ;;  %v2820_v9 = vld [vmem:[%s13751_s3 + $0x4a0] sm:$0xff] }
 0x2e6   : > { %v2301_v24 = vmax.f32 %v2265_v40, %v2267_v35  ;;  %3338 = vmatpush.msra.mxu3 %v2764_v48  ;;  %v2300_v28 = vmax.f32 %v2262_v37, %v2264_v36  ;;  %v1824_v35 = vpop.f32.mrf.mxu0  ;;  %v2748_v59 = vld [vmem:[%s13751_s3 + $0x260] sm:$0xff] }
 0x2e7   : > { %v1914_v52 = vadd.f32 %v1913_v53, %v1824_v35  ;;  %3381 = vmatpush.msra.mxu0 %v2820_v9  ;;  %v2904_v42 = vld [vmem:[%s13751_s3 + $0x740] sm:$0xff]  ;;  %v14033_v35 = vld [vmem:[#allocation33_spill] sm:$0xff] }
 0x2e8   : > { %v2331_v17 = vadd.f32 %v8480_v3, %v2301_v24  ;;  %3339 = vmatpush.msra.mxu3 %v2760_v27  ;;  %v2816_v24 = vld [vmem:[%s13751_s3 + $0x480] sm:$0xff]  ;;  %v2330_v0 = vadd.f32 %v8549_v20, %v2300_v28  ;;  %3417 = vmatpush.msrb.mxu2 %v2904_v42  ;;  %v2179_v28 = vsel %vm2144_vm6, %v8457_v15, %v2105_v25 }
 0x2e9   : > { %3382 = vmatpush.msra.mxu0 %v2816_v24  ;;  %v2800_v4 = vld [vmem:[%s13751_s3 + $0x400] sm:$0xff]  ;;  %v14035_v24 = vld [vmem:[#allocation57_spill] sm:$0xff] }
 0x2ea   : > { %v8697_v54 = vmax.f32 %v2331_v17, 0.0  ;;  %v8699_v60 = vpop.permute.xlu0 %2076  ;;  %3340 = vmatpush.msra.mxu3 %v2756_v38  ;;  %v8797_v1 = vmax.f32 %v2330_v0, 0.0  ;;  %v14034_v38 = vld [vmem:[#allocation35_spill] sm:$0xff]  ;;  %v14037_v42 = vld [vmem:[#allocation34_spill] sm:$0xff] }
 0x2eb   : > { %3383 = vmatpush.msra.mxu0 %v2812_v61  ;;  %v2170_v27 = vsel %vm2144_vm6, %v8664_v31, %v8699_v60  ;;  %v14032_v31 = vld [vmem:[#allocation32_spill] sm:$0xff]  ;;  %v1374_v9 = vadd.f32 %v14034_v38, %v8216_v62  ;;  %v2884_v62 = vld [vmem:[%s13751_s3 + $0x6a0] sm:$0xff] }
 0x2ec   : > { %3323 = vmatmul.f32.gmra.mxu1 %v8697_v54  ;;  %v8712_v46 = vpack.i.bf16 %v8697_v54, %v8695_v49  ;;  %v2266_v60 = vmax.f32 %v14032_v31, %v2170_v27 }
 0x2ed   : > { %3384 = vmatpush.msra.mxu0 %v2808_v12  ;;  %v1916_v12 = vpop.f32.mrf.mxu2 }
 0x2ee   : > { %6866 = vrot.lane.b32.xlu1 %v8712_v46, %s13949_s27 }
 0x2ef   : > { %3385 = vmatpush.msra.mxu0 %v2804_v50 }
 0x2f1   : > { %3386 = vmatpush.msra.mxu0 %v2800_v4  ;;  %v2872_v4 = vld [vmem:[%s13751_s3 + $0x640] sm:$0xff] }
 0x2f2   : > { %v8753_v30 = vpop.permute.xlu0 %2086  ;;  %v2083_v34 = vpop.permute.xlu1 %2082 }
 0x2f3   : > { %v2173_v40 = vsel %vm2144_vm6, %v8424_v19, %v8753_v30  ;;  %v2752_v19 = vld [vmem:[%s13751_s3 + $0x280] sm:$0xff]  ;;  %v2172_v13 = vsel %vm2144_vm6, %v8638_v47, %v2083_v34  ;;  %v14036_v34 = vld [vmem:[#allocation36_spill] sm:$0xff] }
 0x2f4   : > { %v2269_v56 = vmax.f32 %v1365_v21, %v2173_v40  ;;  %3341 = vmatpush.msra.mxu3 %v2752_v19  ;;  %v2900_v47 = vld [vmem:[%s13751_s3 + $0x720] sm:$0xff]  ;;  %v2268_v23 = vmax.f32 %v8172_v16, %v2172_v13  ;;  %v1741_v16 = vpop.f32.mrf.mxu3  ;;  %v1371_v40 = vadd.f32 %v14033_v35, %v8202_v51  ;;  %v1652_v19 = vpop.f32.mrf.mxu1  ;;  %v2275_v51 = vmax.f32 %v1374_v9, %v2179_v28 }
 0x2f5   : > { %v2896_v21 = vld [vmem:[%s13751_s3 + $0x700] sm:$0xff]  ;;  %3418 = vmatpush.msrb.mxu2 %v2900_v47  ;;  %v1742_v0 = vadd.f32 %v1741_v16, %v1652_v19 }
 0x2f6   : > { %v2303_v17 = vmax.f32 %v2269_v56, %v2271_v7  ;;  %2118 = vrot.lane.b32.xlu1 %v1914_v52, %s7023_s17  ;;  %3342 = vmatpush.msra.mxu3 %v2748_v59  ;;  %v2302_v22 = vmax.f32 %v2266_v60, %v2268_v23  ;;  %v2888_v56 = vld [vmem:[%s13751_s3 + $0x6c0] sm:$0xff] }
 0x2f7   : > { %3419 = vmatpush.msrb.mxu2 %v2896_v21  ;;  %v2876_v13 = vld [vmem:[%s13751_s3 + $0x660] sm:$0xff]  ;;  %v14038_v21 = vld [vmem:[#allocation40_spill] sm:$0xff] }
 0x2f8   : > { %v2333_v58 = vadd.f32 %v8480_v3, %v2303_v17  ;;  %3343 = vmatpush.msra.mxu3 %v2744_v44  ;;  %v2332_v61 = vadd.f32 %v8549_v20, %v2302_v22  ;;  %v14039_v60 = vld [vmem:[#allocation38_spill] sm:$0xff] }
 0x2f9   : > { %3420 = vmatpush.msrb.mxu2 %v2892_v5  ;;  %v2868_v28 = vld [vmem:[%s13751_s3 + $0x620] sm:$0xff] }
 0x2fa   : > { %v8799_v36 = vmax.f32 %v2333_v58, 0.0  ;;  %v2089_v48 = vpop.permute.xlu0 %2088  ;;  %3344 = vmatpush.msra.mxu3 %v2740_v33  ;;  %v2107_v41 = vpop.permute.xlu2 %2106  ;;  %v8874_v47 = vmax.f32 %v2332_v61, 0.0  ;;  %v2864_v9 = vld [vmem:[%s13751_s3 + $0x600] sm:$0xff] }
 0x2fb   : > { %v2174_v59 = vsel %vm2144_vm6, %v8753_v30, %v2089_v48  ;;  %3421 = vmatpush.msrb.mxu2 %v2888_v56  ;;  %v1827_v33 = vpop.f32.mrf.mxu0  ;;  %v2180_v50 = vsel %vm2144_vm6, %v2105_v25, %v2107_v41 }
 0x2fc   : > { %14031 = vst [vmem:[#allocation9_spill] sm:$0xff] %v8799_v36  ;;  %3326 = vmatmul.f32.gmra.mxu1 %v8799_v36  ;;  %v8812_v37 = vpack.i.bf16 %v8799_v36, %v8797_v1  ;;  %v8816_v53 = vpack.i.bf16 %v8799_v36, %v8697_v54  ;;  %3345 = vmatpush.msra.mxu3 %v2736_v57 }
 0x2fd   : > { %3422 = vmatpush.msrb.mxu2 %v2884_v62  ;;  %v2270_v30 = vmax.f32 %v14037_v42, %v2174_v59  ;;  %v2276_v31 = vmax.f32 %v14038_v21, %v2180_v50  ;;  %v1917_v35 = vadd.f32 %v1916_v12, %v1827_v33  ;;  %v14045_v50 = vld [vmem:[#allocation44_spill] sm:$0xff] }
 0x2fe   : > { %6871 = vrot.lane.b32.xlu2 %v8812_v37, %s13949_s27  ;;  %6876 = vrot.lane.b32.xlu0 %v8816_v53, %s7024_s16 }
 0x302   : > { %v2099_v52 = vpop.permute.xlu0 %2098  ;;  %v2095_v7 = vpop.permute.xlu1 %2094 }
 0x303   : > { %v2177_v26 = vsel %vm2144_vm6, %v14035_v24, %v2099_v52  ;;  %v2176_v15 = vsel %vm2144_vm6, %v8722_v11, %v2095_v7  ;;  %v2880_v11 = vld [vmem:[%s13751_s3 + $0x680] sm:$0xff]  ;;  %v1830_v19 = vpop.f32.mrf.mxu0 }
 0x304   : > { %v2273_v17 = vmax.f32 %v1371_v40, %v2177_v26  ;;  %v2272_v44 = vmax.f32 %v14036_v34, %v2176_v15  ;;  %3423 = vmatpush.msrb.mxu2 %v2880_v11  ;;  %v14040_v15 = vld [vmem:[#allocation51_spill] sm:$0xff] }
 0x306   : > { %v2305_v58 = vmax.f32 %v2273_v17, %v2275_v51  ;;  %2128 = vrot.lane.b32.xlu2 %v1742_v0, %s7023_s17  ;;  %6886 = vrot.lane.b32.xlu0 %v8625_v10, %s7025_s26  ;;  %v2304_v57 = vmax.f32 %v2270_v30, %v2272_v44  ;;  %v2320_v0 = vadd.f32 %v8549_v20, %v8510_v45  ;;  %v1744_v17 = vpop.f32.mrf.mxu3  ;;  %v14042_v45 = vld [vmem:[#allocation59_spill] sm:$0xff] }
 0x307   : > { %3424 = vmatpush.msrb.mxu2 %v2876_v13  ;;  %v14044_v13 = vld [vmem:[#allocation37_spill] sm:$0xff] }
 0x308   : > { %v2335_v48 = vadd.f32 %v8480_v3, %v2305_v58  ;;  %v2334_v40 = vadd.f32 %v8549_v20, %v2304_v57  ;;  %v2344_v59 = vmax.f32 %v2320_v0, 0.0  ;;  %v1655_v58 = vpop.f32.mrf.mxu1  ;;  %v14046_v57 = vld [vmem:[#allocation39_spill] sm:$0xff] }
 0x309   : > { %3425 = vmatpush.msrb.mxu2 %v2872_v4  ;;  %v1745_v34 = vadd.f32 %v1744_v17, %v1655_v58 }
 0x30a   : > { %v8876_v10 = vmax.f32 %v2335_v48, 0.0  ;;  %v2101_v27 = vpop.permute.xlu1 %2100  ;;  %v8902_v7 = vmax.f32 %v2334_v40, 0.0  ;;  %v14043_v48 = vld [vmem:[#allocation41_spill] sm:$0xff] }
 0x30b   : > { %v2178_v23 = vsel %vm2144_vm6, %v2099_v52, %v2101_v27  ;;  %3426 = vmatpush.msrb.mxu2 %v2868_v28  ;;  %v1919_v52 = vpop.f32.mrf.mxu2  ;;  %v1377_v33 = vadd.f32 %v14044_v13, %v14043_v48  ;;  %v1380_v27 = vadd.f32 %v14046_v57, %v14045_v50  ;;  %v2980_v48 = vld [vmem:[%s13751_s3 + $0x9a0] sm:$0xff] }
 0x30c   : > { %v2274_v5 = vmax.f32 %v14039_v60, %v2178_v23  ;;  %v6895_v25 = vpack.i.bf16 %v8586_v2, %v8876_v10  ;;  %v8888_v16 = vpack.i.bf16 %v8876_v10, %v8874_v47  ;;  %v1920_v24 = vadd.f32 %v1919_v52, %v1830_v19  ;;  %v14047_v23 = vld [vmem:[#allocation58_spill] sm:$0xff]  ;;  %v14049_v52 = vld [vmem:[#allocation55_spill] sm:$0xff] }
 0x30d   : > { %3427 = vmatpush.msrb.mxu2 %v2864_v9  ;;  %v2972_v57 = vld [vmem:[%s13751_s3 + $0x960] sm:$0xff] }
 0x30e   : > { %v2306_v38 = vmax.f32 %v2274_v5, %v2276_v31  ;;  %6896 = vrot.lane.b32.xlu0 %v6895_v25, %s7024_s16  ;;  %6881 = vrot.lane.b32.xlu1 %v8888_v16, %s13949_s27  ;;  %v6900_v5 = vpack.i.bf16 %v8797_v1, %v8695_v49 }
 0x30f   : > { %2124 = vrot.lane.b32.xlu2 %v1917_v35, %s7023_s17 }
 0x310   : > { %v2336_v22 = vadd.f32 %v8549_v20, %v2306_v38 }
 0x312   : > { %v8904_v56 = vmax.f32 %v2336_v22, 0.0  ;;  %v8914_v51 = vpop.permute.xlu2 %6836  ;;  %v8923_v12 = vpop.permute.xlu1 %2110  ;;  %v6930_v22 = vpack.i.bf16 %v8902_v7, %v8874_v47 }
 0x313   : > { %v6838_v61 = vunpack.i.l.bf16 %v8914_v51  ;;  %v2181_v42 = vsel %vm2144_vm6, %v14042_v45, %v8923_v12  ;;  %v6839_v35 = vunpack.i.h.bf16 %v8914_v51 }
 0x314   : > { %v6905_v26 = vpack.i.bf16 %v8904_v56, %v8902_v7 }
 0x315   : > { %v8961_v9 = vsel %vm1057_vm5, %v8586_v2, %v6839_v35  ;;  %v14050_v2 = vld [vmem:[#allocation53_spill] sm:$0xff] }
 0x316   : > { %2126 = vrot.lane.b32.xlu1 %v14040_v15, %s7023_s17  ;;  %2130 = vrot.lane.b32.xlu0 %v1920_v24, %s7023_s17  ;;  %v1747_v24 = vpop.f32.mrf.mxu3 }
 0x317   : > { %6906 = vrot.lane.b32.xlu2 %v6905_v26, %s13949_s27  ;;  %s7026_s27 = smov 64  }
 0x31a   : > { %v6832_v62 = vpop.permute.xlu0 %6831 }
 0x31b   : > { %v6833_v41 = vunpack.i.l.bf16 %v6832_v62  ;;  %v6834_v30 = vunpack.i.h.bf16 %v6832_v62  ;;  %v14053_v62 = vld [vmem:[#allocation56_spill] sm:$0xff] }
 0x31d   : > { %v8918_v44 = vsel %vm1057_vm5, %v2344_v59, %v6833_v41  ;;  %v8921_v11 = vsel %vm1057_vm5, %v6833_v41, %v6838_v61  ;;  %v8945_v60 = vsel %vm1057_vm5, %v2346_v6, %v6834_v30  ;;  %v1748_v59 = vadd.f32 %v1747_v24, %v14053_v62  ;;  %v2948_v24 = vld [vmem:[%s13751_s3 + $0x8a0] sm:$0xff] }
 0x31e   : > { %14041 = vst [vmem:[#allocation15_spill] sm:$0xff] %v8921_v11  ;;  %3346 = vmatmul.f32.vlgmr.msra.gmra.mxu3 %v8918_v44  ;;  %3387 = vmatmul.f32.vlgmr.msra.gmra.mxu0 %v8921_v11  ;;  %v2944_v62 = vld [vmem:[%s13751_s3 + $0x880] sm:$0xff] }
 0x31f   : > { %6891 = vrot.lane.b32.xlu1 %v8629_v18, %s7026_s27  ;;  %2134 = vrot.lane.b32.xlu0 %v1745_v34, %s7023_s17  ;;  %v2277_v18 = vmax.f32 %v1377_v33, %v2181_v42  ;;  %v2984_v42 = vld [vmem:[%s13751_s3 + $0x9c0] sm:$0xff] }
 0x320   : > { %v2976_v33 = vld [vmem:[%s13751_s3 + $0x980] sm:$0xff] }
 0x322   : > { %v8937_v4 = vpop.permute.xlu0 %2116 }
 0x323   : > { %v2183_v21 = vsel %vm2144_vm6, %v14047_v23, %v8937_v4  ;;  %v2968_v23 = vld [vmem:[%s13751_s3 + $0x940] sm:$0xff] }
 0x324   : > { %v2279_v31 = vmax.f32 %v1380_v27, %v2183_v21  ;;  %v3052_v27 = vld [vmem:[%s13751_s3 + $0xbe0] sm:$0xff] }
 0x325   : > { %3494 = vmatpush.msrb.mxu3 %v3052_v27  ;;  %v3048_v21 = vld [vmem:[%s13751_s3 + $0xbc0] sm:$0xff] }
 0x326   : > { %v2307_v25 = vmax.f32 %v2277_v18, %v2279_v31  ;;  %3349 = vmatmul.f32.gmra.mxu3 %v8945_v60  ;;  %v2964_v18 = vld [vmem:[%s13751_s3 + $0x920] sm:$0xff] }
 0x327   : > { %6901 = vrot.lane.b32.xlu1 %v6900_v5, %s7024_s16  ;;  %6916 = vrot.lane.b32.xlu0 %v8712_v46, %s7025_s26  ;;  %v3044_v31 = vld [vmem:[%s13751_s3 + $0xba0] sm:$0xff] }
 0x328   : > { %v2337_v28 = vadd.f32 %v8480_v3, %v2307_v25  ;;  %3495 = vmatpush.msrb.mxu3 %v3048_v21  ;;  %v2960_v5 = vld [vmem:[%s13751_s3 + $0x900] sm:$0xff] }
 0x329   : > { %v3040_v25 = vld [vmem:[%s13751_s3 + $0xb80] sm:$0xff] }
 0x32a   : > { %v2361_v40 = vmax.f32 %v2337_v28, 0.0  ;;  %v8955_v8 = vpop.permute.xlu0 %6841  ;;  %3496 = vmatpush.msrb.mxu3 %v3044_v31  ;;  %v2956_v28 = vld [vmem:[%s13751_s3 + $0x8e0] sm:$0xff] }
 0x32b   : > { %v13794_v6 = vunpack.i.l.bf16 %v8955_v8  ;;  %v13792_v26 = vunpack.i.h.bf16 %v8955_v8  ;;  %v2936_v27 = vld [vmem:[%s13751_s3 + $0x840] sm:$0xff] }
 0x32c   : > { %v6910_v38 = vpack.i.bf16 %v8618_v32, %v2361_v40  ;;  %3497 = vmatpush.msrb.mxu3 %v3040_v25  ;;  %v2932_v25 = vld [vmem:[%s13751_s3 + $0x820] sm:$0xff] }
 0x32d   : > { %v8966_v46 = vsel %vm2481_vm7, %v6838_v61, %v13794_v6 }
 0x32e   : > { %14048 = vst [vmem:[#allocation10_spill] sm:$0xff] %v8966_v46  ;;  %3352 = vmatmul.f32.gmra.mxu3 %v8961_v9  ;;  %3428 = vmatmul.f32.vlgmr.msrb.gmra.mxu2 %v8966_v46 }
 0x32f   : > { %2138 = vrot.lane.b32.xlu1 %v14049_v52, %s7023_s17  ;;  %6911 = vrot.lane.b32.xlu2 %v6910_v38, %s7024_s16  ;;  %v3032_v38 = vld [vmem:[%s13751_s3 + $0xb40] sm:$0xff] }
 0x330   : > { %6931 = vrot.lane.b32.xlu0 %v6930_v22, %s7024_s16 }
 0x332   : > { %v9002_v61 = vpop.permute.xlu2 %6856  ;;  %v9013_v58 = vpop.permute.xlu0 %2112 }
 0x333   : > { %v6858_v41 = vunpack.i.l.bf16 %v9002_v61 }
 0x335   : > { %v9022_v45 = vsel %vm1057_vm5, %v6839_v35, %v6858_v41  ;;  %v3036_v35 = vld [vmem:[%s13751_s3 + $0xb60] sm:$0xff] }
 0x336   : > { %14054 = vst [vmem:[#allocation11_spill] sm:$0xff] %v9022_v45  ;;  %3498 = vmatpush.msrb.mxu3 %v3036_v35  ;;  %v9149_v35 = vld [vmem:[%s13751_s3 + $0xda0] sm:$0xff] }
 0x337   : > { %6921 = vrot.lane.b32.xlu1 %v8812_v37, %s7025_s26  ;;  %2132 = vrot.lane.b32.xlu2 %v14050_v2, %s7023_s17 }
 0x338   : > { %2599 = vrot.lane.b32.xlu0 %v8876_v10, %s7026_s27  ;;  %3499 = vmatpush.msrb.mxu3 %v3032_v38 }
 0x33a   : > { %v8982_v19 = vpop.permute.xlu1 %6846 }
 0x33b   : > { %v6849_v0 = vunpack.i.h.bf16 %v8982_v19  ;;  %v6848_v51 = vunpack.i.l.bf16 %v8982_v19  ;;  %v9184_v19 = vld [vmem:[%s13751_s3 + $0xd80] sm:$0xff] }
 0x33d   : > { %v8991_v37 = vsel %vm1057_vm5, %v8618_v32, %v6849_v0  ;;  %v8994_v17 = vsel %vm1057_vm5, %v6834_v30, %v6848_v51  ;;  %v8999_v10 = vsel %vm2481_vm7, %v6848_v51, %v13792_v26  ;;  %v6859_v32 = vunpack.i.h.bf16 %v9002_v61  ;;  %v3028_v51 = vld [vmem:[%s13751_s3 + $0xb20] sm:$0xff] }
 0x33e   : > { %14051 = vst [vmem:[#allocation18_spill] sm:$0xff] %v8994_v17  ;;  %3355 = vmatmul.f32.gmra.mxu3 %v8991_v37  ;;  %3390 = vmatmul.f32.gmra.mxu0 %v8994_v17  ;;  %v2992_v61 = vld [vmem:[%s13751_s3 + $0xa00] sm:$0xff] }
 0x33f   : > { %14052 = vst [vmem:[#allocation13_spill] sm:$0xff] %v8999_v10  ;;  %3431 = vmatmul.f32.gmra.mxu2 %v8999_v10  ;;  %6936 = vrot.lane.b32.xlu1 %v8888_v16, %s7025_s26  ;;  %v9019_v34 = vsel %vm1057_vm5, %v8695_v49, %v6859_v32  ;;  %v2988_v16 = vld [vmem:[%s13751_s3 + $0x9e0] sm:$0xff] }
 0x340   : > { %2140 = vrot.lane.b32.xlu2 %v1748_v59, %s7023_s17  ;;  %2603 = vrot.lane.b32.xlu0 %v2361_v40, %s7026_s27  ;;  %v3024_v59 = vld [vmem:[%s13751_s3 + $0xb00] sm:$0xff] }
 0x341   : > { %3453 = vmatpush.msrb.mxu1 %v2988_v16  ;;  %3500 = vmatpush.msrb.mxu3 %v3028_v51  ;;  %v2940_v16 = vld [vmem:[%s13751_s3 + $0x860] sm:$0xff] }
 0x342   : > { %v9089_v22 = vpop.permute.xlu1 %6851  ;;  %v9312_v26 = vld [vmem:[%s13751_s3 + $0xc40] sm:$0xff] }
 0x343   : > { %3454 = vmatpush.msrb.mxu1 %v2984_v42  ;;  %v9111_v42 = vld [vmem:[%s13751_s3 + $0xde0] sm:$0xff]  ;;  %3501 = vmatpush.msrb.mxu3 %v3024_v59 }
 0x344   : > { %3535 = vmatpush.msrb.mxu0 %v9111_v42  ;;  %v3172_v59 = vld [vmem:[%s13751_s3 + $0xfa0] sm:$0xff] }
 0x345   : > { %3455 = vmatpush.msrb.mxu1 %v2980_v48  ;;  %v3180_v48 = vld [vmem:[%s13751_s3 + $0xfe0] sm:$0xff] }
 0x346   : > { %3358 = vmatmul.f32.gmra.mxu3 %v9019_v34  ;;  %3393 = vmatmul.f32.gmra.mxu0 %v9022_v45  ;;  %v6853_v45 = vunpack.i.l.bf16 %v9089_v22 }
 0x347   : > { %2475 = vrot.lane.b32.xlu1 %v8904_v56, %s7024_s16  ;;  %3456 = vmatpush.msrb.mxu1 %v2976_v33  ;;  %v3020_v33 = vld [vmem:[%s13751_s3 + $0xae0] sm:$0xff] }
 0x348   : > { %6926 = vrot.lane.b32.xlu2 %v8816_v53, %s7026_s27  ;;  %v6940_v53 = vpack.i.bf16 %v2361_v40, %v8902_v7  ;;  %v2952_v40 = vld [vmem:[%s13751_s3 + $0x8c0] sm:$0xff]  ;;  %3576 = vmatpush.msra.mxu2 %v3180_v48 }
 0x349   : > { %3457 = vmatpush.msrb.mxu1 %v2972_v57  ;;  %v3176_v57 = vld [vmem:[%s13751_s3 + $0xfc0] sm:$0xff]  ;;  %3502 = vmatpush.msrb.mxu3 %v3020_v33 }
 0x34a   : > { %v9036_v30 = vpop.permute.xlu0 %6861  ;;  %3577 = vmatpush.msra.mxu2 %v3176_v57  ;;  %v3004_v48 = vld [vmem:[%s13751_s3 + $0xa60] sm:$0xff]  ;;  %v2182_v57 = vsel %vm2144_vm6, %v8923_v12, %v9013_v58 }
 0x34b   : > { %v13790_v13 = vunpack.i.l.bf16 %v9036_v30  ;;  %3458 = vmatpush.msrb.mxu1 %v2968_v23  ;;  %v3016_v23 = vld [vmem:[%s13751_s3 + $0xac0] sm:$0xff] }
 0x34c   : > { %3503 = vmatpush.msrb.mxu3 %v3016_v23  ;;  %3578 = vmatpush.msra.mxu2 %v3172_v59  ;;  %v9196_v33 = vld [vmem:[%s13751_s3 + $0xd60] sm:$0xff]  ;;  %v14058_v59 = vld [vmem:[#allocation43_spill] sm:$0xff] }
 0x34d   : > { %v9048_v50 = vsel %vm2481_vm7, %v6858_v41, %v13790_v13  ;;  %3459 = vmatpush.msrb.mxu1 %v2964_v18  ;;  %v9103_v41 = vpop.permute.xlu2 %2120  ;;  %v13789_v18 = vunpack.i.h.bf16 %v9036_v30  ;;  %v9215_v12 = vld [vmem:[%s13751_s3 + $0xd40] sm:$0xff] }
 0x34e   : > { %14055 = vst [vmem:[#allocation14_spill] sm:$0xff] %v9048_v50  ;;  %3434 = vmatmul.f32.gmra.mxu2 %v9048_v50 }
 0x34f   : > { %3460 = vmatpush.msrb.mxu1 %v2960_v5 }
 0x350   : > { %6941 = vrot.lane.b32.xlu2 %v6940_v53, %s7025_s26  ;;  %v9123_v53 = vld [vmem:[%s13751_s3 + $0xdc0] sm:$0xff] }
 0x351   : > { %3461 = vmatpush.msrb.mxu1 %v2956_v28  ;;  %3536 = vmatpush.msrb.mxu0 %v9123_v53  ;;  %v3012_v28 = vld [vmem:[%s13751_s3 + $0xaa0] sm:$0xff] }
 0x352   : > { %3504 = vmatpush.msrb.mxu3 %v3012_v28  ;;  %v9210_v28 = vpop.permute.xlu0 %2122 }
 0x353   : > { %3462 = vmatpush.msrb.mxu1 %v2952_v40  ;;  %3537 = vmatpush.msrb.mxu0 %v9149_v35  ;;  %v2928_v40 = vld [vmem:[%s13751_s3 + $0x800] sm:$0xff] }
 0x355   : > { %3463 = vmatpush.msrb.mxu1 %v2948_v24  ;;  %3538 = vmatpush.msrb.mxu0 %v9184_v19 }
 0x357   : > { %3464 = vmatpush.msrb.mxu1 %v2944_v62  ;;  %3539 = vmatpush.msrb.mxu0 %v9196_v33 }
 0x358   : > { %v9155_v38 = vpop.permute.xlu2 %6871 }
 0x359   : > { %3465 = vmatpush.msrb.mxu1 %v2940_v16  ;;  %v3008_v16 = vld [vmem:[%s13751_s3 + $0xa80] sm:$0xff]  ;;  %v6873_v23 = vunpack.i.l.bf16 %v9155_v38  ;;  %3540 = vmatpush.msrb.mxu0 %v9215_v12 }
 0x35a   : > { %3505 = vmatpush.msrb.mxu3 %v3008_v16  ;;  %v2278_v16 = vmax.f32 %v14058_v59, %v2182_v57  ;;  %v3092_v57 = vld [vmem:[%s13751_s3 + $0xd20] sm:$0xff] }
 0x35b   : > { %3466 = vmatpush.msrb.mxu1 %v2936_v27  ;;  %v13793_v27 = vunpack.i.h.bf16 %v9155_v38  ;;  %3541 = vmatpush.msrb.mxu0 %v3092_v57  ;;  %v3084_v59 = vld [vmem:[%s13751_s3 + $0xce0] sm:$0xff] }
 0x35c   : > { %3506 = vmatpush.msrb.mxu3 %v3004_v48  ;;  %v2996_v48 = vld [vmem:[%s13751_s3 + $0xa20] sm:$0xff] }
 0x35d   : > { %3467 = vmatpush.msrb.mxu1 %v2932_v25  ;;  %v3000_v25 = vld [vmem:[%s13751_s3 + $0xa40] sm:$0xff] }
 0x35e   : > { %3507 = vmatpush.msrb.mxu3 %v3000_v25  ;;  %v3156_v25 = vld [vmem:[%s13751_s3 + $0xf20] sm:$0xff] }
 0x35f   : > { %3468 = vmatpush.msrb.mxu1 %v2928_v40 }
 0x360   : > { %v9135_v21 = vpop.permute.xlu1 %6866  ;;  %3508 = vmatpush.msrb.mxu3 %v2996_v48  ;;  %v3148_v48 = vld [vmem:[%s13751_s3 + $0xee0] sm:$0xff] }
 0x361   : > { %v13795_v31 = vunpack.i.h.bf16 %v9135_v21  ;;  %v6868_v5 = vunpack.i.l.bf16 %v9135_v21 }
 0x362   : > { %3509 = vmatpush.msrb.mxu3 %v2992_v61  ;;  %v3144_v61 = vld [vmem:[%s13751_s3 + $0xec0] sm:$0xff] }
 0x363   : > { %v9161_v24 = vsel %vm1057_vm5, %v8797_v1, %v13795_v31  ;;  %v9166_v51 = vsel %vm1057_vm5, %v6849_v0, %v6868_v5  ;;  %v9171_v62 = vsel %vm2481_vm7, %v6868_v5, %v13789_v18  ;;  %v3168_v0 = vld [vmem:[%s13751_s3 + $0xf80] sm:$0xff] }
 0x364   : > { %14056 = vst [vmem:[#allocation16_spill] sm:$0xff] %v9166_v51  ;;  %3361 = vmatmul.f32.gmra.mxu3 %v9161_v24  ;;  %3396 = vmatmul.f32.gmra.mxu0 %v9166_v51  ;;  %v3164_v5 = vld [vmem:[%s13751_s3 + $0xf60] sm:$0xff] }
 0x365   : > { %14057 = vst [vmem:[#allocation19_spill] sm:$0xff] %v9171_v62  ;;  %3437 = vmatmul.f32.gmra.mxu2 %v9171_v62  ;;  %v14059_v18 = vld [vmem:[#allocation46_spill] sm:$0xff]  ;;  %6598 = vmatpush.msra.mxu3 %v9111_v42  ;;  %v14065_v62 = vunpack.i.l.bf16 %v8955_v8 }
 0x366   : > { %3579 = vmatpush.msra.mxu2 %v3168_v0  ;;  %v3160_v0 = vld [vmem:[%s13751_s3 + $0xf40] sm:$0xff] }
 0x367   : > { %v3076_v42 = vld [vmem:[%s13751_s3 + $0xca0] sm:$0xff]  ;;  %6599 = vmatpush.msra.mxu3 %v9123_v53 }
 0x368   : > { %v2119_v40 = vpop.permute.xlu1 %2118  ;;  %3580 = vmatpush.msra.mxu2 %v3164_v5 }
 0x369   : > { %v2184_v58 = vsel %vm2144_vm6, %v8937_v4, %v2119_v40  ;;  %v9232_v4 = vsel %vm1057_vm5, %v8874_v47, %v13793_v27  ;;  %6600 = vmatpush.msra.mxu3 %v9149_v35  ;;  %v3132_v35 = vld [vmem:[%s13751_s3 + $0xe60] sm:$0xff] }
 0x36a   : > { %v2280_v13 = vmax.f32 %v14059_v18, %v2184_v58  ;;  %v9237_v18 = vsel %vm1057_vm5, %v6859_v32, %v6873_v23  ;;  %v9251_v32 = vpop.permute.xlu2 %2128  ;;  %3581 = vmatpush.msra.mxu2 %v3160_v0  ;;  %v3152_v58 = vld [vmem:[%s13751_s3 + $0xf00] sm:$0xff] }
 0x36b   : > { %14060 = vst [vmem:[#allocation20_spill] sm:$0xff] %v9237_v18  ;;  %6601 = vmatpush.msra.mxu3 %v9184_v19  ;;  %v3128_v19 = vld [vmem:[%s13751_s3 + $0xe40] sm:$0xff] }
 0x36c   : > { %v2308_v5 = vmax.f32 %v2278_v16, %v2280_v13  ;;  %3364 = vmatmul.f32.gmra.mxu3 %v9232_v4  ;;  %3399 = vmatmul.f32.gmra.mxu0 %v9237_v18  ;;  %v3088_v13 = vld [vmem:[%s13751_s3 + $0xd00] sm:$0xff] }
 0x36d   : > { %3582 = vmatpush.msra.mxu2 %v3156_v25  ;;  %3542 = vmatpush.msrb.mxu0 %v3088_v13  ;;  %v3080_v25 = vld [vmem:[%s13751_s3 + $0xcc0] sm:$0xff] }
 0x36e   : > { %v2338_v40 = vadd.f32 %v8549_v20, %v2308_v5  ;;  %6602 = vmatpush.msra.mxu3 %v9196_v33  ;;  %v9331_v33 = vld [vmem:[%s13751_s3 + $0xc00] sm:$0xff] }
 0x36f   : > { %3583 = vmatpush.msra.mxu2 %v3152_v58  ;;  %3543 = vmatpush.msrb.mxu0 %v3084_v59  ;;  %v3140_v58 = vld [vmem:[%s13751_s3 + $0xea0] sm:$0xff] }
 0x370   : > { %v9263_v16 = vmax.f32 %v2338_v40, 0.0  ;;  %v9265_v0 = vpop.permute.xlu0 %6876  ;;  %6603 = vmatpush.msra.mxu3 %v9215_v12 }
 0x371   : > { %v13791_v5 = vunpack.i.l.bf16 %v9265_v0  ;;  %3584 = vmatpush.msra.mxu2 %v3148_v48  ;;  %3544 = vmatpush.msrb.mxu0 %v3080_v25  ;;  %v3136_v48 = vld [vmem:[%s13751_s3 + $0xe80] sm:$0xff] }
 0x372   : > { %2479 = vrot.lane.b32.xlu1 %v9263_v16, %s7024_s16  ;;  %v2125_v53 = vpop.permute.xlu2 %2124  ;;  %6604 = vmatpush.msra.mxu3 %v3092_v57  ;;  %s6258_s16 = scalar_lea.sflag [#allocation4], %s7196_s28 }
 0x373   : > { %v9283_v40 = vsel %vm2481_vm7, %v6873_v23, %v13791_v5  ;;  %3585 = vmatpush.msra.mxu2 %v3144_v61  ;;  %v3072_v23 = vld [vmem:[%s13751_s3 + $0xc80] sm:$0xff]  ;;  %3545 = vmatpush.msrb.mxu0 %v3076_v42 }
 0x374   : > { %14061 = vst [vmem:[#allocation17_spill] sm:$0xff] %v9283_v40  ;;  %3440 = vmatmul.f32.gmra.mxu2 %v9283_v40  ;;  %v3068_v5 = vld [vmem:[%s13751_s3 + $0xc60] sm:$0xff]  ;;  %6605 = vmatpush.msra.mxu3 %v3088_v13 }
 0x375   : > { %3586 = vmatpush.msra.mxu2 %v3140_v58  ;;  %3546 = vmatpush.msrb.mxu0 %v3072_v23  ;;  %v9321_v58 = vld [vmem:[%s13751_s3 + $0xc20] sm:$0xff] }
 0x376   : > { %6606 = vmatpush.msra.mxu3 %v3084_v59  ;;  %v14068_v59 = vld [vmem:[#allocation42_spill] sm:$0xff] }
 0x377   : > { %3587 = vmatpush.msra.mxu2 %v3136_v48  ;;  %3547 = vmatpush.msrb.mxu0 %v3068_v5  ;;  %v3124_v48 = vld [vmem:[%s13751_s3 + $0xe20] sm:$0xff] }
 0x378   : > { %v9304_v61 = vpop.permute.xlu0 %6886  ;;  %6607 = vmatpush.msra.mxu3 %v3080_v25 }
 0x379   : > { %3588 = vmatpush.msra.mxu2 %v3132_v35  ;;  %3548 = vmatpush.msrb.mxu0 %v9312_v26  ;;  %v3120_v35 = vld [vmem:[%s13751_s3 + $0xe00] sm:$0xff] }
 0x37a   : > { %v9343_v6 = vpop.permute.xlu2 %6906  ;;  %6608 = vmatpush.msra.mxu3 %v3076_v42 }
 0x37b   : > { %3589 = vmatpush.msra.mxu2 %v3128_v19  ;;  %3549 = vmatpush.msrb.mxu0 %v9321_v58  ;;  %v13804_v19 = vunpack.i.h.bf16 %v9265_v0  ;;  %v6908_v25 = vunpack.i.l.bf16 %v9343_v6 }
 0x37c   : > { %6609 = vmatpush.msra.mxu3 %v3072_v23  ;;  %v14071_v23 = vunpack.i.h.bf16 %v9155_v38 }
 0x37d   : > { %3590 = vmatpush.msra.mxu2 %v3124_v48  ;;  %3550 = vmatpush.msrb.mxu0 %v9331_v33  ;;  %v14062_v48 = vunpack.i.h.bf16 %v9135_v21  ;;  %v2185_v21 = vsel %vm2144_vm6, %v9103_v41, %v9210_v28 }
 0x37e   : > { %6610 = vmatpush.msra.mxu3 %v3068_v5 }
 0x37f   : > { %3591 = vmatpush.msra.mxu2 %v3120_v35 }
 0x380   : > { %v9337_v12 = vpop.permute.xlu0 %6896  ;;  %v9339_v27 = vpop.permute.xlu1 %6881  ;;  %6611 = vmatpush.msra.mxu3 %v9312_v26 }
 0x381   : > { %v6899_v57 = vunpack.i.h.bf16 %v9337_v12  ;;  %v6884_v31 = vunpack.i.h.bf16 %v9339_v27  ;;  %v6883_v18 = vunpack.i.l.bf16 %v9339_v27 }
 0x382   : > { %6612 = vmatpush.msra.mxu3 %v9321_v58  ;;  %v1922_v58 = vpop.f32.mrf.mxu2 }
 0x383   : > { %v9350_v13 = vsel %vm1057_vm5, %v8902_v7, %v6884_v31  ;;  %v9355_v40 = vsel %vm1057_vm5, %v14062_v48, %v6883_v18  ;;  %v9360_v51 = vsel %vm2481_vm7, %v6883_v18, %v13804_v19  ;;  %v9365_v27 = vsel %vm2481_vm7, %v14065_v62, %v6899_v57  ;;  %v14067_v18 = vld [vmem:[#allocation47_spill] sm:$0xff]  ;;  %v14069_v19 = vld [vmem:[#allocation49_spill] sm:$0xff] }
 0x384   : > { %14063 = vst [vmem:[#allocation21_spill] sm:$0xff] %v9355_v40  ;;  %3367 = vmatmul.f32.gmra.mxu3 %v9350_v13  ;;  %3402 = vmatmul.f32.gmra.mxu0 %v9355_v40  ;;  %v1383_v35 = vadd.f32 %v14068_v59, %v14067_v18  ;;  %v2186_v62 = vsel %vm2144_vm6, %v9210_v28, %v2125_v53  ;;  %v13817_v48 = vunpack.i.l.bf16 %v9337_v12  ;;  %v14070_v40 = vld [vmem:[#allocation45_spill] sm:$0xff] }
 0x385   : > { %14064 = vst [vmem:[#allocation23_spill] sm:$0xff] %v9360_v51  ;;  %3443 = vmatmul.f32.gmra.mxu2 %v9360_v51  ;;  %3469 = vmatmul.f32.vlgmr.msrb.gmra.mxu1 %v9365_v27  ;;  %v1386_v51 = vadd.f32 %v14070_v40, %v14069_v19  ;;  %v2282_v53 = vmax.f32 %v8270_v29, %v2186_v62  ;;  %v6909_v62 = vunpack.i.h.bf16 %v9343_v6 }
 0x386   : > { %14066 = vst [vmem:[#allocation22_spill] sm:$0xff] %v9365_v27  ;;  %v2281_v41 = vmax.f32 %v1383_v35, %v2185_v21  ;;  %v9395_v21 = vsel %vm1057_vm5, %v14071_v23, %v6908_v25  ;;  %6613 = vmatpush.msra.mxu3 %v9331_v33  ;;  %v6888_v33 = vunpack.i.l.bf16 %v9304_v61 }
 0x387   : > { %14072 = vst [vmem:[#allocation24_spill] sm:$0xff] %v9395_v21 }
 0x388   : > { %v2127_v50 = vpop.permute.xlu1 %2126  ;;  %v2131_v17 = vpop.permute.xlu0 %2130 }
 0x389   : > { %v2187_v42 = vsel %vm2144_vm6, %v2127_v50, %v9251_v32  ;;  %v9385_v18 = vpop.permute.xlu2 %6911  ;;  %v2188_v28 = vsel %vm2144_vm6, %v9251_v32, %v2131_v17  ;;  %v9400_v50 = vsel %vm2481_vm7, %v6908_v25, %v13817_v48  ;;  %v9403_v17 = vsel %vm2548_vm8, %v6899_v57, %v6853_v45 }
 0x38a   : > { %v2283_v59 = vmax.f32 %v1386_v51, %v2187_v42  ;;  %v6914_v40 = vunpack.i.h.bf16 %v9385_v18  ;;  %v2284_v19 = vmax.f32 %v14040_v15, %v2188_v28  ;;  %14073 = vst [vmem:[#allocation26_spill] sm:$0xff] %v9400_v50  ;;  %v14074_v15 = vunpack.i.h.bf16 %v8955_v8 }
 0x38b   : > { %v13815_v35 = vunpack.i.l.bf16 %v9385_v18 }
 0x38c   : > { %v2309_v29 = vmax.f32 %v2281_v41, %v2283_v59  ;;  %v2310_v51 = vmax.f32 %v2282_v53, %v2284_v19  ;;  %3405 = vmatmul.f32.gmra.mxu0 %v9395_v21  ;;  %v9409_v32 = vsel %vm2481_vm7, %v14074_v15, %v6914_v40  ;;  %3510 = vmatmul.f32.vlgmr.msrb.gmra.mxu3 %v9403_v17  ;;  %v6854_v41 = vunpack.i.h.bf16 %v9089_v22 }
 0x38d   : > { %14075 = vst [vmem:[#allocation25_spill] sm:$0xff] %v9409_v32  ;;  %3446 = vmatmul.f32.gmra.mxu2 %v9400_v50  ;;  %3472 = vmatmul.f32.gmra.mxu1 %v9409_v32  ;;  %v9434_v53 = vsel %vm1057_vm5, %v6884_v31, %v6909_v62  ;;  %v9442_v6 = vsel %vm2481_vm7, %v6909_v62, %v13815_v35  ;;  %v1833_v31 = vpop.f32.mrf.mxu0  ;;  %v14084_v35 = vld [vmem:[#allocation54_spill] sm:$0xff] }
 0x38e   : > { %v2339_v38 = vadd.f32 %v8480_v3, %v2309_v29  ;;  %v9416_v5 = vadd.f32 %v8549_v20, %v2310_v51  ;;  %14076 = vst [vmem:[#allocation27_spill] sm:$0xff] %v9434_v53  ;;  %v9445_v22 = vsel %vm2548_vm8, %v6914_v40, %v6854_v41  ;;  %v1923_v59 = vadd.f32 %v1922_v58, %v1833_v31 }
 0x38f   : > { %14077 = vst [vmem:[#allocation28_spill] sm:$0xff] %v9442_v6  ;;  %v6889_v29 = vunpack.i.h.bf16 %v9304_v61  ;;  %v9458_v15 = vsel %vm2548_vm8, %v6853_v45, %v6888_v33 }
 0x390   : > { %v2363_v57 = vmax.f32 %v2339_v38, 0.0  ;;  %v13816_v8 = vmax.f32 %v9416_v5, 0.0  ;;  %14078 = vst [vmem:[#allocation29_spill] sm:$0xff] %v9458_v15  ;;  %v14079_v38 = vunpack.i.l.bf16 %v9036_v30 }
 0x391   : > { %v9423_v25 = vpop.permute.xlu1 %6891  ;;  %v9426_v42 = vpop.permute.xlu0 %2134 }
 0x392   : > { %2607 = vrot.lane.b32.xlu0 %v2363_v57, %s7026_s27  ;;  %2546 = vrot.lane.b32.xlu1 %v13816_v8, %s7025_s26  ;;  %v6945_v26 = vpack.i.bf16 %v2363_v57, %v8904_v56  ;;  %v2133_v28 = vpop.permute.xlu2 %2132  ;;  %v13820_v19 = vunpack.i.l.bf16 %v9423_v25  ;;  %v14085_v8 = vld [vmem:[#allocation50_spill] sm:$0xff] }
 0x393   : > { %v1392_v48 = vadd.f32 %v14085_v8, %v14084_v35 }
 0x394   : > { %6946 = vrot.lane.b32.xlu2 %v6945_v26, %s7025_s26  ;;  %3408 = vmatmul.f32.gmra.mxu0 %v9434_v53  ;;  %v9478_v45 = vsel %vm2615_vm9, %v6888_v33, %v13820_v19  ;;  %v2189_v26 = vsel %vm2144_vm6, %v2133_v28, %v9426_v42  ;;  %v13823_v28 = vunpack.i.h.bf16 %v9423_v25 }
 0x395   : > { %3449 = vmatmul.f32.gmra.mxu2 %v9442_v6  ;;  %3513 = vmatmul.f32.gmra.mxu3 %v9445_v22  ;;  %14081 = vst [vmem:[#allocation31_spill] sm:$0xff] %v9478_v45 }
 0x399   : > { %v6902_v23 = vpop.permute.xlu1 %6901  ;;  %v9455_v40 = vpop.permute.xlu0 %6916 }
 0x39a   : > { %v6903_v51 = vunpack.i.l.bf16 %v6902_v23  ;;  %2585 = vrot.lane.b32.xlu0 %v8695_v49, %s7026_s27  ;;  %2136 = vrot.lane.b32.xlu1 %v1923_v59, %s7023_s17  ;;  %v9471_v49 = vpop.permute.xlu2 %2140  ;;  %v6918_v62 = vunpack.i.l.bf16 %v9455_v40  ;;  %v6904_v58 = vunpack.i.h.bf16 %v6902_v23  ;;  %v6919_v31 = vunpack.i.h.bf16 %v9455_v40  ;;  %v14082_v59 = vld [vmem:[#allocation52_spill] sm:$0xff] }
 0x39c   : > { %2542 = vrot.lane.b32.xlu2 %v9263_v16, %s7025_s26  ;;  %v9465_v57 = vsel %vm2481_vm7, %v14079_v38, %v6903_v51  ;;  %v9468_v61 = vsel %vm2548_vm8, %v6903_v51, %v6889_v29  ;;  %3551 = vmatmul.f32.vlgmr.msrb.gmra.mxu0 %v9458_v15  ;;  %v14083_v51 = vld [vmem:[#allocation48_spill] sm:$0xff]  ;;  %v9497_v19 = vsel %vm2548_vm8, %v6854_v41, %v6918_v62  ;;  %s473_s26 = scalar_lea.vmem [#allocation3], %s6343_s25 }
 0x39d   : > { %14080 = vst [vmem:[#allocation30_spill] sm:$0xff] %v9465_v57  ;;  %3475 = vmatmul.f32.gmra.mxu1 %v9465_v57  ;;  %3516 = vmatmul.f32.gmra.mxu3 %v9468_v61  ;;  %v1389_v38 = vadd.f32 %v14083_v51, %v14082_v59  ;;  %v14087_v59 = vunpack.i.h.bf16 %v9036_v30  ;;  %v9505_v8 = vsel %vm2548_vm8, %v6904_v58, %v6919_v31 }
 0x39e   : > { %3592 = vmatmul.f32.vlgmr.msra.gmra.mxu2 %v9478_v45  ;;  %14086 = vst [vmem:[#allocation32_spill] sm:$0xff] %v9497_v19 }
 0x39f   : > { %v2285_v23 = vmax.f32 %v1389_v38, %v2189_v26  ;;  %v9502_v35 = vsel %vm2481_vm7, %v14087_v59, %v6904_v58  ;;  %14089 = vst [vmem:[#allocation35_spill] sm:$0xff] %v9505_v8  ;;  %v1836_v59 = vpop.f32.mrf.mxu0 }
 0x3a0   : > { %14088 = vst [vmem:[#allocation33_spill] sm:$0xff] %v9502_v35 }
 0x3a1   : > { %v2139_v15 = vpop.permute.xlu1 %2138 }
 0x3a2   : > { %v2191_v33 = vsel %vm2144_vm6, %v2139_v15, %v9471_v49  ;;  %2589 = vrot.lane.b32.xlu0 %v8797_v1, %s7026_s27  ;;  %2593 = vrot.lane.b32.xlu1 %v8874_v47, %s7026_s27  ;;  %v6932_v15 = vpop.permute.xlu0 %6931  ;;  %v9513_v47 = vsel %vm2615_vm9, %v6918_v62, %v13823_v28  ;;  %v14091_v62 = vunpack.i.l.bf16 %v9265_v0 }
 0x3a3   : > { %v2287_v40 = vmax.f32 %v1392_v48, %v2191_v33  ;;  %14090 = vst [vmem:[#allocation57_spill] sm:$0xff] %v9513_v47  ;;  %v9517_v48 = vpop.permute.xlu2 %6926  ;;  %v6933_v41 = vunpack.i.l.bf16 %v6932_v15 }
 0x3a4   : > { %3554 = vmatmul.f32.gmra.mxu0 %v9497_v19  ;;  %v13822_v51 = vunpack.i.l.bf16 %v9517_v48 }
 0x3a5   : > { %v2311_v1 = vmax.f32 %v2285_v23, %v2287_v40  ;;  %3478 = vmatmul.f32.gmra.mxu1 %v9502_v35  ;;  %3519 = vmatmul.f32.gmra.mxu3 %v9505_v8 }
 0x3a6   : > { %3595 = vmatmul.f32.gmra.mxu2 %v9513_v47 }
 0x3a7   : > { %v2341_v30 = vadd.f32 %v8480_v3, %v2311_v1  ;;  %v9528_v3 = vsel %vm2481_vm7, %v14091_v62, %v6933_v41  ;;  %v6934_v1 = vunpack.i.h.bf16 %v6932_v15 }
 0x3a8   : > { %14092 = vst [vmem:[#allocation36_spill] sm:$0xff] %v9528_v3 }
 0x3a9   : > { %v2365_v26 = vmax.f32 %v2341_v30, 0.0  ;;  %v6922_v58 = vpop.permute.xlu1 %6921 }
 0x3aa   : > { %v6924_v38 = vunpack.i.h.bf16 %v6922_v58  ;;  %v6923_v33 = vunpack.i.l.bf16 %v6922_v58  ;;  %2601 = vrot.lane.b32.xlu0 %v8904_v56, %s7026_s27  ;;  %2605 = vrot.lane.b32.xlu1 %v9263_v16, %s7026_s27  ;;  %v1925_v16 = vpop.f32.mrf.mxu2 }
 0x3ab   : > { %2611 = vrot.lane.b32.xlu2 %v2365_v26, %s7026_s27  ;;  %v1926_v30 = vadd.f32 %v1925_v16, %v1836_v59 }
 0x3ac   : > { %v9531_v23 = vsel %vm2548_vm8, %v6933_v41, %v6924_v38  ;;  %v9534_v40 = vsel %vm2548_vm8, %v6889_v29, %v6923_v33  ;;  %v9539_v56 = vsel %vm2615_vm9, %v6923_v33, %v13822_v51  ;;  %v13821_v29 = vunpack.i.h.bf16 %v9517_v48 }
 0x3ad   : > { %14093 = vst [vmem:[#allocation34_spill] sm:$0xff] %v9531_v23  ;;  %3481 = vmatmul.f32.gmra.mxu1 %v9528_v3  ;;  %3522 = vmatmul.f32.gmra.mxu3 %v9531_v23  ;;  %v14096_v33 = vunpack.i.h.bf16 %v9265_v0  ;;  %v9571_v0 = vpop.permute.xlu2 %6941 }
 0x3ae   : > { %14094 = vst [vmem:[#allocation40_spill] sm:$0xff] %v9534_v40  ;;  %3557 = vmatmul.f32.gmra.mxu0 %v9534_v40  ;;  %3598 = vmatmul.f32.gmra.mxu2 %v9539_v56 }
 0x3af   : > { %14095 = vst [vmem:[#allocation38_spill] sm:$0xff] %v9539_v56  ;;  %v9554_v62 = vsel %vm2481_vm7, %v14096_v33, %v6934_v1  ;;  %v14101_v33 = vunpack.i.l.bf16 %v9337_v12  ;;  %v2733_v12 = vld [vmem:[%s13751_s3 + $0x1e8] sm:$0xff] }
 0x3b0   : > { %14097 = vst [vmem:[#allocation51_spill] sm:$0xff] %v9554_v62  ;;  %3699 = vmatpush.msra.mxu0 %v2733_v12  ;;  %v2713_v12 = vld [vmem:[%s13751_s3 + $0x148] sm:$0xff] }
 0x3b1   : > { %v9545_v41 = vpop.permute.xlu1 %6936 }
 0x3b2   : > { %v13825_v26 = vunpack.i.h.bf16 %v9545_v41  ;;  %v6938_v58 = vunpack.i.l.bf16 %v9545_v41 }
 0x3b3   : > { %2142 = vrot.lane.b32.xlu2 %v1926_v30, %s7023_s17 }
 0x3b4   : > { %v9559_v15 = vsel %vm2548_vm8, %v6934_v1, %v13825_v26  ;;  %v9562_v16 = vsel %vm2548_vm8, %v6919_v31, %v6938_v58  ;;  %v9567_v59 = vsel %vm2615_vm9, %v6938_v58, %v13821_v29  ;;  %v6943_v1 = vunpack.i.l.bf16 %v9571_v0  ;;  %v9579_v58 = vpop.permute.xlu0 %2599  ;;  %v3216_v26 = vld [vmem:[%s13751_s3 + $0x1100] sm:$0xff] }
 0x3b5   : > { %14098 = vst [vmem:[#allocation59_spill] sm:$0xff] %v9559_v15  ;;  %3484 = vmatmul.f32.gmra.mxu1 %v9554_v62  ;;  %3525 = vmatmul.f32.gmra.mxu3 %v9559_v15  ;;  %v13824_v31 = vunpack.i.h.bf16 %v9571_v0 }
 0x3b6   : > { %14099 = vst [vmem:[#allocation41_spill] sm:$0xff] %v9562_v16  ;;  %3560 = vmatmul.f32.gmra.mxu0 %v9562_v16  ;;  %3601 = vmatmul.f32.gmra.mxu2 %v9567_v59  ;;  %v9593_v28 = vsel %vm2615_vm9, %v6943_v1, %v9579_v58  ;;  %v3248_v16 = vld [vmem:[%s13751_s3 + $0x1200] sm:$0xff] }
 0x3b7   : > { %14100 = vst [vmem:[#allocation37_spill] sm:$0xff] %v9567_v59  ;;  %v2753_v59 = vld [vmem:[%s13751_s3 + $0x288] sm:$0xff] }
 0x3b8   : > { %14104 = vst [vmem:[#allocation58_spill] sm:$0xff] %v9593_v28 }
 0x3b9   : > { %v2476_v30 = vpop.permute.xlu1 %2475 }
 0x3ba   : > { %v9584_v29 = vsel %vm2481_vm7, %v14101_v33, %v2476_v30  ;;  %v9589_v51 = vsel %vm2548_vm8, %v2476_v30, %v13824_v31  ;;  %v14106_v30 = vmax.f32 %v9416_v5, 0.0  ;;  %v2729_v33 = vld [vmem:[%s13751_s3 + $0x1c8] sm:$0xff]  ;;  %v3232_v31 = vld [vmem:[%s13751_s3 + $0x1180] sm:$0xff] }
 0x3bb   : > { %2597 = vrot.lane.b32.xlu2 %v8902_v7, %s7026_s27  ;;  %14102 = vst [vmem:[#allocation44_spill] sm:$0xff] %v9584_v29  ;;  %v9598_v7 = vsel %vm2548_vm8, %v6924_v38, %v6943_v1  ;;  %3700 = vmatpush.msra.mxu0 %v2729_v33  ;;  %v2725_v38 = vld [vmem:[%s13751_s3 + $0x1a8] sm:$0xff] }
 0x3bc   : > { %14103 = vst [vmem:[#allocation39_spill] sm:$0xff] %v9589_v51  ;;  %v2721_v1 = vld [vmem:[%s13751_s3 + $0x188] sm:$0xff] }
 0x3bd   : > { %3487 = vmatmul.f32.gmra.mxu1 %v9584_v29  ;;  %3528 = vmatmul.f32.gmra.mxu3 %v9589_v51  ;;  %14105 = vst [vmem:[#allocation55_spill] sm:$0xff] %v9598_v7  ;;  %v2717_v5 = vld [vmem:[%s13751_s3 + $0x168] sm:$0xff] }
 0x3be   : > { %3563 = vmatmul.f32.gmra.mxu0 %v9598_v7  ;;  %3604 = vmatmul.f32.gmra.mxu2 %v9593_v28  ;;  %v2709_v33 = vld [vmem:[%s13751_s3 + $0x128] sm:$0xff] }
 0x3bf   : > { %3701 = vmatpush.msra.mxu0 %v2725_v38  ;;  %v3240_v38 = vld [vmem:[%s13751_s3 + $0x11c0] sm:$0xff]  ;;  %v2769_v28 = vld [vmem:[%s13751_s3 + $0x308] sm:$0xff] }
 0x3c1   : > { %3702 = vmatpush.msra.mxu0 %v2721_v1  ;;  %v2705_v1 = vld [vmem:[%s13751_s3 + $0x108] sm:$0xff] }
 0x3c3   : > { %2609 = vrot.lane.b32.xlu2 %v14106_v30, %s7026_s27  ;;  %3703 = vmatpush.msra.mxu0 %v2717_v5  ;;  %v3244_v30 = vld [vmem:[%s13751_s3 + $0x11e0] sm:$0xff] }
 0x3c4   : > { %3617 = vmatpush.msra.mxu1 %v3244_v30  ;;  %v3236_v5 = vld [vmem:[%s13751_s3 + $0x11a0] sm:$0xff]  ;;  %v2697_v30 = vld [vmem:[%s13751_s3 + $0xc8] sm:$0xff] }
 0x3c5   : > { %3704 = vmatpush.msra.mxu0 %v2713_v12  ;;  %v2701_v12 = vld [vmem:[%s13751_s3 + $0xe8] sm:$0xff] }
 0x3c6   : > { %3618 = vmatpush.msra.mxu1 %v3240_v38  ;;  %v2693_v38 = vld [vmem:[%s13751_s3 + $0xa8] sm:$0xff] }
 0x3c7   : > { %3705 = vmatpush.msra.mxu0 %v2709_v33  ;;  %v3228_v33 = vld [vmem:[%s13751_s3 + $0x1160] sm:$0xff] }
 0x3c8   : > { %3619 = vmatpush.msra.mxu1 %v3236_v5  ;;  %v3224_v5 = vld [vmem:[%s13751_s3 + $0x1140] sm:$0xff] }
 0x3c9   : > { %3706 = vmatpush.msra.mxu0 %v2705_v1  ;;  %v2797_v1 = vld [vmem:[%s13751_s3 + $0x3e8] sm:$0xff] }
 0x3ca   : > { %3620 = vmatpush.msra.mxu1 %v3232_v31  ;;  %3740 = vmatpush.msrb.mxu2 %v2797_v1  ;;  %v2689_v31 = vld [vmem:[%s13751_s3 + $0x88] sm:$0xff] }
 0x3cb   : > { %3707 = vmatpush.msra.mxu0 %v2701_v12  ;;  %v2793_v12 = vld [vmem:[%s13751_s3 + $0x3c8] sm:$0xff] }
 0x3cc   : > { %3621 = vmatpush.msra.mxu1 %v3228_v33  ;;  %v2789_v33 = vld [vmem:[%s13751_s3 + $0x3a8] sm:$0xff]  ;;  %3741 = vmatpush.msrb.mxu2 %v2793_v12  ;;  %v3212_v12 = vld [vmem:[%s13751_s3 + $0x10e0] sm:$0xff] }
 0x3cd   : > { %3708 = vmatpush.msra.mxu0 %v2697_v30  ;;  %v3220_v30 = vld [vmem:[%s13751_s3 + $0x1120] sm:$0xff]  ;;  %v2685_v1 = vld [vmem:[%s13751_s3 + $0x68] sm:$0xff] }
 0x3ce   : > { %3622 = vmatpush.msra.mxu1 %v3224_v5  ;;  %3742 = vmatpush.msrb.mxu2 %v2789_v33  ;;  %v2681_v5 = vld [vmem:[%s13751_s3 + $0x48] sm:$0xff]  ;;  %v3208_v33 = vld [vmem:[%s13751_s3 + $0x10c0] sm:$0xff] }
 0x3cf   : > { %3709 = vmatpush.msra.mxu0 %v2693_v38  ;;  %v2785_v38 = vld [vmem:[%s13751_s3 + $0x388] sm:$0xff] }
 0x3d0   : > { %3623 = vmatpush.msra.mxu1 %v3220_v30  ;;  %3743 = vmatpush.msrb.mxu2 %v2785_v38  ;;  %v2677_v30 = vld [vmem:[%s13751_s3 + $0x28] sm:$0xff] }
 0x3d1   : > { %3710 = vmatpush.msra.mxu0 %v2689_v31  ;;  %v2781_v31 = vld [vmem:[%s13751_s3 + $0x368] sm:$0xff] }
 0x3d2   : > { %3624 = vmatpush.msra.mxu1 %v3216_v26  ;;  %3744 = vmatpush.msrb.mxu2 %v2781_v31  ;;  %v2777_v26 = vld [vmem:[%s13751_s3 + $0x348] sm:$0xff] }
 0x3d3   : > { %3711 = vmatpush.msra.mxu0 %v2685_v1  ;;  %v2673_v1 = vld [vmem:[%s13751_s3 + $0x8] sm:$0xff] }
 0x3d4   : > { %3625 = vmatpush.msra.mxu1 %v3212_v12  ;;  %v3268_v12 = vld [vmem:[%s13751_s3 + $0x12a0] sm:$0xff]  ;;  %v2773_v31 = vld [vmem:[%s13751_s3 + $0x328] sm:$0xff]  ;;  %3745 = vmatpush.msrb.mxu2 %v2777_v26 }
 0x3d5   : > { %3712 = vmatpush.msra.mxu0 %v2681_v5  ;;  %v3204_v5 = vld [vmem:[%s13751_s3 + $0x10a0] sm:$0xff]  ;;  %3668 = vmatpush.msrb.mxu3 %v3268_v12  ;;  %v2765_v12 = vld [vmem:[%s13751_s3 + $0x2e8] sm:$0xff] }
 0x3d6   : > { %3626 = vmatpush.msra.mxu1 %v3208_v33  ;;  %v3200_v33 = vld [vmem:[%s13751_s3 + $0x1080] sm:$0xff]  ;;  %3746 = vmatpush.msrb.mxu2 %v2773_v31  ;;  %v2761_v31 = vld [vmem:[%s13751_s3 + $0x2c8] sm:$0xff] }
 0x3d7   : > { %3713 = vmatpush.msra.mxu0 %v2677_v30  ;;  %v14107_v30 = vunpack.i.l.bf16 %v9385_v18  ;;  %v3196_v18 = vld [vmem:[%s13751_s3 + $0x1060] sm:$0xff] }
 0x3d8   : > { %3627 = vmatpush.msra.mxu1 %v3204_v5  ;;  %3747 = vmatpush.msrb.mxu2 %v2769_v28  ;;  %v3260_v26 = vld [vmem:[%s13751_s3 + $0x1260] sm:$0xff] }
 0x3d9   : > { %3714 = vmatpush.msra.mxu0 %v2673_v1  ;;  %v3264_v1 = vld [vmem:[%s13751_s3 + $0x1280] sm:$0xff] }
 0x3da   : > { %3669 = vmatpush.msrb.mxu3 %v3264_v1  ;;  %3628 = vmatpush.msra.mxu1 %v3200_v33  ;;  %v3192_v5 = vld [vmem:[%s13751_s3 + $0x1040] sm:$0xff]  ;;  %v2757_v1 = vld [vmem:[%s13751_s3 + $0x2a8] sm:$0xff] }
 0x3db   : > { %3748 = vmatpush.msrb.mxu2 %v2765_v12  ;;  %v3256_v28 = vld [vmem:[%s13751_s3 + $0x1240] sm:$0xff] }
 0x3dc   : > { %3670 = vmatpush.msrb.mxu3 %v3260_v26  ;;  %3629 = vmatpush.msra.mxu1 %v3196_v18  ;;  %v3252_v33 = vld [vmem:[%s13751_s3 + $0x1220] sm:$0xff] }
 0x3dd   : > { %3749 = vmatpush.msrb.mxu2 %v2761_v31 }
 0x3de   : > { %3671 = vmatpush.msrb.mxu3 %v3256_v28  ;;  %3630 = vmatpush.msra.mxu1 %v3192_v5  ;;  %v3184_v28 = vld [vmem:[%s13751_s3 + $0x1000] sm:$0xff]  ;;  %v9761_v5 = vpop.permute.xlu0 %2603 }
 0x3df   : > { %3750 = vmatpush.msrb.mxu2 %v2757_v1 }
 0x3e0   : > { %3672 = vmatpush.msrb.mxu3 %v3252_v33 }
 0x3e1   : > { %3751 = vmatpush.msrb.mxu2 %v2753_v59  ;;  %v2741_v59 = vld [vmem:[%s13751_s3 + $0x228] sm:$0xff] }
 0x3e2   : > { %3673 = vmatpush.msrb.mxu3 %v3248_v16  ;;  %v9784_v16 = vpop.f32.mrf.mxu0 }
 0x3e3   : > { %14113 = vst [vmem:[#allocation47_spill] sm:$0xff] %v9784_v16  ;;  %v14117_v16 = vld [vmem:[#allocation8_spill] sm:$0xff] }
 0x3e4   : > { %v2480_v38 = vpop.permute.xlu1 %2479 }
 0x3e5   : > { %v9713_v7 = vsel %vm2481_vm7, %v14107_v30, %v2480_v38  ;;  %v3188_v30 = vld [vmem:[%s13751_s3 + $0x1020] sm:$0xff] }
 0x3e6   : > { %14108 = vst [vmem:[#allocation53_spill] sm:$0xff] %v9713_v7  ;;  %3490 = vmatmul.f32.gmra.mxu1 %v9713_v7 }
 0x3e7   : > { %3631 = vmatpush.msra.mxu1 %v3188_v30  ;;  %v14110_v30 = vunpack.i.h.bf16 %v9545_v41  ;;  %v2745_v41 = vld [vmem:[%s13751_s3 + $0x248] sm:$0xff] }
 0x3e9   : > { %3632 = vmatpush.msra.mxu1 %v3184_v28  ;;  %v14114_v28 = vunpack.i.h.bf16 %v9571_v0  ;;  %v2985_v0 = vld [vmem:[%s13751_s3 + $0x9c8] sm:$0xff] }
 0x3ee   : > { %v6947_v18 = vpop.permute.xlu2 %6946 }
 0x3ef   : > { %v6949_v26 = vunpack.i.h.bf16 %v6947_v18  ;;  %v6948_v12 = vunpack.i.l.bf16 %v6947_v18  ;;  %v2749_v18 = vld [vmem:[%s13751_s3 + $0x268] sm:$0xff] }
 0x3f0   : > { %3752 = vmatpush.msrb.mxu2 %v2749_v18  ;;  %v9798_v18 = vpop.f32.mrf.mxu0 }
 0x3f1   : > { %v9764_v31 = vsel %vm2548_vm8, %v2480_v38, %v6949_v26  ;;  %v9769_v33 = vsel %vm2548_vm8, %v14110_v30, %v6948_v12  ;;  %v9773_v1 = vsel %vm2615_vm9, %v6948_v12, %v9761_v5  ;;  %v2737_v12 = vld [vmem:[%s13751_s3 + $0x208] sm:$0xff]  ;;  %14116 = vst [vmem:[#allocation49_spill] sm:$0xff] %v9798_v18 }
 0x3f2   : > { %14109 = vst [vmem:[#allocation56_spill] sm:$0xff] %v9764_v31  ;;  %3531 = vmatmul.f32.gmra.mxu3 %v9764_v31  ;;  %3566 = vmatmul.f32.gmra.mxu0 %v9769_v33 }
 0x3f3   : > { %14111 = vst [vmem:[#allocation43_spill] sm:$0xff] %v9769_v33  ;;  %3607 = vmatmul.f32.gmra.mxu2 %v9773_v1 }
 0x3f4   : > { %14112 = vst [vmem:[#allocation46_spill] sm:$0xff] %v9773_v1  ;;  %3753 = vmatpush.msrb.mxu2 %v2745_v41  ;;  %v2989_v41 = vld [vmem:[%s13751_s3 + $0x9e8] sm:$0xff] }
 0x3f5   : > { %3863 = vmatpush.msrb.mxu0 %v2989_v41  ;;  %v2981_v41 = vld [vmem:[%s13751_s3 + $0x9a8] sm:$0xff] }
 0x3f6   : > { %v2543_v38 = vpop.permute.xlu2 %2542  ;;  %3754 = vmatpush.msrb.mxu2 %v2741_v59 }
 0x3f7   : > { %v9795_v30 = vsel %vm2548_vm8, %v14114_v28, %v2543_v38  ;;  %3864 = vmatpush.msrb.mxu0 %v2985_v0  ;;  %v2973_v0 = vld [vmem:[%s13751_s3 + $0x968] sm:$0xff] }
 0x3f8   : > { %14115 = vst [vmem:[#allocation42_spill] sm:$0xff] %v9795_v30  ;;  %3755 = vmatpush.msrb.mxu2 %v2737_v12  ;;  %v9820_v18 = vpop.f32.mrf.mxu0 }
 0x3f9   : > { %14120 = vst [vmem:[#allocation48_spill] sm:$0xff] %v9820_v18  ;;  %3865 = vmatpush.msrb.mxu0 %v2981_v41 }
 0x3fa   : > { %3569 = vmatmul.f32.gmra.mxu0 %v9795_v30 }
 0x402   : > { %3715 = vmatmul.f32.vlgmr.msra.gmra.mxu0 %v14117_v16 }
 0x404   : > { %v2547_v33 = vpop.permute.xlu1 %2546  ;;  %v9804_v1 = vpop.permute.xlu0 %2607 }
 0x405   : > { %v9810_v59 = vsel %vm2548_vm8, %v6949_v26, %v2547_v33  ;;  %v9814_v12 = vsel %vm2615_vm9, %v2543_v38, %v9804_v1  ;;  %v9816_v28 = vpop.permute.xlu2 %2611  ;;  %v9826_v26 = vpop.f32.mrf.mxu2  ;;  %v2977_v38 = vld [vmem:[%s13751_s3 + $0x988] sm:$0xff] }
 0x406   : > { %14118 = vst [vmem:[#allocation45_spill] sm:$0xff] %v9810_v59  ;;  %3572 = vmatmul.f32.vlgmr.msra.gmra.mxu3 %v9810_v59  ;;  %3610 = vmatmul.f32.gmra.mxu2 %v9814_v12  ;;  %v9838_v18 = vsel %vm2615_vm9, %v2547_v33, %v9816_v28  ;;  %v9856_v33 = vpop.f32.mrf.mxu0 }
 0x407   : > { %14119 = vst [vmem:[#allocation52_spill] sm:$0xff] %v9814_v12  ;;  %3866 = vmatpush.msrb.mxu0 %v2977_v38 }
 0x408   : > { %14121 = vst [vmem:[#allocation54_spill] sm:$0xff] %v9826_v26 }
 0x409   : > { %14125 = vst [vmem:[#allocation61_spill] sm:$0xff] %v9856_v33  ;;  %3867 = vmatpush.msrb.mxu0 %v2973_v0 }
 0x40a   : > { %3718 = vmatmul.f32.gmra.mxu0 %v8507_v14  ;;  %v14123_v14 = vunpack.i.l.bf16 %v9423_v25 }
 0x40c   : > { %v9831_v16 = vpop.permute.xlu0 %2585  ;;  %v2137_v59 = vpop.permute.xlu1 %2136 }
 0x40d   : > { %14122 = vst [vmem:[#allocation50_spill] sm:$0xff] %v9831_v16  ;;  %v2190_v26 = vsel %vm2144_vm6, %v9426_v42, %v2137_v59  ;;  %v2143_v41 = vpop.permute.xlu2 %2142  ;;  %v9846_v30 = vsel %vm2615_vm9, %v14123_v14, %v9831_v16  ;;  %v2969_v42 = vld [vmem:[%s13751_s3 + $0x948] sm:$0xff] }
 0x40e   : > { %14124 = vst [vmem:[#allocation60_spill] sm:$0xff] %v9846_v30  ;;  %v2286_v12 = vmax.f32 %v14050_v2, %v2190_v26  ;;  %v2192_v40 = vsel %vm2144_vm6, %v9471_v49, %v2143_v41  ;;  %3613 = vmatmul.f32.gmra.mxu2 %v9838_v18  ;;  %3633 = vmatmul.f32.vlgmr.msra.gmra.mxu1 %v9846_v30  ;;  %v2965_v2 = vld [vmem:[%s13751_s3 + $0x928] sm:$0xff]  ;;  %v9890_v41 = vpop.f32.mrf.mxu0 }
 0x40f   : > { %v2288_v59 = vmax.f32 %v14049_v52, %v2192_v40  ;;  %6540 = vmatmul.msk.f32.vlgmr.msrb.gmra.mxu3 %vm3272_vm10, %v9831_v16  ;;  %3868 = vmatpush.msrb.mxu0 %v2969_v42  ;;  %v2961_v26 = vld [vmem:[%s13751_s3 + $0x908] sm:$0xff]  ;;  %v9869_v52 = vpop.f32.mrf.mxu2  ;;  %14130 = vst [vmem:[#allocation65_spill] sm:$0xff] %v9890_v41 }
 0x410   : > { %14126 = vst [vmem:[#allocation62_spill] sm:$0xff] %v9869_v52  ;;  %v3053_v42 = vld [vmem:[%s13751_s3 + $0xbe8] sm:$0xff] }
 0x411   : > { %v2312_v14 = vmax.f32 %v2286_v12, %v2288_v59  ;;  %3869 = vmatpush.msrb.mxu0 %v2965_v2  ;;  %v14128_v12 = vunpack.i.h.bf16 %v9423_v25  ;;  %v2953_v25 = vld [vmem:[%s13751_s3 + $0x8c8] sm:$0xff]  ;;  %3904 = vmatpush.msra.mxu2 %v3053_v42 }
 0x412   : > { %3721 = vmatmul.f32.gmra.mxu0 %v8528_v39  ;;  %v3049_v2 = vld [vmem:[%s13751_s3 + $0xbc8] sm:$0xff] }
 0x413   : > { %v2342_v49 = vadd.f32 %v8549_v20, %v2312_v14  ;;  %3870 = vmatpush.msrb.mxu0 %v2961_v26  ;;  %v2957_v20 = vld [vmem:[%s13751_s3 + $0x8e8] sm:$0xff]  ;;  %3905 = vmatpush.msra.mxu2 %v3049_v2 }
 0x414   : > { %v9871_v40 = vpop.permute.xlu0 %2589  ;;  %v9895_v59 = vpop.permute.xlu1 %2593  ;;  %v2949_v14 = vld [vmem:[%s13751_s3 + $0x8a8] sm:$0xff] }
 0x415   : > { %14127 = vst [vmem:[#allocation63_spill] sm:$0xff] %v9871_v40  ;;  %v2366_v38 = vmax.f32 %v2342_v49, 0.0  ;;  %v9877_v0 = vsel %vm2615_vm9, %v14128_v12, %v9871_v40  ;;  %3871 = vmatpush.msrb.mxu0 %v2957_v20  ;;  %v2945_v26 = vld [vmem:[%s13751_s3 + $0x888] sm:$0xff]  ;;  %v9936_v52 = vpop.permute.xlu2 %2597 }
 0x416   : > { %14129 = vst [vmem:[#allocation64_spill] sm:$0xff] %v9877_v0  ;;  %3636 = vmatmul.f32.gmra.mxu1 %v9877_v0  ;;  %3756 = vmatmul.f32.vlgmr.msrb.gmra.mxu2 %v8918_v44  ;;  %v3045_v20 = vld [vmem:[%s13751_s3 + $0xba8] sm:$0xff]  ;;  %v9931_v2 = vpop.f32.mrf.mxu0 }
 0x417   : > { %6541 = vmatmul.msk.f32.gmra.mxu3 %vm3272_vm10, %v9871_v40  ;;  %2613 = vrot.lane.b32.xlu0 %v2366_v38, %s7026_s27  ;;  %14131 = vst [vmem:[#allocation66_spill] sm:$0xff] %v9895_v59  ;;  %v9904_v49 = vpop.f32.mrf.mxu2  ;;  %v14133_v38 = vunpack.i.l.bf16 %v9517_v48  ;;  %v3041_v42 = vld [vmem:[%s13751_s3 + $0xb88] sm:$0xff] }
 0x418   : > { %3872 = vmatpush.msrb.mxu0 %v2953_v25  ;;  %14132 = vst [vmem:[#allocation67_spill] sm:$0xff] %v9904_v49  ;;  %v2941_v25 = vld [vmem:[%s13751_s3 + $0x868] sm:$0xff]  ;;  %3906 = vmatpush.msra.mxu2 %v3045_v20  ;;  %v14138_v49 = vunpack.i.h.bf16 %v9517_v48 }
 0x419   : > { %v9913_v12 = vsel %vm2615_vm9, %v14133_v38, %v9895_v59  ;;  %14135 = vst [vmem:[#allocation69_spill] sm:$0xff] %v9931_v2  ;;  %v3037_v38 = vld [vmem:[%s13751_s3 + $0xb68] sm:$0xff] }
 0x41a   : > { %3724 = vmatmul.f32.gmra.mxu0 %v8558_v63  ;;  %14134 = vst [vmem:[#allocation68_spill] sm:$0xff] %v9913_v12  ;;  %3907 = vmatpush.msra.mxu2 %v3041_v42  ;;  %v9951_v33 = vsel %vm2615_vm9, %v14138_v49, %v9936_v52  ;;  %v3033_v42 = vld [vmem:[%s13751_s3 + $0xb48] sm:$0xff]  ;;  %v9963_v49 = vpop.f32.mrf.mxu3 }
 0x41b   : > { %3873 = vmatpush.msrb.mxu0 %v2949_v14  ;;  %v2937_v14 = vld [vmem:[%s13751_s3 + $0x848] sm:$0xff]  ;;  %14136 = vst [vmem:[#allocation70_spill] sm:$0xff] %v9936_v52 }
 0x41c   : > { %3908 = vmatpush.msra.mxu2 %v3037_v38  ;;  %14139 = vst [vmem:[#allocation72_spill] sm:$0xff] %v9951_v33  ;;  %v3029_v48 = vld [vmem:[%s13751_s3 + $0xb28] sm:$0xff]  ;;  %v9968_v38 = vpop.permute.xlu0 %2601 }
 0x41d   : > { %3874 = vmatpush.msrb.mxu0 %v2945_v26  ;;  %v2933_v26 = vld [vmem:[%s13751_s3 + $0x828] sm:$0xff]  ;;  %14140 = vst [vmem:[#allocation73_spill] sm:$0xff] %v9963_v49  ;;  %v9993_v49 = vpop.permute.xlu1 %2605 }
 0x41e   : > { %3639 = vmatmul.f32.gmra.mxu1 %v9913_v12  ;;  %3759 = vmatmul.f32.gmra.mxu2 %v8945_v60  ;;  %14141 = vst [vmem:[#allocation74_spill] sm:$0xff] %v9968_v38 }
 0x41f   : > { %6542 = vmatmul.msk.f32.gmra.mxu3 %vm3272_vm10, %v9895_v59  ;;  %3875 = vmatpush.msrb.mxu0 %v2941_v25  ;;  %v9942_v20 = vpop.f32.mrf.mxu2  ;;  %v2929_v25 = vld [vmem:[%s13751_s3 + $0x808] sm:$0xff]  ;;  %14145 = vst [vmem:[#allocation78_spill] sm:$0xff] %v9993_v49 }
 0x420   : > { %14137 = vst [vmem:[#allocation71_spill] sm:$0xff] %v9942_v20  ;;  %3909 = vmatpush.msra.mxu2 %v3033_v42  ;;  %v9981_v42 = vsel %vm2615_vm9, %v9579_v58, %v9968_v38  ;;  %v3009_v58 = vld [vmem:[%s13751_s3 + $0xa88] sm:$0xff] }
 0x421   : > { %3876 = vmatpush.msrb.mxu0 %v2937_v14  ;;  %v3025_v14 = vld [vmem:[%s13751_s3 + $0xb08] sm:$0xff]  ;;  %14144 = vst [vmem:[#allocation77_spill] sm:$0xff] %v9981_v42 }
 0x422   : > { %3727 = vmatmul.f32.gmra.mxu0 %v8588_v55  ;;  %3910 = vmatpush.msra.mxu2 %v3029_v48  ;;  %v3017_v48 = vld [vmem:[%s13751_s3 + $0xac8] sm:$0xff] }
 0x423   : > { %3877 = vmatpush.msrb.mxu0 %v2933_v26  ;;  %v9971_v26 = vpop.f32.mrf.mxu0 }
 0x424   : > { %14142 = vst [vmem:[#allocation75_spill] sm:$0xff] %v9971_v26  ;;  %3911 = vmatpush.msra.mxu2 %v3025_v14  ;;  %v3013_v14 = vld [vmem:[%s13751_s3 + $0xaa8] sm:$0xff]  ;;  %v9999_v26 = vpop.f32.mrf.mxu3 }
 0x425   : > { %3878 = vmatpush.msrb.mxu0 %v2929_v25  ;;  %v3021_v25 = vld [vmem:[%s13751_s3 + $0xae8] sm:$0xff]  ;;  %14146 = vst [vmem:[#allocation79_spill] sm:$0xff] %v9999_v26 }
 0x426   : > { %3642 = vmatmul.f32.gmra.mxu1 %v9951_v33  ;;  %3762 = vmatmul.f32.gmra.mxu2 %v8961_v9  ;;  %v2997_v26 = vld [vmem:[%s13751_s3 + $0xa28] sm:$0xff] }
 0x427   : > { %6543 = vmatmul.msk.f32.gmra.mxu3 %vm3272_vm10, %v9936_v52  ;;  %v9973_v20 = vpop.f32.mrf.mxu2  ;;  %3912 = vmatpush.msra.mxu2 %v3021_v25  ;;  %v3005_v25 = vld [vmem:[%s13751_s3 + $0xa68] sm:$0xff] }
 0x428   : > { %14143 = vst [vmem:[#allocation76_spill] sm:$0xff] %v9973_v20 }
 0x429   : > { %3913 = vmatpush.msra.mxu2 %v3017_v48  ;;  %v10011_v48 = vsel %vm2615_vm9, %v9761_v5, %v9993_v49  ;;  %v10023_v5 = vpop.f32.mrf.mxu1 }
 0x42a   : > { %3730 = vmatmul.f32.gmra.mxu0 %v8620_v43  ;;  %14148 = vst [vmem:[#allocation81_spill] sm:$0xff] %v10011_v48 }
 0x42b   : > { %3914 = vmatpush.msra.mxu2 %v3013_v14  ;;  %v10006_v41 = vpop.f32.mrf.mxu0  ;;  %v3001_v14 = vld [vmem:[%s13751_s3 + $0xa48] sm:$0xff]  ;;  %14149 = vst [vmem:[#allocation82_spill] sm:$0xff] %v10023_v5 }
 0x42c   : > { %v10031_v2 = vpop.f32.mrf.mxu3 }
 0x42d   : > { %3915 = vmatpush.msra.mxu2 %v3009_v58  ;;  %v10025_v58 = vpop.permute.xlu2 %2609  ;;  %14151 = vst [vmem:[#allocation84_spill] sm:$0xff] %v10031_v2  ;;  %v3233_v2 = vld [vmem:[%s13751_s3 + $0x1188] sm:$0xff] }
 0x42e   : > { %3645 = vmatmul.f32.gmra.mxu1 %v9981_v42  ;;  %3765 = vmatmul.f32.gmra.mxu2 %v8991_v37  ;;  %14150 = vst [vmem:[#allocation83_spill] sm:$0xff] %v10025_v58 }
 0x42f   : > { %6544 = vmatmul.msk.f32.gmra.mxu3 %vm3272_vm10, %v9968_v38  ;;  %v10001_v20 = vpop.f32.mrf.mxu2  ;;  %3916 = vmatpush.msra.mxu2 %v3005_v25  ;;  %v10036_v25 = vsel %vm2615_vm9, %v9804_v1, %v10025_v58  ;;  %v3245_v1 = vld [vmem:[%s13751_s3 + $0x11e8] sm:$0xff] }
 0x430   : > { %14147 = vst [vmem:[#allocation80_spill] sm:$0xff] %v10001_v20  ;;  %v2993_v20 = vld [vmem:[%s13751_s3 + $0xa08] sm:$0xff]  ;;  %4027 = vmatpush.msra.mxu0 %v3245_v1 }
 0x431   : > { %3917 = vmatpush.msra.mxu2 %v3001_v14  ;;  %14152 = vst [vmem:[#allocation85_spill] sm:$0xff] %v10036_v25  ;;  %v3229_v1 = vld [vmem:[%s13751_s3 + $0x1168] sm:$0xff] }
 0x432   : > { %3733 = vmatmul.f32.gmra.mxu0 %v8697_v54 }
 0x433   : > { %3918 = vmatpush.msra.mxu2 %v2997_v26  ;;  %v10042_v5 = vpop.f32.mrf.mxu0  ;;  %v10046_v26 = vpop.f32.mrf.mxu1 }
 0x434   : > { %14154 = vst [vmem:[#allocation87_spill] sm:$0xff] %v10042_v5  ;;  %v3237_v5 = vld [vmem:[%s13751_s3 + $0x11a8] sm:$0xff] }
 0x435   : > { %3919 = vmatpush.msra.mxu2 %v2993_v20  ;;  %14155 = vst [vmem:[#allocation88_spill] sm:$0xff] %v10046_v26  ;;  %v3241_v20 = vld [vmem:[%s13751_s3 + $0x11c8] sm:$0xff] }
 0x436   : > { %3648 = vmatmul.f32.gmra.mxu1 %v10011_v48  ;;  %3768 = vmatmul.f32.gmra.mxu2 %v9019_v34 }
 0x437   : > { %6545 = vmatmul.msk.f32.gmra.mxu3 %vm3272_vm10, %v9993_v49  ;;  %v10038_v14 = vpop.f32.mrf.mxu2  ;;  %4028 = vmatpush.msra.mxu0 %v3241_v20  ;;  %v3225_v20 = vld [vmem:[%s13751_s3 + $0x1148] sm:$0xff] }
 0x438   : > { %14153 = vst [vmem:[#allocation86_spill] sm:$0xff] %v10038_v14  ;;  %v10055_v14 = vpop.f32.mrf.mxu3 }
 0x439   : > { %14156 = vst [vmem:[#allocation89_spill] sm:$0xff] %v10055_v14  ;;  %4029 = vmatpush.msra.mxu0 %v3237_v5  ;;  %v3221_v5 = vld [vmem:[%s13751_s3 + $0x1128] sm:$0xff] }
 0x43a   : > { %3736 = vmatmul.f32.gmra.mxu0 %v8799_v36 }
 0x43b   : > { %v10068_v36 = vpop.f32.mrf.mxu1  ;;  %4030 = vmatpush.msra.mxu0 %v3233_v2  ;;  %v2925_v2 = vld [vmem:[%s13751_s3 + $0x7e8] sm:$0xff] }
 0x43c   : > { %14158 = vst [vmem:[#allocation91_spill] sm:$0xff] %v10068_v36  ;;  %3822 = vmatpush.msra.mxu3 %v2925_v2 }
 0x43d   : > { %4031 = vmatpush.msra.mxu0 %v3229_v1 }
 0x43e   : > { %3651 = vmatmul.f32.gmra.mxu1 %v10036_v25  ;;  %3771 = vmatmul.f32.gmra.mxu2 %v9161_v24 }
 0x43f   : > { %6546 = vmatmul.msk.f32.gmra.mxu3 %vm3272_vm10, %v10025_v58  ;;  %v10061_v26 = vpop.f32.mrf.mxu2  ;;  %4032 = vmatpush.msra.mxu0 %v3225_v20  ;;  %v2861_v20 = vld [vmem:[%s13751_s3 + $0x5e8] sm:$0xff] }
 0x440   : > { %v10078_v14 = vpop.f32.mrf.mxu3  ;;  %3781 = vmatpush.msrb.mxu1 %v2861_v20  ;;  %v2849_v20 = vld [vmem:[%s13751_s3 + $0x588] sm:$0xff] }
 0x441   : > { %14159 = vst [vmem:[#allocation92_spill] sm:$0xff] %v10078_v14  ;;  %4033 = vmatpush.msra.mxu0 %v3221_v5  ;;  %v3213_v14 = vld [vmem:[%s13751_s3 + $0x10e8] sm:$0xff] }
 0x442   : > { %3879 = vmatmul.f32.vlgmr.msrb.gmra.mxu0 %v9365_v27  ;;  %v10066_v27 = vpop.f32.mrf.mxu0 }
 0x443   : > { %14157 = vst [vmem:[#allocation90_spill] sm:$0xff] %v10066_v27  ;;  %v3217_v27 = vld [vmem:[%s13751_s3 + $0x1108] sm:$0xff]  ;;  %v10089_v1 = vpop.f32.mrf.mxu1 }
 0x444   : > { %14160 = vst [vmem:[#allocation93_spill] sm:$0xff] %v10089_v1  ;;  %4034 = vmatpush.msra.mxu0 %v3217_v27  ;;  %v3209_v1 = vld [vmem:[%s13751_s3 + $0x10c8] sm:$0xff] }
 0x445   : > { %v2853_v27 = vld [vmem:[%s13751_s3 + $0x5a8] sm:$0xff] }
 0x446   : > { %3774 = vmatmul.f32.gmra.mxu2 %v9232_v4  ;;  %4035 = vmatpush.msra.mxu0 %v3213_v14  ;;  %v2913_v14 = vld [vmem:[%s13751_s3 + $0x788] sm:$0xff] }
 0x447   : > { %v10091_v36 = vpop.f32.mrf.mxu2 }
 0x448   : > { %14161 = vst [vmem:[#allocation94_spill] sm:$0xff] %v10091_v36  ;;  %v10106_v2 = vpop.f32.mrf.mxu3  ;;  %v2857_v36 = vld [vmem:[%s13751_s3 + $0x5c8] sm:$0xff]  ;;  %4036 = vmatpush.msra.mxu0 %v3209_v1 }
 0x449   : > { %14163 = vst [vmem:[#allocation96_spill] sm:$0xff] %v10106_v2  ;;  %3782 = vmatpush.msrb.mxu1 %v2857_v36  ;;  %v3201_v36 = vld [vmem:[%s13751_s3 + $0x1088] sm:$0xff] }
 0x44a   : > { %3882 = vmatmul.f32.gmra.mxu0 %v9409_v32  ;;  %v2921_v32 = vld [vmem:[%s13751_s3 + $0x7c8] sm:$0xff]  ;;  %v10103_v5 = vpop.f32.mrf.mxu0 }
 0x44b   : > { %14162 = vst [vmem:[#allocation95_spill] sm:$0xff] %v10103_v5  ;;  %3823 = vmatpush.msra.mxu3 %v2921_v32  ;;  %v2917_v5 = vld [vmem:[%s13751_s3 + $0x7a8] sm:$0xff]  ;;  %v10129_v2 = vpop.f32.mrf.mxu1  ;;  %3783 = vmatpush.msrb.mxu1 %v2853_v27 }
 0x44c   : > { %v3205_v32 = vld [vmem:[%s13751_s3 + $0x10a8] sm:$0xff]  ;;  %14164 = vst [vmem:[#allocation97_spill] sm:$0xff] %v10129_v2 }
 0x44d   : > { %3824 = vmatpush.msra.mxu3 %v2917_v5  ;;  %v2909_v1 = vld [vmem:[%s13751_s3 + $0x768] sm:$0xff]  ;;  %4037 = vmatpush.msra.mxu0 %v3205_v32 }
 0x44e   : > { %3777 = vmatmul.f32.gmra.mxu2 %v9350_v13  ;;  %v2845_v5 = vld [vmem:[%s13751_s3 + $0x568] sm:$0xff]  ;;  %3784 = vmatpush.msrb.mxu1 %v2849_v20 }
 0x44f   : > { %3825 = vmatpush.msra.mxu3 %v2913_v14  ;;  %v3197_v27 = vld [vmem:[%s13751_s3 + $0x1068] sm:$0xff]  ;;  %4038 = vmatpush.msra.mxu0 %v3201_v36 }
 0x450   : > { %v2905_v2 = vld [vmem:[%s13751_s3 + $0x748] sm:$0xff]  ;;  %3785 = vmatpush.msrb.mxu1 %v2845_v5 }
 0x451   : > { %3826 = vmatpush.msra.mxu3 %v2909_v1  ;;  %v2841_v32 = vld [vmem:[%s13751_s3 + $0x548] sm:$0xff]  ;;  %4039 = vmatpush.msra.mxu0 %v3197_v27 }
 0x452   : > { %3885 = vmatmul.f32.gmra.mxu0 %v9465_v57  ;;  %v10141_v57 = vpop.f32.mrf.mxu2  ;;  %v3193_v14 = vld [vmem:[%s13751_s3 + $0x1048] sm:$0xff]  ;;  %3786 = vmatpush.msrb.mxu1 %v2841_v32 }
 0x453   : > { %14165 = vst [vmem:[#allocation98_spill] sm:$0xff] %v10141_v57  ;;  %v2901_v20 = vld [vmem:[%s13751_s3 + $0x728] sm:$0xff]  ;;  %3827 = vmatpush.msra.mxu3 %v2905_v2  ;;  %v10170_v57 = vpop.f32.mrf.mxu3  ;;  %4040 = vmatpush.msra.mxu0 %v3193_v14  ;;  %v10175_v27 = vpop.f32.mrf.mxu1 }
 0x454   : > { %v2837_v36 = vld [vmem:[%s13751_s3 + $0x528] sm:$0xff]  ;;  %14167 = vst [vmem:[#allocation100_spill] sm:$0xff] %v10170_v57 }
 0x455   : > { %v3189_v1 = vld [vmem:[%s13751_s3 + $0x1028] sm:$0xff]  ;;  %3828 = vmatpush.msra.mxu3 %v2901_v20  ;;  %14168 = vst [vmem:[#allocation101_spill] sm:$0xff] %v10175_v27  ;;  %3787 = vmatpush.msrb.mxu1 %v2837_v36 }
 0x456   : > { %3920 = vmatmul.f32.vlgmr.msra.gmra.mxu2 %v9403_v17  ;;  %v2897_v5 = vld [vmem:[%s13751_s3 + $0x708] sm:$0xff]  ;;  %4041 = vmatpush.msra.mxu0 %v3189_v1 }
 0x457   : > { %v2833_v2 = vld [vmem:[%s13751_s3 + $0x508] sm:$0xff]  ;;  %3829 = vmatpush.msra.mxu3 %v2897_v5 }
 0x458   : > { %v3185_v32 = vld [vmem:[%s13751_s3 + $0x1008] sm:$0xff]  ;;  %3788 = vmatpush.msrb.mxu1 %v2833_v2 }
 0x459   : > { %v2829_v14 = vld [vmem:[%s13751_s3 + $0x4e8] sm:$0xff]  ;;  %4042 = vmatpush.msra.mxu0 %v3185_v32 }
 0x45a   : > { %3888 = vmatmul.f32.gmra.mxu0 %v9502_v35  ;;  %v10149_v35 = vpop.f32.mrf.mxu0  ;;  %v2889_v20 = vld [vmem:[%s13751_s3 + $0x6c8] sm:$0xff]  ;;  %v10193_v57 = vpop.f32.mrf.mxu2  ;;  %3789 = vmatpush.msrb.mxu1 %v2829_v14 }
 0x45b   : > { %14166 = vst [vmem:[#allocation99_spill] sm:$0xff] %v10149_v35  ;;  %v2893_v35 = vld [vmem:[%s13751_s3 + $0x6e8] sm:$0xff]  ;;  %v10207_v32 = vpop.f32.mrf.mxu3  ;;  %v10209_v14 = vpop.f32.mrf.mxu1 }
 0x45c   : > { %3830 = vmatpush.msra.mxu3 %v2893_v35  ;;  %v2825_v36 = vld [vmem:[%s13751_s3 + $0x4c8] sm:$0xff]  ;;  %14169 = vst [vmem:[#allocation102_spill] sm:$0xff] %v10193_v57 }
 0x45d   : > { %v2885_v1 = vld [vmem:[%s13751_s3 + $0x6a8] sm:$0xff]  ;;  %3790 = vmatpush.msrb.mxu1 %v2825_v36  ;;  %14171 = vst [vmem:[#allocation104_spill] sm:$0xff] %v10209_v14 }
 0x45e   : > { %3923 = vmatmul.f32.gmra.mxu2 %v9445_v22  ;;  %3831 = vmatpush.msra.mxu3 %v2889_v20  ;;  %v2821_v35 = vld [vmem:[%s13751_s3 + $0x4a8] sm:$0xff] }
 0x45f   : > { %v2881_v2 = vld [vmem:[%s13751_s3 + $0x688] sm:$0xff]  ;;  %3791 = vmatpush.msrb.mxu1 %v2821_v35 }
 0x460   : > { %3832 = vmatpush.msra.mxu3 %v2885_v1  ;;  %v2817_v20 = vld [vmem:[%s13751_s3 + $0x488] sm:$0xff] }
 0x461   : > { %v2877_v36 = vld [vmem:[%s13751_s3 + $0x668] sm:$0xff]  ;;  %3792 = vmatpush.msrb.mxu1 %v2817_v20 }
 0x462   : > { %3891 = vmatmul.f32.gmra.mxu0 %v9528_v3  ;;  %v10199_v5 = vpop.f32.mrf.mxu0  ;;  %3833 = vmatpush.msra.mxu3 %v2881_v2  ;;  %v2813_v57 = vld [vmem:[%s13751_s3 + $0x468] sm:$0xff]  ;;  %v10245_v27 = vpop.f32.mrf.mxu2 }
 0x463   : > { %14170 = vst [vmem:[#allocation103_spill] sm:$0xff] %v10199_v5  ;;  %v3269_v1 = vld [vmem:[%s13751_s3 + $0x12a8] sm:$0xff]  ;;  %3793 = vmatpush.msrb.mxu1 %v2813_v57 }
 0x464   : > { %v2873_v35 = vld [vmem:[%s13751_s3 + $0x648] sm:$0xff]  ;;  %3834 = vmatpush.msra.mxu3 %v2877_v36  ;;  %4078 = vmatpush.msrb.mxu2 %v3269_v1  ;;  %14173 = vst [vmem:[#allocation106_spill] sm:$0xff] %v10245_v27 }
 0x465   : > { %v2809_v2 = vld [vmem:[%s13751_s3 + $0x448] sm:$0xff] }
 0x466   : > { %3926 = vmatmul.f32.gmra.mxu2 %v9468_v61  ;;  %v3265_v20 = vld [vmem:[%s13751_s3 + $0x1288] sm:$0xff]  ;;  %3835 = vmatpush.msra.mxu3 %v2873_v35  ;;  %v10253_v35 = vpop.f32.mrf.mxu3 }
 0x467   : > { %v2869_v14 = vld [vmem:[%s13751_s3 + $0x628] sm:$0xff]  ;;  %4079 = vmatpush.msrb.mxu2 %v3265_v20  ;;  %3794 = vmatpush.msrb.mxu1 %v2809_v2  ;;  %14174 = vst [vmem:[#allocation107_spill] sm:$0xff] %v10253_v35 }
 0x468   : > { %v2805_v36 = vld [vmem:[%s13751_s3 + $0x428] sm:$0xff]  ;;  %3836 = vmatpush.msra.mxu3 %v2869_v14 }
 0x469   : > { %v3261_v1 = vld [vmem:[%s13751_s3 + $0x1268] sm:$0xff]  ;;  %3795 = vmatpush.msrb.mxu1 %v2805_v36 }
 0x46a   : > { %3894 = vmatmul.f32.gmra.mxu0 %v9554_v62  ;;  %v2865_v57 = vld [vmem:[%s13751_s3 + $0x608] sm:$0xff]  ;;  %4080 = vmatpush.msrb.mxu2 %v3261_v1  ;;  %v10272_v35 = vpop.f32.mrf.mxu2  ;;  %v2802_v62 = vld [vmem:[%s13751_s3 + $0x410] sm:$0xff] }
 0x46b   : > { %3837 = vmatpush.msra.mxu3 %v2865_v57  ;;  %v2801_v20 = vld [vmem:[%s13751_s3 + $0x408] sm:$0xff]  ;;  %14177 = vst [vmem:[#allocation110_spill] sm:$0xff] %v10272_v35 }
 0x46c   : > { %v3257_v2 = vld [vmem:[%s13751_s3 + $0x1248] sm:$0xff]  ;;  %3796 = vmatpush.msrb.mxu1 %v2801_v20 }
 0x46d   : > { %4081 = vmatpush.msrb.mxu2 %v3257_v2  ;;  %v3253_v14 = vld [vmem:[%s13751_s3 + $0x1228] sm:$0xff] }
 0x46e   : > { %3929 = vmatmul.f32.gmra.mxu2 %v9505_v8  ;;  %v3249_v36 = vld [vmem:[%s13751_s3 + $0x1208] sm:$0xff]  ;;  %v10275_v20 = vpop.f32.mrf.mxu3 }
 0x46f   : > { %v10237_v5 = vpop.f32.mrf.mxu0  ;;  %4082 = vmatpush.msrb.mxu2 %v3253_v14  ;;  %14178 = vst [vmem:[#allocation111_spill] sm:$0xff] %v10275_v20  ;;  %v2862_v14 = vld [vmem:[%s13751_s3 + $0x5f0] sm:$0xff]  ;;  %v14201_v3 = vld [vmem:[#allocation23_spill] sm:$0xff] }
 0x470   : > { %14172 = vst [vmem:[#allocation105_spill] sm:$0xff] %v10237_v5  ;;  %v10250_v5 = vpop.f32.mrf.mxu1  ;;  %4191 = vmatpush.msrb.mxu0 %v2862_v14 }
 0x471   : > { %4083 = vmatpush.msrb.mxu2 %v3249_v36  ;;  %v2858_v36 = vld [vmem:[%s13751_s3 + $0x5d0] sm:$0xff] }
 0x472   : > { %3897 = vmatmul.f32.gmra.mxu0 %v9584_v29 }
 0x473   : > { %4192 = vmatpush.msrb.mxu0 %v2858_v36  ;;  %v2850_v36 = vld [vmem:[%s13751_s3 + $0x590] sm:$0xff] }
 0x476   : > { %3932 = vmatmul.f32.gmra.mxu2 %v9531_v23  ;;  %v10280_v27 = vpop.f32.mrf.mxu2  ;;  %v10292_v20 = vpop.f32.mrf.mxu3 }
 0x477   : > { %v10268_v1 = vpop.f32.mrf.mxu0  ;;  %14179 = vst [vmem:[#allocation112_spill] sm:$0xff] %v10280_v27  ;;  %v2838_v27 = vld [vmem:[%s13751_s3 + $0x530] sm:$0xff] }
 0x478   : > { %14175 = vst [vmem:[#allocation108_spill] sm:$0xff] %v10268_v1  ;;  %v10270_v57 = vpop.f32.mrf.mxu1 }
 0x479   : > { %14176 = vst [vmem:[#allocation109_spill] sm:$0xff] %v10270_v57 }
 0x47a   : > { %3900 = vmatmul.f32.gmra.mxu0 %v9713_v7  ;;  %14181 = vst [vmem:[#allocation114_spill] sm:$0xff] %v10292_v20  ;;  %v2826_v7 = vld [vmem:[%s13751_s3 + $0x4d0] sm:$0xff] }
 0x47e   : > { %3935 = vmatmul.f32.gmra.mxu2 %v9559_v15 }
 0x47f   : > { %v10278_v2 = vpop.f32.mrf.mxu0 }
 0x480   : > { %v10283_v29 = vpop.f32.mrf.mxu1 }
 0x481   : > { %14180 = vst [vmem:[#allocation113_spill] sm:$0xff] %v10283_v29  ;;  %v2854_v29 = vld [vmem:[%s13751_s3 + $0x5b0] sm:$0xff] }
 0x482   : > { %4043 = vmatmul.f32.vlgmr.msra.gmra.mxu0 %v9846_v30 }
 0x483   : > { %4193 = vmatpush.msrb.mxu0 %v2854_v29  ;;  %v2846_v29 = vld [vmem:[%s13751_s3 + $0x570] sm:$0xff] }
 0x485   : > { %4194 = vmatpush.msrb.mxu0 %v2850_v36 }
 0x486   : > { %3938 = vmatmul.f32.gmra.mxu2 %v9589_v51  ;;  %v3093_v51 = vld [vmem:[%s13751_s3 + $0xd28] sm:$0xff] }
 0x487   : > { %v10294_v57 = vpop.f32.mrf.mxu0  ;;  %4195 = vmatpush.msrb.mxu0 %v2846_v29  ;;  %v2834_v29 = vld [vmem:[%s13751_s3 + $0x510] sm:$0xff] }
 0x488   : > { %v10315_v20 = vpop.f32.mrf.mxu1 }
 0x489   : > { %v10299_v1 = vpop.permute.xlu0 %2613  ;;  %v10301_v35 = vpop.f32.mrf.mxu2  ;;  %14185 = vst [vmem:[#allocation118_spill] sm:$0xff] %v10315_v20 }
 0x48a   : > { %14182 = vst [vmem:[#allocation115_spill] sm:$0xff] %v10299_v1  ;;  %6547 = vmatmul.msk.f32.gmra.mxu3 %vm3272_vm10, %v10299_v1  ;;  %v10308_v14 = vsel %vm2615_vm9, %v9816_v28, %v10299_v1  ;;  %4046 = vmatmul.f32.gmra.mxu0 %v9877_v0  ;;  %v2842_v28 = vld [vmem:[%s13751_s3 + $0x550] sm:$0xff]  ;;  %v10329_v20 = vpop.f32.mrf.mxu3  ;;  %v3113_v0 = vld [vmem:[%s13751_s3 + $0xdc8] sm:$0xff] }
 0x48b   : > { %14183 = vst [vmem:[#allocation116_spill] sm:$0xff] %v10301_v35  ;;  %3654 = vmatmul.f32.gmra.mxu1 %v10308_v14  ;;  %4196 = vmatpush.msrb.mxu0 %v2842_v28  ;;  %v3181_v28 = vld [vmem:[%s13751_s3 + $0xfe8] sm:$0xff] }
 0x48c   : > { %14184 = vst [vmem:[#allocation117_spill] sm:$0xff] %v10308_v14  ;;  %3986 = vmatpush.msrb.mxu3 %v3181_v28  ;;  %v3173_v28 = vld [vmem:[%s13751_s3 + $0xfa8] sm:$0xff] }
 0x48d   : > { %14186 = vst [vmem:[#allocation119_spill] sm:$0xff] %v10329_v20  ;;  %4197 = vmatpush.msrb.mxu0 %v2838_v27  ;;  %v3117_v20 = vld [vmem:[%s13751_s3 + $0xde8] sm:$0xff] }
 0x48e   : > { %3941 = vmatmul.f32.gmra.mxu2 %v9764_v31  ;;  %v3177_v27 = vld [vmem:[%s13751_s3 + $0xfc8] sm:$0xff]  ;;  %3945 = vmatpush.msra.mxu1 %v3117_v20  ;;  %v14189_v31 = vld [vmem:[#allocation18_spill] sm:$0xff] }
 0x48f   : > { %v10324_v35 = vpop.f32.mrf.mxu0  ;;  %4198 = vmatpush.msrb.mxu0 %v2834_v29  ;;  %3987 = vmatpush.msrb.mxu3 %v3177_v27  ;;  %v3109_v20 = vld [vmem:[%s13751_s3 + $0xda8] sm:$0xff]  ;;  %v2822_v27 = vld [vmem:[%s13751_s3 + $0x4b0] sm:$0xff] }
 0x490   : > { %v10357_v30 = vpop.f32.mrf.mxu1  ;;  %3946 = vmatpush.msra.mxu1 %v3113_v0  ;;  %v3169_v0 = vld [vmem:[%s13751_s3 + $0xf88] sm:$0xff] }
 0x491   : > { %v10331_v36 = vpop.f32.mrf.mxu2  ;;  %14187 = vst [vmem:[#allocation120_spill] sm:$0xff] %v10357_v30  ;;  %v2926_v30 = vld [vmem:[%s13751_s3 + $0x7f0] sm:$0xff]  ;;  %3988 = vmatpush.msrb.mxu3 %v3173_v28 }
 0x492   : > { %3838 = vmatmul.f32.vlgmr.msra.gmra.mxu3 %v8966_v46  ;;  %4049 = vmatmul.f32.gmra.mxu0 %v9913_v12  ;;  %v2830_v12 = vld [vmem:[%s13751_s3 + $0x4f0] sm:$0xff] }
 0x493   : > { %3797 = vmatmul.f32.vlgmr.msrb.gmra.mxu1 %v8921_v11  ;;  %4199 = vmatpush.msrb.mxu0 %v2830_v12 }
 0x494   : > { %4232 = vmatpush.msra.mxu2 %v2926_v30  ;;  %3947 = vmatpush.msra.mxu1 %v3109_v20  ;;  %v2818_v30 = vld [vmem:[%s13751_s3 + $0x490] sm:$0xff] }
 0x495   : > { %4200 = vmatpush.msrb.mxu0 %v2826_v7  ;;  %v3105_v7 = vld [vmem:[%s13751_s3 + $0xd88] sm:$0xff]  ;;  %v2922_v20 = vld [vmem:[%s13751_s3 + $0x7d0] sm:$0xff]  ;;  %3989 = vmatpush.msrb.mxu3 %v3169_v0 }
 0x496   : > { %6548 = vmatmul.msk.f32.vlgmr.msrb.gmra.mxu2 %vm3272_vm10, %v9831_v16  ;;  %v10380_v16 = vpop.f32.mrf.mxu3  ;;  %3948 = vmatpush.msra.mxu1 %v3105_v7  ;;  %v3161_v0 = vld [vmem:[%s13751_s3 + $0xf48] sm:$0xff] }
 0x497   : > { %v10364_v29 = vpop.f32.mrf.mxu0  ;;  %14188 = vst [vmem:[#allocation121_spill] sm:$0xff] %v10380_v16  ;;  %4201 = vmatpush.msrb.mxu0 %v2822_v27  ;;  %v3101_v27 = vld [vmem:[%s13751_s3 + $0xd68] sm:$0xff]  ;;  %4233 = vmatpush.msra.mxu2 %v2922_v20  ;;  %v2918_v16 = vld [vmem:[%s13751_s3 + $0x7b0] sm:$0xff] }
 0x498   : > { %v3097_v7 = vld [vmem:[%s13751_s3 + $0xd48] sm:$0xff]  ;;  %3949 = vmatpush.msra.mxu1 %v3101_v27 }
 0x499   : > { %v3757_v12 = vpop.f32.mrf.mxu2  ;;  %4202 = vmatpush.msrb.mxu0 %v2818_v30  ;;  %v2810_v30 = vld [vmem:[%s13751_s3 + $0x450] sm:$0xff]  ;;  %4234 = vmatpush.msra.mxu2 %v2918_v16 }
 0x49a   : > { %3841 = vmatmul.f32.gmra.mxu3 %v8999_v10  ;;  %4052 = vmatmul.f32.gmra.mxu0 %v9951_v33  ;;  %v10383_v28 = vadd.f32 %v3757_v12, %v10278_v2  ;;  %v3165_v2 = vld [vmem:[%s13751_s3 + $0xf68] sm:$0xff]  ;;  %v2814_v12 = vld [vmem:[%s13751_s3 + $0x470] sm:$0xff]  ;;  %v10420_v33 = vpop.f32.mrf.mxu1 }
 0x49b   : > { %3800 = vmatmul.f32.gmra.mxu1 %v14189_v31  ;;  %3990 = vmatpush.msrb.mxu3 %v3165_v2  ;;  %14190 = vst [vmem:[#allocation122_spill] sm:$0xff] %v10420_v33  ;;  %v2914_v2 = vld [vmem:[%s13751_s3 + $0x790] sm:$0xff]  ;;  %v3153_v33 = vld [vmem:[%s13751_s3 + $0xf08] sm:$0xff] }
 0x49c   : > { %4203 = vmatpush.msrb.mxu0 %v2814_v12  ;;  %3950 = vmatpush.msra.mxu1 %v3097_v7  ;;  %v14191_v12 = vld [vmem:[#allocation14_spill] sm:$0xff]  ;;  %v2806_v16 = vld [vmem:[%s13751_s3 + $0x430] sm:$0xff] }
 0x49d   : > { %3991 = vmatpush.msrb.mxu3 %v3161_v0  ;;  %v2910_v0 = vld [vmem:[%s13751_s3 + $0x770] sm:$0xff]  ;;  %4235 = vmatpush.msra.mxu2 %v2914_v2 }
 0x49e   : > { %6549 = vmatmul.msk.f32.gmra.mxu2 %vm3272_vm10, %v9871_v40  ;;  %4204 = vmatpush.msrb.mxu0 %v2810_v30  ;;  %v3157_v40 = vld [vmem:[%s13751_s3 + $0xf28] sm:$0xff]  ;;  %v10452_v15 = vpop.f32.mrf.mxu3 }
 0x49f   : > { %v10418_v20 = vpop.f32.mrf.mxu0  ;;  %v14192_v30 = vld [vmem:[#allocation11_spill] sm:$0xff]  ;;  %3992 = vmatpush.msrb.mxu3 %v3157_v40  ;;  %3951 = vmatpush.msra.mxu1 %v3093_v51  ;;  %14193 = vst [vmem:[#allocation123_spill] sm:$0xff] %v10452_v15 }
 0x4a0   : > { %4205 = vmatpush.msrb.mxu0 %v2806_v16  ;;  %4236 = vmatpush.msra.mxu2 %v2910_v0  ;;  %v3149_v51 = vld [vmem:[%s13751_s3 + $0xee8] sm:$0xff] }
 0x4a1   : > { %v3760_v27 = vpop.f32.mrf.mxu2  ;;  %3993 = vmatpush.msrb.mxu3 %v3153_v33  ;;  %v3085_v40 = vld [vmem:[%s13751_s3 + $0xce8] sm:$0xff] }
 0x4a2   : > { %3844 = vmatmul.f32.gmra.mxu3 %v14191_v12  ;;  %4055 = vmatmul.f32.gmra.mxu0 %v9981_v42  ;;  %v10440_v7 = vadd.f32 %v3760_v27, %v10294_v57  ;;  %v3089_v42 = vld [vmem:[%s13751_s3 + $0xd08] sm:$0xff]  ;;  %v2906_v57 = vld [vmem:[%s13751_s3 + $0x750] sm:$0xff]  ;;  %v10476_v0 = vpop.f32.mrf.mxu1 }
 0x4a3   : > { %3803 = vmatmul.f32.gmra.mxu1 %v14192_v30  ;;  %4206 = vmatpush.msrb.mxu0 %v2802_v62  ;;  %v2902_v27 = vld [vmem:[%s13751_s3 + $0x730] sm:$0xff]  ;;  %v3145_v16 = vld [vmem:[%s13751_s3 + $0xec8] sm:$0xff]  ;;  %14194 = vst [vmem:[#allocation124_spill] sm:$0xff] %v10476_v0 }
 0x4a4   : > { %3952 = vmatpush.msra.mxu1 %v3089_v42  ;;  %4237 = vmatpush.msra.mxu2 %v2906_v57  ;;  %v3081_v33 = vld [vmem:[%s13751_s3 + $0xcc8] sm:$0xff]  ;;  %v2898_v62 = vld [vmem:[%s13751_s3 + $0x710] sm:$0xff] }
 0x4a5   : > { %3994 = vmatpush.msrb.mxu3 %v3149_v51  ;;  %v14195_v42 = vld [vmem:[#allocation19_spill] sm:$0xff]  ;;  %v14196_v51 = vld [vmem:[#allocation16_spill] sm:$0xff] }
 0x4a6   : > { %6550 = vmatmul.msk.f32.gmra.mxu2 %vm3272_vm10, %v9895_v59  ;;  %3953 = vmatpush.msra.mxu1 %v3085_v40  ;;  %v3141_v40 = vld [vmem:[%s13751_s3 + $0xea8] sm:$0xff]  ;;  %v14198_v59 = vld [vmem:[#allocation17_spill] sm:$0xff] }
 0x4a7   : > { %v10465_v2 = vpop.f32.mrf.mxu0  ;;  %4238 = vmatpush.msra.mxu2 %v2902_v27  ;;  %3995 = vmatpush.msrb.mxu3 %v3145_v16  ;;  %v3077_v0 = vld [vmem:[%s13751_s3 + $0xca8] sm:$0xff]  ;;  %v2890_v27 = vld [vmem:[%s13751_s3 + $0x6d0] sm:$0xff]  ;;  %v10507_v16 = vpop.f32.mrf.mxu3 }
 0x4a8   : > { %3954 = vmatpush.msra.mxu1 %v3081_v33  ;;  %14197 = vst [vmem:[#allocation125_spill] sm:$0xff] %v10507_v16 }
 0x4a9   : > { %v3763_v15 = vpop.f32.mrf.mxu2  ;;  %4239 = vmatpush.msra.mxu2 %v2898_v62  ;;  %3996 = vmatpush.msrb.mxu3 %v3141_v40  ;;  %v3133_v62 = vld [vmem:[%s13751_s3 + $0xe68] sm:$0xff] }
 0x4aa   : > { %3847 = vmatmul.f32.gmra.mxu3 %v14195_v42  ;;  %4058 = vmatmul.f32.gmra.mxu0 %v10011_v48  ;;  %v10484_v57 = vadd.f32 %v3763_v15, %v10324_v35  ;;  %v2894_v48 = vld [vmem:[%s13751_s3 + $0x6f0] sm:$0xff]  ;;  %v3137_v15 = vld [vmem:[%s13751_s3 + $0xe88] sm:$0xff] }
 0x4ab   : > { %3806 = vmatmul.f32.gmra.mxu1 %v14196_v51  ;;  %v3073_v35 = vld [vmem:[%s13751_s3 + $0xc88] sm:$0xff]  ;;  %4240 = vmatpush.msra.mxu2 %v2894_v48 }
 0x4ac   : > { %3955 = vmatpush.msra.mxu1 %v3077_v0  ;;  %3997 = vmatpush.msrb.mxu3 %v3137_v15  ;;  %v3069_v40 = vld [vmem:[%s13751_s3 + $0xc68] sm:$0xff]  ;;  %v14199_v15 = vld [vmem:[#allocation20_spill] sm:$0xff] }
 0x4ad   : > { %4241 = vmatpush.msra.mxu2 %v2890_v27  ;;  %v3129_v48 = vld [vmem:[%s13751_s3 + $0xe48] sm:$0xff]  ;;  %v10532_v27 = vpop.f32.mrf.mxu1 }
 0x4ae   : > { %6551 = vmatmul.msk.f32.gmra.mxu2 %vm3272_vm10, %v9936_v52  ;;  %3956 = vmatpush.msra.mxu1 %v3073_v35  ;;  %v2886_v52 = vld [vmem:[%s13751_s3 + $0x6b0] sm:$0xff]  ;;  %v3065_v35 = vld [vmem:[%s13751_s3 + $0xc48] sm:$0xff]  ;;  %14200 = vst [vmem:[#allocation126_spill] sm:$0xff] %v10532_v27 }
 0x4af   : > { %v10509_v33 = vpop.f32.mrf.mxu0  ;;  %3998 = vmatpush.msrb.mxu3 %v3133_v62  ;;  %4242 = vmatpush.msra.mxu2 %v2886_v52  ;;  %v2878_v52 = vld [vmem:[%s13751_s3 + $0x670] sm:$0xff]  ;;  %v3121_v62 = vld [vmem:[%s13751_s3 + $0xe08] sm:$0xff] }
 0x4b0   : > { %3957 = vmatpush.msra.mxu1 %v3069_v40  ;;  %v10551_v40 = vpop.f32.mrf.mxu3 }
 0x4b1   : > { %v3766_v16 = vpop.f32.mrf.mxu2  ;;  %3999 = vmatpush.msrb.mxu3 %v3129_v48  ;;  %v2874_v48 = vld [vmem:[%s13751_s3 + $0x650] sm:$0xff] }
 0x4b2   : > { %3850 = vmatmul.f32.gmra.mxu3 %v14198_v59  ;;  %4061 = vmatmul.f32.gmra.mxu0 %v10036_v25  ;;  %v10526_v0 = vadd.f32 %v3766_v16, %v10364_v29  ;;  %v2882_v25 = vld [vmem:[%s13751_s3 + $0x690] sm:$0xff]  ;;  %v3125_v29 = vld [vmem:[%s13751_s3 + $0xe28] sm:$0xff] }
 0x4b3   : > { %3809 = vmatmul.f32.gmra.mxu1 %v14199_v15  ;;  %v3061_v16 = vld [vmem:[%s13751_s3 + $0xc28] sm:$0xff]  ;;  %4243 = vmatpush.msra.mxu2 %v2882_v25  ;;  %v2870_v25 = vld [vmem:[%s13751_s3 + $0x630] sm:$0xff] }
 0x4b4   : > { %3958 = vmatpush.msra.mxu1 %v3065_v35  ;;  %4000 = vmatpush.msrb.mxu3 %v3125_v29  ;;  %v3057_v35 = vld [vmem:[%s13751_s3 + $0xc08] sm:$0xff] }
 0x4b5   : > { %4244 = vmatpush.msra.mxu2 %v2878_v52  ;;  %v10568_v52 = vpop.f32.mrf.mxu1 }
 0x4b6   : > { %6552 = vmatmul.msk.f32.gmra.mxu2 %vm3272_vm10, %v9968_v38  ;;  %3959 = vmatpush.msra.mxu1 %v3061_v16  ;;  %v14203_v16 = vld [vmem:[#allocation21_spill] sm:$0xff] }
 0x4b7   : > { %v3737_v27 = vpop.f32.mrf.mxu0  ;;  %4001 = vmatpush.msrb.mxu3 %v3121_v62  ;;  %4245 = vmatpush.msra.mxu2 %v2874_v48  ;;  %v2866_v62 = vld [vmem:[%s13751_s3 + $0x610] sm:$0xff] }
 0x4b8   : > { %3960 = vmatpush.msra.mxu1 %v3057_v35  ;;  %v3118_v48 = vld [vmem:[%s13751_s3 + $0xdf0] sm:$0xff] }
 0x4b9   : > { %v3769_v38 = vpop.f32.mrf.mxu2  ;;  %4246 = vmatpush.msra.mxu2 %v2870_v25  ;;  %v3114_v35 = vld [vmem:[%s13751_s3 + $0xdd0] sm:$0xff]  ;;  %4355 = vmatpush.msra.mxu0 %v3118_v48 }
 0x4ba   : > { %3853 = vmatmul.f32.gmra.mxu3 %v14201_v3  ;;  %4064 = vmatmul.f32.gmra.mxu0 %v10308_v14  ;;  %v10565_v29 = vadd.f32 %v3769_v38, %v10418_v20  ;;  %v10575_v14 = vpop.f32.mrf.mxu3  ;;  %v3106_v48 = vld [vmem:[%s13751_s3 + $0xd90] sm:$0xff] }
 0x4bb   : > { %3812 = vmatmul.f32.gmra.mxu1 %v14203_v16  ;;  %4247 = vmatpush.msra.mxu2 %v2866_v62 }
 0x4bc   : > { %14202 = vst [vmem:[#allocation127_spill] sm:$0xff] %v10565_v29  ;;  %4356 = vmatpush.msra.mxu0 %v3114_v35 }
 0x4bd   : > { %v10591_v25 = vpop.f32.mrf.mxu1 }
 0x4be   : > { %6553 = vmatmul.msk.f32.gmra.mxu2 %vm3272_vm10, %v9993_v49  ;;  %14205 = vst [vmem:[#allocation129_spill] sm:$0xff] %v10591_v25 }
 0x4bf   : > { %v10577_v23 = vpop.f32.mrf.mxu0 }
 0x4c1   : > { %v3772_v38 = vpop.f32.mrf.mxu2 }
 0x4c2   : > { %3856 = vmatmul.f32.gmra.mxu3 %v9400_v50  ;;  %4207 = vmatmul.f32.vlgmr.msrb.gmra.mxu0 %v8921_v11  ;;  %v10582_v20 = vadd.f32 %v3772_v38, %v10465_v2  ;;  %v3110_v2 = vld [vmem:[%s13751_s3 + $0xdb0] sm:$0xff]  ;;  %v10600_v38 = vpop.f32.mrf.mxu3 }
 0x4c3   : > { %3815 = vmatmul.f32.gmra.mxu1 %v9395_v21  ;;  %4357 = vmatpush.msra.mxu0 %v3110_v2  ;;  %14206 = vst [vmem:[#allocation130_spill] sm:$0xff] %v10600_v38  ;;  %v3102_v2 = vld [vmem:[%s13751_s3 + $0xd70] sm:$0xff] }
 0x4c4   : > { %14204 = vst [vmem:[#allocation128_spill] sm:$0xff] %v10582_v20  ;;  %v3098_v38 = vld [vmem:[%s13751_s3 + $0xd50] sm:$0xff] }
 0x4c5   : > { %4358 = vmatpush.msra.mxu0 %v3106_v48  ;;  %v10617_v25 = vpop.f32.mrf.mxu1  ;;  %v3090_v48 = vld [vmem:[%s13751_s3 + $0xd10] sm:$0xff] }
 0x4c6   : > { %6554 = vmatmul.msk.f32.gmra.mxu2 %vm3272_vm10, %v10025_v58  ;;  %14207 = vst [vmem:[#allocation131_spill] sm:$0xff] %v10617_v25  ;;  %v3078_v58 = vld [vmem:[%s13751_s3 + $0xcb0] sm:$0xff] }
 0x4c7   : > { %v10595_v62 = vpop.f32.mrf.mxu0  ;;  %4359 = vmatpush.msra.mxu0 %v3102_v2 }
 0x4c9   : > { %v3775_v11 = vpop.f32.mrf.mxu2  ;;  %4360 = vmatpush.msra.mxu0 %v3098_v38  ;;  %v2798_v38 = vld [vmem:[%s13751_s3 + $0x3f0] sm:$0xff] }
 0x4ca   : > { %3859 = vmatmul.f32.gmra.mxu3 %v9442_v6  ;;  %4210 = vmatmul.f32.gmra.mxu0 %v14189_v31  ;;  %v10608_v35 = vadd.f32 %v3775_v11, %v10509_v33  ;;  %v3094_v11 = vld [vmem:[%s13751_s3 + $0xd30] sm:$0xff]  ;;  %v10631_v2 = vpop.f32.mrf.mxu3 }
 0x4cb   : > { %3818 = vmatmul.f32.gmra.mxu1 %v9434_v53  ;;  %4361 = vmatpush.msra.mxu0 %v3094_v11  ;;  %14208 = vst [vmem:[#allocation132_spill] sm:$0xff] %v10631_v2  ;;  %v2734_v11 = vld [vmem:[%s13751_s3 + $0x1f0] sm:$0xff] }
 0x4cc   : > { %4150 = vmatpush.msra.mxu3 %v2798_v38  ;;  %4109 = vmatpush.msrb.mxu1 %v2734_v11  ;;  %v2790_v2 = vld [vmem:[%s13751_s3 + $0x3b0] sm:$0xff] }
 0x4cd   : > { %4362 = vmatpush.msra.mxu0 %v3090_v48  ;;  %v3082_v48 = vld [vmem:[%s13751_s3 + $0xcd0] sm:$0xff]  ;;  %v10669_v49 = vpop.f32.mrf.mxu1 }
 0x4ce   : > { %6555 = vmatmul.msk.f32.gmra.mxu2 %vm3272_vm10, %v10299_v1  ;;  %v14209_v1 = vld [vmem:[#allocation29_spill] sm:$0xff]  ;;  %v2726_v11 = vld [vmem:[%s13751_s3 + $0x1b0] sm:$0xff]  ;;  %14211 = vst [vmem:[#allocation134_spill] sm:$0xff] %v10669_v49 }
 0x4cf   : > { %v10621_v31 = vpop.f32.mrf.mxu0  ;;  %v3070_v49 = vld [vmem:[%s13751_s3 + $0xc70] sm:$0xff] }
 0x4d1   : > { %v3778_v33 = vpop.f32.mrf.mxu2 }
 0x4d2   : > { %4002 = vmatmul.f32.vlgmr.msrb.gmra.mxu3 %v9478_v45  ;;  %4213 = vmatmul.f32.gmra.mxu0 %v14192_v30  ;;  %v10633_v25 = vadd.f32 %v3778_v33, %v3737_v27  ;;  %v3086_v30 = vld [vmem:[%s13751_s3 + $0xcf0] sm:$0xff] }
 0x4d3   : > { %3961 = vmatmul.f32.vlgmr.msra.gmra.mxu1 %v14209_v1  ;;  %v2794_v27 = vld [vmem:[%s13751_s3 + $0x3d0] sm:$0xff]  ;;  %4363 = vmatpush.msra.mxu0 %v3086_v30 }
 0x4d4   : > { %v2730_v33 = vld [vmem:[%s13751_s3 + $0x1d0] sm:$0xff]  ;;  %4151 = vmatpush.msra.mxu3 %v2794_v27 }
 0x4d5   : > { %4110 = vmatpush.msrb.mxu1 %v2730_v33  ;;  %4364 = vmatpush.msra.mxu0 %v3082_v48  ;;  %v3182_v30 = vld [vmem:[%s13751_s3 + $0xff0] sm:$0xff]  ;;  %v10726_v20 = vpop.f32.mrf.mxu1 }
 0x4d6   : > { %4248 = vmatmul.f32.vlgmr.msra.gmra.mxu2 %v8966_v46  ;;  %4152 = vmatpush.msra.mxu3 %v2790_v2  ;;  %v2786_v27 = vld [vmem:[%s13751_s3 + $0x390] sm:$0xff]  ;;  %v10700_v46 = vpop.f32.mrf.mxu3  ;;  %14214 = vst [vmem:[#allocation137_spill] sm:$0xff] %v10726_v20 }
 0x4d7   : > { %v10658_v38 = vpop.f32.mrf.mxu0  ;;  %4396 = vmatpush.msrb.mxu2 %v3182_v30  ;;  %4111 = vmatpush.msrb.mxu1 %v2726_v11  ;;  %v2722_v48 = vld [vmem:[%s13751_s3 + $0x190] sm:$0xff]  ;;  %14212 = vst [vmem:[#allocation135_spill] sm:$0xff] %v10700_v46 }
 0x4d8   : > { %14210 = vst [vmem:[#allocation133_spill] sm:$0xff] %v10658_v38  ;;  %4365 = vmatpush.msra.mxu0 %v3078_v58  ;;  %v3074_v2 = vld [vmem:[%s13751_s3 + $0xc90] sm:$0xff]  ;;  %4153 = vmatpush.msra.mxu3 %v2786_v27 }
 0x4d9   : > { %v10674_v33 = vpop.f32.mrf.mxu2  ;;  %v3178_v30 = vld [vmem:[%s13751_s3 + $0xfd0] sm:$0xff]  ;;  %4112 = vmatpush.msrb.mxu1 %v2722_v48 }
 0x4da   : > { %4005 = vmatmul.f32.gmra.mxu3 %v9513_v47  ;;  %4216 = vmatmul.f32.gmra.mxu0 %v14196_v51  ;;  %v2782_v58 = vld [vmem:[%s13751_s3 + $0x370] sm:$0xff] }
 0x4db   : > { %3964 = vmatmul.f32.gmra.mxu1 %v9497_v19  ;;  %v2718_v11 = vld [vmem:[%s13751_s3 + $0x170] sm:$0xff]  ;;  %4366 = vmatpush.msra.mxu0 %v3074_v2 }
 0x4dc   : > { %v3174_v51 = vld [vmem:[%s13751_s3 + $0xfb0] sm:$0xff]  ;;  %4397 = vmatpush.msrb.mxu2 %v3178_v30  ;;  %4154 = vmatpush.msra.mxu3 %v2782_v58 }
 0x4dd   : > { %v2778_v27 = vld [vmem:[%s13751_s3 + $0x350] sm:$0xff]  ;;  %4113 = vmatpush.msrb.mxu1 %v2718_v11  ;;  %4367 = vmatpush.msra.mxu0 %v3070_v49 }
 0x4de   : > { %v2714_v48 = vld [vmem:[%s13751_s3 + $0x150] sm:$0xff]  ;;  %4251 = vmatmul.f32.gmra.mxu2 %v8999_v10  ;;  %4155 = vmatpush.msra.mxu3 %v2778_v27 }
 0x4df   : > { %v3066_v2 = vld [vmem:[%s13751_s3 + $0xc50] sm:$0xff]  ;;  %v10715_v58 = vpop.f32.mrf.mxu0  ;;  %4398 = vmatpush.msrb.mxu2 %v3174_v51  ;;  %4114 = vmatpush.msrb.mxu1 %v2714_v48 }
 0x4e0   : > { %v3170_v30 = vld [vmem:[%s13751_s3 + $0xf90] sm:$0xff]  ;;  %14213 = vst [vmem:[#allocation136_spill] sm:$0xff] %v10715_v58  ;;  %4368 = vmatpush.msra.mxu0 %v3066_v2 }
 0x4e1   : > { %v2774_v46 = vld [vmem:[%s13751_s3 + $0x330] sm:$0xff]  ;;  %4399 = vmatpush.msrb.mxu2 %v3170_v30  ;;  %v10728_v49 = vpop.f32.mrf.mxu2 }
 0x4e2   : > { %v2710_v11 = vld [vmem:[%s13751_s3 + $0x130] sm:$0xff]  ;;  %4008 = vmatmul.f32.gmra.mxu3 %v9539_v56  ;;  %4219 = vmatmul.f32.gmra.mxu0 %v14199_v15 }
 0x4e3   : > { %v3062_v10 = vld [vmem:[%s13751_s3 + $0xc30] sm:$0xff]  ;;  %4156 = vmatpush.msra.mxu3 %v2774_v46  ;;  %4115 = vmatpush.msrb.mxu1 %v2710_v11  ;;  %v10758_v11 = vpop.f32.mrf.mxu3 }
 0x4e4   : > { %v3166_v51 = vld [vmem:[%s13751_s3 + $0xf70] sm:$0xff]  ;;  %4369 = vmatpush.msra.mxu0 %v3062_v10  ;;  %14216 = vst [vmem:[#allocation138_spill] sm:$0xff] %v10758_v11 }
 0x4e5   : > { %v2770_v27 = vld [vmem:[%s13751_s3 + $0x310] sm:$0xff]  ;;  %4400 = vmatpush.msrb.mxu2 %v3166_v51 }
 0x4e6   : > { %v14215_v48 = vld [vmem:[#allocation40_spill] sm:$0xff]  ;;  %4157 = vmatpush.msra.mxu3 %v2770_v27  ;;  %4254 = vmatmul.f32.gmra.mxu2 %v14191_v12  ;;  %v14218_v12 = vld [vmem:[#allocation37_spill] sm:$0xff] }
 0x4e7   : > { %3967 = vmatmul.f32.gmra.mxu1 %v14215_v48  ;;  %v2706_v2 = vld [vmem:[%s13751_s3 + $0x110] sm:$0xff]  ;;  %v10760_v58 = vpop.f32.mrf.mxu0 }
 0x4e8   : > { %v3058_v30 = vld [vmem:[%s13751_s3 + $0xc10] sm:$0xff]  ;;  %4116 = vmatpush.msrb.mxu1 %v2706_v2  ;;  %14217 = vst [vmem:[#allocation139_spill] sm:$0xff] %v10760_v58 }
 0x4e9   : > { %v3162_v20 = vld [vmem:[%s13751_s3 + $0xf50] sm:$0xff]  ;;  %4370 = vmatpush.msra.mxu0 %v3058_v30  ;;  %v10771_v11 = vpop.f32.mrf.mxu2 }
 0x4ea   : > { %v2766_v46 = vld [vmem:[%s13751_s3 + $0x2f0] sm:$0xff]  ;;  %4401 = vmatpush.msrb.mxu2 %v3162_v20  ;;  %4011 = vmatmul.f32.gmra.mxu3 %v14218_v12  ;;  %v14219_v20 = vld [vmem:[#allocation41_spill] sm:$0xff] }
 0x4eb   : > { %v2702_v15 = vld [vmem:[%s13751_s3 + $0xf0] sm:$0xff]  ;;  %4158 = vmatpush.msra.mxu3 %v2766_v46  ;;  %4222 = vmatmul.f32.gmra.mxu0 %v14203_v16  ;;  %v10782_v46 = vpop.f32.mrf.mxu1  ;;  %v10805_v58 = vpop.f32.mrf.mxu3 }
 0x4ec   : > { %v3158_v10 = vld [vmem:[%s13751_s3 + $0xf30] sm:$0xff]  ;;  %4117 = vmatpush.msrb.mxu1 %v2702_v15  ;;  %14220 = vst [vmem:[#allocation140_spill] sm:$0xff] %v10782_v46 }
 0x4ed   : > { %v2762_v51 = vld [vmem:[%s13751_s3 + $0x2d0] sm:$0xff]  ;;  %4402 = vmatpush.msrb.mxu2 %v3158_v10  ;;  %14221 = vst [vmem:[#allocation141_spill] sm:$0xff] %v10805_v58 }
 0x4ee   : > { %v2698_v27 = vld [vmem:[%s13751_s3 + $0xd0] sm:$0xff]  ;;  %4159 = vmatpush.msra.mxu3 %v2762_v51  ;;  %4257 = vmatmul.f32.gmra.mxu2 %v14195_v42 }
 0x4ef   : > { %v3154_v2 = vld [vmem:[%s13751_s3 + $0xf10] sm:$0xff]  ;;  %3970 = vmatmul.f32.gmra.mxu1 %v14219_v20  ;;  %v10800_v46 = vpop.f32.mrf.mxu0 }
 0x4f0   : > { %v2758_v15 = vld [vmem:[%s13751_s3 + $0x2b0] sm:$0xff]  ;;  %4118 = vmatpush.msrb.mxu1 %v2698_v27  ;;  %4403 = vmatpush.msrb.mxu2 %v3154_v2 }
 0x4f1   : > { %v2694_v30 = vld [vmem:[%s13751_s3 + $0xb0] sm:$0xff]  ;;  %4160 = vmatpush.msra.mxu3 %v2758_v15  ;;  %v10813_v8 = vpop.f32.mrf.mxu2 }
 0x4f2   : > { %v3150_v10 = vld [vmem:[%s13751_s3 + $0xef0] sm:$0xff]  ;;  %4119 = vmatpush.msrb.mxu1 %v2694_v30  ;;  %14222 = vst [vmem:[#allocation142_spill] sm:$0xff] %v10813_v8 }
 0x4f3   : > { %v2754_v16 = vld [vmem:[%s13751_s3 + $0x290] sm:$0xff]  ;;  %4404 = vmatpush.msrb.mxu2 %v3150_v10  ;;  %4225 = vmatmul.f32.gmra.mxu0 %v9395_v21 }
 0x4f4   : > { %v2690_v51 = vld [vmem:[%s13751_s3 + $0x90] sm:$0xff]  ;;  %4161 = vmatpush.msra.mxu3 %v2754_v16  ;;  %v14223_v16 = vld [vmem:[#allocation58_spill] sm:$0xff] }
 0x4f5   : > { %v3146_v27 = vld [vmem:[%s13751_s3 + $0xed0] sm:$0xff]  ;;  %4120 = vmatpush.msrb.mxu1 %v2690_v51  ;;  %4014 = vmatmul.f32.gmra.mxu3 %v14223_v16  ;;  %v14224_v51 = vld [vmem:[#allocation55_spill] sm:$0xff] }
 0x4f6   : > { %v2750_v2 = vld [vmem:[%s13751_s3 + $0x270] sm:$0xff]  ;;  %4405 = vmatpush.msrb.mxu2 %v3146_v27 }
 0x4f7   : > { %v3142_v15 = vld [vmem:[%s13751_s3 + $0xeb0] sm:$0xff]  ;;  %4162 = vmatpush.msra.mxu3 %v2750_v2  ;;  %3973 = vmatmul.f32.gmra.mxu1 %v14224_v51  ;;  %v10842_v8 = vpop.f32.mrf.mxu0 }
 0x4f8   : > { %v2686_v30 = vld [vmem:[%s13751_s3 + $0x70] sm:$0xff]  ;;  %4406 = vmatpush.msrb.mxu2 %v3142_v15  ;;  %v10833_v15 = vpop.f32.mrf.mxu1 }
 0x4f9   : > { %v2746_v42 = vld [vmem:[%s13751_s3 + $0x250] sm:$0xff]  ;;  %4121 = vmatpush.msrb.mxu1 %v2686_v30  ;;  %14225 = vst [vmem:[#allocation143_spill] sm:$0xff] %v10833_v15  ;;  %4260 = vmatmul.f32.gmra.mxu2 %v14198_v59  ;;  %v10850_v15 = vpop.f32.mrf.mxu2  ;;  %v14227_v59 = vld [vmem:[#allocation46_spill] sm:$0xff] }
 0x4fa   : > { %v3138_v10 = vld [vmem:[%s13751_s3 + $0xe90] sm:$0xff]  ;;  %4163 = vmatpush.msra.mxu3 %v2746_v42  ;;  %14226 = vst [vmem:[#allocation144_spill] sm:$0xff] %v10850_v15 }
 0x4fb   : > { %v2682_v27 = vld [vmem:[%s13751_s3 + $0x50] sm:$0xff]  ;;  %4407 = vmatpush.msrb.mxu2 %v3138_v10  ;;  %4228 = vmatmul.f32.gmra.mxu0 %v9434_v53 }
 0x4fc   : > { %v2742_v2 = vld [vmem:[%s13751_s3 + $0x230] sm:$0xff]  ;;  %4122 = vmatpush.msrb.mxu1 %v2682_v27 }
 0x4fd   : > { %v3134_v58 = vld [vmem:[%s13751_s3 + $0xe70] sm:$0xff]  ;;  %4164 = vmatpush.msra.mxu3 %v2742_v2  ;;  %v14229_v2 = vld [vmem:[#allocation43_spill] sm:$0xff] }
 0x4fe   : > { %v2678_v21 = vld [vmem:[%s13751_s3 + $0x30] sm:$0xff]  ;;  %4408 = vmatpush.msrb.mxu2 %v3134_v58  ;;  %4017 = vmatmul.f32.gmra.mxu3 %v14227_v59  ;;  %v10857_v58 = vpop.f32.mrf.mxu3 }
 0x4ff   : > { %v2738_v42 = vld [vmem:[%s13751_s3 + $0x210] sm:$0xff]  ;;  %4123 = vmatpush.msrb.mxu1 %v2678_v21  ;;  %14228 = vst [vmem:[#allocation145_spill] sm:$0xff] %v10857_v58 }
 0x500   : > { %v3130_v30 = vld [vmem:[%s13751_s3 + $0xe50] sm:$0xff]  ;;  %4165 = vmatpush.msra.mxu3 %v2738_v42  ;;  %3976 = vmatmul.f32.gmra.mxu1 %v14229_v2  ;;  %v3369_v42 = vadd.f32 %v10207_v32, %v10250_v5  ;;  %v10866_v15 = vpop.f32.mrf.mxu1  ;;  %v2735_v5 = vld [vmem:[%s13751_s3 + $0x1f8] sm:$0xff] }
 0x501   : > { %v3126_v10 = vld [vmem:[%s13751_s3 + $0xe30] sm:$0xff]  ;;  %4409 = vmatpush.msrb.mxu2 %v3130_v30  ;;  %v10863_v30 = vpop.f32.mrf.mxu0  ;;  %14230 = vst [vmem:[#allocation146_spill] sm:$0xff] %v10866_v15  ;;  %v10869_v38 = vpop.f32.mrf.mxu2  ;;  %4519 = vmatpush.msrb.mxu0 %v2735_v5 }
 0x502   : > { %v2674_v27 = vld [vmem:[%s13751_s3 + $0x10] sm:$0xff]  ;;  %4263 = vmatmul.f32.gmra.mxu2 %v14201_v3  ;;  %v3410_v53 = vadd.f32 %v10006_v41, %v3369_v42  ;;  %v2983_v3 = vld [vmem:[%s13751_s3 + $0x9b8] sm:$0xff] }
 0x503   : > { %v3122_v21 = vld [vmem:[%s13751_s3 + $0xe10] sm:$0xff]  ;;  %4410 = vmatpush.msrb.mxu2 %v3126_v10  ;;  %4124 = vmatpush.msrb.mxu1 %v2674_v27  ;;  %v14232_v10 = vld [vmem:[#allocation42_spill] sm:$0xff] }
 0x504   : > { %v3451_v29 = vadd.f32 %v10061_v26, %v3410_v53  ;;  %v14231_v58 = vld [vmem:[#allocation52_spill] sm:$0xff]  ;;  %4371 = vmatmul.f32.vlgmr.msra.gmra.mxu0 %v14209_v1  ;;  %v2731_v26 = vld [vmem:[%s13751_s3 + $0x1d8] sm:$0xff] }
 0x505   : > { %4411 = vmatpush.msrb.mxu2 %v3122_v21  ;;  %4520 = vmatpush.msrb.mxu0 %v2731_v26  ;;  %v2795_v1 = vld [vmem:[%s13751_s3 + $0x3d8] sm:$0xff] }
 0x506   : > { %4020 = vmatmul.f32.gmra.mxu3 %v14231_v58  ;;  %v3492_v32 = vadd.f32 %v10568_v52, %v3451_v29  ;;  %v10878_v41 = vpop.f32.mrf.mxu3  ;;  %v2727_v29 = vld [vmem:[%s13751_s3 + $0x1b8] sm:$0xff] }
 0x507   : > { %14233 = vst [vmem:[#allocation52_spill] sm:$0xff] %v10878_v41  ;;  %4521 = vmatpush.msrb.mxu0 %v2727_v29  ;;  %v2715_v41 = vld [vmem:[%s13751_s3 + $0x158] sm:$0xff] }
 0x508   : > { %3979 = vmatmul.f32.gmra.mxu1 %v14232_v10  ;;  %v3533_v27 = vadd.f32 %v10551_v40, %v3492_v32  ;;  %v3655_v42 = vpop.f32.mrf.mxu1  ;;  %v2723_v40 = vld [vmem:[%s13751_s3 + $0x198] sm:$0xff] }
 0x509   : > { %v10882_v53 = vpop.f32.mrf.mxu0  ;;  %v10892_v5 = vpop.f32.mrf.mxu2  ;;  %v14234_v32 = vld [vmem:[#allocation45_spill] sm:$0xff]  ;;  %4522 = vmatpush.msrb.mxu0 %v2723_v40  ;;  %v14236_v40 = vld [vmem:[#allocation8_spill] sm:$0xff] }
 0x50a   : > { %4266 = vmatmul.f32.gmra.mxu2 %v9400_v50  ;;  %v3574_v21 = vadd.f32 %v10575_v14, %v3533_v27  ;;  %v2719_v27 = vld [vmem:[%s13751_s3 + $0x178] sm:$0xff] }
 0x50b   : > { %4523 = vmatpush.msrb.mxu0 %v2719_v27 }
 0x50c   : > { %v3615_v52 = vadd.f32 %v10331_v36, %v3574_v21  ;;  %4374 = vmatmul.f32.gmra.mxu0 %v9497_v19 }
 0x50d   : > { %4524 = vmatpush.msrb.mxu0 %v2715_v41  ;;  %v3054_v41 = vld [vmem:[%s13751_s3 + $0xbf0] sm:$0xff] }
 0x50e   : > { %4023 = vmatmul.f32.gmra.mxu3 %v9838_v18  ;;  %v3656_v14 = vadd.f32 %v3655_v42, %v3615_v52  ;;  %v3696_v26 = vpop.f32.mrf.mxu3  ;;  %v2711_v42 = vld [vmem:[%s13751_s3 + $0x138] sm:$0xff] }
 0x50f   : > { %v2707_v52 = vld [vmem:[%s13751_s3 + $0x118] sm:$0xff]  ;;  %4525 = vmatpush.msrb.mxu0 %v2711_v42  ;;  %4314 = vmatpush.msrb.mxu3 %v3054_v41  ;;  %v3050_v42 = vld [vmem:[%s13751_s3 + $0xbd0] sm:$0xff] }
 0x510   : > { %3982 = vmatmul.f32.gmra.mxu1 %v14234_v32  ;;  %v10903_v36 = vadd.f32 %v3696_v26, %v3656_v14  ;;  %v3798_v15 = vpop.f32.mrf.mxu1  ;;  %v2990_v14 = vld [vmem:[%s13751_s3 + $0x9f0] sm:$0xff]  ;;  %v2703_v26 = vld [vmem:[%s13751_s3 + $0xf8] sm:$0xff] }
 0x511   : > { %v10906_v21 = vpop.f32.mrf.mxu0  ;;  %v10914_v29 = vpop.f32.mrf.mxu2  ;;  %v3799_v27 = vadd.f32 %v3798_v15, %v10383_v28  ;;  %4273 = vmatpush.msra.mxu1 %v2990_v14  ;;  %4526 = vmatpush.msrb.mxu0 %v2707_v52  ;;  %v2986_v28 = vld [vmem:[%s13751_s3 + $0x9d0] sm:$0xff]  ;;  %v2699_v15 = vld [vmem:[%s13751_s3 + $0xd8] sm:$0xff] }
 0x512   : > { %14235 = vst [vmem:[#allocation147_spill] sm:$0xff] %v10903_v36  ;;  %4269 = vmatmul.f32.gmra.mxu2 %v9442_v6  ;;  %4315 = vmatpush.msrb.mxu3 %v3050_v42  ;;  %v3046_v41 = vld [vmem:[%s13751_s3 + $0xbb0] sm:$0xff]  ;;  %v2691_v42 = vld [vmem:[%s13751_s3 + $0x98] sm:$0xff] }
 0x513   : > { %4527 = vmatpush.msrb.mxu0 %v2703_v26  ;;  %4274 = vmatpush.msra.mxu1 %v2986_v28  ;;  %v2982_v14 = vld [vmem:[%s13751_s3 + $0x9b0] sm:$0xff] }
 0x514   : > { %4377 = vmatmul.f32.gmra.mxu0 %v14215_v48  ;;  %4316 = vmatpush.msrb.mxu3 %v3046_v41  ;;  %v3042_v26 = vld [vmem:[%s13751_s3 + $0xb90] sm:$0xff] }
 0x515   : > { %4528 = vmatpush.msrb.mxu0 %v2699_v15  ;;  %v14237_v15 = vld [vmem:[#allocation12_spill] sm:$0xff]  ;;  %4275 = vmatpush.msra.mxu1 %v2982_v14  ;;  %v2791_v14 = vld [vmem:[%s13751_s3 + $0x3b8] sm:$0xff] }
 0x516   : > { %4166 = vmatmul.f32.vlgmr.msra.gmra.mxu3 %v8918_v44  ;;  %v3839_v36 = vpop.f32.mrf.mxu3  ;;  %v2978_v41 = vld [vmem:[%s13751_s3 + $0x990] sm:$0xff] }
 0x517   : > { %v3840_v48 = vadd.f32 %v3839_v36, %v3799_v27  ;;  %v2695_v27 = vld [vmem:[%s13751_s3 + $0xb8] sm:$0xff]  ;;  %4317 = vmatpush.msrb.mxu3 %v3042_v26  ;;  %4276 = vmatpush.msra.mxu1 %v2978_v41 }
 0x518   : > { %4125 = vmatmul.f32.vlgmr.msrb.gmra.mxu1 %v14236_v40  ;;  %v3801_v52 = vpop.f32.mrf.mxu1  ;;  %4529 = vmatpush.msrb.mxu0 %v2695_v27  ;;  %v2974_v27 = vld [vmem:[%s13751_s3 + $0x970] sm:$0xff] }
 0x519   : > { %v10936_v19 = vpop.f32.mrf.mxu0  ;;  %v3881_v36 = vadd.f32 %v10577_v23, %v3840_v48  ;;  %v2799_v23 = vld [vmem:[%s13751_s3 + $0x3f8] sm:$0xff]  ;;  %v10957_v48 = vpop.f32.mrf.mxu2  ;;  %4277 = vmatpush.msra.mxu1 %v2974_v27 }
 0x51a   : > { %4412 = vmatmul.f32.vlgmr.msrb.gmra.mxu2 %v9478_v45  ;;  %4530 = vmatpush.msrb.mxu0 %v2691_v42  ;;  %v2679_v27 = vld [vmem:[%s13751_s3 + $0x38] sm:$0xff] }
 0x51b   : > { %v10968_v28 = vadd.f32 %v10674_v33, %v3881_v36  ;;  %4560 = vmatpush.msra.mxu2 %v2799_v23  ;;  %v3038_v33 = vld [vmem:[%s13751_s3 + $0xb70] sm:$0xff] }
 0x51c   : > { %4380 = vmatmul.f32.gmra.mxu0 %v14219_v20  ;;  %v3802_v20 = vadd.f32 %v3801_v52, %v10440_v7  ;;  %v2687_v7 = vld [vmem:[%s13751_s3 + $0x78] sm:$0xff]  ;;  %v3034_v23 = vld [vmem:[%s13751_s3 + $0xb50] sm:$0xff]  ;;  %4318 = vmatpush.msrb.mxu3 %v3038_v33 }
 0x51d   : > { %4561 = vmatpush.msra.mxu2 %v2795_v1  ;;  %4531 = vmatpush.msrb.mxu0 %v2687_v7  ;;  %v2787_v1 = vld [vmem:[%s13751_s3 + $0x398] sm:$0xff]  ;;  %v3030_v33 = vld [vmem:[%s13751_s3 + $0xb30] sm:$0xff] }
 0x51e   : > { %4169 = vmatmul.f32.gmra.mxu3 %v8945_v60  ;;  %v3842_v36 = vpop.f32.mrf.mxu3 }
 0x51f   : > { %v3843_v52 = vadd.f32 %v3842_v36, %v3802_v20  ;;  %v2683_v20 = vld [vmem:[%s13751_s3 + $0x58] sm:$0xff]  ;;  %4562 = vmatpush.msra.mxu2 %v2791_v14  ;;  %4319 = vmatpush.msrb.mxu3 %v3034_v23  ;;  %v2970_v36 = vld [vmem:[%s13751_s3 + $0x950] sm:$0xff] }
 0x520   : > { %4128 = vmatmul.f32.gmra.mxu1 %v14237_v15  ;;  %v10995_v42 = vpop.f32.mrf.mxu1  ;;  %4532 = vmatpush.msrb.mxu0 %v2683_v20  ;;  %v2783_v14 = vld [vmem:[%s13751_s3 + $0x378] sm:$0xff]  ;;  %v3026_v23 = vld [vmem:[%s13751_s3 + $0xb10] sm:$0xff] }
 0x521   : > { %v3884_v26 = vadd.f32 %v10595_v62, %v3843_v52  ;;  %v11000_v41 = vpop.f32.mrf.mxu0  ;;  %v11008_v62 = vpop.f32.mrf.mxu2  ;;  %v2966_v52 = vld [vmem:[%s13751_s3 + $0x930] sm:$0xff]  ;;  %4278 = vmatpush.msra.mxu1 %v2970_v36  ;;  %4563 = vmatpush.msra.mxu2 %v2787_v1  ;;  %v2779_v20 = vld [vmem:[%s13751_s3 + $0x358] sm:$0xff] }
 0x522   : > { %4415 = vmatmul.f32.gmra.mxu2 %v9513_v47  ;;  %4320 = vmatpush.msrb.mxu3 %v3030_v33  ;;  %v3022_v36 = vld [vmem:[%s13751_s3 + $0xaf0] sm:$0xff]  ;;  %v2775_v33 = vld [vmem:[%s13751_s3 + $0x338] sm:$0xff] }
 0x523   : > { %v11019_v7 = vadd.f32 %v10728_v49, %v3884_v26  ;;  %4533 = vmatpush.msrb.mxu0 %v2679_v27  ;;  %v2962_v49 = vld [vmem:[%s13751_s3 + $0x910] sm:$0xff]  ;;  %v2675_v26 = vld [vmem:[%s13751_s3 + $0x18] sm:$0xff]  ;;  %4279 = vmatpush.msra.mxu1 %v2966_v52 }
 0x524   : > { %4383 = vmatmul.f32.gmra.mxu0 %v14224_v51  ;;  %4564 = vmatpush.msra.mxu2 %v2783_v14  ;;  %v2958_v27 = vld [vmem:[%s13751_s3 + $0x8f0] sm:$0xff] }
 0x525   : > { %4321 = vmatpush.msrb.mxu3 %v3026_v23  ;;  %4280 = vmatpush.msra.mxu1 %v2962_v49  ;;  %v3018_v52 = vld [vmem:[%s13751_s3 + $0xad0] sm:$0xff]  ;;  %v2771_v23 = vld [vmem:[%s13751_s3 + $0x318] sm:$0xff] }
 0x526   : > { %4172 = vmatmul.f32.gmra.mxu3 %v8961_v9  ;;  %v11031_v51 = vpop.f32.mrf.mxu3  ;;  %4534 = vmatpush.msrb.mxu0 %v2675_v26  ;;  %v2954_v26 = vld [vmem:[%s13751_s3 + $0x8d0] sm:$0xff] }
 0x527   : > { %4565 = vmatpush.msra.mxu2 %v2779_v20  ;;  %4322 = vmatpush.msrb.mxu3 %v3022_v36  ;;  %v3014_v20 = vld [vmem:[%s13751_s3 + $0xab0] sm:$0xff]  ;;  %v2767_v36 = vld [vmem:[%s13751_s3 + $0x2f8] sm:$0xff] }
 0x528   : > { %4131 = vmatmul.f32.gmra.mxu1 %v8528_v39  ;;  %v11046_v1 = vpop.f32.mrf.mxu1 }
 0x529   : > { %v11057_v14 = vpop.f32.mrf.mxu2  ;;  %v11064_v49 = vpop.f32.mrf.mxu0  ;;  %4566 = vmatpush.msra.mxu2 %v2775_v33  ;;  %4281 = vmatpush.msra.mxu1 %v2958_v27  ;;  %v2950_v33 = vld [vmem:[%s13751_s3 + $0x8b0] sm:$0xff] }
 0x52a   : > { %4418 = vmatmul.f32.gmra.mxu2 %v9539_v56  ;;  %4323 = vmatpush.msrb.mxu3 %v3018_v52  ;;  %v3010_v27 = vld [vmem:[%s13751_s3 + $0xa90] sm:$0xff]  ;;  %v2763_v52 = vld [vmem:[%s13751_s3 + $0x2d8] sm:$0xff] }
 0x52b   : > { %4567 = vmatpush.msra.mxu2 %v2771_v23  ;;  %4282 = vmatpush.msra.mxu1 %v2954_v26  ;;  %v3006_v23 = vld [vmem:[%s13751_s3 + $0xa70] sm:$0xff] }
 0x52c   : > { %4386 = vmatmul.f32.gmra.mxu0 %v14229_v2  ;;  %4324 = vmatpush.msrb.mxu3 %v3014_v20  ;;  %v2946_v26 = vld [vmem:[%s13751_s3 + $0x890] sm:$0xff] }
 0x52d   : > { %4568 = vmatpush.msra.mxu2 %v2767_v36  ;;  %4283 = vmatpush.msra.mxu1 %v2950_v33  ;;  %v3002_v20 = vld [vmem:[%s13751_s3 + $0xa50] sm:$0xff]  ;;  %v2755_v33 = vld [vmem:[%s13751_s3 + $0x298] sm:$0xff] }
 0x52e   : > { %4175 = vmatmul.f32.gmra.mxu3 %v8991_v37  ;;  %v11076_v2 = vpop.f32.mrf.mxu3  ;;  %v2942_v36 = vld [vmem:[%s13751_s3 + $0x870] sm:$0xff] }
 0x52f   : > { %4325 = vmatpush.msrb.mxu3 %v3010_v27  ;;  %4569 = vmatpush.msra.mxu2 %v2763_v52  ;;  %v2998_v27 = vld [vmem:[%s13751_s3 + $0xa30] sm:$0xff] }
 0x530   : > { %4134 = vmatmul.f32.gmra.mxu1 %v8558_v63  ;;  %v11088_v56 = vpop.f32.mrf.mxu1 }
 0x531   : > { %v11099_v47 = vpop.f32.mrf.mxu2  ;;  %4326 = vmatpush.msrb.mxu3 %v3006_v23  ;;  %4284 = vmatpush.msra.mxu1 %v2946_v26  ;;  %v11116_v52 = vpop.f32.mrf.mxu0  ;;  %v2938_v23 = vld [vmem:[%s13751_s3 + $0x850] sm:$0xff] }
 0x532   : > { %4421 = vmatmul.f32.gmra.mxu2 %v14218_v12  ;;  %v2759_v12 = vld [vmem:[%s13751_s3 + $0x2b8] sm:$0xff]  ;;  %v2994_v26 = vld [vmem:[%s13751_s3 + $0xa10] sm:$0xff] }
 0x533   : > { %4570 = vmatpush.msra.mxu2 %v2759_v12  ;;  %4327 = vmatpush.msrb.mxu3 %v3002_v20  ;;  %v2751_v12 = vld [vmem:[%s13751_s3 + $0x278] sm:$0xff] }
 0x534   : > { %4389 = vmatmul.f32.gmra.mxu0 %v14232_v10  ;;  %4285 = vmatpush.msra.mxu1 %v2942_v36  ;;  %v2747_v20 = vld [vmem:[%s13751_s3 + $0x258] sm:$0xff]  ;;  %v2934_v36 = vld [vmem:[%s13751_s3 + $0x830] sm:$0xff] }
 0x535   : > { %4571 = vmatpush.msra.mxu2 %v2755_v33  ;;  %4328 = vmatpush.msrb.mxu3 %v2998_v27  ;;  %v2743_v33 = vld [vmem:[%s13751_s3 + $0x238] sm:$0xff]  ;;  %v2930_v27 = vld [vmem:[%s13751_s3 + $0x810] sm:$0xff] }
 0x536   : > { %4178 = vmatmul.f32.gmra.mxu3 %v9019_v34  ;;  %v11118_v10 = vpop.f32.mrf.mxu3  ;;  %4286 = vmatpush.msra.mxu1 %v2938_v23  ;;  %v2739_v23 = vld [vmem:[%s13751_s3 + $0x218] sm:$0xff] }
 0x537   : > { %4572 = vmatpush.msra.mxu2 %v2751_v12  ;;  %4329 = vmatpush.msrb.mxu3 %v2994_v26 }
 0x538   : > { %4137 = vmatmul.f32.gmra.mxu1 %v8588_v55  ;;  %v11130_v45 = vpop.f32.mrf.mxu1 }
 0x539   : > { %4573 = vmatpush.msra.mxu2 %v2747_v20  ;;  %4287 = vmatpush.msra.mxu1 %v2934_v36  ;;  %v11155_v26 = vpop.f32.mrf.mxu0  ;;  %v2991_v20 = vld [vmem:[%s13751_s3 + $0x9f8] sm:$0xff] }
 0x53a   : > { %4424 = vmatmul.f32.gmra.mxu2 %v14223_v16  ;;  %v11138_v16 = vpop.f32.mrf.mxu2  ;;  %4683 = vmatpush.msra.mxu0 %v2991_v20  ;;  %v14238_v20 = vld [vmem:[#allocation9_spill] sm:$0xff] }
 0x53b   : > { %4574 = vmatpush.msra.mxu2 %v2743_v33  ;;  %4288 = vmatpush.msra.mxu1 %v2930_v27 }
 0x53c   : > { %4392 = vmatmul.f32.gmra.mxu0 %v14234_v32 }
 0x53d   : > { %4575 = vmatpush.msra.mxu2 %v2739_v23  ;;  %v2987_v23 = vld [vmem:[%s13751_s3 + $0x9d8] sm:$0xff] }
 0x53e   : > { %4181 = vmatmul.f32.gmra.mxu3 %v9161_v24  ;;  %v11152_v12 = vpop.f32.mrf.mxu3  ;;  %4684 = vmatpush.msra.mxu0 %v2987_v23 }
 0x540   : > { %4140 = vmatmul.f32.gmra.mxu1 %v8620_v43  ;;  %v3816_v32 = vpop.f32.mrf.mxu1  ;;  %4685 = vmatpush.msra.mxu0 %v2983_v3  ;;  %v2967_v3 = vld [vmem:[%s13751_s3 + $0x938] sm:$0xff] }
 0x541   : > { %v3817_v36 = vadd.f32 %v3816_v32, %v10608_v35  ;;  %v11171_v50 = vpop.f32.mrf.mxu0  ;;  %v2979_v32 = vld [vmem:[%s13751_s3 + $0x998] sm:$0xff] }
 0x542   : > { %4427 = vmatmul.f32.gmra.mxu2 %v14227_v59  ;;  %v11157_v6 = vpop.f32.mrf.mxu2  ;;  %4686 = vmatpush.msra.mxu0 %v2979_v32 }
 0x544   : > { %4535 = vmatmul.f32.vlgmr.msrb.gmra.mxu0 %v14236_v40 }
 0x546   : > { %4184 = vmatmul.f32.gmra.mxu3 %v9232_v4  ;;  %v3857_v33 = vpop.f32.mrf.mxu3 }
 0x547   : > { %v3858_v27 = vadd.f32 %v3857_v33, %v3817_v36  ;;  %v2975_v33 = vld [vmem:[%s13751_s3 + $0x978] sm:$0xff] }
 0x548   : > { %4143 = vmatmul.f32.gmra.mxu1 %v8697_v54  ;;  %v3819_v40 = vpop.f32.mrf.mxu1  ;;  %4687 = vmatpush.msra.mxu0 %v2975_v33  ;;  %v3246_v33 = vld [vmem:[%s13751_s3 + $0x11f0] sm:$0xff] }
 0x549   : > { %v3899_v59 = vadd.f32 %v10800_v46, %v3858_v27  ;;  %v3820_v36 = vadd.f32 %v3819_v40, %v10633_v25  ;;  %v2963_v40 = vld [vmem:[%s13751_s3 + $0x918] sm:$0xff]  ;;  %4437 = vmatpush.msrb.mxu1 %v3246_v33 }
 0x54a   : > { %4430 = vmatmul.f32.gmra.mxu2 %v14231_v58  ;;  %v11176_v35 = vpop.f32.mrf.mxu2  ;;  %v3055_v33 = vld [vmem:[%s13751_s3 + $0xbf8] sm:$0xff] }
 0x54b   : > { %v11184_v46 = vadd.f32 %v10892_v5, %v3899_v59  ;;  %v2971_v59 = vld [vmem:[%s13751_s3 + $0x958] sm:$0xff]  ;;  %4724 = vmatpush.msrb.mxu2 %v3055_v33  ;;  %v3226_v33 = vld [vmem:[%s13751_s3 + $0x1150] sm:$0xff] }
 0x54c   : > { %4538 = vmatmul.f32.gmra.mxu0 %v14237_v15 }
 0x54d   : > { %4688 = vmatpush.msra.mxu0 %v2971_v59  ;;  %v3242_v59 = vld [vmem:[%s13751_s3 + $0x11d0] sm:$0xff] }
 0x54e   : > { %4187 = vmatmul.f32.gmra.mxu3 %v9350_v13  ;;  %v3860_v27 = vpop.f32.mrf.mxu3  ;;  %4438 = vmatpush.msrb.mxu1 %v3242_v59 }
 0x54f   : > { %v3861_v23 = vadd.f32 %v3860_v27, %v3820_v36  ;;  %v14239_v36 = vld [vmem:[#allocation22_spill] sm:$0xff]  ;;  %4689 = vmatpush.msra.mxu0 %v2967_v3 }
 0x550   : > { %4146 = vmatmul.f32.gmra.mxu1 %v14238_v20  ;;  %v3962_v15 = vpop.f32.mrf.mxu1 }
 0x551   : > { %v3902_v5 = vadd.f32 %v10842_v8, %v3861_v23  ;;  %v11209_v8 = vpop.f32.mrf.mxu0  ;;  %v3963_v27 = vadd.f32 %v3962_v15, %v10968_v28  ;;  %4690 = vmatpush.msra.mxu0 %v2963_v40  ;;  %v3805_v28 = vadd.f32 %v10995_v42, %v10484_v57  ;;  %v2951_v40 = vld [vmem:[%s13751_s3 + $0x8b8] sm:$0xff] }
 0x552   : > { %4433 = vmatmul.f32.gmra.mxu2 %v9838_v18  ;;  %v11199_v25 = vpop.f32.mrf.mxu2  ;;  %v2947_v42 = vld [vmem:[%s13751_s3 + $0x898] sm:$0xff] }
 0x553   : > { %v11207_v32 = vadd.f32 %v10914_v29, %v3902_v5  ;;  %v2955_v5 = vld [vmem:[%s13751_s3 + $0x8d8] sm:$0xff] }
 0x554   : > { %4541 = vmatmul.f32.gmra.mxu0 %v8528_v39  ;;  %v2959_v39 = vld [vmem:[%s13751_s3 + $0x8f8] sm:$0xff] }
 0x555   : > { %4691 = vmatpush.msra.mxu0 %v2959_v39  ;;  %v14240_v39 = vld [vmem:[#allocation25_spill] sm:$0xff] }
 0x556   : > { %4330 = vmatmul.f32.vlgmr.msrb.gmra.mxu3 %v9403_v17  ;;  %v4003_v23 = vpop.f32.mrf.mxu3 }
 0x557   : > { %v4004_v29 = vadd.f32 %v4003_v23, %v3963_v27  ;;  %4692 = vmatpush.msra.mxu0 %v2955_v5  ;;  %v3846_v27 = vadd.f32 %v11031_v51, %v3805_v28  ;;  %v3234_v51 = vld [vmem:[%s13751_s3 + $0x1190] sm:$0xff]  ;;  %v3051_v23 = vld [vmem:[%s13751_s3 + $0xbd8] sm:$0xff] }
 0x558   : > { %4289 = vmatmul.f32.vlgmr.msra.gmra.mxu1 %v14239_v36  ;;  %v3965_v3 = vpop.f32.mrf.mxu1  ;;  %v3230_v5 = vld [vmem:[%s13751_s3 + $0x1170] sm:$0xff]  ;;  %4725 = vmatpush.msrb.mxu2 %v3051_v23 }
 0x559   : > { %v4045_v15 = vadd.f32 %v10863_v30, %v4004_v29  ;;  %4693 = vmatpush.msra.mxu0 %v2951_v40  ;;  %v11260_v29 = vpop.f32.mrf.mxu0 }
 0x55a   : > { %4576 = vmatmul.f32.vlgmr.msra.gmra.mxu2 %v8918_v44  ;;  %v3238_v44 = vld [vmem:[%s13751_s3 + $0x11b0] sm:$0xff]  ;;  %v11242_v30 = vpop.f32.mrf.mxu2 }
 0x55b   : > { %v11240_v57 = vadd.f32 %v10957_v48, %v4045_v15  ;;  %v3966_v48 = vadd.f32 %v3965_v3, %v11019_v7  ;;  %4439 = vmatpush.msrb.mxu1 %v3238_v44  ;;  %4694 = vmatpush.msra.mxu0 %v2947_v42  ;;  %v3887_v7 = vadd.f32 %v10621_v31, %v3846_v27  ;;  %v3047_v15 = vld [vmem:[%s13751_s3 + $0xbb8] sm:$0xff] }
 0x55c   : > { %4544 = vmatmul.f32.gmra.mxu0 %v8558_v63  ;;  %v2943_v63 = vld [vmem:[%s13751_s3 + $0x878] sm:$0xff]  ;;  %v3808_v44 = vadd.f32 %v11046_v1, %v10526_v0  ;;  %4726 = vmatpush.msrb.mxu2 %v3047_v15 }
 0x55d   : > { %4440 = vmatpush.msrb.mxu1 %v3234_v51  ;;  %4695 = vmatpush.msra.mxu0 %v2943_v63  ;;  %v2939_v3 = vld [vmem:[%s13751_s3 + $0x858] sm:$0xff]  ;;  %v3928_v1 = vadd.f32 %v10771_v11, %v3887_v7  ;;  %v3218_v63 = vld [vmem:[%s13751_s3 + $0x1110] sm:$0xff] }
 0x55e   : > { %4333 = vmatmul.f32.gmra.mxu3 %v9445_v22  ;;  %v4006_v59 = vpop.f32.mrf.mxu3  ;;  %v2935_v27 = vld [vmem:[%s13751_s3 + $0x838] sm:$0xff]  ;;  %v3849_v0 = vadd.f32 %v11076_v2, %v3808_v44  ;;  %v3222_v2 = vld [vmem:[%s13751_s3 + $0x1130] sm:$0xff] }
 0x55f   : > { %v4007_v28 = vadd.f32 %v4006_v59, %v3966_v48  ;;  %4441 = vmatpush.msrb.mxu1 %v3230_v5  ;;  %4696 = vmatpush.msra.mxu0 %v2939_v3  ;;  %v3039_v51 = vld [vmem:[%s13751_s3 + $0xb78] sm:$0xff]  ;;  %v14242_v48 = vld [vmem:[#allocation30_spill] sm:$0xff]  ;;  %v14244_v3 = vld [vmem:[#allocation127_spill] sm:$0xff] }
 0x560   : > { %4292 = vmatmul.f32.gmra.mxu1 %v14240_v39  ;;  %v2931_v11 = vld [vmem:[%s13751_s3 + $0x818] sm:$0xff]  ;;  %v3811_v44 = vadd.f32 %v11088_v56, %v14244_v3  ;;  %v3258_v3 = vld [vmem:[%s13751_s3 + $0x1250] sm:$0xff] }
 0x561   : > { %v4048_v40 = vadd.f32 %v10882_v53, %v4007_v28  ;;  %4442 = vmatpush.msrb.mxu1 %v3226_v33  ;;  %4697 = vmatpush.msra.mxu0 %v2935_v27  ;;  %v14243_v59 = vld [vmem:[#allocation133_spill] sm:$0xff]  ;;  %v11315_v15 = vpop.f32.mrf.mxu0  ;;  %v3214_v33 = vld [vmem:[%s13751_s3 + $0x10f0] sm:$0xff]  ;;  %v14246_v27 = vld [vmem:[#allocation142_spill] sm:$0xff] }
 0x562   : > { %4579 = vmatmul.f32.gmra.mxu2 %v8945_v60  ;;  %v3043_v60 = vld [vmem:[%s13751_s3 + $0xb98] sm:$0xff]  ;;  %v11290_v42 = vpop.f32.mrf.mxu2  ;;  %v3890_v5 = vadd.f32 %v14243_v59, %v3849_v0  ;;  %v3852_v56 = vadd.f32 %v11118_v10, %v3811_v44  ;;  %v14249_v59 = vld [vmem:[#allocation136_spill] sm:$0xff] }
 0x563   : > { %v11287_v53 = vadd.f32 %v11008_v62, %v4048_v40  ;;  %4727 = vmatpush.msrb.mxu2 %v3043_v60  ;;  %4443 = vmatpush.msrb.mxu1 %v3222_v2  ;;  %v3031_v28 = vld [vmem:[%s13751_s3 + $0xb38] sm:$0xff]  ;;  %v3270_v60 = vld [vmem:[%s13751_s3 + $0x12b0] sm:$0xff] }
 0x564   : > { %v3968_v31 = vpop.f32.mrf.mxu1  ;;  %4547 = vmatmul.f32.gmra.mxu0 %v8588_v55  ;;  %v3035_v55 = vld [vmem:[%s13751_s3 + $0xb58] sm:$0xff]  ;;  %4488 = vmatpush.msra.mxu3 %v3270_v60  ;;  %v3931_v0 = vadd.f32 %v14246_v27, %v3890_v5  ;;  %v3893_v5 = vadd.f32 %v14249_v59, %v3852_v56  ;;  %v14250_v44 = vld [vmem:[#allocation128_spill] sm:$0xff] }
 0x565   : > { %14241 = vst [vmem:[#allocation8_spill] sm:$0xff] %v11287_v53  ;;  %v3969_v62 = vadd.f32 %v3968_v31, %v3928_v1  ;;  %4728 = vmatpush.msrb.mxu2 %v3039_v51  ;;  %4698 = vmatpush.msra.mxu0 %v2931_v11  ;;  %v14247_v51 = vld [vmem:[#allocation35_spill] sm:$0xff]  ;;  %v3023_v2 = vld [vmem:[%s13751_s3 + $0xaf8] sm:$0xff] }
 0x566   : > { %4336 = vmatmul.f32.gmra.mxu3 %v9468_v61  ;;  %v4009_v23 = vpop.f32.mrf.mxu3  ;;  %4444 = vmatpush.msrb.mxu1 %v3218_v63  ;;  %v14248_v10 = vld [vmem:[#allocation33_spill] sm:$0xff]  ;;  %v3206_v63 = vld [vmem:[%s13751_s3 + $0x10b0] sm:$0xff] }
 0x567   : > { %v4010_v7 = vadd.f32 %v4009_v23, %v3969_v62  ;;  %4729 = vmatpush.msrb.mxu2 %v3035_v55  ;;  %v3266_v62 = vld [vmem:[%s13751_s3 + $0x1290] sm:$0xff] }
 0x568   : > { %4295 = vmatmul.f32.gmra.mxu1 %v14242_v48  ;;  %v3262_v55 = vld [vmem:[%s13751_s3 + $0x1270] sm:$0xff]  ;;  %4489 = vmatpush.msra.mxu3 %v3266_v62 }
 0x569   : > { %v4051_v40 = vadd.f32 %v10906_v21, %v4010_v7  ;;  %4730 = vmatpush.msrb.mxu2 %v3031_v28  ;;  %4445 = vmatpush.msrb.mxu1 %v3214_v33  ;;  %v3015_v28 = vld [vmem:[%s13751_s3 + $0xab8] sm:$0xff]  ;;  %v11373_v60 = vpop.f32.mrf.mxu0  ;;  %v3202_v33 = vld [vmem:[%s13751_s3 + $0x1090] sm:$0xff] }
 0x56a   : > { %4582 = vmatmul.f32.gmra.mxu2 %v8961_v9  ;;  %v3027_v9 = vld [vmem:[%s13751_s3 + $0xb18] sm:$0xff]  ;;  %v11334_v1 = vpop.f32.mrf.mxu2  ;;  %4490 = vmatpush.msra.mxu3 %v3262_v55  ;;  %v3254_v62 = vld [vmem:[%s13751_s3 + $0x1230] sm:$0xff] }
 0x56b   : > { %v11331_v21 = vadd.f32 %v11057_v14, %v4051_v40  ;;  %v3210_v14 = vld [vmem:[%s13751_s3 + $0x10d0] sm:$0xff]  ;;  %4731 = vmatpush.msrb.mxu2 %v3027_v9  ;;  %v3814_v40 = vadd.f32 %v11130_v45, %v14250_v44  ;;  %v2995_v44 = vld [vmem:[%s13751_s3 + $0xa18] sm:$0xff] }
 0x56c   : > { %v3971_v31 = vpop.f32.mrf.mxu1  ;;  %4550 = vmatmul.f32.gmra.mxu0 %v8620_v43  ;;  %v3019_v43 = vld [vmem:[%s13751_s3 + $0xad8] sm:$0xff]  ;;  %4446 = vmatpush.msrb.mxu1 %v3210_v14 }
 0x56d   : > { %14245 = vst [vmem:[#allocation12_spill] sm:$0xff] %v11331_v21  ;;  %v3972_v11 = vadd.f32 %v3971_v31, %v3931_v0  ;;  %4965 = vrot.lane.b32.xlu1 %v11331_v21, %s13950_s23  ;;  %4732 = vmatpush.msrb.mxu2 %v3023_v2  ;;  %v3855_v56 = vadd.f32 %v11152_v12, %v3814_v40  ;;  %v14253_v2 = vld [vmem:[#allocation34_spill] sm:$0xff]  ;;  %v3007_v14 = vld [vmem:[%s13751_s3 + $0xa78] sm:$0xff]  ;;  %v14254_v12 = vld [vmem:[#allocation36_spill] sm:$0xff] }
 0x56e   : > { %4339 = vmatmul.f32.gmra.mxu3 %v14247_v51  ;;  %v4012_v23 = vpop.f32.mrf.mxu3  ;;  %4447 = vmatpush.msrb.mxu1 %v3206_v63  ;;  %v14255_v63 = vld [vmem:[#allocation139_spill] sm:$0xff]  ;;  %v3190_v40 = vld [vmem:[%s13751_s3 + $0x1030] sm:$0xff] }
 0x56f   : > { %v4013_v7 = vadd.f32 %v4012_v23, %v3972_v11  ;;  %4733 = vmatpush.msrb.mxu2 %v3019_v43  ;;  %4491 = vmatpush.msra.mxu3 %v3258_v3  ;;  %v3003_v43 = vld [vmem:[%s13751_s3 + $0xa58] sm:$0xff]  ;;  %v3194_v23 = vld [vmem:[%s13751_s3 + $0x1050] sm:$0xff]  ;;  %v3896_v59 = vadd.f32 %v14255_v63, %v3855_v56 }
 0x570   : > { %4298 = vmatmul.f32.gmra.mxu1 %v14248_v10  ;;  %v3186_v56 = vld [vmem:[%s13751_s3 + $0x1010] sm:$0xff] }
 0x571   : > { %v4054_v31 = vadd.f32 %v10936_v19, %v4013_v7  ;;  %4734 = vmatpush.msrb.mxu2 %v3015_v28  ;;  %v14252_v19 = vld [vmem:[#allocation144_spill] sm:$0xff]  ;;  %4448 = vmatpush.msrb.mxu1 %v3202_v33  ;;  %v2999_v7 = vld [vmem:[%s13751_s3 + $0xa38] sm:$0xff]  ;;  %v14258_v33 = vld [vmem:[#allocation51_spill] sm:$0xff] }
 0x572   : > { %4585 = vmatmul.f32.gmra.mxu2 %v8991_v37  ;;  %v3011_v37 = vld [vmem:[%s13751_s3 + $0xa98] sm:$0xff]  ;;  %v3934_v27 = vadd.f32 %v14252_v19, %v3893_v5  ;;  %v11383_v0 = vpop.f32.mrf.mxu2  ;;  %4492 = vmatpush.msra.mxu3 %v3254_v62 }
 0x573   : > { %v11380_v45 = vadd.f32 %v11099_v47, %v4054_v31  ;;  %v3198_v47 = vld [vmem:[%s13751_s3 + $0x1070] sm:$0xff]  ;;  %4735 = vmatpush.msrb.mxu2 %v3011_v37  ;;  %v3937_v31 = vadd.f32 %v10869_v38, %v3896_v59  ;;  %v14257_v37 = vld [vmem:[#allocation59_spill] sm:$0xff] }
 0x574   : > { %v3974_v9 = vpop.f32.mrf.mxu1  ;;  %4553 = vmatmul.f32.gmra.mxu0 %v8697_v54  ;;  %v3250_v54 = vld [vmem:[%s13751_s3 + $0x1210] sm:$0xff]  ;;  %4449 = vmatpush.msrb.mxu1 %v3198_v47  ;;  %v14260_v47 = vld [vmem:[#allocation39_spill] sm:$0xff] }
 0x575   : > { %14251 = vst [vmem:[#allocation9_spill] sm:$0xff] %v11380_v45  ;;  %v3975_v11 = vadd.f32 %v3974_v9, %v3934_v27  ;;  %4971 = vrot.lane.b32.xlu0 %v11380_v45, %s13950_s23  ;;  %4736 = vmatpush.msrb.mxu2 %v3007_v14 }
 0x576   : > { %4342 = vmatmul.f32.gmra.mxu3 %v14253_v2  ;;  %4450 = vmatpush.msrb.mxu1 %v3194_v23 }
 0x577   : > { %4493 = vmatpush.msra.mxu3 %v3250_v54  ;;  %4737 = vmatpush.msrb.mxu2 %v3003_v43  ;;  %v3247_v54 = vld [vmem:[%s13751_s3 + $0x11f8] sm:$0xff] }
 0x578   : > { %4301 = vmatmul.f32.gmra.mxu1 %v14254_v12  ;;  %v4015_v55 = vpop.f32.mrf.mxu3  ;;  %4847 = vmatpush.msrb.mxu0 %v3247_v54  ;;  %v2923_v54 = vld [vmem:[%s13751_s3 + $0x7d8] sm:$0xff] }
 0x579   : > { %v4016_v5 = vadd.f32 %v4015_v55, %v3975_v11  ;;  %4738 = vmatpush.msrb.mxu2 %v2999_v7  ;;  %4451 = vmatpush.msrb.mxu1 %v3190_v40  ;;  %v14261_v11 = vld [vmem:[#allocation44_spill] sm:$0xff] }
 0x57a   : > { %4588 = vmatmul.f32.gmra.mxu2 %v9019_v34 }
 0x57b   : > { %v4057_v28 = vadd.f32 %v11000_v41, %v4016_v5  ;;  %v11428_v41 = vpop.f32.mrf.mxu0  ;;  %4739 = vmatpush.msrb.mxu2 %v2995_v44  ;;  %4452 = vmatpush.msrb.mxu1 %v3186_v56  ;;  %v14262_v5 = vld [vmem:[#allocation56_spill] sm:$0xff] }
 0x57c   : > { %v11424_v9 = vpop.f32.mrf.mxu2  ;;  %4556 = vmatmul.f32.gmra.mxu0 %v14238_v20 }
 0x57d   : > { %v3977_v3 = vpop.f32.mrf.mxu1  ;;  %v11421_v34 = vadd.f32 %v11138_v16, %v4057_v28 }
 0x57e   : > { %4345 = vmatmul.f32.gmra.mxu3 %v14257_v37  ;;  %v3978_v19 = vadd.f32 %v3977_v3, %v3937_v31 }
 0x57f   : > { %14256 = vst [vmem:[#allocation22_spill] sm:$0xff] %v11421_v34  ;;  %4977 = vrot.lane.b32.xlu1 %v11421_v34, %s13950_s23 }
 0x580   : > { %4304 = vmatmul.f32.gmra.mxu1 %v14258_v33 }
 0x581   : > { %v4018_v38 = vpop.f32.mrf.mxu3 }
 0x582   : > { %v4019_v16 = vadd.f32 %v4018_v38, %v3978_v19  ;;  %4591 = vmatmul.f32.gmra.mxu2 %v9161_v24  ;;  %v14265_v38 = vld [vmem:[#allocation60_spill] sm:$0xff] }
 0x584   : > { %v4060_v20 = vadd.f32 %v11064_v49, %v4019_v16  ;;  %4699 = vmatmul.f32.vlgmr.msra.gmra.mxu0 %v14239_v36  ;;  %v3243_v36 = vld [vmem:[%s13751_s3 + $0x11d8] sm:$0xff] }
 0x585   : > { %v3980_v27 = vpop.f32.mrf.mxu1  ;;  %v11441_v14 = vpop.f32.mrf.mxu2  ;;  %4848 = vmatpush.msrb.mxu0 %v3243_v36  ;;  %v2927_v16 = vld [vmem:[%s13751_s3 + $0x7f8] sm:$0xff] }
 0x586   : > { %v11439_v62 = vadd.f32 %v11157_v6, %v4060_v20  ;;  %4348 = vmatmul.f32.gmra.mxu3 %v14260_v47  ;;  %v3981_v24 = vadd.f32 %v3980_v27, %v11184_v46  ;;  %v11452_v6 = vpop.f32.mrf.mxu0  ;;  %v3239_v46 = vld [vmem:[%s13751_s3 + $0x11b8] sm:$0xff] }
 0x587   : > { %4849 = vmatpush.msrb.mxu0 %v3239_v46  ;;  %4642 = vmatpush.msrb.mxu3 %v2927_v16  ;;  %v2855_v46 = vld [vmem:[%s13751_s3 + $0x5b8] sm:$0xff] }
 0x588   : > { %14259 = vst [vmem:[#allocation25_spill] sm:$0xff] %v11439_v62  ;;  %4307 = vmatmul.f32.gmra.mxu1 %v14261_v11  ;;  %4983 = vrot.lane.b32.xlu0 %v11439_v62, %s13950_s23  ;;  %v3195_v16 = vld [vmem:[%s13751_s3 + $0x1058] sm:$0xff] }
 0x589   : > { %v4021_v49 = vpop.f32.mrf.mxu3  ;;  %4643 = vmatpush.msrb.mxu3 %v2923_v54  ;;  %v14268_v54 = vld [vmem:[#allocation66_spill] sm:$0xff] }
 0x58a   : > { %v4022_v43 = vadd.f32 %v4021_v49, %v3981_v24  ;;  %4594 = vmatmul.f32.gmra.mxu2 %v9232_v4  ;;  %v3235_v4 = vld [vmem:[%s13751_s3 + $0x1198] sm:$0xff] }
 0x58b   : > { %4850 = vmatpush.msrb.mxu0 %v3235_v4  ;;  %v2859_v24 = vld [vmem:[%s13751_s3 + $0x5d8] sm:$0xff]  ;;  %v14266_v4 = vld [vmem:[#allocation63_spill] sm:$0xff] }
 0x58c   : > { %v4063_v55 = vadd.f32 %v11116_v52, %v4022_v43  ;;  %4702 = vmatmul.f32.gmra.mxu0 %v14240_v39  ;;  %v14263_v52 = vld [vmem:[#allocation53_spill] sm:$0xff] }
 0x58d   : > { %v3983_v23 = vpop.f32.mrf.mxu1  ;;  %v11465_v59 = vpop.f32.mrf.mxu2  ;;  %v3227_v39 = vld [vmem:[%s13751_s3 + $0x1158] sm:$0xff] }
 0x58e   : > { %v11463_v63 = vadd.f32 %v11176_v35, %v4063_v55  ;;  %4351 = vmatmul.f32.gmra.mxu3 %v14262_v5  ;;  %v3984_v7 = vadd.f32 %v3983_v23, %v11207_v32  ;;  %v3231_v35 = vld [vmem:[%s13751_s3 + $0x1178] sm:$0xff]  ;;  %v11478_v44 = vpop.f32.mrf.mxu0 }
 0x58f   : > { %4851 = vmatpush.msrb.mxu0 %v3231_v35  ;;  %v3223_v32 = vld [vmem:[%s13751_s3 + $0x1138] sm:$0xff] }
 0x590   : > { %4310 = vmatmul.f32.gmra.mxu1 %v14263_v52  ;;  %v3211_v49 = vld [vmem:[%s13751_s3 + $0x10d8] sm:$0xff] }
 0x591   : > { %v4024_v28 = vpop.f32.mrf.mxu3  ;;  %4852 = vmatpush.msrb.mxu0 %v3227_v39  ;;  %v3207_v55 = vld [vmem:[%s13751_s3 + $0x10b8] sm:$0xff] }
 0x592   : > { %v4025_v3 = vadd.f32 %v4024_v28, %v3984_v7  ;;  %4597 = vmatmul.f32.gmra.mxu2 %v9350_v13  ;;  %v14264_v13 = vld [vmem:[#allocation50_spill] sm:$0xff]  ;;  %v3203_v7 = vld [vmem:[%s13751_s3 + $0x1098] sm:$0xff] }
 0x593   : > { %4853 = vmatpush.msrb.mxu0 %v3223_v32  ;;  %v2851_v39 = vld [vmem:[%s13751_s3 + $0x598] sm:$0xff] }
 0x594   : > { %v4066_v40 = vadd.f32 %v11155_v26, %v4025_v3  ;;  %4705 = vmatmul.f32.gmra.mxu0 %v14242_v48  ;;  %v3219_v26 = vld [vmem:[%s13751_s3 + $0x1118] sm:$0xff]  ;;  %v14267_v3 = vld [vmem:[#allocation64_spill] sm:$0xff] }
 0x595   : > { %v4126_v31 = vpop.f32.mrf.mxu1  ;;  %v11490_v19 = vpop.f32.mrf.mxu2  ;;  %v3215_v48 = vld [vmem:[%s13751_s3 + $0x10f8] sm:$0xff]  ;;  %4854 = vmatpush.msrb.mxu0 %v3219_v26 }
 0x596   : > { %v11488_v56 = vadd.f32 %v11199_v25, %v4066_v40  ;;  %6556 = vmatmul.msk.f32.vlgmr.msra.gmra.mxu3 %vm3272_vm10, %v14264_v13  ;;  %v2863_v25 = vld [vmem:[%s13751_s3 + $0x5f8] sm:$0xff]  ;;  %v11525_v23 = vpop.f32.mrf.mxu0 }
 0x597   : > { %4601 = vmatpush.msra.mxu1 %v2863_v25  ;;  %4855 = vmatpush.msrb.mxu0 %v3215_v48  ;;  %v2907_v26 = vld [vmem:[%s13751_s3 + $0x758] sm:$0xff] }
 0x598   : > { %4453 = vmatmul.f32.vlgmr.msrb.gmra.mxu1 %v14265_v38 }
 0x599   : > { %v4167_v20 = vpop.f32.mrf.mxu3  ;;  %4602 = vmatpush.msra.mxu1 %v2859_v24  ;;  %4856 = vmatpush.msrb.mxu0 %v3211_v49 }
 0x59a   : > { %v4168_v27 = vadd.f32 %v4167_v20, %v4126_v31  ;;  %4740 = vmatmul.f32.vlgmr.msrb.gmra.mxu2 %v9403_v17  ;;  %v2919_v17 = vld [vmem:[%s13751_s3 + $0x7b8] sm:$0xff] }
 0x59b   : > { %4644 = vmatpush.msrb.mxu3 %v2919_v17  ;;  %4857 = vmatpush.msrb.mxu0 %v3207_v55  ;;  %v2847_v31 = vld [vmem:[%s13751_s3 + $0x578] sm:$0xff] }
 0x59c   : > { %v4209_v43 = vadd.f32 %v11171_v50, %v4168_v27  ;;  %v2915_v50 = vld [vmem:[%s13751_s3 + $0x798] sm:$0xff]  ;;  %4708 = vmatmul.f32.gmra.mxu0 %v14248_v10  ;;  %4603 = vmatpush.msra.mxu1 %v2855_v46 }
 0x59d   : > { %v4129_v36 = vpop.f32.mrf.mxu1  ;;  %v11542_v28 = vpop.f32.mrf.mxu2  ;;  %4645 = vmatpush.msrb.mxu3 %v2915_v50  ;;  %v2911_v10 = vld [vmem:[%s13751_s3 + $0x778] sm:$0xff]  ;;  %4858 = vmatpush.msrb.mxu0 %v3203_v7 }
 0x59e   : > { %6557 = vmatmul.msk.f32.gmra.mxu3 %vm3272_vm10, %v14266_v4  ;;  %v11540_v35 = vadd.f32 %v11242_v30, %v4209_v43  ;;  %v3199_v30 = vld [vmem:[%s13751_s3 + $0x1078] sm:$0xff]  ;;  %4604 = vmatpush.msra.mxu1 %v2851_v39  ;;  %v11583_v49 = vpop.f32.mrf.mxu0  ;;  %v14269_v43 = vld [vmem:[#allocation68_spill] sm:$0xff] }
 0x59f   : > { %4646 = vmatpush.msrb.mxu3 %v2911_v10  ;;  %4859 = vmatpush.msrb.mxu0 %v3199_v30  ;;  %v2903_v20 = vld [vmem:[%s13751_s3 + $0x738] sm:$0xff] }
 0x5a0   : > { %4456 = vmatmul.f32.gmra.mxu1 %v14267_v3  ;;  %v3191_v27 = vld [vmem:[%s13751_s3 + $0x1038] sm:$0xff] }
 0x5a1   : > { %v4170_v40 = vpop.f32.mrf.mxu3  ;;  %4605 = vmatpush.msra.mxu1 %v2847_v31  ;;  %4647 = vmatpush.msrb.mxu3 %v2907_v26  ;;  %v2835_v46 = vld [vmem:[%s13751_s3 + $0x518] sm:$0xff] }
 0x5a2   : > { %v4171_v32 = vadd.f32 %v4170_v40, %v4129_v36  ;;  %4743 = vmatmul.f32.gmra.mxu2 %v9445_v22  ;;  %v2843_v22 = vld [vmem:[%s13751_s3 + $0x558] sm:$0xff]  ;;  %4860 = vmatpush.msrb.mxu0 %v3195_v16 }
 0x5a3   : > { %4648 = vmatpush.msrb.mxu3 %v2903_v20  ;;  %v2839_v36 = vld [vmem:[%s13751_s3 + $0x538] sm:$0xff]  ;;  %4606 = vmatpush.msra.mxu1 %v2843_v22 }
 0x5a4   : > { %v4212_v25 = vadd.f32 %v11209_v8, %v4171_v32  ;;  %4711 = vmatmul.f32.gmra.mxu0 %v14254_v12  ;;  %v2899_v8 = vld [vmem:[%s13751_s3 + $0x718] sm:$0xff]  ;;  %v14271_v32 = vld [vmem:[#allocation72_spill] sm:$0xff] }
 0x5a5   : > { %v4132_v48 = vpop.f32.mrf.mxu1  ;;  %4861 = vmatpush.msrb.mxu0 %v3191_v27  ;;  %v3187_v12 = vld [vmem:[%s13751_s3 + $0x1018] sm:$0xff]  ;;  %v11595_v17 = vpop.f32.mrf.mxu2  ;;  %4649 = vmatpush.msrb.mxu3 %v2899_v8 }
 0x5a6   : > { %6558 = vmatmul.msk.f32.gmra.mxu3 %vm3272_vm10, %v14268_v54  ;;  %v11581_v24 = vadd.f32 %v11290_v42, %v4212_v25  ;;  %v2895_v42 = vld [vmem:[%s13751_s3 + $0x6f8] sm:$0xff]  ;;  %4607 = vmatpush.msra.mxu1 %v2839_v36  ;;  %v11630_v25 = vpop.f32.mrf.mxu0 }
 0x5a7   : > { %v2891_v7 = vld [vmem:[%s13751_s3 + $0x6d8] sm:$0xff]  ;;  %4862 = vmatpush.msrb.mxu0 %v3187_v12  ;;  %4650 = vmatpush.msrb.mxu3 %v2895_v42 }
 0x5a8   : > { %4459 = vmatmul.f32.gmra.mxu1 %v14269_v43  ;;  %v2887_v30 = vld [vmem:[%s13751_s3 + $0x6b8] sm:$0xff] }
 0x5a9   : > { %v4173_v55 = vpop.f32.mrf.mxu3  ;;  %4608 = vmatpush.msra.mxu1 %v2835_v46  ;;  %v2831_v40 = vld [vmem:[%s13751_s3 + $0x4f8] sm:$0xff]  ;;  %4651 = vmatpush.msrb.mxu3 %v2891_v7  ;;  %v14272_v46 = vld [vmem:[#allocation74_spill] sm:$0xff] }
 0x5aa   : > { %v4174_v50 = vadd.f32 %v4173_v55, %v4132_v48  ;;  %4746 = vmatmul.f32.gmra.mxu2 %v9468_v61  ;;  %v14270_v61 = vld [vmem:[#allocation70_spill] sm:$0xff]  ;;  %v2827_v26 = vld [vmem:[%s13751_s3 + $0x4d8] sm:$0xff] }
 0x5ab   : > { %4652 = vmatpush.msrb.mxu3 %v2887_v30  ;;  %v3271_v16 = vld [vmem:[%s13751_s3 + $0x12b8] sm:$0xff]  ;;  %4609 = vmatpush.msra.mxu1 %v2831_v40 }
 0x5ac   : > { %v4215_v39 = vadd.f32 %v11260_v29, %v4174_v50  ;;  %4714 = vmatmul.f32.gmra.mxu0 %v14258_v33  ;;  %v2883_v29 = vld [vmem:[%s13751_s3 + $0x698] sm:$0xff]  ;;  %4898 = vmatpush.msra.mxu2 %v3271_v16 }
 0x5ad   : > { %v4135_v10 = vpop.f32.mrf.mxu1  ;;  %v2879_v33 = vld [vmem:[%s13751_s3 + $0x678] sm:$0xff]  ;;  %4653 = vmatpush.msrb.mxu3 %v2883_v29  ;;  %4610 = vmatpush.msra.mxu1 %v2827_v26  ;;  %v11639_v27 = vpop.f32.mrf.mxu2 }
 0x5ae   : > { %6559 = vmatmul.msk.f32.gmra.mxu3 %vm3272_vm10, %v14270_v61  ;;  %v11618_v31 = vadd.f32 %v11334_v1, %v4215_v39  ;;  %v2823_v48 = vld [vmem:[%s13751_s3 + $0x4b8] sm:$0xff]  ;;  %v11677_v29 = vpop.f32.mrf.mxu0 }
 0x5af   : > { %v2875_v22 = vld [vmem:[%s13751_s3 + $0x658] sm:$0xff]  ;;  %4654 = vmatpush.msrb.mxu3 %v2879_v33  ;;  %4611 = vmatpush.msra.mxu1 %v2823_v48  ;;  %v14274_v48 = vld [vmem:[#allocation78_spill] sm:$0xff] }
 0x5b0   : > { %4462 = vmatmul.f32.gmra.mxu1 %v14271_v32  ;;  %v3267_v8 = vld [vmem:[%s13751_s3 + $0x1298] sm:$0xff] }
 0x5b1   : > { %v4176_v1 = vpop.f32.mrf.mxu3  ;;  %4899 = vmatpush.msra.mxu2 %v3267_v8  ;;  %v2819_v42 = vld [vmem:[%s13751_s3 + $0x498] sm:$0xff]  ;;  %4655 = vmatpush.msrb.mxu3 %v2875_v22 }
 0x5b2   : > { %v4177_v20 = vadd.f32 %v4176_v1, %v4135_v10  ;;  %4749 = vmatmul.f32.gmra.mxu2 %v14247_v51  ;;  %v2871_v51 = vld [vmem:[%s13751_s3 + $0x638] sm:$0xff]  ;;  %4612 = vmatpush.msra.mxu1 %v2819_v42 }
 0x5b3   : > { %v3263_v55 = vld [vmem:[%s13751_s3 + $0x1278] sm:$0xff]  ;;  %4656 = vmatpush.msrb.mxu3 %v2871_v51 }
 0x5b4   : > { %v4218_v36 = vadd.f32 %v11315_v15, %v4177_v20  ;;  %4717 = vmatmul.f32.gmra.mxu0 %v14261_v11  ;;  %v2867_v15 = vld [vmem:[%s13751_s3 + $0x618] sm:$0xff]  ;;  %4900 = vmatpush.msra.mxu2 %v3263_v55 }
 0x5b5   : > { %v4138_v12 = vpop.f32.mrf.mxu1  ;;  %v14273_v7 = vld [vmem:[#allocation77_spill] sm:$0xff]  ;;  %4657 = vmatpush.msrb.mxu3 %v2867_v15  ;;  %v11683_v1 = vpop.f32.mrf.mxu2 }
 0x5b6   : > { %6560 = vmatmul.msk.f32.gmra.mxu3 %vm3272_vm10, %v14272_v46  ;;  %v11661_v50 = vadd.f32 %v11383_v0, %v4218_v36  ;;  %v2815_v39 = vld [vmem:[%s13751_s3 + $0x478] sm:$0xff] }
 0x5b7   : > { %v3259_v11 = vld [vmem:[%s13751_s3 + $0x1258] sm:$0xff]  ;;  %4613 = vmatpush.msra.mxu1 %v2815_v39 }
 0x5b8   : > { %4465 = vmatmul.f32.gmra.mxu1 %v14273_v7  ;;  %v2811_v30 = vld [vmem:[%s13751_s3 + $0x458] sm:$0xff]  ;;  %4901 = vmatpush.msra.mxu2 %v3259_v11 }
 0x5b9   : > { %v4179_v10 = vpop.f32.mrf.mxu3  ;;  %v3255_v40 = vld [vmem:[%s13751_s3 + $0x1238] sm:$0xff]  ;;  %4614 = vmatpush.msra.mxu1 %v2811_v30 }
 0x5ba   : > { %v4180_v0 = vadd.f32 %v4179_v10, %v4138_v12  ;;  %4752 = vmatmul.f32.gmra.mxu2 %v14253_v2  ;;  %v3251_v33 = vld [vmem:[%s13751_s3 + $0x1218] sm:$0xff]  ;;  %v14278_v10 = vld [vmem:[#allocation115_spill] sm:$0xff] }
 0x5bb   : > { %v2807_v2 = vld [vmem:[%s13751_s3 + $0x438] sm:$0xff]  ;;  %4902 = vmatpush.msra.mxu2 %v3255_v40 }
 0x5bc   : > { %v4221_v26 = vadd.f32 %v11373_v60, %v4180_v0  ;;  %4720 = vmatmul.f32.gmra.mxu0 %v14263_v52  ;;  %v14275_v20 = vld [vmem:[#allocation81_spill] sm:$0xff]  ;;  %4615 = vmatpush.msra.mxu1 %v2807_v2  ;;  %v11700_v52 = vpop.f32.mrf.mxu0 }
 0x5bd   : > { %v4141_v16 = vpop.f32.mrf.mxu1  ;;  %v2803_v22 = vld [vmem:[%s13751_s3 + $0x418] sm:$0xff]  ;;  %4903 = vmatpush.msra.mxu2 %v3251_v33  ;;  %v11708_v55 = vpop.f32.mrf.mxu2 }
 0x5be   : > { %6561 = vmatmul.msk.f32.gmra.mxu3 %vm3272_vm10, %v14274_v48  ;;  %v11692_v60 = vadd.f32 %v11424_v9, %v4221_v26  ;;  %4616 = vmatpush.msra.mxu1 %v2803_v22  ;;  %v14276_v9 = vld [vmem:[#allocation83_spill] sm:$0xff]  ;;  %v14277_v15 = vld [vmem:[#allocation85_spill] sm:$0xff] }
 0x5bf   : > { %v14279_v30 = vld [vmem:[#allocation117_spill] sm:$0xff] }
 0x5c0   : > { %4468 = vmatmul.f32.gmra.mxu1 %v14275_v20  ;;  %v3183_v33 = vld [vmem:[%s13751_s3 + $0xff8] sm:$0xff] }
 0x5c1   : > { %v4182_v8 = vpop.f32.mrf.mxu3  ;;  %4806 = vmatpush.msra.mxu3 %v3183_v33  ;;  %v3159_v33 = vld [vmem:[%s13751_s3 + $0xf38] sm:$0xff] }
 0x5c2   : > { %v4183_v36 = vadd.f32 %v4182_v8, %v4141_v16  ;;  %4755 = vmatmul.f32.gmra.mxu2 %v14257_v37  ;;  %v14280_v16 = vld [vmem:[#allocation10_spill] sm:$0xff] }
 0x5c4   : > { %v4224_v12 = vadd.f32 %v11428_v41, %v4183_v36  ;;  %4863 = vmatmul.f32.vlgmr.msrb.gmra.mxu0 %v14265_v38 }
 0x5c5   : > { %v4144_v51 = vpop.f32.mrf.mxu1  ;;  %v11722_v0 = vpop.f32.mrf.mxu2 }
 0x5c6   : > { %6562 = vmatmul.msk.f32.gmra.mxu3 %vm3272_vm10, %v14276_v9  ;;  %v11706_v42 = vadd.f32 %v11441_v14, %v4224_v12  ;;  %v11719_v14 = vpop.f32.mrf.mxu0 }
 0x5c8   : > { %4471 = vmatmul.f32.gmra.mxu1 %v14277_v15 }
 0x5c9   : > { %v4185_v39 = vpop.f32.mrf.mxu3 }
 0x5ca   : > { %v4186_v37 = vadd.f32 %v4185_v39, %v4144_v51  ;;  %4758 = vmatmul.f32.gmra.mxu2 %v14260_v47  ;;  %v3175_v51 = vld [vmem:[%s13751_s3 + $0xfb8] sm:$0xff] }
 0x5cb   : > { %v3171_v39 = vld [vmem:[%s13751_s3 + $0xf98] sm:$0xff] }
 0x5cc   : > { %v4227_v41 = vadd.f32 %v11452_v6, %v4186_v37  ;;  %4866 = vmatmul.f32.gmra.mxu0 %v14267_v3  ;;  %v14281_v3 = vld [vmem:[#allocation15_spill] sm:$0xff]  ;;  %v14282_v37 = vld [vmem:[#allocation13_spill] sm:$0xff] }
 0x5cd   : > { %v4147_v11 = vpop.f32.mrf.mxu1  ;;  %v11746_v8 = vpop.f32.mrf.mxu2 }
 0x5ce   : > { %6563 = vmatmul.msk.f32.gmra.mxu3 %vm3272_vm10, %v14278_v10  ;;  %v11717_v38 = vadd.f32 %v11465_v59, %v4227_v41  ;;  %v11739_v2 = vpop.f32.mrf.mxu0  ;;  %v14283_v41 = vld [vmem:[#allocation18_spill] sm:$0xff] }
 0x5d0   : > { %4474 = vmatmul.f32.gmra.mxu1 %v14279_v30 }
 0x5d1   : > { %v4188_v40 = vpop.f32.mrf.mxu3 }
 0x5d2   : > { %v4189_v26 = vadd.f32 %v4188_v40, %v4147_v11  ;;  %4761 = vmatmul.f32.gmra.mxu2 %v14262_v5  ;;  %v3119_v5 = vld [vmem:[%s13751_s3 + $0xdf8] sm:$0xff] }
 0x5d3   : > { %4765 = vmatpush.msrb.mxu1 %v3119_v5  ;;  %v3107_v11 = vld [vmem:[%s13751_s3 + $0xd98] sm:$0xff] }
 0x5d4   : > { %v4230_v47 = vadd.f32 %v11478_v44, %v4189_v26  ;;  %4869 = vmatmul.f32.gmra.mxu0 %v14269_v43  ;;  %v3167_v40 = vld [vmem:[%s13751_s3 + $0xf78] sm:$0xff] }
 0x5d5   : > { %v4290_v6 = vpop.f32.mrf.mxu1  ;;  %v11790_v5 = vpop.f32.mrf.mxu2 }
 0x5d6   : > { %4658 = vmatmul.f32.vlgmr.msrb.gmra.mxu3 %v14280_v16  ;;  %v11729_v59 = vadd.f32 %v11490_v19, %v4230_v47  ;;  %v4291_v44 = vadd.f32 %v4290_v6, %v11540_v35  ;;  %v3179_v19 = vld [vmem:[%s13751_s3 + $0xfd8] sm:$0xff]  ;;  %v11782_v16 = vpop.f32.mrf.mxu0 }
 0x5d7   : > { %4807 = vmatpush.msra.mxu3 %v3179_v19  ;;  %v3115_v35 = vld [vmem:[%s13751_s3 + $0xdd8] sm:$0xff] }
 0x5d8   : > { %4617 = vmatmul.f32.vlgmr.msra.gmra.mxu1 %v14281_v3  ;;  %v3163_v6 = vld [vmem:[%s13751_s3 + $0xf58] sm:$0xff] }
 0x5d9   : > { %v4331_v43 = vpop.f32.mrf.mxu3  ;;  %4766 = vmatpush.msrb.mxu1 %v3115_v35  ;;  %4808 = vmatpush.msra.mxu3 %v3175_v51  ;;  %v3095_v19 = vld [vmem:[%s13751_s3 + $0xd38] sm:$0xff] }
 0x5da   : > { %v4332_v22 = vadd.f32 %v4331_v43, %v4291_v44  ;;  %6564 = vmatmul.msk.f32.vlgmr.msra.gmra.mxu2 %vm3272_vm10, %v14264_v13  ;;  %v3111_v13 = vld [vmem:[%s13751_s3 + $0xdb8] sm:$0xff]  ;;  %v14284_v43 = vld [vmem:[#allocation14_spill] sm:$0xff] }
 0x5db   : > { %4809 = vmatpush.msra.mxu3 %v3171_v39  ;;  %4767 = vmatpush.msrb.mxu1 %v3111_v13  ;;  %v3155_v44 = vld [vmem:[%s13751_s3 + $0xf18] sm:$0xff] }
 0x5dc   : > { %v4373_v36 = vadd.f32 %v11525_v23, %v4332_v22  ;;  %4872 = vmatmul.f32.gmra.mxu0 %v14271_v32  ;;  %v14285_v22 = vld [vmem:[#allocation11_spill] sm:$0xff]  ;;  %v3151_v35 = vld [vmem:[%s13751_s3 + $0xef8] sm:$0xff] }
 0x5dd   : > { %v4293_v12 = vpop.f32.mrf.mxu1  ;;  %4810 = vmatpush.msra.mxu3 %v3167_v40  ;;  %4768 = vmatpush.msrb.mxu1 %v3107_v11  ;;  %v3143_v51 = vld [vmem:[%s13751_s3 + $0xeb8] sm:$0xff]  ;;  %v14287_v11 = vld [vmem:[#allocation16_spill] sm:$0xff] }
 0x5de   : > { %4661 = vmatmul.f32.gmra.mxu3 %v14282_v37  ;;  %v11764_v23 = vadd.f32 %v11542_v28, %v4373_v36  ;;  %v4294_v26 = vadd.f32 %v4293_v12, %v11581_v24  ;;  %v3103_v28 = vld [vmem:[%s13751_s3 + $0xd78] sm:$0xff]  ;;  %v11825_v13 = vpop.f32.mrf.mxu0  ;;  %v14286_v37 = vld [vmem:[#allocation19_spill] sm:$0xff] }
 0x5df   : > { %4811 = vmatpush.msra.mxu3 %v3163_v6  ;;  %4769 = vmatpush.msrb.mxu1 %v3103_v28  ;;  %v3087_v39 = vld [vmem:[%s13751_s3 + $0xcf8] sm:$0xff] }
 0x5e0   : > { %4620 = vmatmul.f32.gmra.mxu1 %v14283_v41  ;;  %v11835_v41 = vpop.f32.mrf.mxu2  ;;  %v3083_v40 = vld [vmem:[%s13751_s3 + $0xcd8] sm:$0xff] }
 0x5e1   : > { %v4334_v47 = vpop.f32.mrf.mxu3  ;;  %4812 = vmatpush.msra.mxu3 %v3159_v33  ;;  %v3131_v28 = vld [vmem:[%s13751_s3 + $0xe58] sm:$0xff] }
 0x5e2   : > { %v4335_v32 = vadd.f32 %v4334_v47, %v4294_v26  ;;  %6565 = vmatmul.msk.f32.gmra.mxu2 %vm3272_vm10, %v14266_v4  ;;  %v3099_v4 = vld [vmem:[%s13751_s3 + $0xd58] sm:$0xff] }
 0x5e3   : > { %4813 = vmatpush.msra.mxu3 %v3155_v44  ;;  %4770 = vmatpush.msrb.mxu1 %v3099_v4  ;;  %v3135_v26 = vld [vmem:[%s13751_s3 + $0xe78] sm:$0xff]  ;;  %v14289_v44 = vld [vmem:[#allocation20_spill] sm:$0xff] }
 0x5e4   : > { %v4376_v24 = vadd.f32 %v11583_v49, %v4335_v32  ;;  %4875 = vmatmul.f32.gmra.mxu0 %v14273_v7  ;;  %v3091_v7 = vld [vmem:[%s13751_s3 + $0xd18] sm:$0xff] }
 0x5e5   : > { %v11785_v3 = vpop.f32.mrf.mxu1  ;;  %4814 = vmatpush.msra.mxu3 %v3151_v35  ;;  %4771 = vmatpush.msrb.mxu1 %v3095_v19  ;;  %v3127_v6 = vld [vmem:[%s13751_s3 + $0xe38] sm:$0xff] }
 0x5e6   : > { %4664 = vmatmul.f32.gmra.mxu3 %v14284_v43  ;;  %v11801_v49 = vadd.f32 %v11595_v17, %v4376_v24  ;;  %v3147_v17 = vld [vmem:[%s13751_s3 + $0xed8] sm:$0xff]  ;;  %v11867_v4 = vpop.f32.mrf.mxu0 }
 0x5e7   : > { %4815 = vmatpush.msra.mxu3 %v3147_v17  ;;  %4772 = vmatpush.msrb.mxu1 %v3091_v7  ;;  %v3075_v24 = vld [vmem:[%s13751_s3 + $0xc98] sm:$0xff]  ;;  %v14290_v17 = vld [vmem:[#allocation23_spill] sm:$0xff] }
 0x5e8   : > { %4623 = vmatmul.f32.gmra.mxu1 %v14285_v22  ;;  %v14288_v33 = vld [vmem:[#allocation17_spill] sm:$0xff]  ;;  %v11873_v22 = vpop.f32.mrf.mxu2 }
 0x5e9   : > { %v11810_v36 = vpop.f32.mrf.mxu3  ;;  %4816 = vmatpush.msra.mxu3 %v3143_v51  ;;  %4773 = vmatpush.msrb.mxu1 %v3087_v39  ;;  %v3071_v43 = vld [vmem:[%s13751_s3 + $0xc78] sm:$0xff] }
 0x5ea   : > { %6566 = vmatmul.msk.f32.gmra.mxu2 %vm3272_vm10, %v14268_v54  ;;  %v3139_v54 = vld [vmem:[%s13751_s3 + $0xe98] sm:$0xff] }
 0x5eb   : > { %4817 = vmatpush.msra.mxu3 %v3139_v54  ;;  %4774 = vmatpush.msrb.mxu1 %v3083_v40  ;;  %v3067_v35 = vld [vmem:[%s13751_s3 + $0xc58] sm:$0xff]  ;;  %v14292_v40 = vld [vmem:[#allocation26_spill] sm:$0xff] }
 0x5ec   : > { %4878 = vmatmul.f32.gmra.mxu0 %v14275_v20  ;;  %v3079_v20 = vld [vmem:[%s13751_s3 + $0xcb8] sm:$0xff] }
 0x5ed   : > { %v11820_v12 = vpop.f32.mrf.mxu1  ;;  %4818 = vmatpush.msra.mxu3 %v3135_v26  ;;  %4775 = vmatpush.msrb.mxu1 %v3079_v20  ;;  %v3063_v7 = vld [vmem:[%s13751_s3 + $0xc38] sm:$0xff] }
 0x5ee   : > { %4667 = vmatmul.f32.gmra.mxu3 %v14286_v37  ;;  %v14291_v51 = vld [vmem:[#allocation21_spill] sm:$0xff] }
 0x5ef   : > { %4819 = vmatpush.msra.mxu3 %v3131_v28  ;;  %4776 = vmatpush.msrb.mxu1 %v3075_v24  ;;  %v3059_v39 = vld [vmem:[%s13751_s3 + $0xc18] sm:$0xff] }
 0x5f0   : > { %4626 = vmatmul.f32.gmra.mxu1 %v14287_v11  ;;  %v11899_v37 = vpop.f32.mrf.mxu2 }
 0x5f1   : > { %v11844_v47 = vpop.f32.mrf.mxu3  ;;  %4820 = vmatpush.msra.mxu3 %v3127_v6  ;;  %4777 = vmatpush.msrb.mxu1 %v3071_v43  ;;  %v14295_v43 = vld [vmem:[#allocation27_spill] sm:$0xff] }
 0x5f2   : > { %6567 = vmatmul.msk.f32.gmra.mxu2 %vm3272_vm10, %v14270_v61  ;;  %v3123_v61 = vld [vmem:[%s13751_s3 + $0xe18] sm:$0xff] }
 0x5f3   : > { %4821 = vmatpush.msra.mxu3 %v3123_v61  ;;  %4778 = vmatpush.msrb.mxu1 %v3067_v35 }
 0x5f4   : > { %4881 = vmatmul.f32.gmra.mxu0 %v14277_v15 }
 0x5f5   : > { %v11854_v32 = vpop.f32.mrf.mxu1  ;;  %4779 = vmatpush.msrb.mxu1 %v3063_v7 }
 0x5f6   : > { %4670 = vmatmul.f32.gmra.mxu3 %v14288_v33  ;;  %v14294_v33 = vld [vmem:[#allocation28_spill] sm:$0xff] }
 0x5f7   : > { %4780 = vmatpush.msrb.mxu1 %v3059_v39 }
 0x5f8   : > { %4629 = vmatmul.f32.gmra.mxu1 %v14289_v44  ;;  %v11909_v61 = vpop.f32.mrf.mxu2 }
 0x5f9   : > { %v11875_v19 = vpop.f32.mrf.mxu3 }
 0x5fa   : > { %6568 = vmatmul.msk.f32.gmra.mxu2 %vm3272_vm10, %v14272_v46  ;;  %v11893_v46 = vpop.f32.mrf.mxu0 }
 0x5fc   : > { %4884 = vmatmul.f32.gmra.mxu0 %v14279_v30  ;;  %v14293_v30 = vld [vmem:[#allocation24_spill] sm:$0xff] }
 0x5fd   : > { %v11882_v15 = vpop.f32.mrf.mxu1 }
 0x5fe   : > { %4673 = vmatmul.f32.gmra.mxu3 %v14290_v17 }
 0x600   : > { %4632 = vmatmul.f32.gmra.mxu1 %v14291_v51  ;;  %v14296_v51 = vld [vmem:[#allocation31_spill] sm:$0xff]  ;;  %v11928_v39 = vpop.f32.mrf.mxu2 }
 0x601   : > { %v11895_v54 = vpop.f32.mrf.mxu3 }
 0x602   : > { %6569 = vmatmul.msk.f32.gmra.mxu2 %vm3272_vm10, %v14274_v48  ;;  %v11906_v6 = vpop.f32.mrf.mxu0 }
 0x605   : > { %v4308_v11 = vpop.f32.mrf.mxu1 }
 0x606   : > { %4676 = vmatmul.f32.gmra.mxu3 %v14292_v40  ;;  %v4309_v26 = vadd.f32 %v4308_v11, %v11717_v38  ;;  %v14297_v11 = vld [vmem:[#allocation29_spill] sm:$0xff] }
 0x608   : > { %4635 = vmatmul.f32.gmra.mxu1 %v14293_v30  ;;  %v14299_v30 = vld [vmem:[#allocation57_spill] sm:$0xff] }
 0x609   : > { %v4349_v20 = vpop.f32.mrf.mxu3 }
 0x60a   : > { %v4350_v28 = vadd.f32 %v4349_v20, %v4309_v26  ;;  %6570 = vmatmul.msk.f32.gmra.mxu2 %vm3272_vm10, %v14276_v9  ;;  %v11922_v17 = vpop.f32.mrf.mxu0  ;;  %v14300_v20 = vld [vmem:[#allocation32_spill] sm:$0xff] }
 0x60c   : > { %v4391_v24 = vadd.f32 %v11739_v2, %v4350_v28 }
 0x60d   : > { %v4311_v48 = vpop.f32.mrf.mxu1 }
 0x60e   : > { %4679 = vmatmul.f32.gmra.mxu3 %v14294_v33  ;;  %v11913_v44 = vadd.f32 %v11746_v8, %v4391_v24  ;;  %v4312_v38 = vadd.f32 %v4311_v48, %v11729_v59  ;;  %v4300_v48 = vadd.f32 %v11820_v12, %v11661_v50  ;;  %v14301_v33 = vld [vmem:[#allocation38_spill] sm:$0xff]  ;;  %v4303_v50 = vadd.f32 %v11854_v32, %v11692_v60 }
 0x60f   : > { %v4306_v60 = vadd.f32 %v11882_v15, %v11706_v42 }
 0x610   : > { %4638 = vmatmul.f32.gmra.mxu1 %v14295_v43  ;;  %v14302_v43 = vld [vmem:[#allocation40_spill] sm:$0xff] }
 0x611   : > { %v4352_v35 = vpop.f32.mrf.mxu3 }
 0x612   : > { %v4353_v7 = vadd.f32 %v4352_v35, %v4312_v38  ;;  %6571 = vmatmul.msk.f32.gmra.mxu2 %vm3272_vm10, %v14278_v10  ;;  %v4297_v10 = vadd.f32 %v11785_v3, %v11618_v31  ;;  %v11939_v26 = vpop.f32.mrf.mxu0  ;;  %v4341_v3 = vadd.f32 %v11844_v47, %v4300_v48 }
 0x614   : > { %v4394_v9 = vadd.f32 %v11782_v16, %v4353_v7  ;;  %v4338_v16 = vadd.f32 %v11810_v36, %v4297_v10  ;;  %v14304_v10 = vld [vmem:[#allocation41_spill] sm:$0xff] }
 0x615   : > { %v11920_v2 = vpop.f32.mrf.mxu1 }
 0x616   : > { %4822 = vmatmul.f32.vlgmr.msra.gmra.mxu3 %v14296_v51  ;;  %v11926_v8 = vadd.f32 %v11790_v5, %v4394_v9  ;;  %v11942_v5 = vpop.f32.mrf.mxu2  ;;  %v4379_v24 = vadd.f32 %v11630_v25, %v4338_v16  ;;  %v4382_v9 = vadd.f32 %v11677_v29, %v4341_v3  ;;  %v14306_v3 = vld [vmem:[#allocation55_spill] sm:$0xff] }
 0x618   : > { %4781 = vmatmul.f32.vlgmr.msrb.gmra.mxu1 %v14297_v11  ;;  %v4420_v36 = vadd.f32 %v11639_v27, %v4379_v24  ;;  %v4344_v27 = vadd.f32 %v11875_v19, %v4303_v50  ;;  %v4423_v47 = vadd.f32 %v11683_v1, %v4382_v9  ;;  %v14303_v11 = vld [vmem:[#allocation37_spill] sm:$0xff]  ;;  %v4347_v1 = vadd.f32 %v11895_v54, %v4306_v60  ;;  %v14308_v9 = vld [vmem:[#allocation43_spill] sm:$0xff] }
 0x619   : > { %v11931_v59 = vpop.f32.mrf.mxu3 }
 0x61a   : > { %14298 = vst [vmem:[#allocation30_spill] sm:$0xff] %v11931_v59  ;;  %v11953_v35 = vpop.f32.mrf.mxu0  ;;  %v4385_v29 = vadd.f32 %v11700_v52, %v4344_v27  ;;  %v14309_v27 = vld [vmem:[#allocation42_spill] sm:$0xff] }
 0x61c   : > { %v4426_v48 = vadd.f32 %v11708_v55, %v4385_v29 }
 0x61d   : > { %v11935_v40 = vpop.f32.mrf.mxu1 }
 0x61e   : > { %4825 = vmatmul.f32.gmra.mxu3 %v14299_v30  ;;  %v11956_v25 = vpop.f32.mrf.mxu2 }
 0x620   : > { %4784 = vmatmul.f32.gmra.mxu1 %v14300_v20 }
 0x621   : > { %v11944_v28 = vpop.f32.mrf.mxu3 }
 0x622   : > { %v11966_v24 = vpop.f32.mrf.mxu0 }
 0x625   : > { %v4460_v31 = vpop.f32.mrf.mxu1 }
 0x626   : > { %4828 = vmatmul.f32.gmra.mxu3 %v14301_v33  ;;  %v4461_v38 = vadd.f32 %v4460_v31, %v4420_v36  ;;  %v11971_v19 = vpop.f32.mrf.mxu2  ;;  %v14305_v31 = vld [vmem:[#allocation58_spill] sm:$0xff]  ;;  %v4388_v33 = vadd.f32 %v11719_v14, %v4347_v1 }
 0x628   : > { %4787 = vmatmul.f32.gmra.mxu1 %v14302_v43  ;;  %v4429_v15 = vadd.f32 %v11722_v0, %v4388_v33 }
 0x629   : > { %v4501_v7 = vpop.f32.mrf.mxu3 }
 0x62a   : > { %v4502_v51 = vadd.f32 %v4501_v7, %v4461_v38  ;;  %v4700_v42 = vpop.f32.mrf.mxu0  ;;  %v14307_v7 = vld [vmem:[#allocation46_spill] sm:$0xff] }
 0x62c   : > { %4967 = vrot.lane.b32.xlu2 %v4502_v51, %s13950_s23 }
 0x62d   : > { %v4463_v12 = vpop.f32.mrf.mxu1 }
 0x62e   : > { %4831 = vmatmul.f32.gmra.mxu3 %v14303_v11  ;;  %v4464_v16 = vadd.f32 %v4463_v12, %v4423_v47  ;;  %v4741_v54 = vpop.f32.mrf.mxu2 }
 0x630   : > { %4790 = vmatmul.f32.gmra.mxu1 %v14304_v10  ;;  %v14310_v10 = vld [vmem:[#allocation45_spill] sm:$0xff] }
 0x631   : > { %v4504_v30 = vpop.f32.mrf.mxu3 }
 0x632   : > { %v4505_v20 = vadd.f32 %v4504_v30, %v4464_v16  ;;  %v4703_v14 = vpop.f32.mrf.mxu0 }
 0x634   : > { %4973 = vrot.lane.b32.xlu1 %v4505_v20, %s13950_s23 }
 0x635   : > { %v4466_v32 = vpop.f32.mrf.mxu1 }
 0x636   : > { %4834 = vmatmul.f32.gmra.mxu3 %v14305_v31  ;;  %v4467_v52 = vadd.f32 %v4466_v32, %v4426_v48  ;;  %v4744_v47 = vpop.f32.mrf.mxu2 }
 0x638   : > { %4793 = vmatmul.f32.gmra.mxu1 %v14306_v3 }
 0x639   : > { %v4507_v36 = vpop.f32.mrf.mxu3 }
 0x63a   : > { %v4508_v43 = vadd.f32 %v4507_v36, %v4467_v52  ;;  %v11993_v16 = vpop.f32.mrf.mxu0  ;;  %v4581_v52 = vadd.f32 %v11873_v22, %v11867_v4 }
 0x63c   : > { %4979 = vrot.lane.b32.xlu2 %v4508_v43, %s13950_s23 }
 0x63d   : > { %v4469_v38 = vpop.f32.mrf.mxu1 }
 0x63e   : > { %4837 = vmatmul.f32.gmra.mxu3 %v14307_v7  ;;  %v4470_v55 = vadd.f32 %v4469_v38, %v4429_v15  ;;  %v11997_v29 = vpop.f32.mrf.mxu2 }
 0x640   : > { %4796 = vmatmul.f32.gmra.mxu1 %v14308_v9 }
 0x641   : > { %v4510_v51 = vpop.f32.mrf.mxu3 }
 0x642   : > { %v4511_v50 = vadd.f32 %v4510_v51, %v4470_v55  ;;  %v12001_v48 = vpop.f32.mrf.mxu0 }
 0x644   : > { %4985 = vrot.lane.b32.xlu1 %v4511_v50, %s13950_s23 }
 0x645   : > { %v11982_v12 = vpop.f32.mrf.mxu1 }
 0x646   : > { %4840 = vmatmul.f32.gmra.mxu3 %v14231_v58  ;;  %v4578_v58 = vadd.f32 %v11835_v41, %v11825_v13 }
 0x648   : > { %4799 = vmatmul.f32.gmra.mxu1 %v14309_v27 }
 0x649   : > { %v11987_v11 = vpop.f32.mrf.mxu3 }
 0x64a   : > { %v4712_v13 = vpop.f32.mrf.mxu0 }
 0x64d   : > { %v11989_v0 = vpop.f32.mrf.mxu1 }
 0x64e   : > { %4843 = vmatmul.f32.gmra.mxu3 %v9838_v18  ;;  %v12003_v18 = vpop.f32.mrf.mxu2 }
 0x650   : > { %4802 = vmatmul.f32.gmra.mxu1 %v14310_v10 }
 0x651   : > { %v11995_v30 = vpop.f32.mrf.mxu3 }
 0x652   : > { %v4715_v50 = vpop.f32.mrf.mxu0 }
 0x655   : > { %v4618_v20 = vpop.f32.mrf.mxu1 }
 0x656   : > { %v4619_v60 = vadd.f32 %v4618_v20, %v4578_v58  ;;  %v4753_v9 = vpop.f32.mrf.mxu2  ;;  %v4590_v20 = vadd.f32 %v11928_v39, %v11922_v17 }
 0x659   : > { %v4659_v32 = vpop.f32.mrf.mxu3 }
 0x65a   : > { %v4660_v1 = vadd.f32 %v4659_v32, %v4619_v60  ;;  %v12011_v22 = vpop.f32.mrf.mxu0 }
 0x65c   : > { %v4701_v31 = vadd.f32 %v4700_v42, %v4660_v1 }
 0x65d   : > { %v4621_v3 = vpop.f32.mrf.mxu1 }
 0x65e   : > { %v12007_v36 = vadd.f32 %v4741_v54, %v4701_v31  ;;  %v4622_v33 = vadd.f32 %v4621_v3, %v4581_v52  ;;  %v4756_v42 = vpop.f32.mrf.mxu2 }
 0x661   : > { %v4662_v43 = vpop.f32.mrf.mxu3 }
 0x662   : > { %v4663_v38 = vadd.f32 %v4662_v43, %v4622_v33  ;;  %v12017_v33 = vpop.f32.mrf.mxu0 }
 0x664   : > { %v4704_v15 = vadd.f32 %v4703_v14, %v4663_v38 }
 0x665   : > { %v4624_v7 = vpop.f32.mrf.mxu1 }
 0x666   : > { %v4745_v41 = vadd.f32 %v4744_v47, %v4704_v15  ;;  %v12013_v60 = vpop.f32.mrf.mxu2  ;;  %v4593_v47 = vadd.f32 %v11942_v5, %v11939_v26 }
 0x669   : > { %v4665_v55 = vpop.f32.mrf.mxu3 }
 0x66d   : > { %v4627_v51 = vpop.f32.mrf.mxu1 }
 0x66e   : > { %v12019_v39 = vpop.f32.mrf.mxu2 }
 0x671   : > { %v4668_v27 = vpop.f32.mrf.mxu3 }
 0x675   : > { %v4630_v10 = vpop.f32.mrf.mxu1 }
 0x676   : > { %v4631_v4 = vadd.f32 %v4630_v10, %v4590_v20  ;;  %v12027_v20 = vpop.f32.mrf.mxu2 }
 0x679   : > { %v4671_v54 = vpop.f32.mrf.mxu3 }
 0x67a   : > { %v4672_v58 = vadd.f32 %v4671_v54, %v4631_v4 }
 0x67c   : > { %v4713_v14 = vadd.f32 %v4712_v13, %v4672_v58  ;;  %v12025_v13 = vpop.f32.mrf.mxu0 }
 0x67d   : > { %v4633_v32 = vpop.f32.mrf.mxu1 }
 0x67e   : > { %v4754_v1 = vadd.f32 %v4753_v9, %v4713_v14  ;;  %v4634_v31 = vadd.f32 %v4633_v32, %v4593_v47  ;;  %v4908_v4 = vpop.f32.mrf.mxu2 }
 0x681   : > { %v4674_v3 = vpop.f32.mrf.mxu3 }
 0x682   : > { %v4675_v52 = vadd.f32 %v4674_v3, %v4634_v31  ;;  %v4587_v3 = vadd.f32 %v11909_v61, %v11906_v6 }
 0x684   : > { %v4716_v43 = vadd.f32 %v4715_v50, %v4675_v52  ;;  %v4867_v9 = vpop.f32.mrf.mxu0  ;;  %v4584_v50 = vadd.f32 %v11899_v37, %v11893_v46  ;;  %v4628_v34 = vadd.f32 %v4627_v51, %v4587_v3 }
 0x685   : > { %v4636_v17 = vpop.f32.mrf.mxu1 }
 0x686   : > { %v12021_v38 = vadd.f32 %v4756_v42, %v4716_v43  ;;  %v4625_v42 = vadd.f32 %v4624_v7, %v4584_v50  ;;  %v4911_v62 = vpop.f32.mrf.mxu2  ;;  %v4669_v53 = vadd.f32 %v4668_v27, %v4628_v34 }
 0x688   : > { %v4666_v32 = vadd.f32 %v4665_v55, %v4625_v42 }
 0x689   : > { %v4677_v15 = vpop.f32.mrf.mxu3 }
 0x68a   : > { %v4707_v52 = vadd.f32 %v11993_v16, %v4666_v32 }
 0x68c   : > { %v4870_v47 = vpop.f32.mrf.mxu0  ;;  %v4748_v46 = vadd.f32 %v11997_v29, %v4707_v52 }
 0x68d   : > { %v12023_v10 = vpop.f32.mrf.mxu1 }
 0x68e   : > { %v4914_v61 = vpop.f32.mrf.mxu2 }
 0x691   : > { %v12029_v26 = vpop.f32.mrf.mxu3 }
 0x694   : > { %v4873_v50 = vpop.f32.mrf.mxu0 }
 0x695   : > { %v12031_v5 = vpop.f32.mrf.mxu1 }
 0x699   : > { %v12033_v54 = vpop.f32.mrf.mxu3 }
 0x69c   : > { %v4876_v29 = vpop.f32.mrf.mxu0 }
 0x69d   : > { %v4785_v58 = vpop.f32.mrf.mxu1 }
 0x69e   : > { %v4786_v14 = vadd.f32 %v4785_v58, %v4745_v41  ;;  %v4710_v41 = vadd.f32 %v12001_v48, %v4669_v53  ;;  %v4596_v53 = vadd.f32 %v11956_v25, %v11953_v35 }
 0x6a0   : > { %v4751_v58 = vadd.f32 %v12003_v18, %v4710_v41  ;;  %v4637_v48 = vadd.f32 %v4636_v17, %v4596_v53  ;;  %v12051_v18 = vpop.permute.xlu1 %4965 }
 0x6a1   : > { %v4826_v31 = vpop.f32.mrf.mxu3 }
 0x6a2   : > { %v4827_v43 = vadd.f32 %v4826_v31, %v4786_v14  ;;  %v4473_v14 = vadd.f32 %v11982_v12, %v11913_v44  ;;  %v4678_v31 = vadd.f32 %v4677_v15, %v4637_v48  ;;  %v4476_v12 = vadd.f32 %v11989_v0, %v11926_v8  ;;  %v14311_v0 = vld [vmem:[#allocation101_spill] sm:$0xff] }
 0x6a3   : > { %v4783_v15 = vadd.f32 %v12031_v5, %v12007_v36  ;;  %v14313_v36 = vld [vmem:[#allocation97_spill] sm:$0xff] }
 0x6a4   : > { %v4868_v45 = vadd.f32 %v4867_v9, %v4827_v43  ;;  %v4514_v3 = vadd.f32 %v11987_v11, %v4473_v14  ;;  %v4879_v43 = vpop.f32.mrf.mxu0  ;;  %v4719_v25 = vadd.f32 %v12011_v22, %v4678_v31  ;;  %v4517_v22 = vadd.f32 %v11995_v30, %v4476_v12  ;;  %v14315_v30 = vld [vmem:[#allocation69_spill] sm:$0xff] }
 0x6a5   : > { %v4788_v21 = vpop.f32.mrf.mxu1  ;;  %v14323_v12 = vld [vmem:[#allocation89_spill] sm:$0xff] }
 0x6a6   : > { %v12040_v59 = vadd.f32 %v4908_v4, %v4868_v45  ;;  %v4789_v37 = vadd.f32 %v4788_v21, %v4748_v46  ;;  %v4917_v4 = vpop.f32.mrf.mxu2  ;;  %v4599_v46 = vadd.f32 %v11971_v19, %v11966_v24  ;;  %v4760_v41 = vadd.f32 %v12013_v60, %v4719_v25  ;;  %v14321_v25 = vld [vmem:[#allocation123_spill] sm:$0xff] }
 0x6a7   : > { %v4824_v19 = vadd.f32 %v12033_v54, %v4783_v15 }
 0x6a8   : > { %v4640_v11 = vadd.f32 %v12023_v10, %v4599_v46 }
 0x6a9   : > { %v4829_v7 = vpop.f32.mrf.mxu3  ;;  %v4865_v54 = vadd.f32 %v12025_v13, %v4824_v19  ;;  %v14328_v19 = vld [vmem:[#allocation61_spill] sm:$0xff] }
 0x6aa   : > { %v4830_v55 = vadd.f32 %v4829_v7, %v4789_v37  ;;  %v4681_v24 = vadd.f32 %v12029_v26, %v4640_v11 }
 0x6ac   : > { %v4871_v42 = vadd.f32 %v4870_v47, %v4830_v55  ;;  %v4882_v60 = vpop.f32.mrf.mxu0  ;;  %v4722_v26 = vadd.f32 %v12017_v33, %v4681_v24  ;;  %v4906_v33 = vadd.f32 %v12027_v20, %v4865_v54  ;;  %v14324_v20 = vld [vmem:[#allocation121_spill] sm:$0xff]  ;;  %v14333_v54 = vld [vmem:[#allocation110_spill] sm:$0xff] }
 0x6ad   : > { %v4791_v6 = vpop.f32.mrf.mxu1 }
 0x6ae   : > { %v4912_v16 = vadd.f32 %v4911_v62, %v4871_v42  ;;  %v4792_v51 = vadd.f32 %v4791_v6, %v4751_v58  ;;  %v4920_v35 = vpop.f32.mrf.mxu2 }
 0x6b0   : > { %4969 = vrot.lane.b32.xlu2 %v4912_v16, %s13950_s23 }
 0x6b1   : > { %v4832_v34 = vpop.f32.mrf.mxu3 }
 0x6b2   : > { %v4833_v45 = vadd.f32 %v4832_v34, %v4792_v51  ;;  %v14316_v51 = vld [vmem:[#allocation65_spill] sm:$0xff] }
 0x6b4   : > { %v4874_v27 = vadd.f32 %v4873_v50, %v4833_v45  ;;  %v14312_v50 = vld [vmem:[#allocation96_spill] sm:$0xff] }
 0x6b5   : > { %v4794_v9 = vpop.f32.mrf.mxu1  ;;  %v3363_v42 = vadd.f32 %v14312_v50, %v14311_v0  ;;  %v14317_v45 = vld [vmem:[#allocation80_spill] sm:$0xff]  ;;  %v14329_v0 = vld [vmem:[#allocation103_spill] sm:$0xff] }
 0x6b6   : > { %v4915_v21 = vadd.f32 %v4914_v61, %v4874_v27  ;;  %v4795_v32 = vadd.f32 %v4794_v9, %v4754_v1  ;;  %v12064_v1 = vpop.permute.xlu1 %4977  ;;  %v4923_v9 = vpop.f32.mrf.mxu2 }
 0x6b7   : > { %v3404_v6 = vadd.f32 %v14315_v30, %v3363_v42  ;;  %v14330_v42 = vld [vmem:[#allocation112_spill] sm:$0xff] }
 0x6b8   : > { %4989 = vrot.lane.b32.xlu2 %v11463_v63, %s13950_s23  ;;  %4975 = vrot.lane.b32.xlu0 %v4915_v21, %s13950_s23  ;;  %v14331_v30 = vld [vmem:[#allocation48_spill] sm:$0xff] }
 0x6b9   : > { %v4835_v62 = vpop.f32.mrf.mxu3  ;;  %v3445_v27 = vadd.f32 %v14317_v45, %v3404_v6 }
 0x6ba   : > { %v4836_v52 = vadd.f32 %v4835_v62, %v4795_v32  ;;  %v14319_v62 = vld [vmem:[#allocation124_spill] sm:$0xff]  ;;  %v4972_v32 = vpop.permute.xlu0 %4971 }
 0x6bb   : > { %v3486_v48 = vadd.f32 %v14319_v62, %v3445_v27  ;;  %v14337_v62 = vld [vmem:[#allocation140_spill] sm:$0xff] }
 0x6bc   : > { %v4877_v44 = vadd.f32 %v4876_v29, %v4836_v52  ;;  %v14320_v52 = vld [vmem:[#allocation122_spill] sm:$0xff] }
 0x6bd   : > { %v4797_v47 = vpop.f32.mrf.mxu1 }
 0x6be   : > { %v4798_v37 = vadd.f32 %v4797_v47, %v12021_v38  ;;  %v4918_v55 = vadd.f32 %v4917_v4, %v4877_v44  ;;  %v14314_v38 = vld [vmem:[#allocation92_spill] sm:$0xff]  ;;  %v12085_v29 = vpop.permute.xlu1 %4973  ;;  %v12089_v47 = vpop.permute.xlu2 %4967  ;;  %v14322_v44 = vld [vmem:[#allocation93_spill] sm:$0xff] }
 0x6bf   : > { %v3360_v5 = vadd.f32 %v14314_v38, %v14313_v36  ;;  %v14318_v4 = vld [vmem:[#allocation76_spill] sm:$0xff]  ;;  %v3357_v11 = vadd.f32 %v14323_v12, %v14322_v44  ;;  %v4458_v36 = vadd.f32 %v11935_v40, %v11801_v49  ;;  %v14343_v12 = vld [vmem:[#allocation99_spill] sm:$0xff] }
 0x6c0   : > { %4995 = vrot.lane.b32.xlu2 %v11488_v56, %s13950_s23  ;;  %4991 = vrot.lane.b32.xlu0 %v4514_v3, %s13950_s23  ;;  %v4763_v3 = vadd.f32 %v12019_v39, %v4722_v26  ;;  %v4926_v26 = vpop.f32.mrf.mxu2  ;;  %v14336_v40 = vld [vmem:[#allocation120_spill] sm:$0xff] }
 0x6c1   : > { %v4838_v17 = vpop.f32.mrf.mxu3  ;;  %v3401_v34 = vadd.f32 %v14316_v51, %v3360_v5  ;;  %v4499_v45 = vadd.f32 %v11944_v28, %v4458_v36  ;;  %v14339_v28 = vld [vmem:[#allocation118_spill] sm:$0xff] }
 0x6c2   : > { %v4839_v8 = vadd.f32 %v4838_v17, %v4798_v37  ;;  %v3527_v17 = vadd.f32 %v14321_v25, %v3486_v48  ;;  %v14325_v37 = vld [vmem:[#allocation105_spill] sm:$0xff]  ;;  %v14351_v36 = vld [vmem:[#allocation138_spill] sm:$0xff] }
 0x6c3   : > { %v3442_v53 = vadd.f32 %v14318_v4, %v3401_v34  ;;  %v4984_v34 = vpop.permute.xlu0 %4983 }
 0x6c4   : > { %v4880_v16 = vadd.f32 %v4879_v43, %v4839_v8  ;;  %v4885_v8 = vpop.f32.mrf.mxu0 }
 0x6c5   : > { %v4800_v7 = vpop.f32.mrf.mxu1  ;;  %v3483_v43 = vadd.f32 %v14320_v52, %v3442_v53 }
 0x6c6   : > { %v4801_v10 = vadd.f32 %v4800_v7, %v4760_v41  ;;  %v4921_v13 = vadd.f32 %v4920_v35, %v4880_v16  ;;  %v3568_v7 = vadd.f32 %v14325_v37, %v3527_v17  ;;  %v14327_v41 = vld [vmem:[#allocation84_spill] sm:$0xff]  ;;  %v12109_v38 = vpop.permute.xlu1 %4985  ;;  %v12116_v27 = vpop.permute.xlu2 %4979  ;;  %v14345_v37 = vld [vmem:[#allocation106_spill] sm:$0xff] }
 0x6c7   : > { %v3524_v35 = vadd.f32 %v14324_v20, %v3483_v43  ;;  %v5011_v53 = vsel %vm1007_vm3, %v4984_v34, %v12109_v38  ;;  %v5009_v52 = vsel %vm1007_vm3, %v12064_v1, %v12116_v27  ;;  %v14341_v43 = vld [vmem:[#allocation141_spill] sm:$0xff]  ;;  %v14344_v20 = vld [vmem:[#allocation95_spill] sm:$0xff]  ;;  %v5057_v1 = vld [vmem:[%s13752_s4] sm:$0x3] }
 0x6c8   : > { %4981 = vrot.lane.b32.xlu2 %v4918_v55, %s13950_s23  ;;  %4997 = vrot.lane.b32.xlu0 %v4517_v22, %s13950_s23  ;;  %v14326_v22 = vld [vmem:[#allocation91_spill] sm:$0xff]  ;;  %v3398_v55 = vadd.f32 %v14328_v19, %v3357_v11  ;;  %v14347_v19 = vld [vmem:[#allocation137_spill] sm:$0xff] }
 0x6c9   : > { %v4841_v61 = vpop.f32.mrf.mxu3  ;;  %v3354_v24 = vadd.f32 %v14327_v41, %v14326_v22  ;;  %v3565_v50 = vadd.f32 %v14329_v0, %v3524_v35  ;;  %v14346_v41 = vld [vmem:[#allocation102_spill] sm:$0xff] }
 0x6ca   : > { %v4842_v58 = vadd.f32 %v4841_v61, %v4801_v10  ;;  %v3609_v10 = vadd.f32 %v14330_v42, %v3568_v7  ;;  %v5007_v42 = vsel %vm1007_vm3, %v4972_v32, %v12085_v29 }
 0x6cb   : > { %v3395_v6 = vadd.f32 %v14331_v30, %v3354_v24  ;;  %v3606_v16 = vadd.f32 %v14333_v54, %v3565_v50  ;;  %v12146_v50 = vperm.slane %v5057_v1, 0  ;;  %v5005_v30 = vsel %vm1007_vm3, %v12051_v18, %v12089_v47  ;;  %v5172_v18 = vld [vmem:[%s13753_s5 + $0x1e0] sm:$0xff] }
 0x6cc   : > { %v4883_v21 = vadd.f32 %v4882_v60, %v4842_v58  ;;  %v14332_v60 = vld [vmem:[#allocation71_spill] sm:$0xff]  ;;  %5525 = vmatpush.msra.mxu1 %v5172_v18  ;;  %v5120_v18 = vld [vmem:[%s13753_s5 + $0x40] sm:$0xff] }
 0x6cd   : > { %v4803_v14 = vpop.f32.mrf.mxu1  ;;  %v3439_v61 = vadd.f32 %v14332_v60, %v3398_v55  ;;  %v14334_v58 = vld [vmem:[#allocation143_spill] sm:$0xff]  ;;  %v3647_v48 = vadd.f32 %v14337_v62, %v3606_v16  ;;  %v14353_v62 = vld [vmem:[#allocation104_spill] sm:$0xff] }
 0x6ce   : > { %v4924_v31 = vadd.f32 %v4923_v9, %v4883_v21  ;;  %v4804_v46 = vadd.f32 %v4803_v14, %v4763_v3  ;;  %v3650_v51 = vadd.f32 %v14334_v58, %v3609_v10  ;;  %v14335_v21 = vld [vmem:[#allocation67_spill] sm:$0xff]  ;;  %v14338_v14 = vld [vmem:[#allocation145_spill] sm:$0xff]  ;;  %v14349_v10 = vld [vmem:[#allocation8_spill] sm:$0xff] }
 0x6cf   : > { %v3436_v49 = vadd.f32 %v14335_v21, %v3395_v6  ;;  %v3480_v4 = vadd.f32 %v14336_v40, %v3439_v61  ;;  %v3688_v25 = vadd.f32 %v14341_v43, %v3647_v48  ;;  %v14352_v60 = vld [vmem:[#allocation135_spill] sm:$0xff]  ;;  %v5156_v21 = vld [vmem:[%s13753_s5 + $0x160] sm:$0xff]  ;;  %v14354_v48 = vld [vmem:[#allocation100_spill] sm:$0xff] }
 0x6d0   : > { %4957 = vrot.lane.b32.xlu2 %v4906_v33, %s13950_s23  ;;  %4987 = vrot.lane.b32.xlu0 %v4921_v13, %s13950_s23  ;;  %v3691_v33 = vadd.f32 %v14338_v14, %v3650_v51  ;;  %v5152_v40 = vld [vmem:[%s13753_s5 + $0x140] sm:$0xff]  ;;  %v3366_v14 = vadd.f32 %v14354_v48, %v14353_v62  ;;  %v14356_v43 = vld [vmem:[#allocation12_spill] sm:$0xff] }
 0x6d1   : > { %4993 = vrot.lane.b32.xlu1 %v4924_v31, %s13950_s23  ;;  %v4844_v15 = vpop.f32.mrf.mxu3  ;;  %v3477_v13 = vadd.f32 %v14339_v28, %v3436_v49  ;;  %v14340_v31 = vld [vmem:[#allocation119_spill] sm:$0xff]  ;;  %v5236_v49 = vld [vmem:[%s13753_s5 + $0x3e0] sm:$0xff] }
 0x6d2   : > { %v4845_v39 = vadd.f32 %v4844_v15, %v4804_v46  ;;  %v3521_v3 = vadd.f32 %v14340_v31, %v3480_v4  ;;  %v5043_v17 = vmax.f32 %v3691_v33, %v5011_v53  ;;  %v14342_v46 = vld [vmem:[#allocation114_spill] sm:$0xff]  ;;  %v5041_v15 = vmax.f32 %v3688_v25, %v5009_v52  ;;  %5545 = vmatpush.msrb.mxu3 %v5236_v49 }
 0x6d3   : > { %v3518_v44 = vadd.f32 %v14342_v46, %v3477_v13  ;;  %v5232_v53 = vld [vmem:[%s13753_s5 + $0x3c0] sm:$0xff]  ;;  %v14357_v46 = vld [vmem:[#allocation9_spill] sm:$0xff] }
 0x6d4   : > { %v4886_v5 = vadd.f32 %v4885_v8, %v4845_v39  ;;  %v3562_v11 = vadd.f32 %v14343_v12, %v3521_v3  ;;  %v4455_v39 = vadd.f32 %v11920_v2, %v11764_v23  ;;  %v5053_v22 = vmax.f32 %v5041_v15, %v5043_v17  ;;  %v14348_v8 = vld [vmem:[#allocation30_spill] sm:$0xff]  ;;  %5546 = vmatpush.msrb.mxu3 %v5232_v53  ;;  %v14355_v3 = vld [vmem:[#allocation75_spill] sm:$0xff] }
 0x6d5   : > { %v3559_v35 = vadd.f32 %v14344_v20, %v3518_v44  ;;  %v14350_v23 = vld [vmem:[#allocation134_spill] sm:$0xff]  ;;  %v3407_v52 = vadd.f32 %v14355_v3, %v3366_v14  ;;  %v12203_v17 = vperm.slane %v5057_v1, 1  ;;  %v14365_v14 = vld [vmem:[#allocation147_spill] sm:$0xff] }
 0x6d6   : > { %v4927_v9 = vadd.f32 %v4926_v26, %v4886_v5  ;;  %v3603_v7 = vadd.f32 %v14345_v37, %v3562_v11  ;;  %v4496_v0 = vadd.f32 %v14348_v8, %v4455_v39  ;;  %v5067_v6 = vadd.f32 %v12146_v50, %v5053_v22  ;;  %v5148_v13 = vld [vmem:[%s13753_s5 + $0x120] sm:$0xff] }
 0x6d7   : > { %v3600_v24 = vadd.f32 %v14346_v41, %v3559_v35  ;;  %v5228_v31 = vld [vmem:[%s13753_s5 + $0x3a0] sm:$0xff] }
 0x6d8   : > { %4961 = vrot.lane.b32.xlu0 %v4499_v45, %s13950_s23  ;;  %4953 = vrot.lane.b32.xlu2 %v11240_v57, %s13950_s23  ;;  %v3644_v55 = vadd.f32 %v14347_v19, %v3603_v7  ;;  %v5075_v32 = vmax.f32 %v5067_v6, 0.0  ;;  %v5168_v45 = vld [vmem:[%s13753_s5 + $0x1c0] sm:$0xff] }
 0x6d9   : > { %4999 = vrot.lane.b32.xlu1 %v4927_v9, %s13950_s23  ;;  %v3641_v2 = vadd.f32 %v14350_v23, %v3600_v24  ;;  %5526 = vmatpush.msra.mxu1 %v5168_v45  ;;  %v5160_v9 = vld [vmem:[%s13753_s5 + $0x180] sm:$0xff]  ;;  %v14360_v24 = vld [vmem:[#allocation125_spill] sm:$0xff] }
 0x6da   : > { %v3685_v5 = vadd.f32 %v14351_v36, %v3644_v55  ;;  %5547 = vmatpush.msrb.mxu3 %v5228_v31  ;;  %v5144_v12 = vld [vmem:[%s13753_s5 + $0x100] sm:$0xff] }
 0x6db   : > { %v3682_v61 = vadd.f32 %v14352_v60, %v3641_v2  ;;  %v5224_v11 = vld [vmem:[%s13753_s5 + $0x380] sm:$0xff]  ;;  %v14361_v2 = vld [vmem:[#allocation108_spill] sm:$0xff] }
 0x6dc   : > { %v5039_v26 = vmax.f32 %v3685_v5, %v5007_v42  ;;  %5548 = vmatpush.msrb.mxu3 %v5224_v11  ;;  %v5140_v35 = vld [vmem:[%s13753_s5 + $0xe0] sm:$0xff]  ;;  %v14367_v11 = vld [vmem:[#allocation73_spill] sm:$0xff] }
 0x6dd   : > { %v5037_v54 = vmax.f32 %v3682_v61, %v5005_v30  ;;  %v5220_v37 = vld [vmem:[%s13753_s5 + $0x360] sm:$0xff]  ;;  %v14362_v61 = vld [vmem:[#allocation116_spill] sm:$0xff] }
 0x6de   : > { %v14359_v7 = vld [vmem:[#allocation126_spill] sm:$0xff]  ;;  %5549 = vmatpush.msrb.mxu3 %v5220_v37  ;;  %v14369_v37 = vld [vmem:[#allocation79_spill] sm:$0xff] }
 0x6df   : > { %v5051_v16 = vmax.f32 %v5037_v54, %v5039_v26  ;;  %v5136_v22 = vld [vmem:[%s13753_s5 + $0xc0] sm:$0xff] }
 0x6e0   : > { %4959 = vrot.lane.b32.xlu0 %v14349_v10, %s13950_s23  ;;  %v5216_v41 = vld [vmem:[%s13753_s5 + $0x340] sm:$0xff] }
 0x6e1   : > { %4955 = vrot.lane.b32.xlu1 %v4496_v0, %s13950_s23  ;;  %v5065_v58 = vadd.f32 %v12146_v50, %v5051_v16  ;;  %5550 = vmatpush.msrb.mxu3 %v5216_v41  ;;  %v5132_v0 = vld [vmem:[%s13753_s5 + $0xa0] sm:$0xff] }
 0x6e2   : > { %v5212_v42 = vld [vmem:[%s13753_s5 + $0x320] sm:$0xff] }
 0x6e3   : > { %v5073_v51 = vmax.f32 %v5065_v58, 0.0  ;;  %v5364_v23 = vld [vmem:[%s13753_s5 + $0x7e0] sm:$0xff]  ;;  %5551 = vmatpush.msrb.mxu3 %v5212_v42  ;;  %v14372_v42 = vld [vmem:[#allocation25_spill] sm:$0xff] }
 0x6e4   : > { %v5128_v30 = vld [vmem:[%s13753_s5 + $0x80] sm:$0xff]  ;;  %5585 = vmatpush.msrb.mxu2 %v5364_v23 }
 0x6e5   : > { %v5208_v6 = vld [vmem:[%s13753_s5 + $0x300] sm:$0xff] }
 0x6e6   : > { %v5360_v60 = vld [vmem:[%s13753_s5 + $0x7c0] sm:$0xff]  ;;  %5552 = vmatpush.msrb.mxu3 %v5208_v6 }
 0x6e7   : > { %v5124_v54 = vld [vmem:[%s13753_s5 + $0x60] sm:$0xff]  ;;  %5586 = vmatpush.msrb.mxu2 %v5360_v60 }
 0x6e8   : > { %5092 = vrot.lane.b32.xlu0 %v5075_v32, %s7023_s17  ;;  %v5204_v32 = vld [vmem:[%s13753_s5 + $0x2e0] sm:$0xff] }
 0x6e9   : > { %4963 = vrot.lane.b32.xlu1 %v12040_v59, %s13950_s23  ;;  %v5164_v59 = vld [vmem:[%s13753_s5 + $0x1a0] sm:$0xff]  ;;  %5553 = vmatpush.msrb.mxu3 %v5204_v32 }
 0x6ea   : > { %5527 = vmatpush.msra.mxu1 %v5164_v59  ;;  %v5356_v16 = vld [vmem:[%s13753_s5 + $0x7a0] sm:$0xff] }
 0x6eb   : > { %v14363_v58 = vld [vmem:[#allocation146_spill] sm:$0xff]  ;;  %5587 = vmatpush.msrb.mxu2 %v5356_v16 }
 0x6ec   : > { %5528 = vmatpush.msra.mxu1 %v5160_v9  ;;  %v5200_v45 = vld [vmem:[%s13753_s5 + $0x2c0] sm:$0xff]  ;;  %v14364_v9 = vld [vmem:[#allocation52_spill] sm:$0xff] }
 0x6ed   : > { %v5352_v59 = vld [vmem:[%s13753_s5 + $0x780] sm:$0xff]  ;;  %5554 = vmatpush.msrb.mxu3 %v5200_v45 }
 0x6ee   : > { %5529 = vmatpush.msra.mxu1 %v5156_v21  ;;  %5588 = vmatpush.msrb.mxu2 %v5352_v59  ;;  %v5196_v53 = vld [vmem:[%s13753_s5 + $0x2a0] sm:$0xff]  ;;  %v14377_v59 = vld [vmem:[#allocation109_spill] sm:$0xff] }
 0x6ef   : > { %v5348_v62 = vld [vmem:[%s13753_s5 + $0x760] sm:$0xff]  ;;  %5555 = vmatpush.msrb.mxu3 %v5196_v53 }
 0x6f0   : > { %5530 = vmatpush.msra.mxu1 %v5152_v40  ;;  %v5116_v40 = vld [vmem:[%s13753_s5 + $0x20] sm:$0xff]  ;;  %5589 = vmatpush.msrb.mxu2 %v5348_v62 }
 0x6f1   : > { %5081 = vrot.lane.b32.xlu1 %v5073_v51, %s7027_s13  ;;  %v5344_v31 = vld [vmem:[%s13753_s5 + $0x740] sm:$0xff] }
 0x6f2   : > { %5531 = vmatpush.msra.mxu1 %v5148_v13  ;;  %v5192_v13 = vld [vmem:[%s13753_s5 + $0x280] sm:$0xff]  ;;  %5590 = vmatpush.msrb.mxu2 %v5344_v31 }
 0x6f3   : > { %5556 = vmatpush.msrb.mxu3 %v5192_v13  ;;  %v5296_v16 = vld [vmem:[%s13753_s5 + $0x5c0] sm:$0xff] }
 0x6f4   : > { %5532 = vmatpush.msra.mxu1 %v5144_v12  ;;  %v14366_v12 = vld [vmem:[#allocation82_spill] sm:$0xff] }
 0x6f5   : > { %v5292_v45 = vld [vmem:[%s13753_s5 + $0x5a0] sm:$0xff] }
 0x6f6   : > { %5533 = vmatpush.msra.mxu1 %v5140_v35  ;;  %v14368_v35 = vld [vmem:[#allocation88_spill] sm:$0xff] }
 0x6f8   : > { %5534 = vmatpush.msra.mxu1 %v5136_v22  ;;  %v5332_v22 = vld [vmem:[%s13753_s5 + $0x6e0] sm:$0xff] }
 0x6fa   : > { %5535 = vmatpush.msra.mxu1 %v5132_v0 }
 0x6fc   : > { %5536 = vmatpush.msra.mxu1 %v5128_v30  ;;  %v14374_v30 = vld [vmem:[#allocation62_spill] sm:$0xff] }
 0x6fe   : > { %5537 = vmatpush.msra.mxu1 %v5124_v54  ;;  %v14375_v54 = vld [vmem:[#allocation54_spill] sm:$0xff] }
 0x700   : > { %5538 = vmatpush.msra.mxu1 %v5120_v18 }
 0x702   : > { %5539 = vmatpush.msra.mxu1 %v5116_v40  ;;  %v14378_v40 = vld [vmem:[#allocation111_spill] sm:$0xff] }
 0x70a   : > { %v4970_v34 = vpop.permute.xlu2 %4969 }
 0x70b   : > { %v5006_v4 = vsel %vm1007_vm3, %v12089_v47, %v4970_v34 }
 0x70c   : > { %v5038_v25 = vmax.f32 %v14356_v43, %v5006_v4  ;;  %v5340_v43 = vld [vmem:[%s13753_s5 + $0x720] sm:$0xff] }
 0x70d   : > { %5591 = vmatpush.msrb.mxu2 %v5340_v43  ;;  %v5284_v43 = vld [vmem:[%s13753_s5 + $0x560] sm:$0xff] }
 0x712   : > { %v4990_v33 = vpop.permute.xlu2 %4989 }
 0x71a   : > { %v4996_v5 = vpop.permute.xlu2 %4995 }
 0x72a   : > { %v4976_v28 = vpop.permute.xlu0 %4975 }
 0x72b   : > { %v5008_v47 = vsel %vm1007_vm3, %v12085_v29, %v4976_v28  ;;  %v14358_v29 = vld [vmem:[#allocation86_spill] sm:$0xff] }
 0x72c   : > { %v5040_v44 = vmax.f32 %v14357_v46, %v5008_v47  ;;  %v3448_v15 = vadd.f32 %v14358_v29, %v3407_v52  ;;  %v5112_v28 = vld [vmem:[%s13753_s5] sm:$0xff]  ;;  %v4982_v47 = vpop.permute.xlu2 %4981  ;;  %v3348_v29 = vadd.f32 %v14367_v11, %v14366_v12 }
 0x72d   : > { %5540 = vmatpush.msra.mxu1 %v5112_v28  ;;  %v5188_v52 = vld [vmem:[%s13753_s5 + $0x260] sm:$0xff]  ;;  %v14379_v28 = vld [vmem:[#allocation107_spill] sm:$0xff] }
 0x72e   : > { %v5052_v20 = vmax.f32 %v5038_v25, %v5040_v44  ;;  %v3489_v39 = vadd.f32 %v14359_v7, %v3448_v15  ;;  %v5184_v25 = vld [vmem:[%s13753_s5 + $0x240] sm:$0xff]  ;;  %5557 = vmatpush.msrb.mxu3 %v5188_v52  ;;  %v5010_v15 = vsel %vm1007_vm3, %v12116_v27, %v4982_v47  ;;  %v3351_v7 = vadd.f32 %v14369_v37, %v14368_v35  ;;  %v14370_v27 = vld [vmem:[#allocation49_spill] sm:$0xff] }
 0x72f   : > { %v5336_v44 = vld [vmem:[%s13753_s5 + $0x700] sm:$0xff] }
 0x730   : > { %v5066_v1 = vadd.f32 %v12203_v17, %v5052_v20  ;;  %v3530_v19 = vadd.f32 %v14360_v24, %v3489_v39  ;;  %v5180_v20 = vld [vmem:[%s13753_s5 + $0x220] sm:$0xff]  ;;  %5558 = vmatpush.msrb.mxu3 %v5184_v25  ;;  %5592 = vmatpush.msrb.mxu2 %v5336_v44 }
 0x731   : > { %v14380_v47 = vld [vmem:[#allocation90_spill] sm:$0xff] }
 0x732   : > { %v5074_v55 = vmax.f32 %v5066_v1, 0.0  ;;  %v12228_v8 = vpop.permute.xlu0 %4991  ;;  %v3571_v36 = vadd.f32 %v14361_v2, %v3530_v19  ;;  %v3392_v19 = vadd.f32 %v14370_v27, %v3351_v7  ;;  %5559 = vmatpush.msrb.mxu3 %v5180_v20  ;;  %v14373_v2 = vld [vmem:[#allocation47_spill] sm:$0xff]  ;;  %5593 = vmatpush.msrb.mxu2 %v5332_v22  ;;  %v5312_v52 = vld [vmem:[%s13753_s5 + $0x640] sm:$0xff]  ;;  %v14385_v27 = vld [vmem:[#allocation129_spill] sm:$0xff] }
 0x733   : > { %v5013_v34 = vsel %vm1007_vm3, %v4990_v33, %v12228_v8  ;;  %v5492_v25 = vld [vmem:[%s13753_s5 + $0xbe0] sm:$0xff] }
 0x734   : > { %5083 = vrot.lane.b32.xlu2 %v5074_v55, %s7027_s13  ;;  %v3612_v26 = vadd.f32 %v14362_v61, %v3571_v36  ;;  %v14371_v55 = vld [vmem:[#allocation22_spill] sm:$0xff]  ;;  %v3389_v36 = vadd.f32 %v14373_v2, %v3348_v29  ;;  %v3433_v6 = vadd.f32 %v14374_v30, %v3392_v19  ;;  %s6270_s13 = sshll.u32 %s473_s26, 4  ;;  %s6271_s13 = int_to_ptr.vmem [resolvable:$true] %s6270_s13 }
 0x735   : > { %v5042_v0 = vmax.f32 %v14371_v55, %v5010_v15  ;;  %v5324_v61 = vld [vmem:[%s13753_s5 + $0x6a0] sm:$0xff] }
 0x736   : > { %v3653_v51 = vadd.f32 %v14363_v58, %v3612_v26  ;;  %v5300_v26 = vld [vmem:[%s13753_s5 + $0x5e0] sm:$0xff]  ;;  %v3430_v32 = vadd.f32 %v14375_v54, %v3389_v36  ;;  %v14376_v58 = vld [vmem:[#allocation113_spill] sm:$0xff]  ;;  %v5169_v54 = vld [vmem:[%s13753_s5 + $0x1c8] sm:$0xff] }
 0x737   : > { %5565 = vmatpush.msra.mxu0 %v5300_v26  ;;  %v5488_v11 = vld [vmem:[%s13753_s5 + $0xbc0] sm:$0xff] }
 0x738   : > { %v3694_v21 = vadd.f32 %v14364_v9, %v3653_v51  ;;  %v3474_v51 = vadd.f32 %v14376_v58, %v3433_v6  ;;  %v3471_v9 = vadd.f32 %v14377_v59, %v3430_v32  ;;  %v14382_v29 = vld [vmem:[#allocation98_spill] sm:$0xff] }
 0x739   : > { %5566 = vmatpush.msra.mxu0 %v5296_v16  ;;  %v5308_v20 = vld [vmem:[%s13753_s5 + $0x620] sm:$0xff] }
 0x73a   : > { %v12273_v49 = vpop.permute.xlu0 %4997  ;;  %v5045_v48 = vmax.f32 %v3694_v21, %v5013_v34  ;;  %v5320_v34 = vld [vmem:[%s13753_s5 + $0x680] sm:$0xff]  ;;  %v12354_v21 = vpop.permute.xlu2 %4957  ;;  %v3512_v13 = vadd.f32 %v14379_v28, %v3471_v9 }
 0x73b   : > { %v5015_v4 = vsel %vm1007_vm3, %v4996_v5, %v12273_v49  ;;  %v5176_v5 = vld [vmem:[%s13753_s5 + $0x200] sm:$0xff]  ;;  %5567 = vmatpush.msra.mxu0 %v5292_v45  ;;  %v5165_v45 = vld [vmem:[%s13753_s5 + $0x1a8] sm:$0xff] }
 0x73c   : > { %v5047_v33 = vmax.f32 %v14365_v14, %v5015_v4  ;;  %5560 = vmatpush.msrb.mxu3 %v5176_v5  ;;  %v3515_v4 = vadd.f32 %v14378_v40, %v3474_v51  ;;  %v5316_v14 = vld [vmem:[%s13753_s5 + $0x660] sm:$0xff] }
 0x73d   : > { %v5280_v35 = vld [vmem:[%s13753_s5 + $0x540] sm:$0xff] }
 0x73e   : > { %v5055_v3 = vmax.f32 %v5045_v48, %v5047_v33  ;;  %v5288_v33 = vld [vmem:[%s13753_s5 + $0x580] sm:$0xff]  ;;  %5625 = vmatpush.msra.mxu3 %v5492_v25 }
 0x73f   : > { %5568 = vmatpush.msra.mxu0 %v5288_v33  ;;  %v5484_v7 = vld [vmem:[%s13753_s5 + $0xba0] sm:$0xff] }
 0x740   : > { %v5069_v46 = vadd.f32 %v12146_v50, %v5055_v3  ;;  %v3556_v3 = vadd.f32 %v14380_v47, %v3515_v4  ;;  %v5304_v22 = vld [vmem:[%s13753_s5 + $0x600] sm:$0xff]  ;;  %5626 = vmatpush.msra.mxu3 %v5488_v11 }
 0x741   : > { %5569 = vmatpush.msra.mxu0 %v5284_v43  ;;  %v5272_v5 = vld [vmem:[%s13753_s5 + $0x500] sm:$0xff] }
 0x742   : > { %v5077_v39 = vmax.f32 %v5069_v46, 0.0  ;;  %v4988_v1 = vpop.permute.xlu0 %4987  ;;  %v14381_v46 = vld [vmem:[#allocation87_spill] sm:$0xff]  ;;  %v3597_v15 = vadd.f32 %v14382_v29, %v3556_v3  ;;  %5627 = vmatpush.msra.mxu3 %v5484_v7  ;;  %v4954_v6 = vpop.permute.xlu2 %4953  ;;  %v5476_v32 = vld [vmem:[%s13753_s5 + $0xb60] sm:$0xff] }
 0x743   : > { %v5012_v41 = vsel %vm1007_vm3, %v12109_v38, %v4988_v1  ;;  %v4994_v24 = vpop.permute.xlu1 %4993  ;;  %v5328_v38 = vld [vmem:[%s13753_s5 + $0x6c0] sm:$0xff]  ;;  %v3553_v44 = vadd.f32 %v14381_v46, %v3512_v13  ;;  %5570 = vmatpush.msra.mxu0 %v5280_v35  ;;  %v5157_v13 = vld [vmem:[%s13753_s5 + $0x168] sm:$0xff] }
 0x744   : > { %v5044_v23 = vmax.f32 %v14372_v42, %v5012_v41  ;;  %5101 = vrot.lane.b32.xlu1 %v5077_v39, %s7028_s21  ;;  %5594 = vmatpush.msrb.mxu2 %v5328_v38  ;;  %v5014_v62 = vsel %vm1007_vm3, %v12228_v8, %v4994_v24  ;;  %v14384_v39 = vld [vmem:[#allocation131_spill] sm:$0xff]  ;;  %v5276_v41 = vld [vmem:[%s13753_s5 + $0x520] sm:$0xff] }
 0x745   : > { %v5046_v12 = vmax.f32 %v11463_v63, %v5014_v62  ;;  %v14383_v63 = vld [vmem:[#allocation94_spill] sm:$0xff]  ;;  %v3638_v1 = vadd.f32 %v14384_v39, %v3597_v15  ;;  %5571 = vmatpush.msra.mxu0 %v5276_v41  ;;  %v5145_v29 = vld [vmem:[%s13753_s5 + $0x108] sm:$0xff] }
 0x746   : > { %v5054_v60 = vmax.f32 %v5042_v0, %v5044_v23  ;;  %5595 = vmatpush.msrb.mxu2 %v5324_v61  ;;  %v3594_v37 = vadd.f32 %v14383_v63, %v3553_v44  ;;  %v5428_v24 = vld [vmem:[%s13753_s5 + $0x9e0] sm:$0xff]  ;;  %v5173_v0 = vld [vmem:[%s13753_s5 + $0x1e8] sm:$0xff]  ;;  %v14386_v23 = vld [vmem:[#allocation132_spill] sm:$0xff] }
 0x747   : > { %v5480_v42 = vld [vmem:[%s13753_s5 + $0xb80] sm:$0xff]  ;;  %v3679_v2 = vadd.f32 %v14386_v23, %v3638_v1  ;;  %5605 = vmatpush.msrb.mxu1 %v5428_v24  ;;  %5572 = vmatpush.msra.mxu0 %v5272_v5  ;;  %v5141_v35 = vld [vmem:[%s13753_s5 + $0xe8] sm:$0xff] }
 0x748   : > { %v5068_v18 = vadd.f32 %v12203_v17, %v5054_v60  ;;  %5596 = vmatpush.msrb.mxu2 %v5320_v34  ;;  %v3635_v19 = vadd.f32 %v14385_v27, %v3594_v37  ;;  %v14387_v38 = vld [vmem:[#allocation130_spill] sm:$0xff]  ;;  %5628 = vmatpush.msra.mxu3 %v5480_v42  ;;  %v5137_v7 = vld [vmem:[%s13753_s5 + $0xc8] sm:$0xff] }
 0x749   : > { %v5268_v51 = vld [vmem:[%s13753_s5 + $0x4e0] sm:$0xff]  ;;  %v5133_v1 = vld [vmem:[%s13753_s5 + $0xa8] sm:$0xff] }
 0x74a   : > { %v5076_v53 = vmax.f32 %v5068_v18, 0.0  ;;  %v12359_v48 = vpop.permute.xlu0 %4961  ;;  %5597 = vmatpush.msrb.mxu2 %v5316_v14  ;;  %v3676_v30 = vadd.f32 %v14387_v38, %v3635_v19  ;;  %v5424_v18 = vld [vmem:[%s13753_s5 + $0x9c0] sm:$0xff]  ;;  %5629 = vmatpush.msra.mxu3 %v5476_v32  ;;  %v5129_v41 = vld [vmem:[%s13753_s5 + $0x88] sm:$0xff] }
 0x74b   : > { %v5000_v31 = vpop.permute.xlu1 %4999  ;;  %v5472_v59 = vld [vmem:[%s13753_s5 + $0xb40] sm:$0xff]  ;;  %5573 = vmatpush.msra.mxu0 %v5268_v51  ;;  %5606 = vmatpush.msrb.mxu1 %v5424_v18  ;;  %v5125_v27 = vld [vmem:[%s13753_s5 + $0x68] sm:$0xff] }
 0x74c   : > { %v5016_v8 = vsel %vm1007_vm3, %v12273_v49, %v5000_v31  ;;  %5094 = vrot.lane.b32.xlu0 %v5076_v53, %s7023_s17  ;;  %5598 = vmatpush.msrb.mxu2 %v5312_v52  ;;  %v5264_v9 = vld [vmem:[%s13753_s5 + $0x4c0] sm:$0xff]  ;;  %v5161_v53 = vld [vmem:[%s13753_s5 + $0x188] sm:$0xff] }
 0x74d   : > { %v5048_v49 = vmax.f32 %v11488_v56, %v5016_v8  ;;  %v5420_v40 = vld [vmem:[%s13753_s5 + $0x9a0] sm:$0xff]  ;;  %5630 = vmatpush.msra.mxu3 %v5472_v59  ;;  %5574 = vmatpush.msra.mxu0 %v5264_v9  ;;  %v5153_v52 = vld [vmem:[%s13753_s5 + $0x148] sm:$0xff] }
 0x74e   : > { %5599 = vmatpush.msrb.mxu2 %v5308_v20  ;;  %v5468_v62 = vld [vmem:[%s13753_s5 + $0xb20] sm:$0xff]  ;;  %5607 = vmatpush.msrb.mxu1 %v5420_v40  ;;  %v5121_v19 = vld [vmem:[%s13753_s5 + $0x48] sm:$0xff] }
 0x74f   : > { %v5056_v56 = vmax.f32 %v5046_v12, %v5048_v49  ;;  %v5260_v14 = vld [vmem:[%s13753_s5 + $0x4a0] sm:$0xff]  ;;  %5631 = vmatpush.msra.mxu3 %v5468_v62  ;;  %v5297_v51 = vld [vmem:[%s13753_s5 + $0x5c8] sm:$0xff] }
 0x750   : > { %5600 = vmatpush.msrb.mxu2 %v5304_v22  ;;  %v5416_v33 = vld [vmem:[%s13753_s5 + $0x980] sm:$0xff]  ;;  %5575 = vmatpush.msra.mxu0 %v5260_v14  ;;  %v5289_v59 = vld [vmem:[%s13753_s5 + $0x588] sm:$0xff] }
 0x751   : > { %v5070_v55 = vadd.f32 %v12203_v17, %v5056_v56  ;;  %v5464_v31 = vld [vmem:[%s13753_s5 + $0xb00] sm:$0xff]  ;;  %5608 = vmatpush.msrb.mxu1 %v5416_v33  ;;  %v5237_v40 = vld [vmem:[%s13753_s5 + $0x3e8] sm:$0xff] }
 0x752   : > { %v4960_v36 = vpop.permute.xlu0 %4959  ;;  %5665 = vmatpush.msra.mxu2 %v5173_v0  ;;  %v5256_v3 = vld [vmem:[%s13753_s5 + $0x480] sm:$0xff]  ;;  %5632 = vmatpush.msra.mxu3 %v5464_v31  ;;  %v5281_v62 = vld [vmem:[%s13753_s5 + $0x548] sm:$0xff] }
 0x753   : > { %v5078_v60 = vmax.f32 %v5070_v55, 0.0  ;;  %v4956_v61 = vpop.permute.xlu1 %4955  ;;  %v5003_v26 = vsel %vm1007_vm3, %v4960_v36, %v12359_v48  ;;  %v5412_v43 = vld [vmem:[%s13753_s5 + $0x960] sm:$0xff]  ;;  %5576 = vmatpush.msra.mxu0 %v5256_v3  ;;  %v5117_v55 = vld [vmem:[%s13753_s5 + $0x28] sm:$0xff] }
 0x754   : > { %v5001_v16 = vsel %vm1007_vm3, %v4954_v6, %v4956_v61  ;;  %v5035_v58 = vmax.f32 %v3679_v2, %v5003_v26  ;;  %5666 = vmatpush.msra.mxu2 %v5169_v54  ;;  %v5002_v47 = vsel %vm1007_vm3, %v4956_v61, %v12354_v21  ;;  %v5252_v25 = vld [vmem:[%s13753_s5 + $0x460] sm:$0xff]  ;;  %5609 = vmatpush.msrb.mxu1 %v5412_v43  ;;  %v5113_v2 = vld [vmem:[%s13753_s5 + $0x8] sm:$0xff] }
 0x755   : > { %v5033_v34 = vmax.f32 %v3676_v30, %v5001_v16  ;;  %5103 = vrot.lane.b32.xlu2 %v5078_v60, %s7028_s21  ;;  %v5460_v46 = vld [vmem:[%s13753_s5 + $0xae0] sm:$0xff]  ;;  %v5034_v44 = vmax.f32 %v11240_v57, %v5002_v47  ;;  %5577 = vmatpush.msra.mxu0 %v5252_v25  ;;  %v5301_v16 = vld [vmem:[%s13753_s5 + $0x5e8] sm:$0xff]  ;;  %s6268_s21 = scalar_lea.hbm %s13757_s9, %s6579_s22 }
 0x756   : > { %5667 = vmatpush.msra.mxu2 %v5165_v45  ;;  %v5408_v49 = vld [vmem:[%s13753_s5 + $0x940] sm:$0xff]  ;;  %5633 = vmatpush.msra.mxu3 %v5460_v46  ;;  %v5229_v14 = vld [vmem:[%s13753_s5 + $0x3a8] sm:$0xff]  ;;  %s6272_s23 = sshll.u32 %s6268_s21, 4  ;;  %s6273_s23 = int_to_ptr.hbm [resolvable:$true] %s6272_s23 }
 0x757   : > { %v5049_v4 = vmax.f32 %v5033_v34, %v5035_v58  ;;  %v5248_v11 = vld [vmem:[%s13753_s5 + $0x440] sm:$0xff]  ;;  %5610 = vmatpush.msrb.mxu1 %v5408_v49  ;;  %v5293_v34 = vld [vmem:[%s13753_s5 + $0x5a8] sm:$0xff]  ;;  %s6969_s14 = sshra.s32 %s6273_s23, 4  ;;  %s6970_s14 = int_to_ptr.hbm [resolvable:$true] %s6969_s14 }
 0x758   : > { %5668 = vmatpush.msra.mxu2 %v5161_v53  ;;  %v5456_v57 = vld [vmem:[%s13753_s5 + $0xac0] sm:$0xff]  ;;  %5578 = vmatpush.msra.mxu0 %v5248_v11  ;;  %v5233_v53 = vld [vmem:[%s13753_s5 + $0x3c8] sm:$0xff]  ;;  %s6971_s24 = scalar_lea.hbm %s6970_s14, 8  ;;  %p6976_p2 = scmp.lt.s32.totalorder %s6970_s14, %s13757_s9 }
 0x759   : > { %v5063_v28 = vadd.f32 %v12146_v50, %v5049_v4  ;;  %v5244_v15 = vld [vmem:[%s13753_s5 + $0x420] sm:$0xff]  ;;  %5634 = vmatpush.msra.mxu3 %v5456_v57  ;;  %v5285_v4 = vld [vmem:[%s13753_s5 + $0x568] sm:$0xff]  ;;  %p6972_p13 = scmp.ne.s32.totalorder %s6970_s14, %s6971_s24  ;;  %p6977_p3 = scmp.lt.s32.totalorder %s6975_s29, %s6971_s24 }
 0x75a   : > { %5669 = vmatpush.msra.mxu2 %v5157_v13  ;;  %v5240_v63 = vld [vmem:[%s13753_s5 + $0x400] sm:$0xff]  ;;  %5579 = vmatpush.msra.mxu0 %v5244_v15  ;;  %v5277_v33 = vld [vmem:[%s13753_s5 + $0x528] sm:$0xff]  ;;  %v12656_v43 = vpop.permute.xlu0 %5092 }
 0x75b   : > { %v12473_v50 = vmax.f32 %v5063_v28, 0.0  ;;  %v4964_v8 = vpop.permute.xlu1 %4963  ;;  %v5504_v22 = vld [vmem:[%s13753_s5 + $0xc40] sm:$0xff]  ;;  %v5225_v28 = vld [vmem:[%s13753_s5 + $0x388] sm:$0xff]  ;;  %p6973_p0 = pnand %p6972_p13, %p7117_p6  ;;  %p6978_p4 = por %p6977_p3, %p6976_p2 }
 0x75c   : > { %v5004_v21 = vsel %vm1007_vm3, %v12359_v48, %v4964_v8  ;;  %v5149_v48 = vld [vmem:[%s13753_s5 + $0x128] sm:$0xff]  ;;  %5670 = vmatpush.msra.mxu2 %v5153_v52  ;;  %5580 = vmatpush.msra.mxu0 %v5240_v63  ;;  %v5500_v24 = vld [vmem:[%s13753_s5 + $0xc20] sm:$0xff] }
 0x75d   : > { %v5036_v12 = vmax.f32 %v14349_v10, %v5004_v21  ;;  %5541 = vmatmul.f32.vlgmr.msra.gmra.mxu1 %v12473_v50  ;;  %v5404_v0 = vld [vmem:[%s13753_s5 + $0x920] sm:$0xff]  ;;  %v5273_v13 = vld [vmem:[%s13753_s5 + $0x508] sm:$0xff]  ;;  %p6974_p1 = pneg %p6973_p0 }
 0x75e   : > { %5671 = vmatpush.msra.mxu2 %v5149_v48  ;;  %v5452_v42 = vld [vmem:[%s13753_s5 + $0xaa0] sm:$0xff]  ;;  %5611 = vmatpush.msrb.mxu1 %v5404_v0  ;;  %v5221_v31 = vld [vmem:[%s13753_s5 + $0x368] sm:$0xff] }
 0x75f   : > { %v5050_v10 = vmax.f32 %v5034_v44, %v5036_v12  ;;  %v5496_v23 = vld [vmem:[%s13753_s5 + $0xc00] sm:$0xff]  ;;  %5635 = vmatpush.msra.mxu3 %v5452_v42  ;;  %v5269_v47 = vld [vmem:[%s13753_s5 + $0x4e8] sm:$0xff]  ;;  %p6979_p5 = pnand %p6978_p4, %p6974_p1 }
 0x760   : > { %5672 = vmatpush.msra.mxu2 %v5145_v29  ;;  %v5400_v36 = vld [vmem:[%s13753_s5 + $0x900] sm:$0xff]  ;;  %v5217_v3 = vld [vmem:[%s13753_s5 + $0x348] sm:$0xff] }
 0x761   : > { %v5064_v20 = vadd.f32 %v12203_v17, %v5050_v10  ;;  %v5508_v17 = vld [vmem:[%s13753_s5 + $0xc60] sm:$0xff]  ;;  %5612 = vmatpush.msrb.mxu1 %v5400_v36  ;;  %v5265_v8 = vld [vmem:[%s13753_s5 + $0x4c8] sm:$0xff] }
 0x762   : > { %5673 = vmatpush.msra.mxu2 %v5141_v35  ;;  %5657 = vmatpush.msrb.mxu0 %v5508_v17  ;;  %v5448_v5 = vld [vmem:[%s13753_s5 + $0xa80] sm:$0xff]  ;;  %v5213_v52 = vld [vmem:[%s13753_s5 + $0x328] sm:$0xff] }
 0x763   : > { %v12517_v37 = vpop.permute.xlu1 %5081  ;;  %v5072_v56 = vmax.f32 %v5064_v20, 0.0  ;;  %5636 = vmatpush.msra.mxu3 %v5448_v5  ;;  %v5396_v38 = vld [vmem:[%s13753_s5 + $0x8e0] sm:$0xff]  ;;  %v5365_v25 = vld [vmem:[%s13753_s5 + $0x7e8] sm:$0xff] }
 0x764   : > { %5674 = vmatpush.msra.mxu2 %v5137_v7  ;;  %5658 = vmatpush.msrb.mxu0 %v5504_v22  ;;  %v5444_v30 = vld [vmem:[%s13753_s5 + $0xa60] sm:$0xff]  ;;  %v5429_v46 = vld [vmem:[%s13753_s5 + $0x9e8] sm:$0xff] }
 0x765   : > { %v12527_v39 = vsel %vm5085_vm11, %v5072_v56, %v12517_v37  ;;  %5613 = vmatpush.msrb.mxu1 %v5396_v38  ;;  %5637 = vmatpush.msra.mxu3 %v5444_v30  ;;  %v5392_v6 = vld [vmem:[%s13753_s5 + $0x8c0] sm:$0xff]  ;;  %v5261_v48 = vld [vmem:[%s13753_s5 + $0x4a8] sm:$0xff] }
 0x766   : > { %5561 = vmatmul.f32.vlgmr.msrb.gmra.mxu3 %v12527_v39  ;;  %5675 = vmatpush.msra.mxu2 %v5133_v1  ;;  %v5440_v60 = vld [vmem:[%s13753_s5 + $0xa40] sm:$0xff]  ;;  %v5361_v49 = vld [vmem:[%s13753_s5 + $0x7c8] sm:$0xff] }
 0x767   : > { %5659 = vmatpush.msrb.mxu0 %v5500_v24  ;;  %5614 = vmatpush.msrb.mxu1 %v5392_v6  ;;  %v5388_v61 = vld [vmem:[%s13753_s5 + $0x8a0] sm:$0xff]  ;;  %v5425_v11 = vld [vmem:[%s13753_s5 + $0x9c8] sm:$0xff] }
 0x768   : > { %5676 = vmatpush.msra.mxu2 %v5129_v41  ;;  %5638 = vmatpush.msra.mxu3 %v5440_v60  ;;  %v5436_v26 = vld [vmem:[%s13753_s5 + $0xa20] sm:$0xff]  ;;  %v5209_v57 = vld [vmem:[%s13753_s5 + $0x308] sm:$0xff] }
 0x769   : > { %5660 = vmatpush.msrb.mxu0 %v5496_v23  ;;  %5615 = vmatpush.msrb.mxu1 %v5388_v61  ;;  %v5384_v54 = vld [vmem:[%s13753_s5 + $0x880] sm:$0xff]  ;;  %v5257_v10 = vld [vmem:[%s13753_s5 + $0x488] sm:$0xff] }
 0x76a   : > { %5677 = vmatpush.msra.mxu2 %v5125_v27  ;;  %5639 = vmatpush.msra.mxu3 %v5436_v26  ;;  %v5432_v32 = vld [vmem:[%s13753_s5 + $0xa00] sm:$0xff]  ;;  %v5357_v29 = vld [vmem:[%s13753_s5 + $0x7a8] sm:$0xff] }
 0x76b   : > { %5616 = vmatpush.msrb.mxu1 %v5384_v54  ;;  %v5380_v58 = vld [vmem:[%s13753_s5 + $0x860] sm:$0xff]  ;;  %v5421_v15 = vld [vmem:[%s13753_s5 + $0x9a8] sm:$0xff] }
 0x76c   : > { %5678 = vmatpush.msra.mxu2 %v5121_v19  ;;  %5640 = vmatpush.msra.mxu3 %v5432_v32  ;;  %v5376_v18 = vld [vmem:[%s13753_s5 + $0x840] sm:$0xff]  ;;  %v5205_v20 = vld [vmem:[%s13753_s5 + $0x2e8] sm:$0xff] }
 0x76d   : > { %5617 = vmatpush.msrb.mxu1 %v5380_v58  ;;  %v5372_v45 = vld [vmem:[%s13753_s5 + $0x820] sm:$0xff]  ;;  %v5253_v35 = vld [vmem:[%s13753_s5 + $0x468] sm:$0xff] }
 0x76e   : > { %5679 = vmatpush.msra.mxu2 %v5117_v55  ;;  %5705 = vmatpush.msrb.mxu3 %v5301_v16  ;;  %v5368_v9 = vld [vmem:[%s13753_s5 + $0x800] sm:$0xff]  ;;  %v5353_v63 = vld [vmem:[%s13753_s5 + $0x788] sm:$0xff] }
 0x76f   : > { %5618 = vmatpush.msrb.mxu1 %v5376_v18  ;;  %v5201_v56 = vld [vmem:[%s13753_s5 + $0x2c8] sm:$0xff] }
 0x770   : > { %5680 = vmatpush.msra.mxu2 %v5113_v2  ;;  %5706 = vmatpush.msrb.mxu3 %v5297_v51  ;;  %v5249_v7 = vld [vmem:[%s13753_s5 + $0x448] sm:$0xff] }
 0x771   : > { %5619 = vmatpush.msrb.mxu1 %v5372_v45  ;;  %v5349_v17 = vld [vmem:[%s13753_s5 + $0x768] sm:$0xff] }
 0x772   : > { %5707 = vmatpush.msrb.mxu3 %v5293_v34  ;;  %v5413_v1 = vld [vmem:[%s13753_s5 + $0x968] sm:$0xff] }
 0x773   : > { %5620 = vmatpush.msrb.mxu1 %v5368_v9  ;;  %v5197_v22 = vld [vmem:[%s13753_s5 + $0x2a8] sm:$0xff] }
 0x774   : > { %5708 = vmatpush.msrb.mxu3 %v5289_v59  ;;  %v5245_v41 = vld [vmem:[%s13753_s5 + $0x428] sm:$0xff] }
 0x775   : > { %5685 = vmatpush.msra.mxu1 %v5237_v40  ;;  %v5345_v24 = vld [vmem:[%s13753_s5 + $0x748] sm:$0xff] }
 0x776   : > { %5709 = vmatpush.msrb.mxu3 %v5285_v4  ;;  %v5409_v27 = vld [vmem:[%s13753_s5 + $0x948] sm:$0xff] }
 0x777   : > { %5686 = vmatpush.msra.mxu1 %v5233_v53  ;;  %v5193_v19 = vld [vmem:[%s13753_s5 + $0x288] sm:$0xff]  ;;  %v5302_v53 = vld [vmem:[%s13753_s5 + $0x5f0] sm:$0xff] }
 0x778   : > { %5710 = vmatpush.msrb.mxu3 %v5281_v62  ;;  %v5241_v55 = vld [vmem:[%s13753_s5 + $0x408] sm:$0xff]  ;;  %v5174_v62 = vld [vmem:[%s13753_s5 + $0x1f0] sm:$0xff] }
 0x779   : > { %5687 = vmatpush.msra.mxu1 %v5229_v14  ;;  %v5341_v0 = vld [vmem:[%s13753_s5 + $0x728] sm:$0xff] }
 0x77a   : > { %5711 = vmatpush.msrb.mxu3 %v5277_v33  ;;  %v5405_v42 = vld [vmem:[%s13753_s5 + $0x928] sm:$0xff]  ;;  %v5298_v33 = vld [vmem:[%s13753_s5 + $0x5d0] sm:$0xff] }
 0x77b   : > { %5688 = vmatpush.msra.mxu1 %v5225_v28  ;;  %v5189_v23 = vld [vmem:[%s13753_s5 + $0x268] sm:$0xff]  ;;  %v5170_v28 = vld [vmem:[%s13753_s5 + $0x1d0] sm:$0xff] }
 0x77c   : > { %5712 = vmatpush.msrb.mxu3 %v5273_v13  ;;  %v5337_v2 = vld [vmem:[%s13753_s5 + $0x708] sm:$0xff]  ;;  %v5294_v13 = vld [vmem:[%s13753_s5 + $0x5b0] sm:$0xff] }
 0x77d   : > { %5689 = vmatpush.msra.mxu1 %v5221_v31  ;;  %v5401_v36 = vld [vmem:[%s13753_s5 + $0x908] sm:$0xff]  ;;  %v5166_v31 = vld [vmem:[%s13753_s5 + $0x1b0] sm:$0xff] }
 0x77e   : > { %5713 = vmatpush.msrb.mxu3 %v5269_v47  ;;  %v5185_v5 = vld [vmem:[%s13753_s5 + $0x248] sm:$0xff]  ;;  %v5290_v47 = vld [vmem:[%s13753_s5 + $0x590] sm:$0xff] }
 0x77f   : > { %5690 = vmatpush.msra.mxu1 %v5217_v3  ;;  %v5333_v38 = vld [vmem:[%s13753_s5 + $0x6e8] sm:$0xff]  ;;  %v5162_v3 = vld [vmem:[%s13753_s5 + $0x190] sm:$0xff] }
 0x780   : > { %5714 = vmatpush.msrb.mxu3 %v5265_v8  ;;  %v5397_v30 = vld [vmem:[%s13753_s5 + $0x8e8] sm:$0xff]  ;;  %v5286_v8 = vld [vmem:[%s13753_s5 + $0x570] sm:$0xff] }
 0x781   : > { %5691 = vmatpush.msra.mxu1 %v5213_v52  ;;  %v5181_v6 = vld [vmem:[%s13753_s5 + $0x228] sm:$0xff] }
 0x782   : > { %5715 = vmatpush.msrb.mxu3 %v5261_v48  ;;  %v5329_v60 = vld [vmem:[%s13753_s5 + $0x6c8] sm:$0xff]  ;;  %v5282_v48 = vld [vmem:[%s13753_s5 + $0x550] sm:$0xff] }
 0x783   : > { %5692 = vmatpush.msra.mxu1 %v5209_v57  ;;  %v5393_v61 = vld [vmem:[%s13753_s5 + $0x8c8] sm:$0xff]  ;;  %v5278_v57 = vld [vmem:[%s13753_s5 + $0x530] sm:$0xff] }
 0x784   : > { %5716 = vmatpush.msrb.mxu3 %v5257_v10  ;;  %v5177_v26 = vld [vmem:[%s13753_s5 + $0x208] sm:$0xff]  ;;  %v5150_v10 = vld [vmem:[%s13753_s5 + $0x130] sm:$0xff] }
 0x785   : > { %5693 = vmatpush.msra.mxu1 %v5205_v20  ;;  %v5325_v54 = vld [vmem:[%s13753_s5 + $0x6a8] sm:$0xff]  ;;  %v5146_v20 = vld [vmem:[%s13753_s5 + $0x110] sm:$0xff] }
 0x786   : > { %5717 = vmatpush.msrb.mxu3 %v5253_v35  ;;  %v5389_v32 = vld [vmem:[%s13753_s5 + $0x8a8] sm:$0xff] }
 0x787   : > { %5694 = vmatpush.msra.mxu1 %v5201_v56  ;;  %v5321_v16 = vld [vmem:[%s13753_s5 + $0x688] sm:$0xff]  ;;  %v5142_v56 = vld [vmem:[%s13753_s5 + $0xf0] sm:$0xff] }
 0x788   : > { %5718 = vmatpush.msrb.mxu3 %v5249_v7  ;;  %v5385_v58 = vld [vmem:[%s13753_s5 + $0x888] sm:$0xff] }
 0x789   : > { %5695 = vmatpush.msra.mxu1 %v5197_v22  ;;  %v5317_v51 = vld [vmem:[%s13753_s5 + $0x668] sm:$0xff] }
 0x78a   : > { %5719 = vmatpush.msrb.mxu3 %v5245_v41  ;;  %v5381_v18 = vld [vmem:[%s13753_s5 + $0x868] sm:$0xff]  ;;  %v5266_v41 = vld [vmem:[%s13753_s5 + $0x4d0] sm:$0xff] }
 0x78b   : > { %5696 = vmatpush.msra.mxu1 %v5193_v19  ;;  %v5313_v34 = vld [vmem:[%s13753_s5 + $0x648] sm:$0xff]  ;;  %v5134_v19 = vld [vmem:[%s13753_s5 + $0xb0] sm:$0xff] }
 0x78c   : > { %5720 = vmatpush.msrb.mxu3 %v5241_v55  ;;  %v5377_v45 = vld [vmem:[%s13753_s5 + $0x848] sm:$0xff]  ;;  %v5262_v55 = vld [vmem:[%s13753_s5 + $0x4b0] sm:$0xff] }
 0x78d   : > { %5697 = vmatpush.msra.mxu1 %v5189_v23  ;;  %v5309_v59 = vld [vmem:[%s13753_s5 + $0x628] sm:$0xff]  ;;  %v5130_v23 = vld [vmem:[%s13753_s5 + $0x90] sm:$0xff] }
 0x78e   : > { %v5084_v21 = vpop.permute.xlu2 %5083  ;;  %v5373_v9 = vld [vmem:[%s13753_s5 + $0x828] sm:$0xff] }
 0x78f   : > { %v12666_v44 = vsel %vm5085_vm11, %v12517_v37, %v5084_v21  ;;  %v12670_v12 = vsel %vm2144_vm6, %v5084_v21, %v12656_v43  ;;  %v5417_v37 = vld [vmem:[%s13753_s5 + $0x988] sm:$0xff]  ;;  %5698 = vmatpush.msra.mxu1 %v5185_v5  ;;  %v5158_v21 = vld [vmem:[%s13753_s5 + $0x170] sm:$0xff] }
 0x790   : > { %5581 = vmatmul.f32.vlgmr.msra.gmra.mxu0 %v12666_v44  ;;  %5601 = vmatmul.f32.vlgmr.msrb.gmra.mxu2 %v12670_v12  ;;  %v5305_v40 = vld [vmem:[%s13753_s5 + $0x608] sm:$0xff] }
 0x791   : > { %5725 = vmatpush.msra.mxu0 %v5365_v25  ;;  %5745 = vmatpush.msrb.mxu2 %v5429_v46  ;;  %v5369_v4 = vld [vmem:[%s13753_s5 + $0x808] sm:$0xff] }
 0x792   : > { %5699 = vmatpush.msra.mxu1 %v5181_v6  ;;  %v5509_v46 = vld [vmem:[%s13753_s5 + $0xc68] sm:$0xff]  ;;  %v5222_v6 = vld [vmem:[%s13753_s5 + $0x370] sm:$0xff] }
 0x793   : > { %5726 = vmatpush.msra.mxu0 %v5361_v49  ;;  %5746 = vmatpush.msrb.mxu2 %v5425_v11  ;;  %v5154_v49 = vld [vmem:[%s13753_s5 + $0x150] sm:$0xff]  ;;  %v5505_v11 = vld [vmem:[%s13753_s5 + $0xc48] sm:$0xff] }
 0x794   : > { %5700 = vmatpush.msra.mxu1 %v5177_v26  ;;  %v5497_v35 = vld [vmem:[%s13753_s5 + $0xc08] sm:$0xff]  ;;  %v5250_v26 = vld [vmem:[%s13753_s5 + $0x450] sm:$0xff] }
 0x795   : > { %5727 = vmatpush.msra.mxu0 %v5357_v29  ;;  %5747 = vmatpush.msrb.mxu2 %v5421_v15  ;;  %v5501_v29 = vld [vmem:[%s13753_s5 + $0xc28] sm:$0xff]  ;;  %v5274_v15 = vld [vmem:[%s13753_s5 + $0x510] sm:$0xff] }
 0x796   : > { %v5493_v22 = vld [vmem:[%s13753_s5 + $0xbe8] sm:$0xff] }
 0x797   : > { %5728 = vmatpush.msra.mxu0 %v5353_v63  ;;  %5748 = vmatpush.msrb.mxu2 %v5417_v37  ;;  %v5270_v63 = vld [vmem:[%s13753_s5 + $0x4f0] sm:$0xff]  ;;  %v5481_v5 = vld [vmem:[%s13753_s5 + $0xb88] sm:$0xff] }
 0x798   : > { %5681 = vmatmul.f32.vlgmr.msra.gmra.mxu2 %v12473_v50 }
 0x799   : > { %5729 = vmatpush.msra.mxu0 %v5349_v17  ;;  %5749 = vmatpush.msrb.mxu2 %v5413_v1  ;;  %v5238_v17 = vld [vmem:[%s13753_s5 + $0x3f0] sm:$0xff] }
 0x79b   : > { %5730 = vmatpush.msra.mxu0 %v5345_v24  ;;  %5750 = vmatpush.msrb.mxu2 %v5409_v27  ;;  %v5234_v24 = vld [vmem:[%s13753_s5 + $0x3d0] sm:$0xff]  ;;  %v5489_v27 = vld [vmem:[%s13753_s5 + $0xbc8] sm:$0xff] }
 0x79d   : > { %5731 = vmatpush.msra.mxu0 %v5341_v0  ;;  %5751 = vmatpush.msrb.mxu2 %v5405_v42  ;;  %v5230_v0 = vld [vmem:[%s13753_s5 + $0x3b0] sm:$0xff]  ;;  %v5485_v42 = vld [vmem:[%s13753_s5 + $0xba8] sm:$0xff] }
 0x79f   : > { %5732 = vmatpush.msra.mxu0 %v5337_v2  ;;  %5752 = vmatpush.msrb.mxu2 %v5401_v36  ;;  %v5258_v2 = vld [vmem:[%s13753_s5 + $0x490] sm:$0xff] }
 0x7a0   : > { %v5226_v36 = vld [vmem:[%s13753_s5 + $0x390] sm:$0xff] }
 0x7a1   : > { %5733 = vmatpush.msra.mxu0 %v5333_v38  ;;  %5753 = vmatpush.msrb.mxu2 %v5397_v30  ;;  %v5126_v38 = vld [vmem:[%s13753_s5 + $0x70] sm:$0xff] }
 0x7a2   : > { %v5254_v30 = vld [vmem:[%s13753_s5 + $0x470] sm:$0xff] }
 0x7a3   : > { %5734 = vmatpush.msra.mxu0 %v5329_v60  ;;  %5754 = vmatpush.msrb.mxu2 %v5393_v61  ;;  %v5477_v60 = vld [vmem:[%s13753_s5 + $0xb68] sm:$0xff]  ;;  %v5122_v61 = vld [vmem:[%s13753_s5 + $0x50] sm:$0xff] }
 0x7a5   : > { %5735 = vmatpush.msra.mxu0 %v5325_v54  ;;  %5755 = vmatpush.msrb.mxu2 %v5389_v32  ;;  %v5218_v54 = vld [vmem:[%s13753_s5 + $0x350] sm:$0xff]  ;;  %v5473_v32 = vld [vmem:[%s13753_s5 + $0xb48] sm:$0xff] }
 0x7a7   : > { %5736 = vmatpush.msra.mxu0 %v5321_v16  ;;  %5756 = vmatpush.msrb.mxu2 %v5385_v58  ;;  %v5118_v16 = vld [vmem:[%s13753_s5 + $0x30] sm:$0xff] }
 0x7a8   : > { %v5246_v58 = vld [vmem:[%s13753_s5 + $0x430] sm:$0xff] }
 0x7a9   : > { %5737 = vmatpush.msra.mxu0 %v5317_v51  ;;  %5757 = vmatpush.msrb.mxu2 %v5381_v18  ;;  %v5214_v51 = vld [vmem:[%s13753_s5 + $0x330] sm:$0xff]  ;;  %v5469_v18 = vld [vmem:[%s13753_s5 + $0xb28] sm:$0xff] }
 0x7ab   : > { %5738 = vmatpush.msra.mxu0 %v5313_v34  ;;  %5758 = vmatpush.msrb.mxu2 %v5377_v45  ;;  %v5114_v34 = vld [vmem:[%s13753_s5 + $0x10] sm:$0xff] }
 0x7ac   : > { %v5242_v45 = vld [vmem:[%s13753_s5 + $0x410] sm:$0xff] }
 0x7ad   : > { %5739 = vmatpush.msra.mxu0 %v5309_v59  ;;  %5759 = vmatpush.msrb.mxu2 %v5373_v9  ;;  %v5210_v59 = vld [vmem:[%s13753_s5 + $0x310] sm:$0xff] }
 0x7ae   : > { %v5430_v9 = vld [vmem:[%s13753_s5 + $0x9f0] sm:$0xff] }
 0x7af   : > { %5740 = vmatpush.msra.mxu0 %v5305_v40  ;;  %5760 = vmatpush.msrb.mxu2 %v5369_v4  ;;  %v12816_v14 = vpop.permute.xlu2 %5103  ;;  %v5510_v40 = vld [vmem:[%s13753_s5 + $0xc70] sm:$0xff]  ;;  %v5465_v4 = vld [vmem:[%s13753_s5 + $0xb08] sm:$0xff] }
 0x7b0   : > { %6572 = vmatmul.msk.f32.vlgmr.msrb.gmra.mxu0 %vm5522_vm12, %v12816_v14 }
 0x7b1   : > { %5845 = vmatpush.msra.mxu2 %v5302_v53  ;;  %5805 = vmatpush.msrb.mxu0 %v5174_v62  ;;  %v5206_v53 = vld [vmem:[%s13753_s5 + $0x2f0] sm:$0xff] }
 0x7b2   : > { %v5426_v62 = vld [vmem:[%s13753_s5 + $0x9d0] sm:$0xff] }
 0x7b3   : > { %5846 = vmatpush.msra.mxu2 %v5298_v33  ;;  %5806 = vmatpush.msrb.mxu0 %v5170_v28  ;;  %v5506_v33 = vld [vmem:[%s13753_s5 + $0xc50] sm:$0xff]  ;;  %v5461_v28 = vld [vmem:[%s13753_s5 + $0xae8] sm:$0xff] }
 0x7b5   : > { %5847 = vmatpush.msra.mxu2 %v5294_v13  ;;  %5807 = vmatpush.msrb.mxu0 %v5166_v31  ;;  %v5202_v13 = vld [vmem:[%s13753_s5 + $0x2d0] sm:$0xff] }
 0x7b6   : > { %v5102_v52 = vpop.permute.xlu1 %5101  ;;  %v5422_v31 = vld [vmem:[%s13753_s5 + $0x9b0] sm:$0xff] }
 0x7b7   : > { %5848 = vmatpush.msra.mxu2 %v5290_v47  ;;  %5808 = vmatpush.msrb.mxu0 %v5162_v3  ;;  %v12846_v25 = vsel %vm5105_vm13, %v5102_v52, %v12816_v14  ;;  %v5502_v47 = vld [vmem:[%s13753_s5 + $0xc30] sm:$0xff]  ;;  %v5457_v3 = vld [vmem:[%s13753_s5 + $0xac8] sm:$0xff] }
 0x7b8   : > { %5741 = vmatmul.f32.vlgmr.msra.gmra.mxu0 %v12670_v12  ;;  %5641 = vmatmul.f32.vlgmr.msra.gmra.mxu3 %v12846_v25 }
 0x7b9   : > { %5849 = vmatpush.msra.mxu2 %v5286_v8  ;;  %5809 = vmatpush.msrb.mxu0 %v5158_v21  ;;  %v5198_v8 = vld [vmem:[%s13753_s5 + $0x2b0] sm:$0xff] }
 0x7ba   : > { %5797 = vmatpush.msra.mxu3 %v5509_v46  ;;  %v5498_v21 = vld [vmem:[%s13753_s5 + $0xc10] sm:$0xff]  ;;  %v5453_v46 = vld [vmem:[%s13753_s5 + $0xaa8] sm:$0xff] }
 0x7bb   : > { %5850 = vmatpush.msra.mxu2 %v5282_v48  ;;  %5810 = vmatpush.msrb.mxu0 %v5154_v49  ;;  %v5303_v48 = vld [vmem:[%s13753_s5 + $0x5f8] sm:$0xff]  ;;  %v5194_v49 = vld [vmem:[%s13753_s5 + $0x290] sm:$0xff] }
 0x7bc   : > { %5798 = vmatpush.msra.mxu3 %v5505_v11  ;;  %v5414_v11 = vld [vmem:[%s13753_s5 + $0x970] sm:$0xff] }
 0x7bd   : > { %5851 = vmatpush.msra.mxu2 %v5278_v57  ;;  %5811 = vmatpush.msrb.mxu0 %v5150_v10  ;;  %v5449_v57 = vld [vmem:[%s13753_s5 + $0xa88] sm:$0xff]  ;;  %v5299_v10 = vld [vmem:[%s13753_s5 + $0x5d8] sm:$0xff] }
 0x7be   : > { %5799 = vmatpush.msra.mxu3 %v5501_v29  ;;  %v5095_v37 = vpop.permute.xlu0 %5094  ;;  %v5190_v29 = vld [vmem:[%s13753_s5 + $0x270] sm:$0xff] }
 0x7bf   : > { %5852 = vmatpush.msra.mxu2 %v5274_v15  ;;  %5812 = vmatpush.msrb.mxu0 %v5146_v20  ;;  %v5096_v7 = vsel %vm2144_vm6, %v12656_v43, %v5095_v37  ;;  %v5138_v43 = vld [vmem:[%s13753_s5 + $0xd0] sm:$0xff]  ;;  %v5445_v20 = vld [vmem:[%s13753_s5 + $0xa68] sm:$0xff] }
 0x7c0   : > { %v12892_v1 = vsel %vm5105_vm13, %v5096_v7, %v5102_v52  ;;  %5800 = vmatpush.msra.mxu3 %v5497_v35  ;;  %v5418_v52 = vld [vmem:[%s13753_s5 + $0x990] sm:$0xff]  ;;  %v5295_v35 = vld [vmem:[%s13753_s5 + $0x5b8] sm:$0xff] }
 0x7c1   : > { %5853 = vmatpush.msra.mxu2 %v5270_v63  ;;  %5813 = vmatpush.msrb.mxu0 %v5142_v56  ;;  %v5410_v15 = vld [vmem:[%s13753_s5 + $0x950] sm:$0xff]  ;;  %v5441_v56 = vld [vmem:[%s13753_s5 + $0xa48] sm:$0xff]  ;;  %v5291_v7 = vld [vmem:[%s13753_s5 + $0x598] sm:$0xff] }
 0x7c2   : > { %5721 = vmatmul.f32.vlgmr.msrb.gmra.mxu3 %v12666_v44  ;;  %5621 = vmatmul.f32.vlgmr.msrb.gmra.mxu1 %v12892_v1  ;;  %v5186_v63 = vld [vmem:[%s13753_s5 + $0x250] sm:$0xff] }
 0x7c3   : > { %5825 = vmatpush.msrb.mxu3 %v5238_v17  ;;  %5761 = vmatmul.f32.vlgmr.msrb.gmra.mxu2 %v12892_v1  ;;  %v5406_v37 = vld [vmem:[%s13753_s5 + $0x930] sm:$0xff] }
 0x7c4   : > { %5765 = vmatpush.msrb.mxu1 %v5493_v22  ;;  %5814 = vmatpush.msrb.mxu0 %v5138_v43  ;;  %v5182_v17 = vld [vmem:[%s13753_s5 + $0x230] sm:$0xff]  ;;  %v5437_v43 = vld [vmem:[%s13753_s5 + $0xa28] sm:$0xff] }
 0x7c5   : > { %5854 = vmatpush.msra.mxu2 %v5266_v41  ;;  %5826 = vmatpush.msrb.mxu3 %v5234_v24  ;;  %v5402_v22 = vld [vmem:[%s13753_s5 + $0x910] sm:$0xff]  ;;  %v5287_v41 = vld [vmem:[%s13753_s5 + $0x578] sm:$0xff] }
 0x7c6   : > { %5766 = vmatpush.msrb.mxu1 %v5489_v27  ;;  %5815 = vmatpush.msrb.mxu0 %v5134_v19  ;;  %v5178_v24 = vld [vmem:[%s13753_s5 + $0x210] sm:$0xff]  ;;  %v5433_v19 = vld [vmem:[%s13753_s5 + $0xa08] sm:$0xff] }
 0x7c7   : > { %5855 = vmatpush.msra.mxu2 %v5262_v55  ;;  %5827 = vmatpush.msrb.mxu3 %v5230_v0  ;;  %v5398_v27 = vld [vmem:[%s13753_s5 + $0x8f0] sm:$0xff]  ;;  %v5283_v0 = vld [vmem:[%s13753_s5 + $0x558] sm:$0xff] }
 0x7c8   : > { %5767 = vmatpush.msrb.mxu1 %v5485_v42  ;;  %5816 = vmatpush.msrb.mxu0 %v5130_v23  ;;  %v5494_v55 = vld [vmem:[%s13753_s5 + $0xbf0] sm:$0xff] }
 0x7c9   : > { %5856 = vmatpush.msra.mxu2 %v5258_v2  ;;  %5828 = vmatpush.msrb.mxu3 %v5226_v36  ;;  %v5394_v42 = vld [vmem:[%s13753_s5 + $0x8d0] sm:$0xff]  ;;  %v5279_v36 = vld [vmem:[%s13753_s5 + $0x538] sm:$0xff] }
 0x7ca   : > { %5768 = vmatpush.msrb.mxu1 %v5481_v5  ;;  %5817 = vmatpush.msrb.mxu0 %v5126_v38  ;;  %v5366_v23 = vld [vmem:[%s13753_s5 + $0x7f0] sm:$0xff] }
 0x7cb   : > { %5857 = vmatpush.msra.mxu2 %v5254_v30  ;;  %6573 = vmatmul.msk.f32.vlgmr.msra.gmra.mxu3 %vm5522_vm12, %v12816_v14  ;;  %v5490_v2 = vld [vmem:[%s13753_s5 + $0xbd0] sm:$0xff] }
 0x7cc   : > { %5701 = vmatmul.f32.vlgmr.msra.gmra.mxu1 %v12527_v39  ;;  %5829 = vmatpush.msrb.mxu3 %v5222_v6  ;;  %v5390_v5 = vld [vmem:[%s13753_s5 + $0x8b0] sm:$0xff]  ;;  %v5275_v6 = vld [vmem:[%s13753_s5 + $0x518] sm:$0xff] }
 0x7cd   : > { %5769 = vmatpush.msrb.mxu1 %v5477_v60  ;;  %5818 = vmatpush.msrb.mxu0 %v5122_v61  ;;  %v5362_v38 = vld [vmem:[%s13753_s5 + $0x7d0] sm:$0xff] }
 0x7ce   : > { %5858 = vmatpush.msra.mxu2 %v5250_v26  ;;  %5830 = vmatpush.msrb.mxu3 %v5218_v54  ;;  %v5486_v30 = vld [vmem:[%s13753_s5 + $0xbb0] sm:$0xff]  ;;  %v5271_v54 = vld [vmem:[%s13753_s5 + $0x4f8] sm:$0xff] }
 0x7cf   : > { %5770 = vmatpush.msrb.mxu1 %v5473_v32  ;;  %5819 = vmatpush.msrb.mxu0 %v5118_v16  ;;  %v5386_v60 = vld [vmem:[%s13753_s5 + $0x890] sm:$0xff] }
 0x7d0   : > { %5859 = vmatpush.msra.mxu2 %v5246_v58  ;;  %5831 = vmatpush.msrb.mxu3 %v5214_v51  ;;  %v5358_v61 = vld [vmem:[%s13753_s5 + $0x7b0] sm:$0xff]  ;;  %v5267_v51 = vld [vmem:[%s13753_s5 + $0x4d8] sm:$0xff] }
 0x7d1   : > { %5771 = vmatpush.msrb.mxu1 %v5469_v18  ;;  %5820 = vmatpush.msrb.mxu0 %v5114_v34  ;;  %v5482_v26 = vld [vmem:[%s13753_s5 + $0xb90] sm:$0xff] }
 0x7d2   : > { %5860 = vmatpush.msra.mxu2 %v5242_v45  ;;  %5821 = vmatmul.f32.vlgmr.msrb.gmra.mxu0 %v12473_v50  ;;  %v5382_v32 = vld [vmem:[%s13753_s5 + $0x870] sm:$0xff] }
 0x7d3   : > { %5832 = vmatpush.msrb.mxu3 %v5210_v59  ;;  %5861 = vmatmul.f32.vlgmr.msra.gmra.mxu2 %v12666_v44  ;;  %v5354_v16 = vld [vmem:[%s13753_s5 + $0x790] sm:$0xff]  ;;  %v5263_v59 = vld [vmem:[%s13753_s5 + $0x4b8] sm:$0xff] }
 0x7d4   : > { %5885 = vmatpush.msra.mxu0 %v5430_v9  ;;  %5937 = vmatpush.msrb.mxu2 %v5510_v40  ;;  %v5478_v58 = vld [vmem:[%s13753_s5 + $0xb70] sm:$0xff] }
 0x7d5   : > { %5772 = vmatpush.msrb.mxu1 %v5465_v4  ;;  %5833 = vmatpush.msrb.mxu3 %v5206_v53  ;;  %v5378_v18 = vld [vmem:[%s13753_s5 + $0x850] sm:$0xff]  ;;  %v5259_v53 = vld [vmem:[%s13753_s5 + $0x498] sm:$0xff] }
 0x7d6   : > { %5886 = vmatpush.msra.mxu0 %v5426_v62  ;;  %5938 = vmatpush.msrb.mxu2 %v5506_v33  ;;  %v5350_v34 = vld [vmem:[%s13753_s5 + $0x770] sm:$0xff] }
 0x7d7   : > { %5773 = vmatpush.msrb.mxu1 %v5461_v28  ;;  %5834 = vmatpush.msrb.mxu3 %v5202_v13  ;;  %v5474_v45 = vld [vmem:[%s13753_s5 + $0xb50] sm:$0xff]  ;;  %v5239_v13 = vld [vmem:[%s13753_s5 + $0x3f8] sm:$0xff] }
 0x7d8   : > { %5887 = vmatpush.msra.mxu0 %v5422_v31  ;;  %5939 = vmatpush.msrb.mxu2 %v5502_v47  ;;  %v5374_v9 = vld [vmem:[%s13753_s5 + $0x830] sm:$0xff]  ;;  %v5255_v31 = vld [vmem:[%s13753_s5 + $0x478] sm:$0xff] }
 0x7d9   : > { %5774 = vmatpush.msrb.mxu1 %v5457_v3  ;;  %5835 = vmatpush.msrb.mxu3 %v5198_v8  ;;  %v5346_v40 = vld [vmem:[%s13753_s5 + $0x750] sm:$0xff]  ;;  %v5235_v8 = vld [vmem:[%s13753_s5 + $0x3d8] sm:$0xff] }
 0x7da   : > { %5888 = vmatpush.msra.mxu0 %v5418_v52  ;;  %5940 = vmatpush.msrb.mxu2 %v5498_v21  ;;  %v5470_v4 = vld [vmem:[%s13753_s5 + $0xb30] sm:$0xff]  ;;  %v5251_v52 = vld [vmem:[%s13753_s5 + $0x458] sm:$0xff] }
 0x7db   : > { %5775 = vmatpush.msrb.mxu1 %v5453_v46  ;;  %5836 = vmatpush.msrb.mxu3 %v5194_v49  ;;  %v5370_v62 = vld [vmem:[%s13753_s5 + $0x810] sm:$0xff]  ;;  %v5247_v49 = vld [vmem:[%s13753_s5 + $0x438] sm:$0xff] }
 0x7dc   : > { %5985 = vmatpush.msra.mxu2 %v5303_v48  ;;  %5889 = vmatpush.msra.mxu0 %v5414_v11  ;;  %v5342_v33 = vld [vmem:[%s13753_s5 + $0x730] sm:$0xff]  ;;  %v5231_v48 = vld [vmem:[%s13753_s5 + $0x3b8] sm:$0xff] }
 0x7dd   : > { %6574 = vmatmul.msk.f32.vlgmr.msrb.gmra.mxu2 %vm5522_vm12, %v12816_v14  ;;  %5776 = vmatpush.msrb.mxu1 %v5449_v57  ;;  %v5466_v28 = vld [vmem:[%s13753_s5 + $0xb10] sm:$0xff] }
 0x7de   : > { %5986 = vmatpush.msra.mxu2 %v5299_v10  ;;  %5837 = vmatpush.msrb.mxu3 %v5190_v29  ;;  %v5338_v47 = vld [vmem:[%s13753_s5 + $0x710] sm:$0xff]  ;;  %v5227_v10 = vld [vmem:[%s13753_s5 + $0x398] sm:$0xff] }
 0x7df   : > { %5890 = vmatpush.msra.mxu0 %v5410_v15  ;;  %5777 = vmatpush.msrb.mxu1 %v5445_v20  ;;  %v5462_v3 = vld [vmem:[%s13753_s5 + $0xaf0] sm:$0xff]  ;;  %v5243_v29 = vld [vmem:[%s13753_s5 + $0x418] sm:$0xff] }
 0x7e0   : > { %5987 = vmatpush.msra.mxu2 %v5295_v35  ;;  %5838 = vmatpush.msrb.mxu3 %v5186_v63  ;;  %v5334_v21 = vld [vmem:[%s13753_s5 + $0x6f0] sm:$0xff]  ;;  %v5223_v35 = vld [vmem:[%s13753_s5 + $0x378] sm:$0xff] }
 0x7e1   : > { %5891 = vmatpush.msra.mxu0 %v5406_v37  ;;  %5778 = vmatpush.msrb.mxu1 %v5441_v56  ;;  %v5458_v46 = vld [vmem:[%s13753_s5 + $0xad0] sm:$0xff]  ;;  %v5511_v63 = vld [vmem:[%s13753_s5 + $0xc78] sm:$0xff] }
 0x7e2   : > { %5988 = vmatpush.msra.mxu2 %v5291_v7  ;;  %5839 = vmatpush.msrb.mxu3 %v5182_v17  ;;  %v5330_v11 = vld [vmem:[%s13753_s5 + $0x6d0] sm:$0xff]  ;;  %v5219_v7 = vld [vmem:[%s13753_s5 + $0x358] sm:$0xff] }
 0x7e3   : > { %5892 = vmatpush.msra.mxu0 %v5402_v22  ;;  %5779 = vmatpush.msrb.mxu1 %v5437_v43  ;;  %v5454_v57 = vld [vmem:[%s13753_s5 + $0xab0] sm:$0xff]  ;;  %v5507_v17 = vld [vmem:[%s13753_s5 + $0xc58] sm:$0xff] }
 0x7e4   : > { %5989 = vmatpush.msra.mxu2 %v5287_v41  ;;  %5840 = vmatpush.msrb.mxu3 %v5178_v24  ;;  %v5326_v15 = vld [vmem:[%s13753_s5 + $0x6b0] sm:$0xff]  ;;  %v5503_v41 = vld [vmem:[%s13753_s5 + $0xc38] sm:$0xff] }
 0x7e5   : > { %5893 = vmatpush.msra.mxu0 %v5398_v27  ;;  %5780 = vmatpush.msrb.mxu1 %v5433_v19  ;;  %v5450_v20 = vld [vmem:[%s13753_s5 + $0xa90] sm:$0xff]  ;;  %v5211_v19 = vld [vmem:[%s13753_s5 + $0x318] sm:$0xff] }
 0x7e6   : > { %5841 = vmatmul.f32.vlgmr.msrb.gmra.mxu3 %v12527_v39  ;;  %5990 = vmatpush.msra.mxu2 %v5283_v0  ;;  %v5322_v37 = vld [vmem:[%s13753_s5 + $0x690] sm:$0xff] }
 0x7e7   : > { %5905 = vmatpush.msra.mxu3 %v5494_v55  ;;  %5781 = vmatmul.f32.vlgmr.msrb.gmra.mxu1 %v12846_v25  ;;  %v5446_v56 = vld [vmem:[%s13753_s5 + $0xa70] sm:$0xff]  ;;  %v5499_v55 = vld [vmem:[%s13753_s5 + $0xc18] sm:$0xff] }
 0x7e8   : > { %5894 = vmatpush.msra.mxu0 %v5394_v42  ;;  %5865 = vmatpush.msra.mxu1 %v5366_v23  ;;  %v5318_v22 = vld [vmem:[%s13753_s5 + $0x670] sm:$0xff]  ;;  %v5207_v23 = vld [vmem:[%s13753_s5 + $0x2f8] sm:$0xff] }
 0x7e9   : > { %5906 = vmatpush.msra.mxu3 %v5490_v2  ;;  %5991 = vmatpush.msra.mxu2 %v5279_v36  ;;  %v5442_v43 = vld [vmem:[%s13753_s5 + $0xa50] sm:$0xff]  ;;  %v5367_v36 = vld [vmem:[%s13753_s5 + $0x7f8] sm:$0xff] }
 0x7ea   : > { %5895 = vmatpush.msra.mxu0 %v5390_v5  ;;  %5866 = vmatpush.msra.mxu1 %v5362_v38  ;;  %v5314_v24 = vld [vmem:[%s13753_s5 + $0x650] sm:$0xff]  ;;  %v5175_v5 = vld [vmem:[%s13753_s5 + $0x1f8] sm:$0xff] }
 0x7eb   : > { %5907 = vmatpush.msra.mxu3 %v5486_v30  ;;  %5992 = vmatpush.msra.mxu2 %v5275_v6  ;;  %v5438_v27 = vld [vmem:[%s13753_s5 + $0xa30] sm:$0xff]  ;;  %v5203_v38 = vld [vmem:[%s13753_s5 + $0x2d8] sm:$0xff] }
 0x7ec   : > { %5896 = vmatpush.msra.mxu0 %v5386_v60  ;;  %5867 = vmatpush.msra.mxu1 %v5358_v61  ;;  %v5310_v0 = vld [vmem:[%s13753_s5 + $0x630] sm:$0xff]  ;;  %v5171_v30 = vld [vmem:[%s13753_s5 + $0x1d8] sm:$0xff] }
 0x7ed   : > { %5908 = vmatpush.msra.mxu3 %v5482_v26  ;;  %5993 = vmatpush.msra.mxu2 %v5271_v54  ;;  %v5434_v42 = vld [vmem:[%s13753_s5 + $0xa10] sm:$0xff]  ;;  %v5199_v6 = vld [vmem:[%s13753_s5 + $0x2b8] sm:$0xff] }
 0x7ee   : > { %5897 = vmatpush.msra.mxu0 %v5382_v32  ;;  %5868 = vmatpush.msra.mxu1 %v5354_v16  ;;  %v5306_v2 = vld [vmem:[%s13753_s5 + $0x610] sm:$0xff]  ;;  %v5359_v60 = vld [vmem:[%s13753_s5 + $0x7b8] sm:$0xff] }
 0x7ef   : > { %5909 = vmatpush.msra.mxu3 %v5478_v58  ;;  %5994 = vmatpush.msra.mxu2 %v5267_v51  ;;  %v5167_v61 = vld [vmem:[%s13753_s5 + $0x1b8] sm:$0xff] }
 0x7f0   : > { %5898 = vmatpush.msra.mxu0 %v5378_v18  ;;  %5869 = vmatpush.msra.mxu1 %v5350_v34  ;;  %v5195_v26 = vld [vmem:[%s13753_s5 + $0x298] sm:$0xff] }
 0x7f1   : > { %5910 = vmatpush.msra.mxu3 %v5474_v45  ;;  %5995 = vmatpush.msra.mxu2 %v5263_v59  ;;  %v5355_v54 = vld [vmem:[%s13753_s5 + $0x798] sm:$0xff] }
 0x7f2   : > { %5899 = vmatpush.msra.mxu0 %v5374_v9  ;;  %5870 = vmatpush.msra.mxu1 %v5346_v40  ;;  %v5163_v32 = vld [vmem:[%s13753_s5 + $0x198] sm:$0xff] }
 0x7f3   : > { %5911 = vmatpush.msra.mxu3 %v5470_v4  ;;  %5996 = vmatpush.msra.mxu2 %v5259_v53  ;;  %v5191_v16 = vld [vmem:[%s13753_s5 + $0x278] sm:$0xff] }
 0x7f4   : > { %5900 = vmatpush.msra.mxu0 %v5370_v62  ;;  %5871 = vmatpush.msra.mxu1 %v5342_v33  ;;  %v5351_v58 = vld [vmem:[%s13753_s5 + $0x778] sm:$0xff] }
 0x7f5   : > { %5901 = vmatmul.f32.vlgmr.msra.gmra.mxu0 %v12892_v1  ;;  %5912 = vmatpush.msra.mxu3 %v5466_v28  ;;  %v5159_v51 = vld [vmem:[%s13753_s5 + $0x178] sm:$0xff] }
 0x7f6   : > { %5965 = vmatpush.msrb.mxu0 %v5239_v13  ;;  %5997 = vmatpush.msra.mxu2 %v5255_v31  ;;  %v5187_v18 = vld [vmem:[%s13753_s5 + $0x258] sm:$0xff] }
 0x7f7   : > { %5872 = vmatpush.msra.mxu1 %v5338_v47  ;;  %5913 = vmatpush.msra.mxu3 %v5462_v3  ;;  %v5347_v34 = vld [vmem:[%s13753_s5 + $0x758] sm:$0xff] }
 0x7f8   : > { %5966 = vmatpush.msrb.mxu0 %v5235_v8  ;;  %5998 = vmatpush.msra.mxu2 %v5251_v52  ;;  %v5155_v45 = vld [vmem:[%s13753_s5 + $0x158] sm:$0xff] }
 0x7f9   : > { %5873 = vmatpush.msra.mxu1 %v5334_v21  ;;  %5914 = vmatpush.msra.mxu3 %v5458_v46  ;;  %v5183_v59 = vld [vmem:[%s13753_s5 + $0x238] sm:$0xff] }
 0x7fa   : > { %5967 = vmatpush.msrb.mxu0 %v5231_v48  ;;  %5999 = vmatpush.msra.mxu2 %v5247_v49  ;;  %v5343_v9 = vld [vmem:[%s13753_s5 + $0x738] sm:$0xff] }
 0x7fb   : > { %5874 = vmatpush.msra.mxu1 %v5330_v11  ;;  %5915 = vmatpush.msra.mxu3 %v5454_v57  ;;  %v5151_v40 = vld [vmem:[%s13753_s5 + $0x138] sm:$0xff] }
 0x7fc   : > { %5968 = vmatpush.msrb.mxu0 %v5227_v10  ;;  %6000 = vmatpush.msra.mxu2 %v5243_v29  ;;  %v5179_v4 = vld [vmem:[%s13753_s5 + $0x218] sm:$0xff] }
 0x7fd   : > { %5875 = vmatpush.msra.mxu1 %v5326_v15  ;;  %6001 = vmatmul.f32.vlgmr.msra.gmra.mxu2 %v12666_v44  ;;  %v5215_v44 = vld [vmem:[%s13753_s5 + $0x338] sm:$0xff] }
 0x7fe   : > { %5916 = vmatpush.msra.mxu3 %v5450_v20  ;;  %5969 = vmatpush.msrb.mxu0 %v5223_v35  ;;  %v5339_v53 = vld [vmem:[%s13753_s5 + $0x718] sm:$0xff] }
 0x7ff   : > { %6077 = vmatpush.msrb.mxu2 %v5511_v63  ;;  %5876 = vmatpush.msra.mxu1 %v5322_v37  ;;  %v5495_v62 = vld [vmem:[%s13753_s5 + $0xbf8] sm:$0xff] }
 0x800   : > { %5917 = vmatpush.msra.mxu3 %v5446_v56  ;;  %5970 = vmatpush.msrb.mxu0 %v5219_v7  ;;  %v5147_v33 = vld [vmem:[%s13753_s5 + $0x118] sm:$0xff] }
 0x801   : > { %6078 = vmatpush.msrb.mxu2 %v5507_v17  ;;  %5877 = vmatpush.msra.mxu1 %v5318_v22  ;;  %v5335_v28 = vld [vmem:[%s13753_s5 + $0x6f8] sm:$0xff] }
 0x802   : > { %5918 = vmatpush.msra.mxu3 %v5442_v43  ;;  %5971 = vmatpush.msrb.mxu0 %v5215_v44  ;;  %v5491_v13 = vld [vmem:[%s13753_s5 + $0xbd8] sm:$0xff] }
 0x803   : > { %6079 = vmatpush.msrb.mxu2 %v5503_v41  ;;  %5878 = vmatpush.msra.mxu1 %v5314_v24  ;;  %v5143_v31 = vld [vmem:[%s13753_s5 + $0xf8] sm:$0xff] }
 0x804   : > { %5919 = vmatpush.msra.mxu3 %v5438_v27  ;;  %5972 = vmatpush.msrb.mxu0 %v5211_v19  ;;  %v5331_v47 = vld [vmem:[%s13753_s5 + $0x6d8] sm:$0xff]  ;;  %v6103_v27 = vld [vmem:[%s13755_s7 + $0x70] sm:$0xff] }
 0x805   : > { %6080 = vmatpush.msrb.mxu2 %v5499_v55  ;;  %5879 = vmatpush.msra.mxu1 %v5310_v0  ;;  %v5139_v3 = vld [vmem:[%s13753_s5 + $0xd8] sm:$0xff]  ;;  %v6102_v55 = vld [vmem:[%s13755_s7 + $0x68] sm:$0xff]  ;;  %v6119_v0 = vld [vmem:[%s13755_s7 + $0xf0] sm:$0xff] }
 0x806   : > { %6575 = vmatmul.msk.f32.vlgmr.msrb.gmra.mxu2 %vm5522_vm12, %v12816_v14  ;;  %5920 = vmatpush.msra.mxu3 %v5434_v42  ;;  %v5363_v14 = vld [vmem:[%s13753_s5 + $0x7d8] sm:$0xff]  ;;  %v6118_v42 = vld [vmem:[%s13755_s7 + $0xe8] sm:$0xff] }
 0x807   : > { %5973 = vmatpush.msrb.mxu0 %v5207_v23  ;;  %5880 = vmatpush.msra.mxu1 %v5306_v2  ;;  %v5327_v8 = vld [vmem:[%s13753_s5 + $0x6b8] sm:$0xff] }
 0x808   : > { %5921 = vmatmul.f32.vlgmr.msra.gmra.mxu3 %v12846_v25  ;;  %5881 = vmatmul.f32.vlgmr.msra.gmra.mxu1 %v12670_v12  ;;  %v5483_v52 = vld [vmem:[%s13753_s5 + $0xb98] sm:$0xff] }
 0x809   : > { %6005 = vmatpush.msrb.mxu3 %v5367_v36  ;;  %5945 = vmatpush.msrb.mxu1 %v5175_v5  ;;  %v5135_v21 = vld [vmem:[%s13753_s5 + $0xb8] sm:$0xff]  ;;  %v6101_v36 = vld [vmem:[%s13755_s7 + $0x60] sm:$0xff] }
 0x80a   : > { %5974 = vmatpush.msrb.mxu0 %v5203_v38  ;;  %v5323_v46 = vld [vmem:[%s13753_s5 + $0x698] sm:$0xff] }
 0x80b   : > { %6006 = vmatpush.msrb.mxu3 %v5363_v14  ;;  %5946 = vmatpush.msrb.mxu1 %v5171_v30  ;;  %v5479_v48 = vld [vmem:[%s13753_s5 + $0xb78] sm:$0xff] }
 0x80c   : > { %5975 = vmatpush.msrb.mxu0 %v5199_v6  ;;  %v5131_v49 = vld [vmem:[%s13753_s5 + $0x98] sm:$0xff] }
 0x80d   : > { %6007 = vmatpush.msrb.mxu3 %v5359_v60  ;;  %5947 = vmatpush.msrb.mxu1 %v5167_v61  ;;  %v5319_v11 = vld [vmem:[%s13753_s5 + $0x678] sm:$0xff]  ;;  %v6117_v60 = vld [vmem:[%s13755_s7 + $0xe0] sm:$0xff] }
 0x80e   : > { %5976 = vmatpush.msrb.mxu0 %v5195_v26  ;;  %v5475_v57 = vld [vmem:[%s13753_s5 + $0xb58] sm:$0xff]  ;;  %v13503_v61 = vld [vmem:[%s13754_s6] sm:$0xf]  ;;  %v6099_v26 = vld [vmem:[%s13755_s7 + $0x50] sm:$0xff] }
 0x80f   : > { %6008 = vmatpush.msrb.mxu3 %v5355_v54  ;;  %5948 = vmatpush.msrb.mxu1 %v5163_v32  ;;  %v5127_v10 = vld [vmem:[%s13753_s5 + $0x78] sm:$0xff] }
 0x810   : > { %5977 = vmatpush.msrb.mxu0 %v5191_v16  ;;  %v5315_v29 = vld [vmem:[%s13753_s5 + $0x658] sm:$0xff] }
 0x811   : > { %6009 = vmatpush.msrb.mxu3 %v5351_v58  ;;  %5949 = vmatpush.msrb.mxu1 %v5159_v51  ;;  %v5471_v15 = vld [vmem:[%s13753_s5 + $0xb38] sm:$0xff]  ;;  %v6098_v58 = vld [vmem:[%s13755_s7 + $0x48] sm:$0xff]  ;;  %v5514_v51 = vperm.slane %v13503_v61, 0 }
 0x812   : > { %5978 = vmatpush.msrb.mxu0 %v5187_v18  ;;  %v5123_v20 = vld [vmem:[%s13753_s5 + $0x58] sm:$0xff] }
 0x813   : > { %6010 = vmatpush.msrb.mxu3 %v5347_v34  ;;  %5950 = vmatpush.msrb.mxu1 %v5155_v45  ;;  %v5311_v35 = vld [vmem:[%s13753_s5 + $0x638] sm:$0xff]  ;;  %v6115_v34 = vld [vmem:[%s13755_s7 + $0xd0] sm:$0xff]  ;;  %v5542_v45 = vpop.f32.mrf.mxu1 }
 0x814   : > { %5979 = vmatpush.msrb.mxu0 %v5183_v59  ;;  %v5467_v63 = vld [vmem:[%s13753_s5 + $0xb18] sm:$0xff]  ;;  %v6097_v59 = vld [vmem:[%s13755_s7 + $0x40] sm:$0xff] }
 0x815   : > { %6011 = vmatpush.msrb.mxu3 %v5343_v9  ;;  %5951 = vmatpush.msrb.mxu1 %v5151_v40  ;;  %v5119_v37 = vld [vmem:[%s13753_s5 + $0x38] sm:$0xff]  ;;  %v6114_v40 = vld [vmem:[%s13755_s7 + $0xc8] sm:$0xff] }
 0x816   : > { %5980 = vmatpush.msrb.mxu0 %v5179_v4  ;;  %v5307_v56 = vld [vmem:[%s13753_s5 + $0x618] sm:$0xff]  ;;  %v5562_v4 = vpop.f32.mrf.mxu3 }
 0x817   : > { %5981 = vmatmul.f32.vlgmr.msrb.gmra.mxu0 %v12527_v39  ;;  %6012 = vmatpush.msrb.mxu3 %v5339_v53  ;;  %v5487_v39 = vld [vmem:[%s13753_s5 + $0xbb8] sm:$0xff] }
 0x818   : > { %6045 = vmatpush.msra.mxu0 %v5495_v62  ;;  %5952 = vmatpush.msrb.mxu1 %v5147_v33  ;;  %v5463_v7 = vld [vmem:[%s13753_s5 + $0xaf8] sm:$0xff]  ;;  %v5543_v62 = vadd.f32 %v5542_v45, %v5514_v51  ;;  %v6113_v33 = vld [vmem:[%s13755_s7 + $0xc0] sm:$0xff] }
 0x819   : > { %6013 = vmatpush.msrb.mxu3 %v5335_v28  ;;  %v5115_v17 = vld [vmem:[%s13753_s5 + $0x18] sm:$0xff]  ;;  %v5582_v28 = vpop.f32.mrf.mxu0 }
 0x81a   : > { %6046 = vmatpush.msra.mxu0 %v5491_v13  ;;  %5953 = vmatpush.msrb.mxu1 %v5143_v31  ;;  %v5431_v22 = vld [vmem:[%s13753_s5 + $0x9f8] sm:$0xff]  ;;  %v6095_v13 = vld [vmem:[%s13755_s7 + $0x30] sm:$0xff]  ;;  %v5563_v31 = vadd.f32 %v5562_v4, %v5543_v62 }
 0x81b   : > { %6014 = vmatpush.msrb.mxu3 %v5331_v47  ;;  %v5459_v43 = vld [vmem:[%s13753_s5 + $0xad8] sm:$0xff] }
 0x81c   : > { %6047 = vmatpush.msra.mxu0 %v5487_v39  ;;  %5954 = vmatpush.msrb.mxu1 %v5139_v3  ;;  %v6104_v44 = vld [vmem:[%s13755_s7 + $0x78] sm:$0xff]  ;;  %v5602_v3 = vpop.f32.mrf.mxu2 }
 0x81d   : > { %6015 = vmatpush.msrb.mxu3 %v5327_v8  ;;  %v5427_v41 = vld [vmem:[%s13753_s5 + $0x9d8] sm:$0xff]  ;;  %v6094_v8 = vld [vmem:[%s13755_s7 + $0x28] sm:$0xff] }
 0x81e   : > { %6048 = vmatpush.msra.mxu0 %v5483_v52  ;;  %5955 = vmatpush.msrb.mxu1 %v5135_v21  ;;  %v5455_v24 = vld [vmem:[%s13753_s5 + $0xab8] sm:$0xff]  ;;  %v5583_v52 = vadd.f32 %v5582_v28, %v5563_v31  ;;  %v6122_v28 = vld [vmem:[%s13755_s7 + $0x108] sm:$0xff]  ;;  %v5516_v31 = vperm.slane %v13503_v61, 2 }
 0x81f   : > { %6016 = vmatpush.msrb.mxu3 %v5323_v46  ;;  %v5451_v19 = vld [vmem:[%s13753_s5 + $0xa98] sm:$0xff]  ;;  %v6111_v46 = vld [vmem:[%s13755_s7 + $0xb0] sm:$0xff] }
 0x820   : > { %6049 = vmatpush.msra.mxu0 %v5479_v48  ;;  %5956 = vmatpush.msrb.mxu1 %v5131_v49  ;;  %v5419_v23 = vld [vmem:[%s13753_s5 + $0x998] sm:$0xff]  ;;  %v6093_v48 = vld [vmem:[%s13755_s7 + $0x20] sm:$0xff]  ;;  %v5603_v49 = vadd.f32 %v5602_v3, %v5583_v52 }
 0x821   : > { %6017 = vmatpush.msrb.mxu3 %v5319_v11  ;;  %v5447_v2 = vld [vmem:[%s13753_s5 + $0xa78] sm:$0xff] }
 0x822   : > { %6050 = vmatpush.msra.mxu0 %v5475_v57  ;;  %5957 = vmatpush.msrb.mxu1 %v5127_v10  ;;  %v5415_v5 = vld [vmem:[%s13753_s5 + $0x978] sm:$0xff] }
 0x823   : > { %6018 = vmatpush.msrb.mxu3 %v5315_v29  ;;  %v5443_v38 = vld [vmem:[%s13753_s5 + $0xa58] sm:$0xff]  ;;  %v6110_v29 = vld [vmem:[%s13755_s7 + $0xa8] sm:$0xff] }
 0x824   : > { %6051 = vmatpush.msra.mxu0 %v5471_v15  ;;  %5958 = vmatpush.msrb.mxu1 %v5123_v20  ;;  %v6100_v14 = vld [vmem:[%s13755_s7 + $0x58] sm:$0xff] }
 0x825   : > { %6019 = vmatpush.msrb.mxu3 %v5311_v35  ;;  %v5411_v30 = vld [vmem:[%s13753_s5 + $0x958] sm:$0xff]  ;;  %v6109_v35 = vld [vmem:[%s13755_s7 + $0xa0] sm:$0xff] }
 0x826   : > { %6052 = vmatpush.msra.mxu0 %v5467_v63  ;;  %5959 = vmatpush.msrb.mxu1 %v5119_v37  ;;  %v5439_v6 = vld [vmem:[%s13753_s5 + $0xa38] sm:$0xff]  ;;  %v6091_v37 = vld [vmem:[%s13755_s7 + $0x10] sm:$0xff] }
 0x827   : > { %6020 = vmatpush.msrb.mxu3 %v5307_v56  ;;  %v6116_v54 = vld [vmem:[%s13755_s7 + $0xd8] sm:$0xff] }
 0x828   : > { %6053 = vmatpush.msra.mxu0 %v5463_v7  ;;  %5960 = vmatpush.msrb.mxu1 %v5115_v17  ;;  %v5407_v32 = vld [vmem:[%s13753_s5 + $0x938] sm:$0xff] }
 0x829   : > { %6021 = vmatmul.f32.vlgmr.msrb.gmra.mxu3 %v12670_v12  ;;  %5961 = vmatmul.f32.vlgmr.msrb.gmra.mxu1 %v12473_v50  ;;  %v6120_v12 = vld [vmem:[%s13755_s7 + $0xf8] sm:$0xff] }
 0x82a   : > { %6025 = vmatpush.msra.mxu1 %v5431_v22  ;;  %6054 = vmatpush.msra.mxu0 %v5459_v43  ;;  %v5423_v50 = vld [vmem:[%s13753_s5 + $0x9b8] sm:$0xff]  ;;  %v6090_v22 = vld [vmem:[%s13755_s7 + $0x8] sm:$0xff] }
 0x82b   : > { %6163 = vmatpush.msra.mxu3 %v6104_v44  ;;  %6183 = vmatpush.msra.mxu2 %v6120_v12  ;;  %v5435_v16 = vld [vmem:[%s13753_s5 + $0xa18] sm:$0xff]  ;;  %v6107_v12 = vld [vmem:[%s13755_s7 + $0x90] sm:$0xff] }
 0x82c   : > { %6026 = vmatpush.msra.mxu1 %v5427_v41  ;;  %6055 = vmatpush.msra.mxu0 %v5455_v24  ;;  %v5403_v18 = vld [vmem:[%s13753_s5 + $0x918] sm:$0xff]  ;;  %v6089_v41 = vld [vmem:[%s13755_s7] sm:$0xff] }
 0x82d   : > { %6164 = vmatpush.msra.mxu3 %v6103_v27  ;;  %6184 = vmatpush.msra.mxu2 %v6119_v0  ;;  %v5399_v9 = vld [vmem:[%s13753_s5 + $0x8f8] sm:$0xff]  ;;  %v5662_v17 = vpop.f32.mrf.mxu0  ;;  %v6135_v0 = vld [vmem:[%s13755_s7 + $0x170] sm:$0xff] }
 0x82e   : > { %6027 = vmatpush.msra.mxu1 %v5423_v50  ;;  %6056 = vmatpush.msra.mxu0 %v5451_v19  ;;  %v6096_v53 = vld [vmem:[%s13755_s7 + $0x38] sm:$0xff]  ;;  %v6106_v50 = vld [vmem:[%s13755_s7 + $0x88] sm:$0xff] }
 0x82f   : > { %6165 = vmatpush.msra.mxu3 %v6102_v55  ;;  %6185 = vmatpush.msra.mxu2 %v6118_v42  ;;  %v5391_v47 = vld [vmem:[%s13753_s5 + $0x8b8] sm:$0xff]  ;;  %v5515_v55 = vperm.slane %v13503_v61, 1  ;;  %v6134_v42 = vld [vmem:[%s13755_s7 + $0x168] sm:$0xff] }
 0x830   : > { %6028 = vmatpush.msra.mxu1 %v5419_v23  ;;  %6057 = vmatpush.msra.mxu0 %v5447_v2  ;;  %v6112_v39 = vld [vmem:[%s13755_s7 + $0xb8] sm:$0xff]  ;;  %v5682_v23 = vpop.f32.mrf.mxu2  ;;  %v6133_v2 = vld [vmem:[%s13755_s7 + $0x160] sm:$0xff] }
 0x831   : > { %6166 = vmatpush.msra.mxu3 %v6101_v36  ;;  %6186 = vmatpush.msra.mxu2 %v6117_v60  ;;  %v5387_v21 = vld [vmem:[%s13753_s5 + $0x898] sm:$0xff] }
 0x832   : > { %6029 = vmatpush.msra.mxu1 %v5415_v5  ;;  %6058 = vmatpush.msra.mxu0 %v5443_v38  ;;  %v5383_v11 = vld [vmem:[%s13753_s5 + $0x878] sm:$0xff]  ;;  %v5683_v5 = vadd.f32 %v5682_v23, %v5515_v55 }
 0x833   : > { %6167 = vmatpush.msra.mxu3 %v6100_v14  ;;  %6187 = vmatpush.msra.mxu2 %v6116_v54  ;;  %v6092_v10 = vld [vmem:[%s13755_s7 + $0x18] sm:$0xff] }
 0x834   : > { %6030 = vmatpush.msra.mxu1 %v5411_v30  ;;  %6059 = vmatpush.msra.mxu0 %v5439_v6  ;;  %v5379_v15 = vld [vmem:[%s13753_s5 + $0x858] sm:$0xff]  ;;  %v6131_v30 = vld [vmem:[%s13755_s7 + $0x150] sm:$0xff]  ;;  %v6130_v6 = vld [vmem:[%s13755_s7 + $0x148] sm:$0xff] }
 0x835   : > { %6168 = vmatpush.msra.mxu3 %v6099_v26  ;;  %6188 = vmatpush.msra.mxu2 %v6115_v34  ;;  %v5375_v56 = vld [vmem:[%s13753_s5 + $0x838] sm:$0xff]  ;;  %v5742_v54 = vpop.f32.mrf.mxu0 }
 0x836   : > { %6031 = vmatpush.msra.mxu1 %v5407_v32  ;;  %6060 = vmatpush.msra.mxu0 %v5435_v16  ;;  %v5371_v43 = vld [vmem:[%s13753_s5 + $0x818] sm:$0xff]  ;;  %v6129_v16 = vld [vmem:[%s13755_s7 + $0x140] sm:$0xff] }
 0x837   : > { %6061 = vmatmul.f32.vlgmr.msra.gmra.mxu0 %v12846_v25  ;;  %6169 = vmatpush.msra.mxu3 %v6098_v58  ;;  %v5395_v25 = vld [vmem:[%s13753_s5 + $0x8d8] sm:$0xff] }
 0x838   : > { %6032 = vmatpush.msra.mxu1 %v5403_v18  ;;  %6189 = vmatpush.msra.mxu2 %v6114_v40  ;;  %v6108_v27 = vld [vmem:[%s13755_s7 + $0x98] sm:$0xff]  ;;  %v6127_v18 = vld [vmem:[%s13755_s7 + $0x130] sm:$0xff]  ;;  %v6126_v40 = vld [vmem:[%s13755_s7 + $0x128] sm:$0xff] }
 0x839   : > { %6170 = vmatpush.msra.mxu3 %v6097_v59  ;;  %v6136_v19 = vld [vmem:[%s13755_s7 + $0x178] sm:$0xff] }
 0x83a   : > { %6033 = vmatpush.msra.mxu1 %v5399_v9  ;;  %6190 = vmatpush.msra.mxu2 %v6113_v33  ;;  %v6132_v38 = vld [vmem:[%s13755_s7 + $0x158] sm:$0xff]  ;;  %v6123_v33 = vld [vmem:[%s13755_s7 + $0x110] sm:$0xff] }
 0x83b   : > { %6171 = vmatpush.msra.mxu3 %v6096_v53  ;;  %v5642_v63 = vpop.f32.mrf.mxu3  ;;  %v6128_v58 = vld [vmem:[%s13755_s7 + $0x138] sm:$0xff]  ;;  %v6125_v53 = vld [vmem:[%s13755_s7 + $0x120] sm:$0xff] }
 0x83c   : > { %6034 = vmatpush.msra.mxu1 %v5395_v25  ;;  %6191 = vmatpush.msra.mxu2 %v6112_v39  ;;  %v6124_v25 = vld [vmem:[%s13755_s7 + $0x118] sm:$0xff] }
 0x83d   : > { %6172 = vmatpush.msra.mxu3 %v6095_v13  ;;  %v6121_v13 = vld [vmem:[%s13755_s7 + $0x100] sm:$0xff] }
 0x83e   : > { %6035 = vmatpush.msra.mxu1 %v5391_v47  ;;  %6192 = vmatpush.msra.mxu2 %v6111_v46 }
 0x83f   : > { %6173 = vmatpush.msra.mxu3 %v6094_v8  ;;  %v5622_v57 = vpop.f32.mrf.mxu1 }
 0x840   : > { %6036 = vmatpush.msra.mxu1 %v5387_v21  ;;  %v5623_v20 = vadd.f32 %v5622_v57, %v5603_v49  ;;  %6193 = vmatpush.msra.mxu2 %v6110_v29 }
 0x841   : > { %6174 = vmatpush.msra.mxu3 %v6093_v48 }
 0x842   : > { %6037 = vmatpush.msra.mxu1 %v5383_v11  ;;  %v5643_v7 = vadd.f32 %v5642_v63, %v5623_v20  ;;  %6194 = vmatpush.msra.mxu2 %v6109_v35  ;;  %v6150_v63 = vld [vmem:[%s13755_s7 + $0x1e8] sm:$0xff] }
 0x843   : > { %6175 = vmatpush.msra.mxu3 %v6092_v10 }
 0x844   : > { %6038 = vmatpush.msra.mxu1 %v5379_v15  ;;  %v5663_v44 = vadd.f32 %v5662_v17, %v5643_v7  ;;  %6195 = vmatpush.msra.mxu2 %v6108_v27  ;;  %v6151_v15 = vld [vmem:[%s13755_s7 + $0x1f0] sm:$0xf]  ;;  %v6146_v17 = vld [vmem:[%s13755_s7 + $0x1c8] sm:$0xff]  ;;  %v6140_v27 = vld [vmem:[%s13755_s7 + $0x198] sm:$0xff] }
 0x845   : > { %6176 = vmatpush.msra.mxu3 %v6091_v37  ;;  %v5722_v60 = vpop.f32.mrf.mxu3  ;;  %6576 = vmatpush.msk.msrb.mxu0 %vm1203_vm0, %v6151_v15  ;;  %v6149_v37 = vld [vmem:[%s13755_s7 + $0x1e0] sm:$0xff]  ;;  %v6147_v7 = vld [vmem:[%s13755_s7 + $0x1d0] sm:$0xff] }
 0x846   : > { %6039 = vmatpush.msra.mxu1 %v5375_v56  ;;  %v6085_v24 = vmax.f32 %v5663_v44, 0.0  ;;  %6196 = vmatpush.msra.mxu2 %v6107_v12  ;;  %v5762_v51 = vpop.f32.mrf.mxu2  ;;  %v6148_v56 = vld [vmem:[%s13755_s7 + $0x1d8] sm:$0xff]  ;;  %v6143_v44 = vld [vmem:[%s13755_s7 + $0x1b0] sm:$0xff] }
 0x847   : > { %6177 = vmatpush.msra.mxu3 %v6090_v22  ;;  %6225 = vmatpush.msrb.mxu0 %v6150_v63  ;;  %v6145_v22 = vld [vmem:[%s13755_s7 + $0x1c0] sm:$0xff]  ;;  %v6139_v12 = vld [vmem:[%s13755_s7 + $0x190] sm:$0xff] }
 0x848   : > { %6040 = vmatpush.msra.mxu1 %v5371_v43  ;;  %6197 = vmatpush.msra.mxu2 %v6106_v50  ;;  %v6144_v43 = vld [vmem:[%s13755_s7 + $0x1b8] sm:$0xff]  ;;  %v6138_v50 = vld [vmem:[%s13755_s7 + $0x188] sm:$0xff] }
 0x849   : > { %6041 = vmatmul.f32.vlgmr.msra.gmra.mxu1 %v12892_v1  ;;  %6178 = vmatpush.msra.mxu3 %v6089_v41  ;;  %v6105_v1 = vld [vmem:[%s13755_s7 + $0x80] sm:$0xff]  ;;  %v5702_v36 = vpop.f32.mrf.mxu1  ;;  %v6142_v41 = vld [vmem:[%s13755_s7 + $0x1a8] sm:$0xff] }
 0x84a   : > { %6179 = vmatmul.f32.vlgmr.msra.gmra.mxu3 %v6085_v24  ;;  %6203 = vmatpush.msrb.mxu1 %v6136_v19  ;;  %v5703_v14 = vadd.f32 %v5702_v36, %v5683_v5  ;;  %v6141_v24 = vld [vmem:[%s13755_s7 + $0x1a0] sm:$0xff] }
 0x84b   : > { %6198 = vmatpush.msra.mxu2 %v6105_v1  ;;  %6226 = vmatpush.msrb.mxu0 %v6149_v37  ;;  %v6137_v19 = vld [vmem:[%s13755_s7 + $0x180] sm:$0xff]  ;;  %v5517_v1 = vperm.slane %v13503_v61, 3 }
 0x84c   : > { %6204 = vmatpush.msrb.mxu1 %v6135_v0  ;;  %v5723_v26 = vadd.f32 %v5722_v60, %v5703_v14  ;;  %v6950_v61 = vld [vmem:[%s13756_s8] ss:$0 sm:$0xff] }
 0x84d   : > { %6227 = vmatpush.msrb.mxu0 %v6148_v56 }
 0x84e   : > { %6205 = vmatpush.msrb.mxu1 %v6134_v42  ;;  %v5743_v32 = vadd.f32 %v5742_v54, %v5723_v26  ;;  %v5802_v9 = vpop.f32.mrf.mxu3 }
 0x84f   : > { %v5822_v47 = vpop.f32.mrf.mxu0  ;;  %6228 = vmatpush.msrb.mxu0 %v6147_v7 }
 0x850   : > { %6206 = vmatpush.msrb.mxu1 %v6133_v2  ;;  %v5763_v34 = vadd.f32 %v5762_v51, %v5743_v32  ;;  %v5823_v3 = vadd.f32 %v5822_v47, %v5516_v31 }
 0x851   : > { %6229 = vmatpush.msrb.mxu0 %v6146_v17 }
 0x852   : > { %6207 = vmatpush.msrb.mxu1 %v6132_v38 }
 0x853   : > { %6230 = vmatpush.msrb.mxu0 %v6145_v22 }
 0x854   : > { %6208 = vmatpush.msrb.mxu1 %v6131_v30 }
 0x855   : > { %6231 = vmatpush.msrb.mxu0 %v6144_v43 }
 0x856   : > { %6209 = vmatpush.msrb.mxu1 %v6130_v6  ;;  %v5862_v52 = vpop.f32.mrf.mxu2 }
 0x857   : > { %6232 = vmatpush.msrb.mxu0 %v6143_v44 }
 0x858   : > { %6210 = vmatpush.msrb.mxu1 %v6129_v16 }
 0x859   : > { %6233 = vmatpush.msrb.mxu0 %v6142_v41 }
 0x85a   : > { %6211 = vmatpush.msrb.mxu1 %v6128_v58 }
 0x85b   : > { %6234 = vmatpush.msrb.mxu0 %v6141_v24 }
 0x85c   : > { %6212 = vmatpush.msrb.mxu1 %v6127_v18 }
 0x85d   : > { %6235 = vmatpush.msrb.mxu0 %v6140_v27 }
 0x85e   : > { %6213 = vmatpush.msrb.mxu1 %v6126_v40 }
 0x85f   : > { %6236 = vmatpush.msrb.mxu0 %v6139_v12 }
 0x860   : > { %6214 = vmatpush.msrb.mxu1 %v6125_v53  ;;  %v5942_v29 = vpop.f32.mrf.mxu2 }
 0x861   : > { %6237 = vmatpush.msrb.mxu0 %v6138_v50 }
 0x862   : > { %6215 = vmatpush.msrb.mxu1 %v6124_v25 }
 0x863   : > { %6238 = vmatpush.msrb.mxu0 %v6137_v19 }
 0x864   : > { %v5782_v45 = vpop.f32.mrf.mxu1  ;;  %6216 = vmatpush.msrb.mxu1 %v6123_v33 }
 0x865   : > { %v5783_v59 = vadd.f32 %v5782_v45, %v5763_v34 }
 0x866   : > { %6217 = vmatpush.msrb.mxu1 %v6122_v28 }
 0x867   : > { %v5803_v4 = vadd.f32 %v5802_v9, %v5783_v59 }
 0x868   : > { %6218 = vmatpush.msrb.mxu1 %v6121_v13 }
 0x869   : > { %v6086_v62 = vmax.f32 %v5803_v4, 0.0  ;;  %v5842_v39 = vpop.f32.mrf.mxu3 }
 0x86a   : > { %v5843_v8 = vadd.f32 %v5842_v39, %v5823_v3 }
 0x86b   : > { %6199 = vmatmul.f32.vlgmr.msra.gmra.mxu2 %v6086_v62 }
 0x86c   : > { %v5863_v21 = vadd.f32 %v5862_v52, %v5843_v8 }
 0x872   : > { %v5902_v49 = vpop.f32.mrf.mxu0 }
 0x880   : > { %v6002_v2 = vpop.f32.mrf.mxu2 }
 0x885   : > { %v5882_v46 = vpop.f32.mrf.mxu1 }
 0x886   : > { %v5883_v48 = vadd.f32 %v5882_v46, %v5863_v21 }
 0x888   : > { %v5903_v11 = vadd.f32 %v5902_v49, %v5883_v48 }
 0x889   : > { %v6082_v26 = vpop.f32.mrf.mxu2 }
 0x88b   : > { %v5922_v57 = vpop.f32.mrf.mxu3 }
 0x88c   : > { %v5923_v10 = vadd.f32 %v5922_v57, %v5903_v11 }
 0x88e   : > { %v5943_v20 = vadd.f32 %v5942_v29, %v5923_v10 }
 0x890   : > { %v6087_v35 = vmax.f32 %v5943_v20, 0.0 }
 0x892   : > { %6219 = vmatmul.f32.vlgmr.msrb.gmra.mxu1 %v6087_v35 }
 0x894   : > { %v5982_v42 = vpop.f32.mrf.mxu0 }
 0x8a6   : > { %v5962_v55 = vpop.f32.mrf.mxu1 }
 0x8a7   : > { %v5963_v0 = vadd.f32 %v5962_v55, %v5517_v1 }
 0x8a9   : > { %v5983_v23 = vadd.f32 %v5982_v42, %v5963_v0 }
 0x8ab   : > { %v6003_v36 = vadd.f32 %v6002_v2, %v5983_v23 }
 0x8ac   : > { %v6022_v5 = vpop.f32.mrf.mxu3 }
 0x8ad   : > { %v6023_v38 = vadd.f32 %v6022_v5, %v6003_v36 }
 0x8b4   : > { %v6062_v6 = vpop.f32.mrf.mxu0 }
 0x8c6   : > { %v6042_v14 = vpop.f32.mrf.mxu1 }
 0x8c7   : > { %v6043_v30 = vadd.f32 %v6042_v14, %v6023_v38 }
 0x8c9   : > { %v6063_v60 = vadd.f32 %v6062_v6, %v6043_v30 }
 0x8cb   : > { %v6083_v54 = vadd.f32 %v6082_v26, %v6063_v60 }
 0x8cd   : > { %v6088_v32 = vmax.f32 %v6083_v54, 0.0  ;;  %v6180_v16 = vpop.f32.mrf.mxu3 }
 0x8ce   : > { %v6181_v51 = vadd.f32 %v6950_v61, %v6180_v16 }
 0x8cf   : > { %6577 = vmatmul.msk.f32.vlgmr.msrb.gmra.mxu0 %vm6156_vm14, %v6088_v32 }
 0x8ee   : > { %v6200_v58 = vpop.f32.mrf.mxu2 }
 0x8ef   : > { %v6201_v34 = vadd.f32 %v6200_v58, %v6181_v51 }
 0x90f   : > { %v6220_v18 = vpop.f32.mrf.mxu1 }
 0x910   : > { %v6221_v45 = vadd.f32 %v6220_v18, %v6201_v34 }
 0x94c   : > { %v6240_v59 = vpop.f32.mrf.mxu0 }
 0x94d   : > { %v6241_v9 = vadd.f32 %v6240_v59, %v6221_v45 }
 0x94f   : > { %v6244_v40 = vsel %vm6243_vm15, %v6241_v9, -inf }
 0x950   : > { %6245 = vmax.xlane.f32.xlu1 %v6244_v40 }
 0x9c3   : > { %v6246_v4 = vpop.xlane.xlu1 %6245 }
 0x9c4   : > { %v6247_v53 = vsub.f32 %v6241_v9, %v6246_v4 }
 0x9c6   : > { %v6248_v62 = vmul.f32 1.442695, %v6247_v53 }
 0x9c8   : > { %6951 = vpow2.f32 %v6248_v62 }
 0x9ce   : > { %v6952_v25 = vpop.eup %6951 }
 0x9cf   : > { %v6250_v33 = vsel %vm6243_vm15, %v6952_v25, 0.0 }
 0x9d0   : > { %6251 = vadd.xlane.f32.xlu2 %v6250_v33 }
 0xa43   : > { %v6252_v28 = vpop.xlane.xlu2 %6251 }
 0xa44   : > { %6953 = vlog2.f32 %v6252_v28 }
 0xa4a   : > { %v6954_v13 = vpop.eup %6953 }
 0xa4b   : > { %v6254_v31 = vmul.f32 0.6931472, %v6954_v13 }
 0xa4d   : > { %v6255_v47 = vsub.f32 %v6247_v53, %v6254_v31 }
 0xa4f   : > { %6256 = vst.msk [vmem:[%s473_s26] sm:$0xff] %vm6243_vm15, %v6255_v47 }
 0xa50   : > { %6982 = shalt.err (!%p6979_p5)
}
 0xa51   : > { %6616 = dma.vmem_to_hbm [thread:$0]  (%p7117_p6), %s6271_s13, 128, %s6273_s23, %s6258_s16  }
 0xa52 PF: > { %s6284_s28 = sand.u32 1, %s7005_s30   ;;  %p6619_p7 = pnand %p6340_p9, %p7121_p8 }
 0xa53   : > { %s6285_s22 = scalar_lea.sflag [#allocation4], %s6284_s28 }
 0xa54   : > { %p6620_p10 = pneg %p6619_p7 }
 0xa56   : > { %7000 = dma.done.wait (%p6620_p10), %s6285_s22, 128  }
 0xa57   : > { %7002 = vsyncadd (%p6620_p10), %s6285_s22, 4294967168  ;;  %s14389_s11 = sld [smem:[#allocation6_spill]]  ;;  %p19_p11 = scmp.ge.s32.totalorder %s7102_s15, 4  }
 0xa58   : > { %s14390_s27 = sld [smem:[#allocation7_spill]]  ;;  %s14391_s30 = smov %s7009_s10 }
 0xa59   : > { %s14394_s12 = smov %s7102_s15 }
 0xa5a   :  { %21 = sbr.rel (!%p19_p11) target bundleno = 5 (0x5), region = 138 }
 0xa5d   : > { %s14392_s10 = smov %s14389_s11 }
 0xa5e   : > { %s14393_s11 = smov %s14390_s27 }
 0xa5f   :  { %6291 = vsyncpa [#allocation4], 1 }
 0xa60   :  { %6293 = vsyncpa [#allocation4 + $0x1], 1 }

</bundles_post_ra>
